<compile_context>
chip_gen: v7x
topology: tpu7x:2x2x1
jax: 0.10.0
libtpu: 0.0.40
codegen_flags: <defaults>
</compile_context>

<pallas_src>
import functools
import math

import jax
import jax.numpy as jnp
from jax.experimental import pallas as pl
from jax.experimental.pallas import tpu as pltpu


# ---------------------------------------------------------------------------
# Per-generation tuning (VMEM scoped limit, default row tile).
# ---------------------------------------------------------------------------
@functools.lru_cache(maxsize=None)
def _tuning():
    try:
        vmem = int(pltpu.get_tpu_info().vmem_capacity_bytes)
    except Exception:  # CPU / interpret / older runtime: be conservative
        vmem = 0
    if vmem >= (96 << 20):          # v5e / v6e: 128 MiB physical VMEM
        return 80 << 20, 1024
    return 40 << 20, 512            # v7x (64 MiB per TC) and unknown targets


def _round_up(x, m):
    return ((x + m - 1) // m) * m


def _pick_tm(M, tm):
    """Row-tile: as big as possible, but >=2 row blocks when feasible so the
    'parallel' row axis shards across both TensorCores on v7x."""
    if M <= 16:
        return M
    if M <= tm:
        half = _round_up(-(-M // 2), 8)
        return half if half < M else M
    return tm


def _pick_tk(K, cap=2048):
    """Largest 128-aligned divisor of K (never pads the activation)."""
    top = (min(cap, K) // 128) * 128
    for d in range(top, 0, -128):
        if K % d == 0:
            return d
    # TODO(synk): ragged-K masking; for now keep the full K block.
    return K


# ---------------------------------------------------------------------------
# Pallas GEMM kernels: bf16 operands, f32 MXU accumulation, fused bias +
# activation (+ fused GDN / IGDN, whose gamma matmul also runs in bf16).
# ---------------------------------------------------------------------------
def _apply_epilogue(y, act, gamma, beta):
    if act == "relu":
        return jnp.maximum(y, 0.0)
    if act == "leaky_relu":
        return jnp.where(y >= 0.0, y, 0.01 * y)
    if act in ("gdn", "igdn"):
        s = jnp.dot((y * y).astype(jnp.bfloat16), gamma,
                    preferred_element_type=jnp.float32) + beta
        if act == "gdn":
            return y * jax.lax.rsqrt(s)      # GDN:  x / sqrt(beta + gamma x^2)
        return y * jnp.sqrt(s)               # IGDN: x * sqrt(beta + gamma x^2)
    return y


def _gemm_kernel_fullk(a_ref, w_ref, b_ref, *rest, act):
    if act in ("gdn", "igdn"):
        gamma_ref, beta_ref, o_ref = rest
        gamma, beta = gamma_ref[...], beta_ref[...]
    else:
        (o_ref,) = rest
        gamma = beta = None
    y = jnp.dot(a_ref[...], w_ref[...],
                preferred_element_type=jnp.float32) + b_ref[...]
    o_ref[...] = _apply_epilogue(y, act, gamma, beta).astype(o_ref.dtype)


def _gemm_kernel_ktiled(a_ref, w_ref, b_ref, *rest, act):
    if act in ("gdn", "igdn"):
        gamma_ref, beta_ref, o_ref, acc_ref = rest
    else:
        o_ref, acc_ref = rest

    @pl.when(pl.program_id(1) == 0)
    def _init():
        acc_ref[...] = jnp.zeros_like(acc_ref)

    acc_ref[...] += jnp.dot(a_ref[...], w_ref[...],
                            preferred_element_type=jnp.float32)

    @pl.when(pl.program_id(1) == pl.num_programs(1) - 1)
    def _epilogue():
        y = acc_ref[...] + b_ref[...]
        if act in ("gdn", "igdn"):
            y = _apply_epilogue(y, act, gamma_ref[...], beta_ref[...])
        else:
            y = _apply_epilogue(y, act, None, None)
        o_ref[...] = y.astype(o_ref.dtype)


def gemm(a, w, bias, *, act="none", gdn=None, out_dtype=jnp.float32, tm=None):
    """(M,K)@(K,N) + bias with fused activation / GDN-IGDN epilogue.

    Prefers one full-K block per row tile (no reduction grid axis); the row axis is
    "parallel" (TensorCore sharding).  Ragged row tiles are store-masked by Pallas.
    """
    vmem_limit, tm_default = _tuning()
    if tm is None:
        tm = tm_default

    a = a.astype(jnp.bfloat16)
    w = w.astype(jnp.bfloat16)
    bias = bias.astype(jnp.float32)
    M, K = a.shape
    N = w.shape[1]
    tm_e = _pick_tm(M, tm)

    use_gdn = act in ("gdn", "igdn")
    gdn_args = []
    if use_gdn:
        gdn_args = [gdn["gamma"].astype(jnp.bfloat16),
                    gdn["beta"].astype(jnp.float32)]

    # Full-K VMEM estimate: double-buffered a/w/out blocks (+ gamma/beta).
    out_bytes = jnp.dtype(out_dtype).itemsize
    fullk_bytes = 2 * tm_e * K * 2 + 2 * K * N * 2 + 2 * tm_e * N * out_bytes
    if use_gdn:
        fullk_bytes += 2 * (N * N * 2 + N * 4)
    tk = K if (K <= 1024 or fullk_bytes <= int(0.7 * vmem_limit)) else _pick_tk(K)
    nk = K // tk if K % tk == 0 else 1

    cp = pltpu.CompilerParams(
        dimension_semantics=("parallel",) if nk == 1 else ("parallel", "arbitrary"),
        vmem_limit_bytes=vmem_limit,
    )

    if nk == 1:
        in_specs = [
            pl.BlockSpec((tm_e, K), lambda i: (i, 0)),
            pl.BlockSpec((K, N), lambda i: (0, 0)),
            pl.BlockSpec((1, N), lambda i: (0, 0)),
        ]
        if use_gdn:
            in_specs += [pl.BlockSpec((N, N), lambda i: (0, 0)),
                         pl.BlockSpec((1, N), lambda i: (0, 0))]
        return pl.pallas_call(
            functools.partial(_gemm_kernel_fullk, act=act),
            grid=(pl.cdiv(M, tm_e),),
            in_specs=in_specs,
            out_specs=pl.BlockSpec((tm_e, N), lambda i: (i, 0)),
            out_shape=jax.ShapeDtypeStruct((M, N), out_dtype),
            compiler_params=cp,
        )(a, w, bias, *gdn_args)

    # K-tiled fallback (divisor tiles only; f32 VMEM accumulator).
    in_specs = [
        pl.BlockSpec((tm_e, tk), lambda i, k: (i, k)),
        pl.BlockSpec((tk, N), lambda i, k: (k, 0)),
        pl.BlockSpec((1, N), lambda i, k: (0, 0)),
    ]
    if use_gdn:
        in_specs += [pl.BlockSpec((N, N), lambda i, k: (0, 0)),
                     pl.BlockSpec((1, N), lambda i, k: (0, 0))]
    return pl.pallas_call(
        functools.partial(_gemm_kernel_ktiled, act=act),
        grid=(pl.cdiv(M, tm_e), nk),
        in_specs=in_specs,
        out_specs=pl.BlockSpec((tm_e, N), lambda i, k: (i, 0)),
        out_shape=jax.ShapeDtypeStruct((M, N), out_dtype),
        scratch_shapes=[pltpu.VMEM((tm_e, N), jnp.float32)],
        compiler_params=cp,
    )(a, w, bias, *gdn_args)


# ---------------------------------------------------------------------------
# Recon head: clamp(0,1) + fused squared-error partial-sum reduction.
# ---------------------------------------------------------------------------
def _recon_kernel(r_ref, x_ref, clip_ref, psum_ref, *, tr, rows):
    i = pl.program_id(0)

    @pl.when(i == 0)
    def _init():
        psum_ref[...] = jnp.zeros_like(psum_ref)

    r = r_ref[...]
    x = x_ref[...]
    clip_ref[...] = jnp.clip(r, 0.0, 1.0)
    d = r - x
    # Mask ragged last-row-tile garbage so it never enters the reduction.
    row_ids = i * tr + jax.lax.broadcasted_iota(jnp.int32, d.shape, 0)
    d = jnp.where(row_ids < rows, d, 0.0)
    psum_ref[...] += jnp.sum(d * d).reshape(1, 1)


def recon_head(recon_nhwc, x_nhwc, tr=1024):
    """Returns (clipped_recon, mse_loss) without writing the sq tensor to HBM."""
    shape = recon_nhwc.shape
    n = recon_nhwc.size
    cols = 128 if n % 128 == 0 else shape[-1]      # lane-dense layout when possible
    rows = n // cols
    r2 = recon_nhwc.reshape(rows, cols).astype(jnp.float32)
    x2 = x_nhwc.reshape(rows, cols).astype(jnp.float32)
    tr_e = _pick_tm(rows, tr)
    blk = pl.BlockSpec((tr_e, cols), lambda i: (i, 0))
    clip2, psum = pl.pallas_call(
        functools.partial(_recon_kernel, tr=tr_e, rows=rows),
        grid=(pl.cdiv(rows, tr_e),),
        in_specs=[blk, blk],
        out_specs=(blk, pl.BlockSpec((1, 1), lambda i: (0, 0))),
        out_shape=(jax.ShapeDtypeStruct((rows, cols), jnp.float32),
                   jax.ShapeDtypeStruct((1, 1), jnp.float32)),
        compiler_params=pltpu.CompilerParams(
            dimension_semantics=("arbitrary",),       # psum accumulates across tiles
            vmem_limit_bytes=_tuning()[0]),
    )(r2, x2)
    return clip2.reshape(shape), psum[0, 0] / n


# ---------------------------------------------------------------------------
# Conv / deconv glue (bf16 im2col -> fused Pallas GEMM)
# ---------------------------------------------------------------------------
def _im2col(x, kh, kw, stride, pad_h, pad_w):
    B, H, W, C = x.shape
    xp = jnp.pad(x, ((0, 0), pad_h, pad_w, (0, 0)))
    Hp = H + pad_h[0] + pad_h[1]
    Wp = W + pad_w[0] + pad_w[1]
    Ho = (Hp - kh) // stride + 1
    Wo = (Wp - kw) // stride + 1
    cols = []
    for i in range(kh):
        for j in range(kw):
            cols.append(
                xp[:, i:i + stride * (Ho - 1) + 1:stride,
                      j:j + stride * (Wo - 1) + 1:stride, :])
    patches = jnp.concatenate(cols, axis=-1)            # (B, Ho, Wo, kh*kw*C)
    return patches.reshape(B * Ho * Wo, kh * kw * C), (B, Ho, Wo)


def _conv_gemm(x, w_flat, bias, *, kh, kw, stride, pad_h, pad_w,
               act="none", gdn=None, out_dtype=jnp.bfloat16):
    # bf16 patches: halves the im2col expansion's HBM footprint / DMA bytes.
    patches, (B, Ho, Wo) = _im2col(x.astype(jnp.bfloat16), kh, kw, stride,
                                   pad_h, pad_w)
    out = gemm(patches, w_flat, bias, act=act, gdn=gdn, out_dtype=out_dtype)
    return out.reshape(B, Ho, Wo, -1)


def conv2d(x, p, *, k, stride, pad, act="none", gdn=None, out_dtype=jnp.bfloat16):
    return _conv_gemm(x, p["w"], p["b"], kh=k, kw=k, stride=stride,
                      pad_h=(pad, pad), pad_w=(pad, pad),
                      act=act, gdn=gdn, out_dtype=out_dtype)


def _phase_kernel_3x3(w4, row_sel, col_sel):
    """Build a (3,3,Cin,Cout) stride-1 kernel for one deconv output phase.

    row_sel / col_sel are length-3 tuples of transposed-conv tap indices
    (None = zero tap), so all four phases share one 3x3 / pad-(1,1) im2col.
    """
    zero = jnp.zeros_like(w4[0, 0])
    rows = []
    for r in row_sel:
        cols = []
        for c in col_sel:
            cols.append(zero if (r is None or c is None) else w4[r, c])
        rows.append(jnp.stack(cols, axis=0))
    return jnp.stack(rows, axis=0)                       # (3, 3, Cin, Cout)


def deconv5x5_s2(x, p, act="none", gdn=None, out_dtype=jnp.bfloat16):
    """ConvTranspose2d(k=5, stride=2, pad=2, output_pad=1) without zero-insertion:
    all four 2x2 output phases merged into ONE stride-1 3x3 GEMM (shared im2col,
    (9*Cin, 4*Cout) weight, block-diagonal GDN gamma), then one interleave reshape."""
    w4, b = p["w"], p["b"]                # w4: (5, 5, Cin, Cout) transposed-conv kernel
    B, H, W, _ = x.shape
    cin, cout = w4.shape[2], w4.shape[3]

    ev = (4, 2, 0)                        # taps feeding even output positions
    od = (None, 3, 1)                     # taps feeding odd output positions (zero-padded)
    phases = [(ev, ev), (ev, od), (od, ev), (od, od)]   # (ee, eo, oe, oo)
    kmerged = jnp.concatenate(
        [_phase_kernel_3x3(w4, rs, cs) for rs, cs in phases], axis=-1)
    bias4 = jnp.tile(b, (1, 4))

    gdn4 = None
    if gdn is not None:
        gdn4 = {"gamma": jnp.kron(jnp.eye(4, dtype=gdn["gamma"].dtype), gdn["gamma"]),
                "beta": jnp.tile(gdn["beta"], (1, 4))}

    out = _conv_gemm(x, kmerged.reshape(9 * cin, 4 * cout), bias4,
                     kh=3, kw=3, stride=1, pad_h=(1, 1), pad_w=(1, 1),
                     act=act, gdn=gdn4, out_dtype=out_dtype)
    out = out.reshape(B, H, W, 2, 2, cout)
    out = jnp.transpose(out, (0, 1, 3, 2, 4, 5)).reshape(B, 2 * H, 2 * W, cout)
    return out


def deconv3x3_s1(x, p, act="none", gdn=None, out_dtype=jnp.bfloat16):
    """ConvTranspose2d(k=3, stride=1, pad=1): stride-1 conv with the flipped kernel."""
    w4, b = p["w"], p["b"]
    cout = w4.shape[-1]
    return _conv_gemm(x, w4[::-1, ::-1].reshape(-1, cout), b,
                      kh=3, kw=3, stride=1, pad_h=(1, 1), pad_w=(1, 1),
                      act=act, gdn=gdn, out_dtype=out_dtype)


# ---------------------------------------------------------------------------
# Parameter init (deterministic, synthetic).  Only arrays live in the pytree;
# all structural config (kernel sizes / strides / pads) is static Python.
# ---------------------------------------------------------------------------
def _conv_params(key, k, cin, cout):
    k1, k2 = jax.random.split(key)
    w = jax.random.normal(k1, (k * k * cin, cout), jnp.float32) / math.sqrt(k * k * cin)
    b = 0.01 * jax.random.normal(k2, (1, cout), jnp.float32)
    return {"w": w, "b": b}


def _deconv_params(key, k, cin, cout):
    k1, k2 = jax.random.split(key)
    w = jax.random.normal(k1, (k, k, cin, cout), jnp.float32) / math.sqrt(k * k * cin)
    b = 0.01 * jax.random.normal(k2, (1, cout), jnp.float32)
    return {"w": w, "b": b}


def _gdn_params(c):
    return {"gamma": 0.1 * jnp.eye(c, dtype=jnp.float32),
            "beta": jnp.ones((1, c), jnp.float32)}


def _bitparm_params(key, c, final):
    k1, k2, k3 = jax.random.split(key, 3)
    p = {"h": 0.1 * jax.random.normal(k1, (c,), jnp.float32),
         "b": 0.1 * jax.random.normal(k2, (c,), jnp.float32)}
    if not final:
        p["a"] = 0.1 * jax.random.normal(k3, (c,), jnp.float32)
    return p


def init_params(key, N, M):
    ks = jax.random.split(key, 24)
    return {
        "enc": [_conv_params(ks[0], 5, 3, N), _conv_params(ks[1], 5, N, N),
                _conv_params(ks[2], 5, N, N), _conv_params(ks[3], 5, N, M)],
        "enc_gdn": [_gdn_params(N), _gdn_params(N), _gdn_params(N)],
        "pe": [_conv_params(ks[4], 3, M, N), _conv_params(ks[5], 5, N, N),
               _conv_params(ks[6], 5, N, N)],
        "pd": [_deconv_params(ks[7], 5, N, N), _deconv_params(ks[8], 5, N, N),
               _deconv_params(ks[9], 3, N, M)],
        "p": [_conv_params(ks[10], 3, M, M), _conv_params(ks[11], 3, M, M),
              _conv_params(ks[12], 3, M, 2 * M)],
        "dec": [_deconv_params(ks[13], 5, M, N), _deconv_params(ks[14], 5, N, N),
                _deconv_params(ks[15], 5, N, N), _deconv_params(ks[16], 5, N, 3)],
        "dec_igdn": [_gdn_params(N), _gdn_params(N), _gdn_params(N)],
        "be_z": [_bitparm_params(ks[17], N, False), _bitparm_params(ks[18], N, False),
                 _bitparm_params(ks[19], N, False), _bitparm_params(ks[20], N, True)],
    }


# ---------------------------------------------------------------------------
# Sub-networks (GDN / IGDN fused into the conv GEMM epilogues; bf16 intermediates)
# ---------------------------------------------------------------------------
def encoder(P, x):
    e, g = P["enc"], P["enc_gdn"]
    x = conv2d(x, e[0], k=5, stride=2, pad=2, act="gdn", gdn=g[0])
    x = conv2d(x, e[1], k=5, stride=2, pad=2, act="gdn", gdn=g[1])
    x = conv2d(x, e[2], k=5, stride=2, pad=2, act="gdn", gdn=g[2])
    return conv2d(x, e[3], k=5, stride=2, pad=2, out_dtype=jnp.float32)   # feature: f32


def prior_encoder(P, feat):
    pe = P["pe"]
    x = jnp.abs(feat)                      # fuses into the im2col gather under XLA
    x = conv2d(x, pe[0], k=3, stride=1, pad=1, act="relu")
    x = conv2d(x, pe[1], k=5, stride=2, pad=2, act="relu")
    return conv2d(x, pe[2], k=5, stride=2, pad=2, out_dtype=jnp.float32)  # z: f32


def prior_decoder(P, z):
    pd = P["pd"]
    x = deconv5x5_s2(z, pd[0], act="relu")
    x = deconv5x5_s2(x, pd[1], act="relu")
    return deconv3x3_s1(x, pd[2])


def p_model(P, x):
    pp = P["p"]
    x = conv2d(x, pp[0], k=3, stride=1, pad=1, act="leaky_relu")
    x = conv2d(x, pp[1], k=3, stride=1, pad=1, act="leaky_relu")
    return conv2d(x, pp[2], k=3, stride=1, pad=1, out_dtype=jnp.float32)  # hyper: f32


def decoder(P, x):
    d, g = P["dec"], P["dec_igdn"]
    x = deconv5x5_s2(x, d[0], act="igdn", gdn=g[0])
    x = deconv5x5_s2(x, d[1], act="igdn", gdn=g[1])
    x = deconv5x5_s2(x, d[2], act="igdn", gdn=g[2])
    return deconv5x5_s2(x, d[3], out_dtype=jnp.float32)                   # recon: f32


def bit_estimator(P, x):
    # factorized iclr18 bit estimator; x is NHWC, per-channel params broadcast on C.
    for i, lyr in enumerate(P["be_z"]):
        x = x * jax.nn.softplus(lyr["h"]) + lyr["b"]
        if i < len(P["be_z"]) - 1:
            x = x + jnp.tanh(x) * jnp.tanh(lyr["a"])
        else:
            x = jax.nn.sigmoid(x)
    return x


def gaussian_likelihood(x, hyper):
    # Distribution_for_entropy: prob = N(mean, |scale|).cdf(x+.5) - cdf(x-.5)
    Mch = hyper.shape[-1] // 2
    mean, scale = hyper[..., :Mch], hyper[..., Mch:]
    sigma = jnp.maximum(jnp.abs(scale), 1e-9)

    def cdf(v):
        return 0.5 * (1.0 + jax.lax.erf((v - mean) / (sigma * math.sqrt(2.0))))

    prob = jnp.abs(cdf(x + 0.5) - cdf(x - 0.5))
    return jnp.maximum(prob, 1e-6)


# ---------------------------------------------------------------------------
# LoadImageCompressor.forward
# ---------------------------------------------------------------------------
def forward(params, input_image):
    """input_image: NCHW float32 in [0,1].  Returns the same 5-tuple as PyTorch."""
    B, C, H, W = input_image.shape
    x = jnp.transpose(input_image, (0, 2, 3, 1))            # -> NHWC

    feature = encoder(params, x)                             # (B, H/16, W/16, M) f32
    z = prior_encoder(params, feature)                       # (B, H/64, W/64, N) f32

    compressed_z = jnp.round(z)                              # eval path (UniverseQuant skipped)
    compressed_feature = jnp.round(feature)

    hyper_dec = p_model(params, prior_decoder(params, compressed_z))
    xp1 = gaussian_likelihood(compressed_feature, hyper_dec)
    total_bits_feature = jnp.sum(jnp.log(xp1)) / (-math.log(2.0))

    recon = decoder(params, compressed_feature)              # (B, H, W, 3) f32
    clipped, mse_loss = recon_head(recon, x)                 # fused clamp + sq-err sum

    prob_z = (bit_estimator(params, compressed_z + 0.5)
              - bit_estimator(params, compressed_z - 0.5))
    total_bits_z = jnp.sum(jnp.clip(-jnp.log(prob_z + 1e-10) / math.log(2.0), 0.0, 50.0))

    denom = B * H * W
    bpp_feature = total_bits_feature / denom
    bpp_z = total_bits_z / denom
    bpp = bpp_feature + bpp_z

    clipped_recon_image = jnp.transpose(clipped, (0, 3, 1, 2))   # back to NCHW
    return clipped_recon_image, mse_loss, bpp_feature, bpp_z, bpp


if __name__ == "__main__":
    key = jax.random.PRNGKey(0)
    kp, kx = jax.random.split(key)
    out_channel_N, out_channel_M = 8, 16                     # small synthetic config
    params = init_params(kp, out_channel_N, out_channel_M)
    # spatial dims must be divisible by 64 (feature = /16, z = /64); NCHW like PyTorch.
    input_image = jax.random.uniform(kx, (2, 3, 64, 64), jnp.float32)

    fwd = jax.jit(forward)
    outputs = fwd(params, input_image)
    jax.block_until_ready(outputs)
    print("KERNEL_OK")
</pallas_src>

<mosaic_0001>
module attributes {stable_mosaic.version = 11 : i64} {
  func.func @_gemm_kernel_fullk(%arg0: i32, %arg1: memref<512x75xbf16, #tpu.memory_space<vmem>>, %arg2: memref<75x8xbf16, #tpu.memory_space<vmem>>, %arg3: memref<1x8xf32, #tpu.memory_space<vmem>>, %arg4: memref<8x8xbf16, #tpu.memory_space<vmem>>, %arg5: memref<1x8xf32, #tpu.memory_space<vmem>>, %arg6: memref<512x8xbf16, #tpu.memory_space<vmem>>) attributes {dimension_semantics = [#tpu.dimension_semantics<parallel>], iteration_bounds = array<i64: 4>, scalar_prefetch = 0 : i64, scratch_operands = 0 : i64, tpu.core_type = #tpu.core_type<tc>, window_params = [{transform_indices = @transform_0, window_bounds = array<i64: 512, 75>}, {pipeline_mode = #tpu.pipeline_mode<synchronous>, transform_indices = @transform_1, window_bounds = array<i64: 75, 8>}, {pipeline_mode = #tpu.pipeline_mode<synchronous>, transform_indices = @transform_2, window_bounds = array<i64: 1, 8>}, {pipeline_mode = #tpu.pipeline_mode<synchronous>, transform_indices = @transform_3, window_bounds = array<i64: 8, 8>}, {pipeline_mode = #tpu.pipeline_mode<synchronous>, transform_indices = @transform_4, window_bounds = array<i64: 1, 8>}, {transform_indices = @transform_5, window_bounds = array<i64: 512, 8>}]} {
    %c0 = arith.constant 0 : index
    %c0_0 = arith.constant 0 : index
    %0 = vector.load %arg4[%c0, %c0_0] : memref<8x8xbf16, #tpu.memory_space<vmem>>, vector<8x8xbf16>
    %c0_1 = arith.constant 0 : index
    %c0_2 = arith.constant 0 : index
    %1 = vector.load %arg5[%c0_1, %c0_2] : memref<1x8xf32, #tpu.memory_space<vmem>>, vector<1x8xf32>
    %c0_3 = arith.constant 0 : index
    %c0_4 = arith.constant 0 : index
    %2 = vector.load %arg1[%c0_3, %c0_4] : memref<512x75xbf16, #tpu.memory_space<vmem>>, vector<512x75xbf16>
    %c0_5 = arith.constant 0 : index
    %c0_6 = arith.constant 0 : index
    %3 = vector.load %arg2[%c0_5, %c0_6] : memref<75x8xbf16, #tpu.memory_space<vmem>>, vector<75x8xbf16>
    %cst = arith.constant dense<0.000000e+00> : vector<512x8xf32>
    %4 = tpu.matmul %2, %3, %cst {dimension_numbers = #tpu.dot_dimension_numbers<[1], [0], [0], [1], [0, 0, 1, 1], [], []>} : vector<512x75xbf16>, vector<75x8xbf16>, vector<512x8xf32> -> vector<512x8xf32>
    %c0_7 = arith.constant 0 : index
    %c0_8 = arith.constant 0 : index
    %5 = vector.load %arg3[%c0_7, %c0_8] : memref<1x8xf32, #tpu.memory_space<vmem>>, vector<1x8xf32>
    %6 = vector.broadcast %5 : vector<1x8xf32> to vector<512x8xf32>
    %7 = arith.addf %4, %6 : vector<512x8xf32>
    %8 = arith.mulf %7, %7 : vector<512x8xf32>
    %9 = arith.truncf %8 : vector<512x8xf32> to vector<512x8xbf16>
    %cst_9 = arith.constant dense<0.000000e+00> : vector<512x8xf32>
    %10 = tpu.matmul %9, %0, %cst_9 {dimension_numbers = #tpu.dot_dimension_numbers<[1], [0], [0], [1], [0, 0, 1, 1], [], []>} : vector<512x8xbf16>, vector<8x8xbf16>, vector<512x8xf32> -> vector<512x8xf32>
    %11 = vector.broadcast %1 : vector<1x8xf32> to vector<512x8xf32>
    %12 = arith.addf %10, %11 : vector<512x8xf32>
    %13 = math.rsqrt %12 : vector<512x8xf32>
    %14 = arith.mulf %7, %13 : vector<512x8xf32>
    %15 = arith.truncf %14 : vector<512x8xf32> to vector<512x8xbf16>
    %c0_10 = arith.constant 0 : index
    %c0_11 = arith.constant 0 : index
    %16 = vector.load %arg6[%c0_10, %c0_11] : memref<512x8xbf16, #tpu.memory_space<vmem>>, vector<512x8xbf16>
    tpu.vector_store %arg6[%c0_10, %c0_11], %15 {strides = array<i32>} : memref<512x8xbf16, #tpu.memory_space<vmem>>, vector<512x8xbf16>,
    return
  }
  func.func @transform_0(%arg0: i32) -> (i32, i32) {
    %c0_i32 = arith.constant 0 : i32
    %c0_i32_0 = arith.constant 0 : i32
    return %arg0, %c0_i32 : i32, i32
  }
  func.func @transform_1(%arg0: i32) -> (i32, i32) {
    %c0_i32 = arith.constant 0 : i32
    %c0_i32_0 = arith.constant 0 : i32
    %c0_i32_1 = arith.constant 0 : i32
    return %c0_i32, %c0_i32_0 : i32, i32
  }
  func.func @transform_2(%arg0: i32) -> (i32, i32) {
    %c0_i32 = arith.constant 0 : i32
    %c0_i32_0 = arith.constant 0 : i32
    %c0_i32_1 = arith.constant 0 : i32
    return %c0_i32, %c0_i32_0 : i32, i32
  }
  func.func @transform_3(%arg0: i32) -> (i32, i32) {
    %c0_i32 = arith.constant 0 : i32
    %c0_i32_0 = arith.constant 0 : i32
    %c0_i32_1 = arith.constant 0 : i32
    return %c0_i32, %c0_i32_0 : i32, i32
  }
  func.func @transform_4(%arg0: i32) -> (i32, i32) {
    %c0_i32 = arith.constant 0 : i32
    %c0_i32_0 = arith.constant 0 : i32
    %c0_i32_1 = arith.constant 0 : i32
    return %c0_i32, %c0_i32_0 : i32, i32
  }
  func.func @transform_5(%arg0: i32) -> (i32, i32) {
    %c0_i32 = arith.constant 0 : i32
    %c0_i32_0 = arith.constant 0 : i32
    return %arg0, %c0_i32 : i32, i32
  }
}

module attributes {stable_mosaic.version = 11 : i64} {
  func.func @_gemm_kernel_fullk(%arg0: i32, %arg1: memref<256x200xbf16, #tpu.memory_space<vmem>>, %arg2: memref<200x8xbf16, #tpu.memory_space<vmem>>, %arg3: memref<1x8xf32, #tpu.memory_space<vmem>>, %arg4: memref<8x8xbf16, #tpu.memory_space<vmem>>, %arg5: memref<1x8xf32, #tpu.memory_space<vmem>>, %arg6: memref<256x8xbf16, #tpu.memory_space<vmem>>) attributes {dimension_semantics = [#tpu.dimension_semantics<parallel>], iteration_bounds = array<i64: 2>, scalar_prefetch = 0 : i64, scratch_operands = 0 : i64, tpu.core_type = #tpu.core_type<tc>, window_params = [{transform_indices = @transform_0, window_bounds = array<i64: 256, 200>}, {pipeline_mode = #tpu.pipeline_mode<synchronous>, transform_indices = @transform_1, window_bounds = array<i64: 200, 8>}, {pipeline_mode = #tpu.pipeline_mode<synchronous>, transform_indices = @transform_2, window_bounds = array<i64: 1, 8>}, {pipeline_mode = #tpu.pipeline_mode<synchronous>, transform_indices = @transform_3, window_bounds = array<i64: 8, 8>}, {pipeline_mode = #tpu.pipeline_mode<synchronous>, transform_indices = @transform_4, window_bounds = array<i64: 1, 8>}, {transform_indices = @transform_5, window_bounds = array<i64: 256, 8>}]} {
    %c0 = arith.constant 0 : index
    %c0_0 = arith.constant 0 : index
    %0 = vector.load %arg4[%c0, %c0_0] : memref<8x8xbf16, #tpu.memory_space<vmem>>, vector<8x8xbf16>
    %c0_1 = arith.constant 0 : index
    %c0_2 = arith.constant 0 : index
    %1 = vector.load %arg5[%c0_1, %c0_2] : memref<1x8xf32, #tpu.memory_space<vmem>>, vector<1x8xf32>
    %c0_3 = arith.constant 0 : index
    %c0_4 = arith.constant 0 : index
    %2 = vector.load %arg1[%c0_3, %c0_4] : memref<256x200xbf16, #tpu.memory_space<vmem>>, vector<256x200xbf16>
    %c0_5 = arith.constant 0 : index
    %c0_6 = arith.constant 0 : index
    %3 = vector.load %arg2[%c0_5, %c0_6] : memref<200x8xbf16, #tpu.memory_space<vmem>>, vector<200x8xbf16>
    %cst = arith.constant dense<0.000000e+00> : vector<256x8xf32>
    %4 = tpu.matmul %2, %3, %cst {dimension_numbers = #tpu.dot_dimension_numbers<[1], [0], [0], [1], [0, 0, 1, 1], [], []>} : vector<256x200xbf16>, vector<200x8xbf16>, vector<256x8xf32> -> vector<256x8xf32>
    %c0_7 = arith.constant 0 : index
    %c0_8 = arith.constant 0 : index
    %5 = vector.load %arg3[%c0_7, %c0_8] : memref<1x8xf32, #tpu.memory_space<vmem>>, vector<1x8xf32>
    %6 = vector.broadcast %5 : vector<1x8xf32> to vector<256x8xf32>
    %7 = arith.addf %4, %6 : vector<256x8xf32>
    %8 = arith.mulf %7, %7 : vector<256x8xf32>
    %9 = arith.truncf %8 : vector<256x8xf32> to vector<256x8xbf16>
    %cst_9 = arith.constant dense<0.000000e+00> : vector<256x8xf32>
    %10 = tpu.matmul %9, %0, %cst_9 {dimension_numbers = #tpu.dot_dimension_numbers<[1], [0], [0], [1], [0, 0, 1, 1], [], []>} : vector<256x8xbf16>, vector<8x8xbf16>, vector<256x8xf32> -> vector<256x8xf32>
    %11 = vector.broadcast %1 : vector<1x8xf32> to vector<256x8xf32>
    %12 = arith.addf %10, %11 : vector<256x8xf32>
    %13 = math.rsqrt %12 : vector<256x8xf32>
    %14 = arith.mulf %7, %13 : vector<256x8xf32>
    %15 = arith.truncf %14 : vector<256x8xf32> to vector<256x8xbf16>
    %c0_10 = arith.constant 0 : index
    %c0_11 = arith.constant 0 : index
    %16 = vector.load %arg6[%c0_10, %c0_11] : memref<256x8xbf16, #tpu.memory_space<vmem>>, vector<256x8xbf16>
    tpu.vector_store %arg6[%c0_10, %c0_11], %15 {strides = array<i32>} : memref<256x8xbf16, #tpu.memory_space<vmem>>, vector<256x8xbf16>,
    return
  }
  func.func @transform_0(%arg0: i32) -> (i32, i32) {
    %c0_i32 = arith.constant 0 : i32
    %c0_i32_0 = arith.constant 0 : i32
    return %arg0, %c0_i32 : i32, i32
  }
  func.func @transform_1(%arg0: i32) -> (i32, i32) {
    %c0_i32 = arith.constant 0 : i32
    %c0_i32_0 = arith.constant 0 : i32
    %c0_i32_1 = arith.constant 0 : i32
    return %c0_i32, %c0_i32_0 : i32, i32
  }
  func.func @transform_2(%arg0: i32) -> (i32, i32) {
    %c0_i32 = arith.constant 0 : i32
    %c0_i32_0 = arith.constant 0 : i32
    %c0_i32_1 = arith.constant 0 : i32
    return %c0_i32, %c0_i32_0 : i32, i32
  }
  func.func @transform_3(%arg0: i32) -> (i32, i32) {
    %c0_i32 = arith.constant 0 : i32
    %c0_i32_0 = arith.constant 0 : i32
    %c0_i32_1 = arith.constant 0 : i32
    return %c0_i32, %c0_i32_0 : i32, i32
  }
  func.func @transform_4(%arg0: i32) -> (i32, i32) {
    %c0_i32 = arith.constant 0 : i32
    %c0_i32_0 = arith.constant 0 : i32
    %c0_i32_1 = arith.constant 0 : i32
    return %c0_i32, %c0_i32_0 : i32, i32
  }
  func.func @transform_5(%arg0: i32) -> (i32, i32) {
    %c0_i32 = arith.constant 0 : i32
    %c0_i32_0 = arith.constant 0 : i32
    return %arg0, %c0_i32 : i32, i32
  }
}

module attributes {stable_mosaic.version = 11 : i64} {
  func.func @_gemm_kernel_fullk(%arg0: i32, %arg1: memref<64x200xbf16, #tpu.memory_space<vmem>>, %arg2: memref<200x8xbf16, #tpu.memory_space<vmem>>, %arg3: memref<1x8xf32, #tpu.memory_space<vmem>>, %arg4: memref<8x8xbf16, #tpu.memory_space<vmem>>, %arg5: memref<1x8xf32, #tpu.memory_space<vmem>>, %arg6: memref<64x8xbf16, #tpu.memory_space<vmem>>) attributes {dimension_semantics = [#tpu.dimension_semantics<parallel>], iteration_bounds = array<i64: 2>, scalar_prefetch = 0 : i64, scratch_operands = 0 : i64, tpu.core_type = #tpu.core_type<tc>, window_params = [{transform_indices = @transform_0, window_bounds = array<i64: 64, 200>}, {pipeline_mode = #tpu.pipeline_mode<synchronous>, transform_indices = @transform_1, window_bounds = array<i64: 200, 8>}, {pipeline_mode = #tpu.pipeline_mode<synchronous>, transform_indices = @transform_2, window_bounds = array<i64: 1, 8>}, {pipeline_mode = #tpu.pipeline_mode<synchronous>, transform_indices = @transform_3, window_bounds = array<i64: 8, 8>}, {pipeline_mode = #tpu.pipeline_mode<synchronous>, transform_indices = @transform_4, window_bounds = array<i64: 1, 8>}, {transform_indices = @transform_5, window_bounds = array<i64: 64, 8>}]} {
    %c0 = arith.constant 0 : index
    %c0_0 = arith.constant 0 : index
    %0 = vector.load %arg4[%c0, %c0_0] : memref<8x8xbf16, #tpu.memory_space<vmem>>, vector<8x8xbf16>
    %c0_1 = arith.constant 0 : index
    %c0_2 = arith.constant 0 : index
    %1 = vector.load %arg5[%c0_1, %c0_2] : memref<1x8xf32, #tpu.memory_space<vmem>>, vector<1x8xf32>
    %c0_3 = arith.constant 0 : index
    %c0_4 = arith.constant 0 : index
    %2 = vector.load %arg1[%c0_3, %c0_4] : memref<64x200xbf16, #tpu.memory_space<vmem>>, vector<64x200xbf16>
    %c0_5 = arith.constant 0 : index
    %c0_6 = arith.constant 0 : index
    %3 = vector.load %arg2[%c0_5, %c0_6] : memref<200x8xbf16, #tpu.memory_space<vmem>>, vector<200x8xbf16>
    %cst = arith.constant dense<0.000000e+00> : vector<64x8xf32>
    %4 = tpu.matmul %2, %3, %cst {dimension_numbers = #tpu.dot_dimension_numbers<[1], [0], [0], [1], [0, 0, 1, 1], [], []>} : vector<64x200xbf16>, vector<200x8xbf16>, vector<64x8xf32> -> vector<64x8xf32>
    %c0_7 = arith.constant 0 : index
    %c0_8 = arith.constant 0 : index
    %5 = vector.load %arg3[%c0_7, %c0_8] : memref<1x8xf32, #tpu.memory_space<vmem>>, vector<1x8xf32>
    %6 = vector.broadcast %5 : vector<1x8xf32> to vector<64x8xf32>
    %7 = arith.addf %4, %6 : vector<64x8xf32>
    %8 = arith.mulf %7, %7 : vector<64x8xf32>
    %9 = arith.truncf %8 : vector<64x8xf32> to vector<64x8xbf16>
    %cst_9 = arith.constant dense<0.000000e+00> : vector<64x8xf32>
    %10 = tpu.matmul %9, %0, %cst_9 {dimension_numbers = #tpu.dot_dimension_numbers<[1], [0], [0], [1], [0, 0, 1, 1], [], []>} : vector<64x8xbf16>, vector<8x8xbf16>, vector<64x8xf32> -> vector<64x8xf32>
    %11 = vector.broadcast %1 : vector<1x8xf32> to vector<64x8xf32>
    %12 = arith.addf %10, %11 : vector<64x8xf32>
    %13 = math.rsqrt %12 : vector<64x8xf32>
    %14 = arith.mulf %7, %13 : vector<64x8xf32>
    %15 = arith.truncf %14 : vector<64x8xf32> to vector<64x8xbf16>
    %c0_10 = arith.constant 0 : index
    %c0_11 = arith.constant 0 : index
    %16 = vector.load %arg6[%c0_10, %c0_11] : memref<64x8xbf16, #tpu.memory_space<vmem>>, vector<64x8xbf16>
    tpu.vector_store %arg6[%c0_10, %c0_11], %15 {strides = array<i32>} : memref<64x8xbf16, #tpu.memory_space<vmem>>, vector<64x8xbf16>,
    return
  }
  func.func @transform_0(%arg0: i32) -> (i32, i32) {
    %c0_i32 = arith.constant 0 : i32
    %c0_i32_0 = arith.constant 0 : i32
    return %arg0, %c0_i32 : i32, i32
  }
  func.func @transform_1(%arg0: i32) -> (i32, i32) {
    %c0_i32 = arith.constant 0 : i32
    %c0_i32_0 = arith.constant 0 : i32
    %c0_i32_1 = arith.constant 0 : i32
    return %c0_i32, %c0_i32_0 : i32, i32
  }
  func.func @transform_2(%arg0: i32) -> (i32, i32) {
    %c0_i32 = arith.constant 0 : i32
    %c0_i32_0 = arith.constant 0 : i32
    %c0_i32_1 = arith.constant 0 : i32
    return %c0_i32, %c0_i32_0 : i32, i32
  }
  func.func @transform_3(%arg0: i32) -> (i32, i32) {
    %c0_i32 = arith.constant 0 : i32
    %c0_i32_0 = arith.constant 0 : i32
    %c0_i32_1 = arith.constant 0 : i32
    return %c0_i32, %c0_i32_0 : i32, i32
  }
  func.func @transform_4(%arg0: i32) -> (i32, i32) {
    %c0_i32 = arith.constant 0 : i32
    %c0_i32_0 = arith.constant 0 : i32
    %c0_i32_1 = arith.constant 0 : i32
    return %c0_i32, %c0_i32_0 : i32, i32
  }
  func.func @transform_5(%arg0: i32) -> (i32, i32) {
    %c0_i32 = arith.constant 0 : i32
    %c0_i32_0 = arith.constant 0 : i32
    return %arg0, %c0_i32 : i32, i32
  }
}

module attributes {stable_mosaic.version = 11 : i64} {
  func.func @_gemm_kernel_fullk(%arg0: i32, %arg1: memref<16x200xbf16, #tpu.memory_space<vmem>>, %arg2: memref<200x16xbf16, #tpu.memory_space<vmem>>, %arg3: memref<1x16xf32, #tpu.memory_space<vmem>>, %arg4: memref<16x16xf32, #tpu.memory_space<vmem>>) attributes {dimension_semantics = [#tpu.dimension_semantics<parallel>], iteration_bounds = array<i64: 2>, scalar_prefetch = 0 : i64, scratch_operands = 0 : i64, tpu.core_type = #tpu.core_type<tc>, window_params = [{transform_indices = @transform_0, window_bounds = array<i64: 16, 200>}, {pipeline_mode = #tpu.pipeline_mode<synchronous>, transform_indices = @transform_1, window_bounds = array<i64: 200, 16>}, {pipeline_mode = #tpu.pipeline_mode<synchronous>, transform_indices = @transform_2, window_bounds = array<i64: 1, 16>}, {transform_indices = @transform_3, window_bounds = array<i64: 16, 16>}]} {
    %c0 = arith.constant 0 : index
    %c0_0 = arith.constant 0 : index
    %0 = vector.load %arg1[%c0, %c0_0] : memref<16x200xbf16, #tpu.memory_space<vmem>>, vector<16x200xbf16>
    %c0_1 = arith.constant 0 : index
    %c0_2 = arith.constant 0 : index
    %1 = vector.load %arg2[%c0_1, %c0_2] : memref<200x16xbf16, #tpu.memory_space<vmem>>, vector<200x16xbf16>
    %cst = arith.constant dense<0.000000e+00> : vector<16x16xf32>
    %2 = tpu.matmul %0, %1, %cst {dimension_numbers = #tpu.dot_dimension_numbers<[1], [0], [0], [1], [0, 0, 1, 1], [], []>} : vector<16x200xbf16>, vector<200x16xbf16>, vector<16x16xf32> -> vector<16x16xf32>
    %c0_3 = arith.constant 0 : index
    %c0_4 = arith.constant 0 : index
    %3 = vector.load %arg3[%c0_3, %c0_4] : memref<1x16xf32, #tpu.memory_space<vmem>>, vector<1x16xf32>
    %4 = vector.broadcast %3 : vector<1x16xf32> to vector<16x16xf32>
    %5 = arith.addf %2, %4 : vector<16x16xf32>
    %c0_5 = arith.constant 0 : index
    %c0_6 = arith.constant 0 : index
    %6 = vector.load %arg4[%c0_5, %c0_6] : memref<16x16xf32, #tpu.memory_space<vmem>>, vector<16x16xf32>
    tpu.vector_store %arg4[%c0_5, %c0_6], %5 {strides = array<i32>} : memref<16x16xf32, #tpu.memory_space<vmem>>, vector<16x16xf32>,
    return
  }
  func.func @transform_0(%arg0: i32) -> (i32, i32) {
    %c0_i32 = arith.constant 0 : i32
    %c0_i32_0 = arith.constant 0 : i32
    return %arg0, %c0_i32 : i32, i32
  }
  func.func @transform_1(%arg0: i32) -> (i32, i32) {
    %c0_i32 = arith.constant 0 : i32
    %c0_i32_0 = arith.constant 0 : i32
    %c0_i32_1 = arith.constant 0 : i32
    return %c0_i32, %c0_i32_0 : i32, i32
  }
  func.func @transform_2(%arg0: i32) -> (i32, i32) {
    %c0_i32 = arith.constant 0 : i32
    %c0_i32_0 = arith.constant 0 : i32
    %c0_i32_1 = arith.constant 0 : i32
    return %c0_i32, %c0_i32_0 : i32, i32
  }
  func.func @transform_3(%arg0: i32) -> (i32, i32) {
    %c0_i32 = arith.constant 0 : i32
    %c0_i32_0 = arith.constant 0 : i32
    return %arg0, %c0_i32 : i32, i32
  }
}

module attributes {stable_mosaic.version = 11 : i64} {
  func.func @_gemm_kernel_fullk(%arg0: i32, %arg1: memref<16x144xbf16, #tpu.memory_space<vmem>>, %arg2: memref<144x32xbf16, #tpu.memory_space<vmem>>, %arg3: memref<1x32xf32, #tpu.memory_space<vmem>>, %arg4: memref<32x32xbf16, #tpu.memory_space<vmem>>, %arg5: memref<1x32xf32, #tpu.memory_space<vmem>>, %arg6: memref<16x32xbf16, #tpu.memory_space<vmem>>) attributes {dimension_semantics = [#tpu.dimension_semantics<parallel>], iteration_bounds = array<i64: 2>, scalar_prefetch = 0 : i64, scratch_operands = 0 : i64, tpu.core_type = #tpu.core_type<tc>, window_params = [{transform_indices = @transform_0, window_bounds = array<i64: 16, 144>}, {pipeline_mode = #tpu.pipeline_mode<synchronous>, transform_indices = @transform_1, window_bounds = array<i64: 144, 32>}, {pipeline_mode = #tpu.pipeline_mode<synchronous>, transform_indices = @transform_2, window_bounds = array<i64: 1, 32>}, {pipeline_mode = #tpu.pipeline_mode<synchronous>, transform_indices = @transform_3, window_bounds = array<i64: 32, 32>}, {pipeline_mode = #tpu.pipeline_mode<synchronous>, transform_indices = @transform_4, window_bounds = array<i64: 1, 32>}, {transform_indices = @transform_5, window_bounds = array<i64: 16, 32>}]} {
    %c0 = arith.constant 0 : index
    %c0_0 = arith.constant 0 : index
    %0 = vector.load %arg4[%c0, %c0_0] : memref<32x32xbf16, #tpu.memory_space<vmem>>, vector<32x32xbf16>
    %c0_1 = arith.constant 0 : index
    %c0_2 = arith.constant 0 : index
    %1 = vector.load %arg5[%c0_1, %c0_2] : memref<1x32xf32, #tpu.memory_space<vmem>>, vector<1x32xf32>
    %c0_3 = arith.constant 0 : index
    %c0_4 = arith.constant 0 : index
    %2 = vector.load %arg1[%c0_3, %c0_4] : memref<16x144xbf16, #tpu.memory_space<vmem>>, vector<16x144xbf16>
    %c0_5 = arith.constant 0 : index
    %c0_6 = arith.constant 0 : index
    %3 = vector.load %arg2[%c0_5, %c0_6] : memref<144x32xbf16, #tpu.memory_space<vmem>>, vector<144x32xbf16>
    %cst = arith.constant dense<0.000000e+00> : vector<16x32xf32>
    %4 = tpu.matmul %2, %3, %cst {dimension_numbers = #tpu.dot_dimension_numbers<[1], [0], [0], [1], [0, 0, 1, 1], [], []>} : vector<16x144xbf16>, vector<144x32xbf16>, vector<16x32xf32> -> vector<16x32xf32>
    %c0_7 = arith.constant 0 : index
    %c0_8 = arith.constant 0 : index
    %5 = vector.load %arg3[%c0_7, %c0_8] : memref<1x32xf32, #tpu.memory_space<vmem>>, vector<1x32xf32>
    %6 = vector.broadcast %5 : vector<1x32xf32> to vector<16x32xf32>
    %7 = arith.addf %4, %6 : vector<16x32xf32>
    %8 = arith.mulf %7, %7 : vector<16x32xf32>
    %9 = arith.truncf %8 : vector<16x32xf32> to vector<16x32xbf16>
    %cst_9 = arith.constant dense<0.000000e+00> : vector<16x32xf32>
    %10 = tpu.matmul %9, %0, %cst_9 {dimension_numbers = #tpu.dot_dimension_numbers<[1], [0], [0], [1], [0, 0, 1, 1], [], []>} : vector<16x32xbf16>, vector<32x32xbf16>, vector<16x32xf32> -> vector<16x32xf32>
    %11 = vector.broadcast %1 : vector<1x32xf32> to vector<16x32xf32>
    %12 = arith.addf %10, %11 : vector<16x32xf32>
    %13 = math.sqrt %12 : vector<16x32xf32>
    %14 = arith.mulf %7, %13 : vector<16x32xf32>
    %15 = arith.truncf %14 : vector<16x32xf32> to vector<16x32xbf16>
    %c0_10 = arith.constant 0 : index
    %c0_11 = arith.constant 0 : index
    %16 = vector.load %arg6[%c0_10, %c0_11] : memref<16x32xbf16, #tpu.memory_space<vmem>>, vector<16x32xbf16>
    tpu.vector_store %arg6[%c0_10, %c0_11], %15 {strides = array<i32>} : memref<16x32xbf16, #tpu.memory_space<vmem>>, vector<16x32xbf16>,
    return
  }
  func.func @transform_0(%arg0: i32) -> (i32, i32) {
    %c0_i32 = arith.constant 0 : i32
    %c0_i32_0 = arith.constant 0 : i32
    return %arg0, %c0_i32 : i32, i32
  }
  func.func @transform_1(%arg0: i32) -> (i32, i32) {
    %c0_i32 = arith.constant 0 : i32
    %c0_i32_0 = arith.constant 0 : i32
    %c0_i32_1 = arith.constant 0 : i32
    return %c0_i32, %c0_i32_0 : i32, i32
  }
  func.func @transform_2(%arg0: i32) -> (i32, i32) {
    %c0_i32 = arith.constant 0 : i32
    %c0_i32_0 = arith.constant 0 : i32
    %c0_i32_1 = arith.constant 0 : i32
    return %c0_i32, %c0_i32_0 : i32, i32
  }
  func.func @transform_3(%arg0: i32) -> (i32, i32) {
    %c0_i32 = arith.constant 0 : i32
    %c0_i32_0 = arith.constant 0 : i32
    %c0_i32_1 = arith.constant 0 : i32
    return %c0_i32, %c0_i32_0 : i32, i32
  }
  func.func @transform_4(%arg0: i32) -> (i32, i32) {
    %c0_i32 = arith.constant 0 : i32
    %c0_i32_0 = arith.constant 0 : i32
    %c0_i32_1 = arith.constant 0 : i32
    return %c0_i32, %c0_i32_0 : i32, i32
  }
  func.func @transform_5(%arg0: i32) -> (i32, i32) {
    %c0_i32 = arith.constant 0 : i32
    %c0_i32_0 = arith.constant 0 : i32
    return %arg0, %c0_i32 : i32, i32
  }
}

module attributes {stable_mosaic.version = 11 : i64} {
  func.func @_gemm_kernel_fullk(%arg0: i32, %arg1: memref<16x144xbf16, #tpu.memory_space<vmem>>, %arg2: memref<144x8xbf16, #tpu.memory_space<vmem>>, %arg3: memref<1x8xf32, #tpu.memory_space<vmem>>, %arg4: memref<16x8xbf16, #tpu.memory_space<vmem>>) attributes {dimension_semantics = [#tpu.dimension_semantics<parallel>], iteration_bounds = array<i64: 2>, scalar_prefetch = 0 : i64, scratch_operands = 0 : i64, tpu.core_type = #tpu.core_type<tc>, window_params = [{transform_indices = @transform_0, window_bounds = array<i64: 16, 144>}, {pipeline_mode = #tpu.pipeline_mode<synchronous>, transform_indices = @transform_1, window_bounds = array<i64: 144, 8>}, {pipeline_mode = #tpu.pipeline_mode<synchronous>, transform_indices = @transform_2, window_bounds = array<i64: 1, 8>}, {transform_indices = @transform_3, window_bounds = array<i64: 16, 8>}]} {
    %c0 = arith.constant 0 : index
    %c0_0 = arith.constant 0 : index
    %0 = vector.load %arg1[%c0, %c0_0] : memref<16x144xbf16, #tpu.memory_space<vmem>>, vector<16x144xbf16>
    %c0_1 = arith.constant 0 : index
    %c0_2 = arith.constant 0 : index
    %1 = vector.load %arg2[%c0_1, %c0_2] : memref<144x8xbf16, #tpu.memory_space<vmem>>, vector<144x8xbf16>
    %cst = arith.constant dense<0.000000e+00> : vector<16x8xf32>
    %2 = tpu.matmul %0, %1, %cst {dimension_numbers = #tpu.dot_dimension_numbers<[1], [0], [0], [1], [0, 0, 1, 1], [], []>} : vector<16x144xbf16>, vector<144x8xbf16>, vector<16x8xf32> -> vector<16x8xf32>
    %c0_3 = arith.constant 0 : index
    %c0_4 = arith.constant 0 : index
    %3 = vector.load %arg3[%c0_3, %c0_4] : memref<1x8xf32, #tpu.memory_space<vmem>>, vector<1x8xf32>
    %4 = vector.broadcast %3 : vector<1x8xf32> to vector<16x8xf32>
    %5 = arith.addf %2, %4 : vector<16x8xf32>
    %cst_5 = arith.constant 0.000000e+00 : f32
    %6 = vector.broadcast %cst_5 : f32 to vector<16x8xf32>
    %7 = arith.maximumf %5, %6 : vector<16x8xf32>
    %8 = arith.truncf %7 : vector<16x8xf32> to vector<16x8xbf16>
    %c0_6 = arith.constant 0 : index
    %c0_7 = arith.constant 0 : index
    %9 = vector.load %arg4[%c0_6, %c0_7] : memref<16x8xbf16, #tpu.memory_space<vmem>>, vector<16x8xbf16>
    tpu.vector_store %arg4[%c0_6, %c0_7], %8 {strides = array<i32>} : memref<16x8xbf16, #tpu.memory_space<vmem>>, vector<16x8xbf16>,
    return
  }
  func.func @transform_0(%arg0: i32) -> (i32, i32) {
    %c0_i32 = arith.constant 0 : i32
    %c0_i32_0 = arith.constant 0 : i32
    return %arg0, %c0_i32 : i32, i32
  }
  func.func @transform_1(%arg0: i32) -> (i32, i32) {
    %c0_i32 = arith.constant 0 : i32
    %c0_i32_0 = arith.constant 0 : i32
    %c0_i32_1 = arith.constant 0 : i32
    return %c0_i32, %c0_i32_0 : i32, i32
  }
  func.func @transform_2(%arg0: i32) -> (i32, i32) {
    %c0_i32 = arith.constant 0 : i32
    %c0_i32_0 = arith.constant 0 : i32
    %c0_i32_1 = arith.constant 0 : i32
    return %c0_i32, %c0_i32_0 : i32, i32
  }
  func.func @transform_3(%arg0: i32) -> (i32, i32) {
    %c0_i32 = arith.constant 0 : i32
    %c0_i32_0 = arith.constant 0 : i32
    return %arg0, %c0_i32 : i32, i32
  }
}

module attributes {stable_mosaic.version = 11 : i64} {
  func.func @_gemm_kernel_fullk(%arg0: i32, %arg1: memref<8x200xbf16, #tpu.memory_space<vmem>>, %arg2: memref<200x8xbf16, #tpu.memory_space<vmem>>, %arg3: memref<1x8xf32, #tpu.memory_space<vmem>>, %arg4: memref<8x8xbf16, #tpu.memory_space<vmem>>) attributes {dimension_semantics = [#tpu.dimension_semantics<parallel>], iteration_bounds = array<i64: 1>, scalar_prefetch = 0 : i64, scratch_operands = 0 : i64, tpu.core_type = #tpu.core_type<tc>, window_params = [{transform_indices = @transform_0, window_bounds = array<i64: 8, 200>}, {pipeline_mode = #tpu.pipeline_mode<synchronous>, transform_indices = @transform_1, window_bounds = array<i64: 200, 8>}, {pipeline_mode = #tpu.pipeline_mode<synchronous>, transform_indices = @transform_2, window_bounds = array<i64: 1, 8>}, {transform_indices = @transform_3, window_bounds = array<i64: 8, 8>}]} {
    %c0 = arith.constant 0 : index
    %c0_0 = arith.constant 0 : index
    %0 = vector.load %arg1[%c0, %c0_0] : memref<8x200xbf16, #tpu.memory_space<vmem>>, vector<8x200xbf16>
    %c0_1 = arith.constant 0 : index
    %c0_2 = arith.constant 0 : index
    %1 = vector.load %arg2[%c0_1, %c0_2] : memref<200x8xbf16, #tpu.memory_space<vmem>>, vector<200x8xbf16>
    %cst = arith.constant dense<0.000000e+00> : vector<8x8xf32>
    %2 = tpu.matmul %0, %1, %cst {dimension_numbers = #tpu.dot_dimension_numbers<[1], [0], [0], [1], [0, 0, 1, 1], [], []>} : vector<8x200xbf16>, vector<200x8xbf16>, vector<8x8xf32> -> vector<8x8xf32>
    %c0_3 = arith.constant 0 : index
    %c0_4 = arith.constant 0 : index
    %3 = vector.load %arg3[%c0_3, %c0_4] : memref<1x8xf32, #tpu.memory_space<vmem>>, vector<1x8xf32>
    %4 = vector.broadcast %3 : vector<1x8xf32> to vector<8x8xf32>
    %5 = arith.addf %2, %4 : vector<8x8xf32>
    %cst_5 = arith.constant 0.000000e+00 : f32
    %6 = vector.broadcast %cst_5 : f32 to vector<8x8xf32>
    %7 = arith.maximumf %5, %6 : vector<8x8xf32>
    %8 = arith.truncf %7 : vector<8x8xf32> to vector<8x8xbf16>
    %c0_6 = arith.constant 0 : index
    %c0_7 = arith.constant 0 : index
    %9 = vector.load %arg4[%c0_6, %c0_7] : memref<8x8xbf16, #tpu.memory_space<vmem>>, vector<8x8xbf16>
    tpu.vector_store %arg4[%c0_6, %c0_7], %8 {strides = array<i32>} : memref<8x8xbf16, #tpu.memory_space<vmem>>, vector<8x8xbf16>,
    return
  }
  func.func @transform_0(%arg0: i32) -> (i32, i32) {
    %c0_i32 = arith.constant 0 : i32
    %c0_i32_0 = arith.constant 0 : i32
    return %arg0, %c0_i32 : i32, i32
  }
  func.func @transform_1(%arg0: i32) -> (i32, i32) {
    %c0_i32 = arith.constant 0 : i32
    %c0_i32_0 = arith.constant 0 : i32
    %c0_i32_1 = arith.constant 0 : i32
    return %c0_i32, %c0_i32_0 : i32, i32
  }
  func.func @transform_2(%arg0: i32) -> (i32, i32) {
    %c0_i32 = arith.constant 0 : i32
    %c0_i32_0 = arith.constant 0 : i32
    %c0_i32_1 = arith.constant 0 : i32
    return %c0_i32, %c0_i32_0 : i32, i32
  }
  func.func @transform_3(%arg0: i32) -> (i32, i32) {
    %c0_i32 = arith.constant 0 : i32
    %c0_i32_0 = arith.constant 0 : i32
    return %arg0, %c0_i32 : i32, i32
  }
}

module attributes {stable_mosaic.version = 11 : i64} {
  func.func @_gemm_kernel_fullk(%arg0: i32, %arg1: memref<2x200xbf16, #tpu.memory_space<vmem>>, %arg2: memref<200x8xbf16, #tpu.memory_space<vmem>>, %arg3: memref<1x8xf32, #tpu.memory_space<vmem>>, %arg4: memref<2x8xf32, #tpu.memory_space<vmem>>) attributes {dimension_semantics = [#tpu.dimension_semantics<parallel>], iteration_bounds = array<i64: 1>, scalar_prefetch = 0 : i64, scratch_operands = 0 : i64, tpu.core_type = #tpu.core_type<tc>, window_params = [{transform_indices = @transform_0, window_bounds = array<i64: 2, 200>}, {pipeline_mode = #tpu.pipeline_mode<synchronous>, transform_indices = @transform_1, window_bounds = array<i64: 200, 8>}, {pipeline_mode = #tpu.pipeline_mode<synchronous>, transform_indices = @transform_2, window_bounds = array<i64: 1, 8>}, {transform_indices = @transform_3, window_bounds = array<i64: 2, 8>}]} {
    %c0 = arith.constant 0 : index
    %c0_0 = arith.constant 0 : index
    %0 = vector.load %arg1[%c0, %c0_0] : memref<2x200xbf16, #tpu.memory_space<vmem>>, vector<2x200xbf16>
    %c0_1 = arith.constant 0 : index
    %c0_2 = arith.constant 0 : index
    %1 = vector.load %arg2[%c0_1, %c0_2] : memref<200x8xbf16, #tpu.memory_space<vmem>>, vector<200x8xbf16>
    %cst = arith.constant dense<0.000000e+00> : vector<2x8xf32>
    %2 = tpu.matmul %0, %1, %cst {dimension_numbers = #tpu.dot_dimension_numbers<[1], [0], [0], [1], [0, 0, 1, 1], [], []>} : vector<2x200xbf16>, vector<200x8xbf16>, vector<2x8xf32> -> vector<2x8xf32>
    %c0_3 = arith.constant 0 : index
    %c0_4 = arith.constant 0 : index
    %3 = vector.load %arg3[%c0_3, %c0_4] : memref<1x8xf32, #tpu.memory_space<vmem>>, vector<1x8xf32>
    %4 = vector.broadcast %3 : vector<1x8xf32> to vector<2x8xf32>
    %5 = arith.addf %2, %4 : vector<2x8xf32>
    %c0_5 = arith.constant 0 : index
    %c0_6 = arith.constant 0 : index
    %6 = vector.load %arg4[%c0_5, %c0_6] : memref<2x8xf32, #tpu.memory_space<vmem>>, vector<2x8xf32>
    tpu.vector_store %arg4[%c0_5, %c0_6], %5 {strides = array<i32>} : memref<2x8xf32, #tpu.memory_space<vmem>>, vector<2x8xf32>,
    return
  }
  func.func @transform_0(%arg0: i32) -> (i32, i32) {
    %c0_i32 = arith.constant 0 : i32
    %c0_i32_0 = arith.constant 0 : i32
    return %arg0, %c0_i32 : i32, i32
  }
  func.func @transform_1(%arg0: i32) -> (i32, i32) {
    %c0_i32 = arith.constant 0 : i32
    %c0_i32_0 = arith.constant 0 : i32
    %c0_i32_1 = arith.constant 0 : i32
    return %c0_i32, %c0_i32_0 : i32, i32
  }
  func.func @transform_2(%arg0: i32) -> (i32, i32) {
    %c0_i32 = arith.constant 0 : i32
    %c0_i32_0 = arith.constant 0 : i32
    %c0_i32_1 = arith.constant 0 : i32
    return %c0_i32, %c0_i32_0 : i32, i32
  }
  func.func @transform_3(%arg0: i32) -> (i32, i32) {
    %c0_i32 = arith.constant 0 : i32
    %c0_i32_0 = arith.constant 0 : i32
    return %arg0, %c0_i32 : i32, i32
  }
}

module attributes {stable_mosaic.version = 11 : i64} {
  func.func @_gemm_kernel_fullk(%arg0: i32, %arg1: memref<2x72xbf16, #tpu.memory_space<vmem>>, %arg2: memref<72x32xbf16, #tpu.memory_space<vmem>>, %arg3: memref<1x32xf32, #tpu.memory_space<vmem>>, %arg4: memref<2x32xbf16, #tpu.memory_space<vmem>>) attributes {dimension_semantics = [#tpu.dimension_semantics<parallel>], iteration_bounds = array<i64: 1>, scalar_prefetch = 0 : i64, scratch_operands = 0 : i64, tpu.core_type = #tpu.core_type<tc>, window_params = [{transform_indices = @transform_0, window_bounds = array<i64: 2, 72>}, {pipeline_mode = #tpu.pipeline_mode<synchronous>, transform_indices = @transform_1, window_bounds = array<i64: 72, 32>}, {pipeline_mode = #tpu.pipeline_mode<synchronous>, transform_indices = @transform_2, window_bounds = array<i64: 1, 32>}, {transform_indices = @transform_3, window_bounds = array<i64: 2, 32>}]} {
    %c0 = arith.constant 0 : index
    %c0_0 = arith.constant 0 : index
    %0 = vector.load %arg1[%c0, %c0_0] : memref<2x72xbf16, #tpu.memory_space<vmem>>, vector<2x72xbf16>
    %c0_1 = arith.constant 0 : index
    %c0_2 = arith.constant 0 : index
    %1 = vector.load %arg2[%c0_1, %c0_2] : memref<72x32xbf16, #tpu.memory_space<vmem>>, vector<72x32xbf16>
    %cst = arith.constant dense<0.000000e+00> : vector<2x32xf32>
    %2 = tpu.matmul %0, %1, %cst {dimension_numbers = #tpu.dot_dimension_numbers<[1], [0], [0], [1], [0, 0, 1, 1], [], []>} : vector<2x72xbf16>, vector<72x32xbf16>, vector<2x32xf32> -> vector<2x32xf32>
    %c0_3 = arith.constant 0 : index
    %c0_4 = arith.constant 0 : index
    %3 = vector.load %arg3[%c0_3, %c0_4] : memref<1x32xf32, #tpu.memory_space<vmem>>, vector<1x32xf32>
    %4 = vector.broadcast %3 : vector<1x32xf32> to vector<2x32xf32>
    %5 = arith.addf %2, %4 : vector<2x32xf32>
    %cst_5 = arith.constant 0.000000e+00 : f32
    %6 = vector.broadcast %cst_5 : f32 to vector<2x32xf32>
    %7 = arith.maximumf %5, %6 : vector<2x32xf32>
    %8 = arith.truncf %7 : vector<2x32xf32> to vector<2x32xbf16>
    %c0_6 = arith.constant 0 : index
    %c0_7 = arith.constant 0 : index
    %9 = vector.load %arg4[%c0_6, %c0_7] : memref<2x32xbf16, #tpu.memory_space<vmem>>, vector<2x32xbf16>
    tpu.vector_store %arg4[%c0_6, %c0_7], %8 {strides = array<i32>} : memref<2x32xbf16, #tpu.memory_space<vmem>>, vector<2x32xbf16>,
    return
  }
  func.func @transform_0(%arg0: i32) -> (i32, i32) {
    %c0_i32 = arith.constant 0 : i32
    %c0_i32_0 = arith.constant 0 : i32
    return %arg0, %c0_i32 : i32, i32
  }
  func.func @transform_1(%arg0: i32) -> (i32, i32) {
    %c0_i32 = arith.constant 0 : i32
    %c0_i32_0 = arith.constant 0 : i32
    %c0_i32_1 = arith.constant 0 : i32
    return %c0_i32, %c0_i32_0 : i32, i32
  }
  func.func @transform_2(%arg0: i32) -> (i32, i32) {
    %c0_i32 = arith.constant 0 : i32
    %c0_i32_0 = arith.constant 0 : i32
    %c0_i32_1 = arith.constant 0 : i32
    return %c0_i32, %c0_i32_0 : i32, i32
  }
  func.func @transform_3(%arg0: i32) -> (i32, i32) {
    %c0_i32 = arith.constant 0 : i32
    %c0_i32_0 = arith.constant 0 : i32
    return %arg0, %c0_i32 : i32, i32
  }
}

module attributes {stable_mosaic.version = 11 : i64} {
  func.func @_gemm_kernel_fullk(%arg0: i32, %arg1: memref<8x72xbf16, #tpu.memory_space<vmem>>, %arg2: memref<72x32xbf16, #tpu.memory_space<vmem>>, %arg3: memref<1x32xf32, #tpu.memory_space<vmem>>, %arg4: memref<8x32xbf16, #tpu.memory_space<vmem>>) attributes {dimension_semantics = [#tpu.dimension_semantics<parallel>], iteration_bounds = array<i64: 1>, scalar_prefetch = 0 : i64, scratch_operands = 0 : i64, tpu.core_type = #tpu.core_type<tc>, window_params = [{transform_indices = @transform_0, window_bounds = array<i64: 8, 72>}, {pipeline_mode = #tpu.pipeline_mode<synchronous>, transform_indices = @transform_1, window_bounds = array<i64: 72, 32>}, {pipeline_mode = #tpu.pipeline_mode<synchronous>, transform_indices = @transform_2, window_bounds = array<i64: 1, 32>}, {transform_indices = @transform_3, window_bounds = array<i64: 8, 32>}]} {
    %c0 = arith.constant 0 : index
    %c0_0 = arith.constant 0 : index
    %0 = vector.load %arg1[%c0, %c0_0] : memref<8x72xbf16, #tpu.memory_space<vmem>>, vector<8x72xbf16>
    %c0_1 = arith.constant 0 : index
    %c0_2 = arith.constant 0 : index
    %1 = vector.load %arg2[%c0_1, %c0_2] : memref<72x32xbf16, #tpu.memory_space<vmem>>, vector<72x32xbf16>
    %cst = arith.constant dense<0.000000e+00> : vector<8x32xf32>
    %2 = tpu.matmul %0, %1, %cst {dimension_numbers = #tpu.dot_dimension_numbers<[1], [0], [0], [1], [0, 0, 1, 1], [], []>} : vector<8x72xbf16>, vector<72x32xbf16>, vector<8x32xf32> -> vector<8x32xf32>
    %c0_3 = arith.constant 0 : index
    %c0_4 = arith.constant 0 : index
    %3 = vector.load %arg3[%c0_3, %c0_4] : memref<1x32xf32, #tpu.memory_space<vmem>>, vector<1x32xf32>
    %4 = vector.broadcast %3 : vector<1x32xf32> to vector<8x32xf32>
    %5 = arith.addf %2, %4 : vector<8x32xf32>
    %cst_5 = arith.constant 0.000000e+00 : f32
    %6 = vector.broadcast %cst_5 : f32 to vector<8x32xf32>
    %7 = arith.maximumf %5, %6 : vector<8x32xf32>
    %8 = arith.truncf %7 : vector<8x32xf32> to vector<8x32xbf16>
    %c0_6 = arith.constant 0 : index
    %c0_7 = arith.constant 0 : index
    %9 = vector.load %arg4[%c0_6, %c0_7] : memref<8x32xbf16, #tpu.memory_space<vmem>>, vector<8x32xbf16>
    tpu.vector_store %arg4[%c0_6, %c0_7], %8 {strides = array<i32>} : memref<8x32xbf16, #tpu.memory_space<vmem>>, vector<8x32xbf16>,
    return
  }
  func.func @transform_0(%arg0: i32) -> (i32, i32) {
    %c0_i32 = arith.constant 0 : i32
    %c0_i32_0 = arith.constant 0 : i32
    return %arg0, %c0_i32 : i32, i32
  }
  func.func @transform_1(%arg0: i32) -> (i32, i32) {
    %c0_i32 = arith.constant 0 : i32
    %c0_i32_0 = arith.constant 0 : i32
    %c0_i32_1 = arith.constant 0 : i32
    return %c0_i32, %c0_i32_0 : i32, i32
  }
  func.func @transform_2(%arg0: i32) -> (i32, i32) {
    %c0_i32 = arith.constant 0 : i32
    %c0_i32_0 = arith.constant 0 : i32
    %c0_i32_1 = arith.constant 0 : i32
    return %c0_i32, %c0_i32_0 : i32, i32
  }
  func.func @transform_3(%arg0: i32) -> (i32, i32) {
    %c0_i32 = arith.constant 0 : i32
    %c0_i32_0 = arith.constant 0 : i32
    return %arg0, %c0_i32 : i32, i32
  }
}

module attributes {stable_mosaic.version = 11 : i64} {
  func.func @_gemm_kernel_fullk(%arg0: i32, %arg1: memref<16x144xbf16, #tpu.memory_space<vmem>>, %arg2: memref<144x16xbf16, #tpu.memory_space<vmem>>, %arg3: memref<1x16xf32, #tpu.memory_space<vmem>>, %arg4: memref<16x16xbf16, #tpu.memory_space<vmem>>) attributes {dimension_semantics = [#tpu.dimension_semantics<parallel>], iteration_bounds = array<i64: 2>, scalar_prefetch = 0 : i64, scratch_operands = 0 : i64, tpu.core_type = #tpu.core_type<tc>, window_params = [{transform_indices = @transform_0, window_bounds = array<i64: 16, 144>}, {pipeline_mode = #tpu.pipeline_mode<synchronous>, transform_indices = @transform_1, window_bounds = array<i64: 144, 16>}, {pipeline_mode = #tpu.pipeline_mode<synchronous>, transform_indices = @transform_2, window_bounds = array<i64: 1, 16>}, {transform_indices = @transform_3, window_bounds = array<i64: 16, 16>}]} {
    %c0 = arith.constant 0 : index
    %c0_0 = arith.constant 0 : index
    %0 = vector.load %arg1[%c0, %c0_0] : memref<16x144xbf16, #tpu.memory_space<vmem>>, vector<16x144xbf16>
    %c0_1 = arith.constant 0 : index
    %c0_2 = arith.constant 0 : index
    %1 = vector.load %arg2[%c0_1, %c0_2] : memref<144x16xbf16, #tpu.memory_space<vmem>>, vector<144x16xbf16>
    %cst = arith.constant dense<0.000000e+00> : vector<16x16xf32>
    %2 = tpu.matmul %0, %1, %cst {dimension_numbers = #tpu.dot_dimension_numbers<[1], [0], [0], [1], [0, 0, 1, 1], [], []>} : vector<16x144xbf16>, vector<144x16xbf16>, vector<16x16xf32> -> vector<16x16xf32>
    %c0_3 = arith.constant 0 : index
    %c0_4 = arith.constant 0 : index
    %3 = vector.load %arg3[%c0_3, %c0_4] : memref<1x16xf32, #tpu.memory_space<vmem>>, vector<1x16xf32>
    %4 = vector.broadcast %3 : vector<1x16xf32> to vector<16x16xf32>
    %5 = arith.addf %2, %4 : vector<16x16xf32>
    %cst_5 = arith.constant 0.000000e+00 : f32
    %6 = vector.broadcast %cst_5 : f32 to vector<16x16xf32>
    %7 = arith.cmpf oge, %5, %6 : vector<16x16xf32>
    %cst_6 = arith.constant 0.00999999977 : f32
    %8 = vector.broadcast %cst_6 : f32 to vector<16x16xf32>
    %9 = arith.mulf %8, %5 : vector<16x16xf32>
    %10 = arith.select %7, %5, %9 : vector<16x16xi1>, vector<16x16xf32>
    %11 = arith.truncf %10 : vector<16x16xf32> to vector<16x16xbf16>
    %c0_7 = arith.constant 0 : index
    %c0_8 = arith.constant 0 : index
    %12 = vector.load %arg4[%c0_7, %c0_8] : memref<16x16xbf16, #tpu.memory_space<vmem>>, vector<16x16xbf16>
    tpu.vector_store %arg4[%c0_7, %c0_8], %11 {strides = array<i32>} : memref<16x16xbf16, #tpu.memory_space<vmem>>, vector<16x16xbf16>,
    return
  }
  func.func @transform_0(%arg0: i32) -> (i32, i32) {
    %c0_i32 = arith.constant 0 : i32
    %c0_i32_0 = arith.constant 0 : i32
    return %arg0, %c0_i32 : i32, i32
  }
  func.func @transform_1(%arg0: i32) -> (i32, i32) {
    %c0_i32 = arith.constant 0 : i32
    %c0_i32_0 = arith.constant 0 : i32
    %c0_i32_1 = arith.constant 0 : i32
    return %c0_i32, %c0_i32_0 : i32, i32
  }
  func.func @transform_2(%arg0: i32) -> (i32, i32) {
    %c0_i32 = arith.constant 0 : i32
    %c0_i32_0 = arith.constant 0 : i32
    %c0_i32_1 = arith.constant 0 : i32
    return %c0_i32, %c0_i32_0 : i32, i32
  }
  func.func @transform_3(%arg0: i32) -> (i32, i32) {
    %c0_i32 = arith.constant 0 : i32
    %c0_i32_0 = arith.constant 0 : i32
    return %arg0, %c0_i32 : i32, i32
  }
}

module attributes {stable_mosaic.version = 11 : i64} {
  func.func @_gemm_kernel_fullk(%arg0: i32, %arg1: memref<16x72xbf16, #tpu.memory_space<vmem>>, %arg2: memref<72x16xbf16, #tpu.memory_space<vmem>>, %arg3: memref<1x16xf32, #tpu.memory_space<vmem>>, %arg4: memref<16x16xbf16, #tpu.memory_space<vmem>>) attributes {dimension_semantics = [#tpu.dimension_semantics<parallel>], iteration_bounds = array<i64: 2>, scalar_prefetch = 0 : i64, scratch_operands = 0 : i64, tpu.core_type = #tpu.core_type<tc>, window_params = [{transform_indices = @transform_0, window_bounds = array<i64: 16, 72>}, {pipeline_mode = #tpu.pipeline_mode<synchronous>, transform_indices = @transform_1, window_bounds = array<i64: 72, 16>}, {pipeline_mode = #tpu.pipeline_mode<synchronous>, transform_indices = @transform_2, window_bounds = array<i64: 1, 16>}, {transform_indices = @transform_3, window_bounds = array<i64: 16, 16>}]} {
    %c0 = arith.constant 0 : index
    %c0_0 = arith.constant 0 : index
    %0 = vector.load %arg1[%c0, %c0_0] : memref<16x72xbf16, #tpu.memory_space<vmem>>, vector<16x72xbf16>
    %c0_1 = arith.constant 0 : index
    %c0_2 = arith.constant 0 : index
    %1 = vector.load %arg2[%c0_1, %c0_2] : memref<72x16xbf16, #tpu.memory_space<vmem>>, vector<72x16xbf16>
    %cst = arith.constant dense<0.000000e+00> : vector<16x16xf32>
    %2 = tpu.matmul %0, %1, %cst {dimension_numbers = #tpu.dot_dimension_numbers<[1], [0], [0], [1], [0, 0, 1, 1], [], []>} : vector<16x72xbf16>, vector<72x16xbf16>, vector<16x16xf32> -> vector<16x16xf32>
    %c0_3 = arith.constant 0 : index
    %c0_4 = arith.constant 0 : index
    %3 = vector.load %arg3[%c0_3, %c0_4] : memref<1x16xf32, #tpu.memory_space<vmem>>, vector<1x16xf32>
    %4 = vector.broadcast %3 : vector<1x16xf32> to vector<16x16xf32>
    %5 = arith.addf %2, %4 : vector<16x16xf32>
    %6 = arith.truncf %5 : vector<16x16xf32> to vector<16x16xbf16>
    %c0_5 = arith.constant 0 : index
    %c0_6 = arith.constant 0 : index
    %7 = vector.load %arg4[%c0_5, %c0_6] : memref<16x16xbf16, #tpu.memory_space<vmem>>, vector<16x16xbf16>
    tpu.vector_store %arg4[%c0_5, %c0_6], %6 {strides = array<i32>} : memref<16x16xbf16, #tpu.memory_space<vmem>>, vector<16x16xbf16>,
    return
  }
  func.func @transform_0(%arg0: i32) -> (i32, i32) {
    %c0_i32 = arith.constant 0 : i32
    %c0_i32_0 = arith.constant 0 : i32
    return %arg0, %c0_i32 : i32, i32
  }
  func.func @transform_1(%arg0: i32) -> (i32, i32) {
    %c0_i32 = arith.constant 0 : i32
    %c0_i32_0 = arith.constant 0 : i32
    %c0_i32_1 = arith.constant 0 : i32
    return %c0_i32, %c0_i32_0 : i32, i32
  }
  func.func @transform_2(%arg0: i32) -> (i32, i32) {
    %c0_i32 = arith.constant 0 : i32
    %c0_i32_0 = arith.constant 0 : i32
    %c0_i32_1 = arith.constant 0 : i32
    return %c0_i32, %c0_i32_0 : i32, i32
  }
  func.func @transform_3(%arg0: i32) -> (i32, i32) {
    %c0_i32 = arith.constant 0 : i32
    %c0_i32_0 = arith.constant 0 : i32
    return %arg0, %c0_i32 : i32, i32
  }
}

module attributes {stable_mosaic.version = 11 : i64} {
  func.func @_gemm_kernel_fullk(%arg0: i32, %arg1: memref<16x144xbf16, #tpu.memory_space<vmem>>, %arg2: memref<144x32xbf16, #tpu.memory_space<vmem>>, %arg3: memref<1x32xf32, #tpu.memory_space<vmem>>, %arg4: memref<16x32xf32, #tpu.memory_space<vmem>>) attributes {dimension_semantics = [#tpu.dimension_semantics<parallel>], iteration_bounds = array<i64: 2>, scalar_prefetch = 0 : i64, scratch_operands = 0 : i64, tpu.core_type = #tpu.core_type<tc>, window_params = [{transform_indices = @transform_0, window_bounds = array<i64: 16, 144>}, {pipeline_mode = #tpu.pipeline_mode<synchronous>, transform_indices = @transform_1, window_bounds = array<i64: 144, 32>}, {pipeline_mode = #tpu.pipeline_mode<synchronous>, transform_indices = @transform_2, window_bounds = array<i64: 1, 32>}, {transform_indices = @transform_3, window_bounds = array<i64: 16, 32>}]} {
    %c0 = arith.constant 0 : index
    %c0_0 = arith.constant 0 : index
    %0 = vector.load %arg1[%c0, %c0_0] : memref<16x144xbf16, #tpu.memory_space<vmem>>, vector<16x144xbf16>
    %c0_1 = arith.constant 0 : index
    %c0_2 = arith.constant 0 : index
    %1 = vector.load %arg2[%c0_1, %c0_2] : memref<144x32xbf16, #tpu.memory_space<vmem>>, vector<144x32xbf16>
    %cst = arith.constant dense<0.000000e+00> : vector<16x32xf32>
    %2 = tpu.matmul %0, %1, %cst {dimension_numbers = #tpu.dot_dimension_numbers<[1], [0], [0], [1], [0, 0, 1, 1], [], []>} : vector<16x144xbf16>, vector<144x32xbf16>, vector<16x32xf32> -> vector<16x32xf32>
    %c0_3 = arith.constant 0 : index
    %c0_4 = arith.constant 0 : index
    %3 = vector.load %arg3[%c0_3, %c0_4] : memref<1x32xf32, #tpu.memory_space<vmem>>, vector<1x32xf32>
    %4 = vector.broadcast %3 : vector<1x32xf32> to vector<16x32xf32>
    %5 = arith.addf %2, %4 : vector<16x32xf32>
    %c0_5 = arith.constant 0 : index
    %c0_6 = arith.constant 0 : index
    %6 = vector.load %arg4[%c0_5, %c0_6] : memref<16x32xf32, #tpu.memory_space<vmem>>, vector<16x32xf32>
    tpu.vector_store %arg4[%c0_5, %c0_6], %5 {strides = array<i32>} : memref<16x32xf32, #tpu.memory_space<vmem>>, vector<16x32xf32>,
    return
  }
  func.func @transform_0(%arg0: i32) -> (i32, i32) {
    %c0_i32 = arith.constant 0 : i32
    %c0_i32_0 = arith.constant 0 : i32
    return %arg0, %c0_i32 : i32, i32
  }
  func.func @transform_1(%arg0: i32) -> (i32, i32) {
    %c0_i32 = arith.constant 0 : i32
    %c0_i32_0 = arith.constant 0 : i32
    %c0_i32_1 = arith.constant 0 : i32
    return %c0_i32, %c0_i32_0 : i32, i32
  }
  func.func @transform_2(%arg0: i32) -> (i32, i32) {
    %c0_i32 = arith.constant 0 : i32
    %c0_i32_0 = arith.constant 0 : i32
    %c0_i32_1 = arith.constant 0 : i32
    return %c0_i32, %c0_i32_0 : i32, i32
  }
  func.func @transform_3(%arg0: i32) -> (i32, i32) {
    %c0_i32 = arith.constant 0 : i32
    %c0_i32_0 = arith.constant 0 : i32
    return %arg0, %c0_i32 : i32, i32
  }
}

module attributes {stable_mosaic.version = 11 : i64} {
  func.func @_gemm_kernel_fullk(%arg0: i32, %arg1: memref<64x72xbf16, #tpu.memory_space<vmem>>, %arg2: memref<72x32xbf16, #tpu.memory_space<vmem>>, %arg3: memref<1x32xf32, #tpu.memory_space<vmem>>, %arg4: memref<32x32xbf16, #tpu.memory_space<vmem>>, %arg5: memref<1x32xf32, #tpu.memory_space<vmem>>, %arg6: memref<64x32xbf16, #tpu.memory_space<vmem>>) attributes {dimension_semantics = [#tpu.dimension_semantics<parallel>], iteration_bounds = array<i64: 2>, scalar_prefetch = 0 : i64, scratch_operands = 0 : i64, tpu.core_type = #tpu.core_type<tc>, window_params = [{transform_indices = @transform_0, window_bounds = array<i64: 64, 72>}, {pipeline_mode = #tpu.pipeline_mode<synchronous>, transform_indices = @transform_1, window_bounds = array<i64: 72, 32>}, {pipeline_mode = #tpu.pipeline_mode<synchronous>, transform_indices = @transform_2, window_bounds = array<i64: 1, 32>}, {pipeline_mode = #tpu.pipeline_mode<synchronous>, transform_indices = @transform_3, window_bounds = array<i64: 32, 32>}, {pipeline_mode = #tpu.pipeline_mode<synchronous>, transform_indices = @transform_4, window_bounds = array<i64: 1, 32>}, {transform_indices = @transform_5, window_bounds = array<i64: 64, 32>}]} {
    %c0 = arith.constant 0 : index
    %c0_0 = arith.constant 0 : index
    %0 = vector.load %arg4[%c0, %c0_0] : memref<32x32xbf16, #tpu.memory_space<vmem>>, vector<32x32xbf16>
    %c0_1 = arith.constant 0 : index
    %c0_2 = arith.constant 0 : index
    %1 = vector.load %arg5[%c0_1, %c0_2] : memref<1x32xf32, #tpu.memory_space<vmem>>, vector<1x32xf32>
    %c0_3 = arith.constant 0 : index
    %c0_4 = arith.constant 0 : index
    %2 = vector.load %arg1[%c0_3, %c0_4] : memref<64x72xbf16, #tpu.memory_space<vmem>>, vector<64x72xbf16>
    %c0_5 = arith.constant 0 : index
    %c0_6 = arith.constant 0 : index
    %3 = vector.load %arg2[%c0_5, %c0_6] : memref<72x32xbf16, #tpu.memory_space<vmem>>, vector<72x32xbf16>
    %cst = arith.constant dense<0.000000e+00> : vector<64x32xf32>
    %4 = tpu.matmul %2, %3, %cst {dimension_numbers = #tpu.dot_dimension_numbers<[1], [0], [0], [1], [0, 0, 1, 1], [], []>} : vector<64x72xbf16>, vector<72x32xbf16>, vector<64x32xf32> -> vector<64x32xf32>
    %c0_7 = arith.constant 0 : index
    %c0_8 = arith.constant 0 : index
    %5 = vector.load %arg3[%c0_7, %c0_8] : memref<1x32xf32, #tpu.memory_space<vmem>>, vector<1x32xf32>
    %6 = vector.broadcast %5 : vector<1x32xf32> to vector<64x32xf32>
    %7 = arith.addf %4, %6 : vector<64x32xf32>
    %8 = arith.mulf %7, %7 : vector<64x32xf32>
    %9 = arith.truncf %8 : vector<64x32xf32> to vector<64x32xbf16>
    %cst_9 = arith.constant dense<0.000000e+00> : vector<64x32xf32>
    %10 = tpu.matmul %9, %0, %cst_9 {dimension_numbers = #tpu.dot_dimension_numbers<[1], [0], [0], [1], [0, 0, 1, 1], [], []>} : vector<64x32xbf16>, vector<32x32xbf16>, vector<64x32xf32> -> vector<64x32xf32>
    %11 = vector.broadcast %1 : vector<1x32xf32> to vector<64x32xf32>
    %12 = arith.addf %10, %11 : vector<64x32xf32>
    %13 = math.sqrt %12 : vector<64x32xf32>
    %14 = arith.mulf %7, %13 : vector<64x32xf32>
    %15 = arith.truncf %14 : vector<64x32xf32> to vector<64x32xbf16>
    %c0_10 = arith.constant 0 : index
    %c0_11 = arith.constant 0 : index
    %16 = vector.load %arg6[%c0_10, %c0_11] : memref<64x32xbf16, #tpu.memory_space<vmem>>, vector<64x32xbf16>
    tpu.vector_store %arg6[%c0_10, %c0_11], %15 {strides = array<i32>} : memref<64x32xbf16, #tpu.memory_space<vmem>>, vector<64x32xbf16>,
    return
  }
  func.func @transform_0(%arg0: i32) -> (i32, i32) {
    %c0_i32 = arith.constant 0 : i32
    %c0_i32_0 = arith.constant 0 : i32
    return %arg0, %c0_i32 : i32, i32
  }
  func.func @transform_1(%arg0: i32) -> (i32, i32) {
    %c0_i32 = arith.constant 0 : i32
    %c0_i32_0 = arith.constant 0 : i32
    %c0_i32_1 = arith.constant 0 : i32
    return %c0_i32, %c0_i32_0 : i32, i32
  }
  func.func @transform_2(%arg0: i32) -> (i32, i32) {
    %c0_i32 = arith.constant 0 : i32
    %c0_i32_0 = arith.constant 0 : i32
    %c0_i32_1 = arith.constant 0 : i32
    return %c0_i32, %c0_i32_0 : i32, i32
  }
  func.func @transform_3(%arg0: i32) -> (i32, i32) {
    %c0_i32 = arith.constant 0 : i32
    %c0_i32_0 = arith.constant 0 : i32
    %c0_i32_1 = arith.constant 0 : i32
    return %c0_i32, %c0_i32_0 : i32, i32
  }
  func.func @transform_4(%arg0: i32) -> (i32, i32) {
    %c0_i32 = arith.constant 0 : i32
    %c0_i32_0 = arith.constant 0 : i32
    %c0_i32_1 = arith.constant 0 : i32
    return %c0_i32, %c0_i32_0 : i32, i32
  }
  func.func @transform_5(%arg0: i32) -> (i32, i32) {
    %c0_i32 = arith.constant 0 : i32
    %c0_i32_0 = arith.constant 0 : i32
    return %arg0, %c0_i32 : i32, i32
  }
}

module attributes {stable_mosaic.version = 11 : i64} {
  func.func @_gemm_kernel_fullk(%arg0: i32, %arg1: memref<256x72xbf16, #tpu.memory_space<vmem>>, %arg2: memref<72x32xbf16, #tpu.memory_space<vmem>>, %arg3: memref<1x32xf32, #tpu.memory_space<vmem>>, %arg4: memref<32x32xbf16, #tpu.memory_space<vmem>>, %arg5: memref<1x32xf32, #tpu.memory_space<vmem>>, %arg6: memref<256x32xbf16, #tpu.memory_space<vmem>>) attributes {dimension_semantics = [#tpu.dimension_semantics<parallel>], iteration_bounds = array<i64: 2>, scalar_prefetch = 0 : i64, scratch_operands = 0 : i64, tpu.core_type = #tpu.core_type<tc>, window_params = [{transform_indices = @transform_0, window_bounds = array<i64: 256, 72>}, {pipeline_mode = #tpu.pipeline_mode<synchronous>, transform_indices = @transform_1, window_bounds = array<i64: 72, 32>}, {pipeline_mode = #tpu.pipeline_mode<synchronous>, transform_indices = @transform_2, window_bounds = array<i64: 1, 32>}, {pipeline_mode = #tpu.pipeline_mode<synchronous>, transform_indices = @transform_3, window_bounds = array<i64: 32, 32>}, {pipeline_mode = #tpu.pipeline_mode<synchronous>, transform_indices = @transform_4, window_bounds = array<i64: 1, 32>}, {transform_indices = @transform_5, window_bounds = array<i64: 256, 32>}]} {
    %c0 = arith.constant 0 : index
    %c0_0 = arith.constant 0 : index
    %0 = vector.load %arg4[%c0, %c0_0] : memref<32x32xbf16, #tpu.memory_space<vmem>>, vector<32x32xbf16>
    %c0_1 = arith.constant 0 : index
    %c0_2 = arith.constant 0 : index
    %1 = vector.load %arg5[%c0_1, %c0_2] : memref<1x32xf32, #tpu.memory_space<vmem>>, vector<1x32xf32>
    %c0_3 = arith.constant 0 : index
    %c0_4 = arith.constant 0 : index
    %2 = vector.load %arg1[%c0_3, %c0_4] : memref<256x72xbf16, #tpu.memory_space<vmem>>, vector<256x72xbf16>
    %c0_5 = arith.constant 0 : index
    %c0_6 = arith.constant 0 : index
    %3 = vector.load %arg2[%c0_5, %c0_6] : memref<72x32xbf16, #tpu.memory_space<vmem>>, vector<72x32xbf16>
    %cst = arith.constant dense<0.000000e+00> : vector<256x32xf32>
    %4 = tpu.matmul %2, %3, %cst {dimension_numbers = #tpu.dot_dimension_numbers<[1], [0], [0], [1], [0, 0, 1, 1], [], []>} : vector<256x72xbf16>, vector<72x32xbf16>, vector<256x32xf32> -> vector<256x32xf32>
    %c0_7 = arith.constant 0 : index
    %c0_8 = arith.constant 0 : index
    %5 = vector.load %arg3[%c0_7, %c0_8] : memref<1x32xf32, #tpu.memory_space<vmem>>, vector<1x32xf32>
    %6 = vector.broadcast %5 : vector<1x32xf32> to vector<256x32xf32>
    %7 = arith.addf %4, %6 : vector<256x32xf32>
    %8 = arith.mulf %7, %7 : vector<256x32xf32>
    %9 = arith.truncf %8 : vector<256x32xf32> to vector<256x32xbf16>
    %cst_9 = arith.constant dense<0.000000e+00> : vector<256x32xf32>
    %10 = tpu.matmul %9, %0, %cst_9 {dimension_numbers = #tpu.dot_dimension_numbers<[1], [0], [0], [1], [0, 0, 1, 1], [], []>} : vector<256x32xbf16>, vector<32x32xbf16>, vector<256x32xf32> -> vector<256x32xf32>
    %11 = vector.broadcast %1 : vector<1x32xf32> to vector<256x32xf32>
    %12 = arith.addf %10, %11 : vector<256x32xf32>
    %13 = math.sqrt %12 : vector<256x32xf32>
    %14 = arith.mulf %7, %13 : vector<256x32xf32>
    %15 = arith.truncf %14 : vector<256x32xf32> to vector<256x32xbf16>
    %c0_10 = arith.constant 0 : index
    %c0_11 = arith.constant 0 : index
    %16 = vector.load %arg6[%c0_10, %c0_11] : memref<256x32xbf16, #tpu.memory_space<vmem>>, vector<256x32xbf16>
    tpu.vector_store %arg6[%c0_10, %c0_11], %15 {strides = array<i32>} : memref<256x32xbf16, #tpu.memory_space<vmem>>, vector<256x32xbf16>,
    return
  }
  func.func @transform_0(%arg0: i32) -> (i32, i32) {
    %c0_i32 = arith.constant 0 : i32
    %c0_i32_0 = arith.constant 0 : i32
    return %arg0, %c0_i32 : i32, i32
  }
  func.func @transform_1(%arg0: i32) -> (i32, i32) {
    %c0_i32 = arith.constant 0 : i32
    %c0_i32_0 = arith.constant 0 : i32
    %c0_i32_1 = arith.constant 0 : i32
    return %c0_i32, %c0_i32_0 : i32, i32
  }
  func.func @transform_2(%arg0: i32) -> (i32, i32) {
    %c0_i32 = arith.constant 0 : i32
    %c0_i32_0 = arith.constant 0 : i32
    %c0_i32_1 = arith.constant 0 : i32
    return %c0_i32, %c0_i32_0 : i32, i32
  }
  func.func @transform_3(%arg0: i32) -> (i32, i32) {
    %c0_i32 = arith.constant 0 : i32
    %c0_i32_0 = arith.constant 0 : i32
    %c0_i32_1 = arith.constant 0 : i32
    return %c0_i32, %c0_i32_0 : i32, i32
  }
  func.func @transform_4(%arg0: i32) -> (i32, i32) {
    %c0_i32 = arith.constant 0 : i32
    %c0_i32_0 = arith.constant 0 : i32
    %c0_i32_1 = arith.constant 0 : i32
    return %c0_i32, %c0_i32_0 : i32, i32
  }
  func.func @transform_5(%arg0: i32) -> (i32, i32) {
    %c0_i32 = arith.constant 0 : i32
    %c0_i32_0 = arith.constant 0 : i32
    return %arg0, %c0_i32 : i32, i32
  }
}

module attributes {stable_mosaic.version = 11 : i64} {
  func.func @_gemm_kernel_fullk(%arg0: i32, %arg1: memref<512x72xbf16, #tpu.memory_space<vmem>>, %arg2: memref<72x12xbf16, #tpu.memory_space<vmem>>, %arg3: memref<1x12xf32, #tpu.memory_space<vmem>>, %arg4: memref<512x12xf32, #tpu.memory_space<vmem>>) attributes {dimension_semantics = [#tpu.dimension_semantics<parallel>], iteration_bounds = array<i64: 4>, scalar_prefetch = 0 : i64, scratch_operands = 0 : i64, tpu.core_type = #tpu.core_type<tc>, window_params = [{transform_indices = @transform_0, window_bounds = array<i64: 512, 72>}, {pipeline_mode = #tpu.pipeline_mode<synchronous>, transform_indices = @transform_1, window_bounds = array<i64: 72, 12>}, {pipeline_mode = #tpu.pipeline_mode<synchronous>, transform_indices = @transform_2, window_bounds = array<i64: 1, 12>}, {transform_indices = @transform_3, window_bounds = array<i64: 512, 12>}]} {
    %c0 = arith.constant 0 : index
    %c0_0 = arith.constant 0 : index
    %0 = vector.load %arg1[%c0, %c0_0] : memref<512x72xbf16, #tpu.memory_space<vmem>>, vector<512x72xbf16>
    %c0_1 = arith.constant 0 : index
    %c0_2 = arith.constant 0 : index
    %1 = vector.load %arg2[%c0_1, %c0_2] : memref<72x12xbf16, #tpu.memory_space<vmem>>, vector<72x12xbf16>
    %cst = arith.constant dense<0.000000e+00> : vector<512x12xf32>
    %2 = tpu.matmul %0, %1, %cst {dimension_numbers = #tpu.dot_dimension_numbers<[1], [0], [0], [1], [0, 0, 1, 1], [], []>} : vector<512x72xbf16>, vector<72x12xbf16>, vector<512x12xf32> -> vector<512x12xf32>
    %c0_3 = arith.constant 0 : index
    %c0_4 = arith.constant 0 : index
    %3 = vector.load %arg3[%c0_3, %c0_4] : memref<1x12xf32, #tpu.memory_space<vmem>>, vector<1x12xf32>
    %4 = vector.broadcast %3 : vector<1x12xf32> to vector<512x12xf32>
    %5 = arith.addf %2, %4 : vector<512x12xf32>
    %c0_5 = arith.constant 0 : index
    %c0_6 = arith.constant 0 : index
    %6 = vector.load %arg4[%c0_5, %c0_6] : memref<512x12xf32, #tpu.memory_space<vmem>>, vector<512x12xf32>
    tpu.vector_store %arg4[%c0_5, %c0_6], %5 {strides = array<i32>} : memref<512x12xf32, #tpu.memory_space<vmem>>, vector<512x12xf32>,
    return
  }
  func.func @transform_0(%arg0: i32) -> (i32, i32) {
    %c0_i32 = arith.constant 0 : i32
    %c0_i32_0 = arith.constant 0 : i32
    return %arg0, %c0_i32 : i32, i32
  }
  func.func @transform_1(%arg0: i32) -> (i32, i32) {
    %c0_i32 = arith.constant 0 : i32
    %c0_i32_0 = arith.constant 0 : i32
    %c0_i32_1 = arith.constant 0 : i32
    return %c0_i32, %c0_i32_0 : i32, i32
  }
  func.func @transform_2(%arg0: i32) -> (i32, i32) {
    %c0_i32 = arith.constant 0 : i32
    %c0_i32_0 = arith.constant 0 : i32
    %c0_i32_1 = arith.constant 0 : i32
    return %c0_i32, %c0_i32_0 : i32, i32
  }
  func.func @transform_3(%arg0: i32) -> (i32, i32) {
    %c0_i32 = arith.constant 0 : i32
    %c0_i32_0 = arith.constant 0 : i32
    return %arg0, %c0_i32 : i32, i32
  }
}

module attributes {stable_mosaic.version = 11 : i64} {
  func.func @_recon_kernel(%arg0: i32, %arg1: memref<96x128xf32, #tpu.memory_space<vmem>>, %arg2: memref<96x128xf32, #tpu.memory_space<vmem>>, %arg3: memref<96x128xf32, #tpu.memory_space<vmem>>, %arg4: memref<1x1xf32, #tpu.memory_space<vmem>>) attributes {dimension_semantics = [#tpu.dimension_semantics<arbitrary>], iteration_bounds = array<i64: 2>, scalar_prefetch = 0 : i64, scratch_operands = 0 : i64, tpu.core_type = #tpu.core_type<tc>, window_params = [{transform_indices = @transform_0, window_bounds = array<i64: 96, 128>}, {transform_indices = @transform_1, window_bounds = array<i64: 96, 128>}, {transform_indices = @transform_2, window_bounds = array<i64: 96, 128>}, {pipeline_mode = #tpu.pipeline_mode<synchronous>, transform_indices = @transform_3, window_bounds = array<i64: 1, 1>}]} {
    %c0_i32 = arith.constant 0 : i32
    %0 = arith.cmpi eq, %arg0, %c0_i32 : i32
    %1 = arith.extui %0 : i1 to i32
    %c0_i32_0 = arith.constant 0 : i32
    %2 = arith.cmpi ne, %1, %c0_i32_0 : i32
    scf.if %2 {
      %cst_13 = arith.constant 0.000000e+00 : f32
      %28 = vector.broadcast %cst_13 : f32 to vector<1x1xf32>
      %c0_14 = arith.constant 0 : index
      %c0_15 = arith.constant 0 : index
      %29 = vector.load %arg4[%c0_14, %c0_15] : memref<1x1xf32, #tpu.memory_space<vmem>>, vector<1x1xf32>
      tpu.vector_store %arg4[%c0_14, %c0_15], %28 {strides = array<i32>} : memref<1x1xf32, #tpu.memory_space<vmem>>, vector<1x1xf32>,
    } else {
    }
    %c0 = arith.constant 0 : index
    %c0_1 = arith.constant 0 : index
    %3 = vector.load %arg1[%c0, %c0_1] : memref<96x128xf32, #tpu.memory_space<vmem>>, vector<96x128xf32>
    %c0_2 = arith.constant 0 : index
    %c0_3 = arith.constant 0 : index
    %4 = vector.load %arg2[%c0_2, %c0_3] : memref<96x128xf32, #tpu.memory_space<vmem>>, vector<96x128xf32>
    %cst = arith.constant 0.000000e+00 : f32
    %cst_4 = arith.constant 1.000000e+00 : f32
    %5 = vector.broadcast %cst : f32 to vector<96x128xf32>
    %6 = arith.maximumf %5, %3 : vector<96x128xf32>
    %7 = vector.broadcast %cst_4 : f32 to vector<96x128xf32>
    %8 = arith.minimumf %7, %6 : vector<96x128xf32>
    %c0_5 = arith.constant 0 : index
    %c0_6 = arith.constant 0 : index
    %9 = vector.load %arg3[%c0_5, %c0_6] : memref<96x128xf32, #tpu.memory_space<vmem>>, vector<96x128xf32>
    tpu.vector_store %arg3[%c0_5, %c0_6], %8 {strides = array<i32>} : memref<96x128xf32, #tpu.memory_space<vmem>>, vector<96x128xf32>,
    %10 = arith.subf %3, %4 : vector<96x128xf32>
    %c96_i32 = arith.constant 96 : i32
    %11 = arith.muli %arg0, %c96_i32 : i32
    %12 = tpu.iota {dimensions = array<i32: 0>} : vector<96x128xi32>
    %13 = vector.broadcast %11 : i32 to vector<96x128xi32>
    %14 = arith.addi %13, %12 : vector<96x128xi32>
    %c192_i32 = arith.constant 192 : i32
    %15 = vector.broadcast %c192_i32 : i32 to vector<96x128xi32>
    %16 = arith.cmpi slt, %14, %15 : vector<96x128xi32>
    %cst_7 = arith.constant 0.000000e+00 : f32
    %17 = vector.broadcast %cst_7 : f32 to vector<96x128xf32>
    %18 = arith.select %16, %10, %17 : vector<96x128xi1>, vector<96x128xf32>
    %c0_8 = arith.constant 0 : index
    %c0_9 = arith.constant 0 : index
    %19 = vector.load %arg4[%c0_8, %c0_9] : memref<1x1xf32, #tpu.memory_space<vmem>>, vector<1x1xf32>
    %20 = arith.mulf %18, %18 : vector<96x128xf32>
    %21 = vector.shape_cast %20 : vector<96x128xf32> to vector<1x96x128xf32>
    %cst_10 = arith.constant dense<0.000000e+00> : vector<1xf32>
    %22 = vector.multi_reduction <add>, %21, %cst_10 [1, 2] : vector<1x96x128xf32> to vector<1xf32>
    %23 = vector.shape_cast %22 : vector<1xf32> to vector<1x1x1xf32>
    %24 = vector.extract %23[0, 0, 0] : f32 from vector<1x1x1xf32>
    %25 = vector.broadcast %24 : f32 to vector<1x1xf32>
    %26 = arith.addf %19, %25 : vector<1x1xf32>
    %c0_11 = arith.constant 0 : index
    %c0_12 = arith.constant 0 : index
    %27 = vector.load %arg4[%c0_11, %c0_12] : memref<1x1xf32, #tpu.memory_space<vmem>>, vector<1x1xf32>
    tpu.vector_store %arg4[%c0_11, %c0_12], %26 {strides = array<i32>} : memref<1x1xf32, #tpu.memory_space<vmem>>, vector<1x1xf32>,
    return
  }
  func.func @transform_0(%arg0: i32) -> (i32, i32) {
    %c0_i32 = arith.constant 0 : i32
    %c0_i32_0 = arith.constant 0 : i32
    return %arg0, %c0_i32 : i32, i32
  }
  func.func @transform_1(%arg0: i32) -> (i32, i32) {
    %c0_i32 = arith.constant 0 : i32
    %c0_i32_0 = arith.constant 0 : i32
    return %arg0, %c0_i32 : i32, i32
  }
  func.func @transform_2(%arg0: i32) -> (i32, i32) {
    %c0_i32 = arith.constant 0 : i32
    %c0_i32_0 = arith.constant 0 : i32
    return %arg0, %c0_i32 : i32, i32
  }
  func.func @transform_3(%arg0: i32) -> (i32, i32) {
    %c0_i32 = arith.constant 0 : i32
    %c0_i32_0 = arith.constant 0 : i32
    %c0_i32_1 = arith.constant 0 : i32
    return %c0_i32, %c0_i32_0 : i32, i32
  }
}

</mosaic_0001>

<bundles_post_ra>
// kernel: forward.18
= control target key start
LH: loop header
LB: loop body
LE: loop exit
PB: predicated region body
PF: predicated region fallthrough
CT: control target
= control target key end

     0   :  { %s2557_s18 = smov 0   ;;  %s3285_s0 = inlined_call_operand.vmem [shape: bf16[2048,75], index: 0, kind: input, shape index: {}]   ;;  %s3286_s1 = inlined_call_operand.vmem [shape: bf16[75,8], index: 1, kind: input, shape index: {}]   ;;  %s3287_s2 = inlined_call_operand.vmem [shape: f32[1,8], index: 2, kind: input, shape index: {}]   ;;  %s3288_s3 = inlined_call_operand.vmem [shape: bf16[8,8], index: 3, kind: input, shape index: {}]   ;;  %s3289_s4 = inlined_call_operand.vmem [shape: f32[1,8], index: 4, kind: input, shape index: {}]   ;;  %s3290_s5 = inlined_call_operand.vmem [shape: bf16[2048,8], index: 5, kind: output, shape index: {}]  }
   0x1 LB: > { %s1891_s19 = sadd.s32 4294967295, %s2524_s18   ;;  %p1895_p0 = scmp.ge.s32.totalorder %s2524_s18, 1  ;;  %s2524_s18 = sphi %s2557_s18, %s15_s18  }
   0x2   : > { %p188_p1 = scmp.lt.s32.totalorder %s2524_s18, 5 }
   0x4   : > { %p189_p2 = pnand %p1895_p0, %p188_p1 }
   0x6   : > { %192 = sbr.rel (%p189_p2) target bundleno = 609 (0x261), region = 40 }
   0xd   : > { %v2353_v0 = vld [vmem:[%s3286_s1] sm:$0xff]   ;;  %v2354_v1 = vld [vmem:[%s3286_s1 + $0x8] sm:$0xff]   ;;  %vm598_vm0 = vcmask 1044480   ;;  %v2355_v2 = vld [vmem:[%s3286_s1 + $0x10] sm:$0xff]   ;;  %s1896_s26 = sshll.u32 %s1891_s19, 6  ;;  %vm599_vm1 = vcmask 1045504  }
   0xe   : > { %2203 = vmatprep.subr.bf16.mxu0 %v2353_v0  ;;  %v2526_v3 = vmov 65535   ;;  %p217_p3 = scmp.lt.s32.totalorder %s1896_s26, 255  ;;  %v2356_v5 = vld [vmem:[%s3286_s1 + $0x18] sm:$0xff]   ;;  %v2357_v6 = vld [vmem:[%s3286_s1 + $0x20] sm:$0x3f]   ;;  %vm501_vm2 = vcmask 613376  }
   0xf   : > { %2204 = vmatpush3.bf16.msra.mxu0 %v2353_v0  ;;  %v600_v4 = vsel %vm598_vm0, 4294967295, %v2526_v3  ;;  %v229_v34 = vld [vmem:[%s3288_s3] sm:$0xf]  ;;  %vm1093_vm3 = vcmask 1043456   ;;  %vm996_vm4 = vcmask 64512   ;;  %vm1770_vm5 = vcmask 60416  }
  0x10   : > { %2205 = vmatprep.subr.bf16.mxu0 %v2354_v1  ;;  %s3337_s26 = smov (!%p217_p3, %s1896_s26), 255  ;;  %v601_v7 = vsel %vm599_vm1, %v600_v4, 0  ;;  %2343 = vmatprep.subr.msk.bf16.mxu1 %vm1093_vm3, %v229_v34  ;;  %v1095_v35 = vsel %vm1093_vm3, %v229_v34, 0  ;;  %v2660_v43 = vld [vmem:[%s3287_s2] ss:$0 sm:$0xff] }
  0x11   : > { %s1897_s6 = sshll.u32 %s3337_s26, 2  ;;  %v603_v8 = vand.u32 %v2357_v6, %v601_v7  ;;  %2278 = vmatpush3.bf16.msra.mxu1 %v1095_v35 }
  0x12   : > { %s2588_s9 = scalar_lea.vmem %s3285_s0, %s1897_s6  ;;  %s3033_s19 = scalar_lea.vmem %s3290_s5, %s1897_s6 }
  0x13   : > { %2206 = vmatpush3.bf16.msra.mxu0 %v2354_v1  ;;  %v2358_v9 = vld [vmem:[%s2588_s9] sm:$0xff]   ;;  %v2359_v10 = vld [vmem:[%s2588_s9 + $0x8] sm:$0xff]   ;;  %v2360_v11 = vld [vmem:[%s2588_s9 + $0x10] sm:$0xff]  }
  0x14   : > { %2207 = vmatprep.subr.bf16.mxu0 %v2355_v2  ;;  %2213 = vmatprep.mubr.msk.bf16.mxu0 %vm501_vm2, %v2358_v9  ;;  %v2361_v12 = vld [vmem:[%s2588_s9 + $0x18] sm:$0xff]   ;;  %v2362_v13 = vld [vmem:[%s2588_s9 + $0x20] sm:$0xff]   ;;  %v2363_v14 = vld [vmem:[%s2588_s9 + $0x28] sm:$0xff]  }
  0x15   : > { %v2364_v15 = vld [vmem:[%s2588_s9 + $0x30] sm:$0xff]   ;;  %v2365_v16 = vld [vmem:[%s2588_s9 + $0x38] sm:$0xff]   ;;  %v2366_v17 = vld [vmem:[%s2588_s9 + $0x40] sm:$0xff]  }
  0x16   : > { %v2367_v18 = vld [vmem:[%s2588_s9 + $0x48] sm:$0xff]   ;;  %v2368_v19 = vld [vmem:[%s2588_s9 + $0x50] sm:$0xff]   ;;  %v2369_v20 = vld [vmem:[%s2588_s9 + $0x58] sm:$0xff]  }
  0x17   : > { %2208 = vmatpush3.bf16.msra.mxu0 %v2355_v2  ;;  %v2370_v21 = vld [vmem:[%s2588_s9 + $0x60] sm:$0xff]   ;;  %v2371_v22 = vld [vmem:[%s2588_s9 + $0x68] sm:$0xff]   ;;  %v2372_v23 = vld [vmem:[%s2588_s9 + $0x70] sm:$0xff]  }
  0x18   : > { %2209 = vmatprep.subr.bf16.mxu0 %v2356_v5  ;;  %v2373_v24 = vld [vmem:[%s2588_s9 + $0x78] sm:$0xff]   ;;  %v2374_v25 = vld [vmem:[%s2588_s9 + $0x80] sm:$0xff]   ;;  %v2375_v26 = vld [vmem:[%s2588_s9 + $0x88] sm:$0xff]  }
  0x19   : > { %v2376_v27 = vld [vmem:[%s2588_s9 + $0x90] sm:$0xff]   ;;  %v2377_v28 = vld [vmem:[%s2588_s9 + $0x98] sm:$0xff]   ;;  %v2378_v29 = vld [vmem:[%s2588_s9 + $0xa0] sm:$0xff]  }
  0x1a   : > { %v2379_v30 = vld [vmem:[%s2588_s9 + $0xa8] sm:$0xff]   ;;  %v2380_v31 = vld [vmem:[%s2588_s9 + $0xb0] sm:$0xff]   ;;  %v2381_v32 = vld [vmem:[%s2588_s9 + $0xb8] sm:$0xff]  }
  0x1b   : > { %2210 = vmatpush3.bf16.msra.mxu0 %v2356_v5  ;;  %v2382_v33 = vld [vmem:[%s2588_s9 + $0xc0] sm:$0xff]   ;;  %v2383_v36 = vld [vmem:[%s2588_s9 + $0xc8] sm:$0xff]   ;;  %v2384_v37 = vld [vmem:[%s2588_s9 + $0xd0] sm:$0xff]  }
  0x1c   : > { %2211 = vmatprep.subr.bf16.mxu0 %v603_v8  ;;  %v2385_v38 = vld [vmem:[%s2588_s9 + $0xd8] sm:$0xff]   ;;  %v2386_v39 = vld [vmem:[%s2588_s9 + $0xe0] sm:$0xff]   ;;  %v2387_v40 = vld [vmem:[%s2588_s9 + $0xe8] sm:$0xff]  }
  0x1d   : > { %v2388_v41 = vld [vmem:[%s2588_s9 + $0xf0] sm:$0xff]   ;;  %v2389_v42 = vld [vmem:[%s2588_s9 + $0xf8] sm:$0xff]  }
  0x1f   : > { %2212 = vmatpush3.bf16.msra.mxu0 %v603_v8 }
  0x22   : > { %2214 = vmatmul.mubr.msk.bf16.vlgmr.msra.gmra.mrb[0].mxu0 %vm501_vm2, %v2359_v10 }
  0x23   : > { %2217 = vmatprep.mubr.msk.bf16.mxu0 %vm501_vm2, %v2360_v11 }
  0x2a   : > { %2218 = vmatmul.mubr.msk.bf16.gmra.mrb[4].mxu0 %vm501_vm2, %v2361_v12 }
  0x2b   : > { %2221 = vmatprep.mubr.msk.bf16.mxu0 %vm501_vm2, %v2362_v13 }
  0x32   : > { %2222 = vmatmul.mubr.msk.bf16.gmra.mrb[8].mxu0 %vm501_vm2, %v2363_v14 }
  0x33   : > { %2225 = vmatprep.mubr.msk.bf16.mxu0 %vm501_vm2, %v2364_v15 }
  0x3a   : > { %2226 = vmatmul.mubr.msk.bf16.gmra.mrb[12].mxu0 %vm501_vm2, %v2365_v16 }
  0x3b   : > { %2229 = vmatprep.mubr.msk.bf16.mxu0 %vm501_vm2, %v2366_v17 }
  0x42   : > { %2230 = vmatmul.mubr.msk.bf16.gmra.mrb[16].mxu0 %vm501_vm2, %v2367_v18 }
  0x43   : > { %2233 = vmatprep.mubr.msk.bf16.mxu0 %vm501_vm2, %v2368_v19 }
  0x4a   : > { %2234 = vmatmul.mubr.msk.bf16.gmra.mrb[20].mxu0 %vm501_vm2, %v2369_v20 }
  0x4b   : > { %2237 = vmatprep.mubr.msk.bf16.mxu0 %vm501_vm2, %v2370_v21 }
  0x52   : > { %2238 = vmatmul.mubr.msk.bf16.gmra.mrb[24].mxu0 %vm501_vm2, %v2371_v22 }
  0x53   : > { %2241 = vmatprep.mubr.msk.bf16.mxu0 %vm501_vm2, %v2372_v23 }
  0x5a   : > { %2242 = vmatmul.mubr.msk.bf16.gmra.mrb[28].mxu0 %vm501_vm2, %v2373_v24 }
  0x5b   : > { %2245 = vmatprep.mubr.msk.bf16.mxu0 %vm501_vm2, %v2374_v25 }
  0x62   : > { %2246 = vmatmul.mubr.msk.bf16.gmra.mrb[32].mxu0 %vm501_vm2, %v2375_v26 }
  0x63   : > { %2249 = vmatprep.mubr.msk.bf16.mxu0 %vm501_vm2, %v2376_v27 }
  0x6a   : > { %2250 = vmatmul.mubr.msk.bf16.gmra.mrb[36].mxu0 %vm501_vm2, %v2377_v28 }
  0x6b   : > { %2253 = vmatprep.mubr.msk.bf16.mxu0 %vm501_vm2, %v2378_v29 }
  0x72   : > { %2254 = vmatmul.mubr.msk.bf16.gmra.mrb[40].mxu0 %vm501_vm2, %v2379_v30 }
  0x73   : > { %2257 = vmatprep.mubr.msk.bf16.mxu0 %vm501_vm2, %v2380_v31 }
  0x7a   : > { %2258 = vmatmul.mubr.msk.bf16.gmra.mrb[44].mxu0 %vm501_vm2, %v2381_v32 }
  0x7b   : > { %2261 = vmatprep.mubr.msk.bf16.mxu0 %vm501_vm2, %v2382_v33 }
  0x82   : > { %2262 = vmatmul.mubr.msk.bf16.gmra.mrb[48].mxu0 %vm501_vm2, %v2383_v36 }
  0x83   : > { %2265 = vmatprep.mubr.msk.bf16.mxu0 %vm501_vm2, %v2384_v37 }
  0x8a   : > { %2266 = vmatmul.mubr.msk.bf16.gmra.mrb[52].mxu0 %vm501_vm2, %v2385_v38 }
  0x8b   : > { %2269 = vmatprep.mubr.msk.bf16.mxu0 %vm501_vm2, %v2386_v39 }
  0x92   : > { %2270 = vmatmul.mubr.msk.bf16.gmra.mrb[56].mxu0 %vm501_vm2, %v2387_v40 }
  0x93   : > { %2273 = vmatprep.mubr.msk.bf16.mxu0 %vm501_vm2, %v2388_v41 }
  0x9a   : > { %2274 = vmatmul.mubr.msk.bf16.gmra.mrb[60].mxu0 %vm501_vm2, %v2389_v42 }
  0xf5   : > { %v2215_v44 = vpop.f32.mrb[0].mxu0 }
  0xf6   : > { %v639_v45 = vpop.f32.mrb[1].mxu0  ;;  %v2666_v48 = vadd.f32 %v2215_v44, %v2660_v43 }
  0xf7   : > { %v2663_v46 = vadd.f32 %v2660_v43, %v639_v45  ;;  %v2216_v47 = vpop.f32.mrb[2].mxu0 }
  0xf8   : > { %v2669_v49 = vadd.f32 %v2216_v47, %v2660_v43  ;;  %v642_v50 = vpop.f32.mrb[3].mxu0  ;;  %v896_v55 = vmul.f32 %v2666_v48, %v2666_v48 }
  0xf9   : > { %v2672_v51 = vadd.f32 %v2660_v43, %v642_v50  ;;  %v894_v53 = vmul.f32 %v2663_v46, %v2663_v46 }
  0xfa   : > { %v897_v52 = vmul.f32 %v2669_v49, %v2669_v49 }
  0xfb   : > { %v895_v54 = vmul.f32 %v2672_v51, %v2672_v51 }
  0xfc   : > { %v959_v58 = vpack.c.bf16 %v897_v52, %v896_v55 }
  0xfd   : > { %v2219_v56 = vpop.f32.mrb[4].mxu0  ;;  %v958_v57 = vpack.c.bf16 %v895_v54, %v894_v53 }
  0xfe   : > { %v655_v59 = vpop.f32.mrb[5].mxu0  ;;  %v2687_v62 = vadd.f32 %v2219_v56, %v2660_v43 }
  0xff   : > { %v2683_v60 = vadd.f32 %v2660_v43, %v655_v59  ;;  %v2220_v61 = vpop.f32.mrb[6].mxu0  ;;  %2279 = vmatprep.mubr.msk.bf16.mxu1 %vm996_vm4, %v958_v57 }
 0x100   : > { %v2690_v63 = vadd.f32 %v2220_v61, %v2660_v43  ;;  %v658_v0 = vpop.f32.mrb[7].mxu0  ;;  %2280 = vmatmul.mubr.msk.bf16.vlgmr.msra.gmra.mrb[0].mxu1 %vm996_vm4, %v959_v58  ;;  %v900_v5 = vmul.f32 %v2687_v62, %v2687_v62 }
 0x101   : > { %v2694_v1 = vadd.f32 %v2660_v43, %v658_v0  ;;  %v898_v3 = vmul.f32 %v2683_v60, %v2683_v60 }
 0x102   : > { %v901_v2 = vmul.f32 %v2690_v63, %v2690_v63 }
 0x103   : > { %v899_v4 = vmul.f32 %v2694_v1, %v2694_v1 }
 0x104   : > { %v961_v8 = vpack.c.bf16 %v901_v2, %v900_v5 }
 0x105   : > { %v960_v6 = vpack.c.bf16 %v899_v4, %v898_v3  ;;  %v2223_v7 = vpop.f32.mrb[8].mxu0 }
 0x106   : > { %v671_v9 = vpop.f32.mrb[9].mxu0  ;;  %v2709_v12 = vadd.f32 %v2223_v7, %v2660_v43 }
 0x107   : > { %v2705_v10 = vadd.f32 %v2660_v43, %v671_v9  ;;  %v2224_v11 = vpop.f32.mrb[10].mxu0  ;;  %2283 = vmatprep.mubr.msk.bf16.mxu1 %vm996_vm4, %v960_v6 }
 0x108   : > { %v2712_v13 = vadd.f32 %v2224_v11, %v2660_v43  ;;  %v674_v14 = vpop.f32.mrb[11].mxu0  ;;  %2284 = vmatmul.mubr.msk.bf16.gmra.mrb[4].mxu1 %vm996_vm4, %v961_v8  ;;  %v904_v19 = vmul.f32 %v2709_v12, %v2709_v12 }
 0x109   : > { %v2716_v15 = vadd.f32 %v2660_v43, %v674_v14  ;;  %v902_v17 = vmul.f32 %v2705_v10, %v2705_v10 }
 0x10a   : > { %v905_v16 = vmul.f32 %v2712_v13, %v2712_v13 }
 0x10b   : > { %v903_v18 = vmul.f32 %v2716_v15, %v2716_v15 }
 0x10c   : > { %v963_v22 = vpack.c.bf16 %v905_v16, %v904_v19 }
 0x10d   : > { %v962_v20 = vpack.c.bf16 %v903_v18, %v902_v17  ;;  %v2227_v21 = vpop.f32.mrb[12].mxu0 }
 0x10e   : > { %v687_v23 = vpop.f32.mrb[13].mxu0  ;;  %v2731_v26 = vadd.f32 %v2227_v21, %v2660_v43 }
 0x10f   : > { %v2727_v24 = vadd.f32 %v2660_v43, %v687_v23  ;;  %v2228_v25 = vpop.f32.mrb[14].mxu0  ;;  %2287 = vmatprep.mubr.msk.bf16.mxu1 %vm996_vm4, %v962_v20 }
 0x110   : > { %v2734_v27 = vadd.f32 %v2228_v25, %v2660_v43  ;;  %v690_v28 = vpop.f32.mrb[15].mxu0  ;;  %2288 = vmatmul.mubr.msk.bf16.gmra.mrb[8].mxu1 %vm996_vm4, %v963_v22  ;;  %v908_v33 = vmul.f32 %v2731_v26, %v2731_v26 }
 0x111   : > { %v2738_v29 = vadd.f32 %v2660_v43, %v690_v28  ;;  %v906_v31 = vmul.f32 %v2727_v24, %v2727_v24 }
 0x112   : > { %v909_v30 = vmul.f32 %v2734_v27, %v2734_v27 }
 0x113   : > { %v907_v32 = vmul.f32 %v2738_v29, %v2738_v29 }
 0x114   : > { %v965_v36 = vpack.c.bf16 %v909_v30, %v908_v33 }
 0x115   : > { %v964_v34 = vpack.c.bf16 %v907_v32, %v906_v31  ;;  %v2231_v35 = vpop.f32.mrb[16].mxu0 }
 0x116   : > { %v703_v37 = vpop.f32.mrb[17].mxu0  ;;  %v2753_v40 = vadd.f32 %v2231_v35, %v2660_v43 }
 0x117   : > { %v2749_v38 = vadd.f32 %v2660_v43, %v703_v37  ;;  %v2232_v39 = vpop.f32.mrb[18].mxu0  ;;  %2291 = vmatprep.mubr.msk.bf16.mxu1 %vm996_vm4, %v964_v34 }
 0x118   : > { %v2756_v41 = vadd.f32 %v2232_v39, %v2660_v43  ;;  %v706_v42 = vpop.f32.mrb[19].mxu0  ;;  %2292 = vmatmul.mubr.msk.bf16.gmra.mrb[12].mxu1 %vm996_vm4, %v965_v36  ;;  %v912_v52 = vmul.f32 %v2753_v40, %v2753_v40 }
 0x119   : > { %v2760_v44 = vadd.f32 %v2660_v43, %v706_v42  ;;  %v910_v47 = vmul.f32 %v2749_v38, %v2749_v38 }
 0x11a   : > { %v913_v45 = vmul.f32 %v2756_v41, %v2756_v41 }
 0x11b   : > { %v911_v50 = vmul.f32 %v2760_v44, %v2760_v44 }
 0x11c   : > { %v967_v55 = vpack.c.bf16 %v913_v45, %v912_v52 }
 0x11d   : > { %v966_v53 = vpack.c.bf16 %v911_v50, %v910_v47  ;;  %v2235_v54 = vpop.f32.mrb[20].mxu0 }
 0x11e   : > { %v719_v56 = vpop.f32.mrb[21].mxu0  ;;  %v2775_v59 = vadd.f32 %v2235_v54, %v2660_v43 }
 0x11f   : > { %v2771_v57 = vadd.f32 %v2660_v43, %v719_v56  ;;  %v2236_v58 = vpop.f32.mrb[22].mxu0  ;;  %2295 = vmatprep.mubr.msk.bf16.mxu1 %vm996_vm4, %v966_v53 }
 0x120   : > { %v2778_v61 = vadd.f32 %v2236_v58, %v2660_v43  ;;  %v722_v0 = vpop.f32.mrb[23].mxu0  ;;  %2296 = vmatmul.mubr.msk.bf16.gmra.mrb[16].mxu1 %vm996_vm4, %v967_v55  ;;  %v916_v6 = vmul.f32 %v2775_v59, %v2775_v59 }
 0x121   : > { %v2782_v2 = vadd.f32 %v2660_v43, %v722_v0  ;;  %v914_v4 = vmul.f32 %v2771_v57, %v2771_v57 }
 0x122   : > { %v917_v3 = vmul.f32 %v2778_v61, %v2778_v61 }
 0x123   : > { %v915_v5 = vmul.f32 %v2782_v2, %v2782_v2 }
 0x124   : > { %v969_v9 = vpack.c.bf16 %v917_v3, %v916_v6 }
 0x125   : > { %v968_v7 = vpack.c.bf16 %v915_v5, %v914_v4  ;;  %v2239_v8 = vpop.f32.mrb[24].mxu0 }
 0x126   : > { %v735_v11 = vpop.f32.mrb[25].mxu0  ;;  %v2797_v17 = vadd.f32 %v2239_v8, %v2660_v43 }
 0x127   : > { %v2793_v14 = vadd.f32 %v2660_v43, %v735_v11  ;;  %v2240_v16 = vpop.f32.mrb[26].mxu0  ;;  %2299 = vmatprep.mubr.msk.bf16.mxu1 %vm996_vm4, %v968_v7 }
 0x128   : > { %v2800_v18 = vadd.f32 %v2240_v16, %v2660_v43  ;;  %v738_v19 = vpop.f32.mrb[27].mxu0  ;;  %2300 = vmatmul.mubr.msk.bf16.gmra.mrb[20].mxu1 %vm996_vm4, %v969_v9  ;;  %v920_v25 = vmul.f32 %v2797_v17, %v2797_v17 }
 0x129   : > { %v2804_v20 = vadd.f32 %v2660_v43, %v738_v19  ;;  %v918_v22 = vmul.f32 %v2793_v14, %v2793_v14 }
 0x12a   : > { %v921_v21 = vmul.f32 %v2800_v18, %v2800_v18 }
 0x12b   : > { %v919_v23 = vmul.f32 %v2804_v20, %v2804_v20 }
 0x12c   : > { %v971_v31 = vpack.c.bf16 %v921_v21, %v920_v25 }
 0x12d   : > { %v970_v28 = vpack.c.bf16 %v919_v23, %v918_v22  ;;  %v2243_v30 = vpop.f32.mrb[28].mxu0 }
 0x12e   : > { %v751_v32 = vpop.f32.mrb[29].mxu0  ;;  %v2819_v35 = vadd.f32 %v2243_v30, %v2660_v43 }
 0x12f   : > { %v2815_v33 = vadd.f32 %v2660_v43, %v751_v32  ;;  %v2244_v34 = vpop.f32.mrb[30].mxu0  ;;  %2303 = vmatprep.mubr.msk.bf16.mxu1 %vm996_vm4, %v970_v28 }
 0x130   : > { %v2822_v36 = vadd.f32 %v2244_v34, %v2660_v43  ;;  %v754_v37 = vpop.f32.mrb[31].mxu0  ;;  %2304 = vmatmul.mubr.msk.bf16.gmra.mrb[24].mxu1 %vm996_vm4, %v971_v31  ;;  %v924_v50 = vmul.f32 %v2819_v35, %v2819_v35 }
 0x131   : > { %v2826_v39 = vadd.f32 %v2660_v43, %v754_v37  ;;  %v922_v45 = vmul.f32 %v2815_v33, %v2815_v33 }
 0x132   : > { %v925_v42 = vmul.f32 %v2822_v36, %v2822_v36 }
 0x133   : > { %v923_v47 = vmul.f32 %v2826_v39, %v2826_v39 }
 0x134   : > { %v973_v54 = vpack.c.bf16 %v925_v42, %v924_v50 }
 0x135   : > { %v972_v52 = vpack.c.bf16 %v923_v47, %v922_v45  ;;  %v2247_v53 = vpop.f32.mrb[32].mxu0 }
 0x136   : > { %v767_v55 = vpop.f32.mrb[33].mxu0  ;;  %v2841_v0 = vadd.f32 %v2247_v53, %v2660_v43 }
 0x137   : > { %v2837_v56 = vadd.f32 %v2660_v43, %v767_v55  ;;  %v2248_v58 = vpop.f32.mrb[34].mxu0  ;;  %2307 = vmatprep.mubr.msk.bf16.mxu1 %vm996_vm4, %v972_v52 }
 0x138   : > { %v2844_v3 = vadd.f32 %v2248_v58, %v2660_v43  ;;  %v770_v4 = vpop.f32.mrb[35].mxu0  ;;  %2308 = vmatmul.mubr.msk.bf16.gmra.mrb[28].mxu1 %vm996_vm4, %v973_v54  ;;  %v928_v9 = vmul.f32 %v2841_v0, %v2841_v0 }
 0x139   : > { %v2848_v5 = vadd.f32 %v2660_v43, %v770_v4  ;;  %v926_v7 = vmul.f32 %v2837_v56, %v2837_v56 }
 0x13a   : > { %v929_v6 = vmul.f32 %v2844_v3, %v2844_v3 }
 0x13b   : > { %v927_v8 = vmul.f32 %v2848_v5, %v2848_v5 }
 0x13c   : > { %v975_v19 = vpack.c.bf16 %v929_v6, %v928_v9 }
 0x13d   : > { %v974_v11 = vpack.c.bf16 %v927_v8, %v926_v7  ;;  %v2251_v16 = vpop.f32.mrb[36].mxu0 }
 0x13e   : > { %v783_v21 = vpop.f32.mrb[37].mxu0  ;;  %v2863_v25 = vadd.f32 %v2251_v16, %v2660_v43 }
 0x13f   : > { %v2859_v22 = vadd.f32 %v2660_v43, %v783_v21  ;;  %v2252_v23 = vpop.f32.mrb[38].mxu0  ;;  %2311 = vmatprep.mubr.msk.bf16.mxu1 %vm996_vm4, %v974_v11 }
 0x140   : > { %v2866_v28 = vadd.f32 %v2252_v23, %v2660_v43  ;;  %v786_v30 = vpop.f32.mrb[39].mxu0  ;;  %2312 = vmatmul.mubr.msk.bf16.gmra.mrb[32].mxu1 %vm996_vm4, %v975_v19  ;;  %v932_v42 = vmul.f32 %v2863_v25, %v2863_v25 }
 0x141   : > { %v2870_v31 = vadd.f32 %v2660_v43, %v786_v30  ;;  %v930_v34 = vmul.f32 %v2859_v22, %v2859_v22 }
 0x142   : > { %v933_v32 = vmul.f32 %v2866_v28, %v2866_v28 }
 0x143   : > { %v931_v37 = vmul.f32 %v2870_v31, %v2870_v31 }
 0x144   : > { %v977_v50 = vpack.c.bf16 %v933_v32, %v932_v42 }
 0x145   : > { %v976_v45 = vpack.c.bf16 %v931_v37, %v930_v34  ;;  %v2255_v47 = vpop.f32.mrb[40].mxu0 }
 0x146   : > { %v799_v52 = vpop.f32.mrb[41].mxu0  ;;  %v2885_v55 = vadd.f32 %v2255_v47, %v2660_v43 }
 0x147   : > { %v2881_v53 = vadd.f32 %v2660_v43, %v799_v52  ;;  %v2256_v54 = vpop.f32.mrb[42].mxu0  ;;  %2315 = vmatprep.mubr.msk.bf16.mxu1 %vm996_vm4, %v976_v45 }
 0x148   : > { %v2888_v58 = vadd.f32 %v2256_v54, %v2660_v43  ;;  %v802_v4 = vpop.f32.mrb[43].mxu0  ;;  %2316 = vmatmul.mubr.msk.bf16.gmra.mrb[36].mxu1 %vm996_vm4, %v977_v50  ;;  %v936_v11 = vmul.f32 %v2885_v55, %v2885_v55 }
 0x149   : > { %v2892_v6 = vadd.f32 %v2660_v43, %v802_v4  ;;  %v934_v8 = vmul.f32 %v2881_v53, %v2881_v53 }
 0x14a   : > { %v937_v7 = vmul.f32 %v2888_v58, %v2888_v58 }
 0x14b   : > { %v935_v9 = vmul.f32 %v2892_v6, %v2892_v6 }
 0x14c   : > { %v979_v21 = vpack.c.bf16 %v937_v7, %v936_v11 }
 0x14d   : > { %v978_v16 = vpack.c.bf16 %v935_v9, %v934_v8  ;;  %v2259_v19 = vpop.f32.mrb[44].mxu0 }
 0x14e   : > { %v815_v23 = vpop.f32.mrb[45].mxu0  ;;  %v2907_v34 = vadd.f32 %v2259_v19, %v2660_v43 }
 0x14f   : > { %v2903_v30 = vadd.f32 %v2660_v43, %v815_v23  ;;  %v2260_v32 = vpop.f32.mrb[46].mxu0  ;;  %2319 = vmatprep.mubr.msk.bf16.mxu1 %vm996_vm4, %v978_v16 }
 0x150   : > { %v2910_v37 = vadd.f32 %v2260_v32, %v2660_v43  ;;  %v818_v42 = vpop.f32.mrb[47].mxu0  ;;  %2320 = vmatmul.mubr.msk.bf16.gmra.mrb[40].mxu1 %vm996_vm4, %v979_v21  ;;  %v940_v54 = vmul.f32 %v2907_v34, %v2907_v34 }
 0x151   : > { %v2914_v45 = vadd.f32 %v2660_v43, %v818_v42  ;;  %v938_v50 = vmul.f32 %v2903_v30, %v2903_v30 }
 0x152   : > { %v941_v47 = vmul.f32 %v2910_v37, %v2910_v37 }
 0x153   : > { %v939_v52 = vmul.f32 %v2914_v45, %v2914_v45 }
 0x154   : > { %v981_v8 = vpack.c.bf16 %v941_v47, %v940_v54 }
 0x155   : > { %v980_v4 = vpack.c.bf16 %v939_v52, %v938_v50  ;;  %v2263_v7 = vpop.f32.mrb[48].mxu0 }
 0x156   : > { %v831_v9 = vpop.f32.mrb[49].mxu0  ;;  %v2929_v19 = vadd.f32 %v2263_v7, %v2660_v43 }
 0x157   : > { %v2925_v11 = vadd.f32 %v2660_v43, %v831_v9  ;;  %v2264_v16 = vpop.f32.mrb[50].mxu0  ;;  %2323 = vmatprep.mubr.msk.bf16.mxu1 %vm996_vm4, %v980_v4 }
 0x158   : > { %v2932_v21 = vadd.f32 %v2264_v16, %v2660_v43  ;;  %v834_v23 = vpop.f32.mrb[51].mxu0  ;;  %2324 = vmatmul.mubr.msk.bf16.gmra.mrb[44].mxu1 %vm996_vm4, %v981_v8  ;;  %v944_v52 = vmul.f32 %v2929_v19, %v2929_v19 }
 0x159   : > { %3306 = vst [vmem:[#allocation2_spill] sm:$0xff] %v2925_v11  ;;  %v2936_v32 = vadd.f32 %v2660_v43, %v834_v23  ;;  %v942_v47 = vmul.f32 %v2925_v11, %v2925_v11 }
 0x15a   : > { %3307 = vst [vmem:[#allocation3_spill] sm:$0xff] %v2932_v21  ;;  %v945_v42 = vmul.f32 %v2932_v21, %v2932_v21 }
 0x15b   : > { %3308 = vst [vmem:[#allocation4_spill] sm:$0xff] %v2936_v32  ;;  %v943_v50 = vmul.f32 %v2936_v32, %v2936_v32 }
 0x15c   : > { %v983_v7 = vpack.c.bf16 %v945_v42, %v944_v52 }
 0x15d   : > { %v982_v54 = vpack.c.bf16 %v943_v50, %v942_v47  ;;  %v2267_v4 = vpop.f32.mrb[52].mxu0 }
 0x15e   : > { %v847_v9 = vpop.f32.mrb[53].mxu0  ;;  %v2951_v23 = vadd.f32 %v2267_v4, %v2660_v43 }
 0x15f   : > { %v2947_v8 = vadd.f32 %v2660_v43, %v847_v9  ;;  %v2268_v16 = vpop.f32.mrb[54].mxu0  ;;  %2327 = vmatprep.mubr.msk.bf16.mxu1 %vm996_vm4, %v982_v54 }
 0x160   : > { %3310 = vst [vmem:[#allocation6_spill] sm:$0xff] %v2951_v23  ;;  %v2954_v21 = vadd.f32 %v2268_v16, %v2660_v43  ;;  %v850_v32 = vpop.f32.mrb[55].mxu0  ;;  %2328 = vmatmul.mubr.msk.bf16.gmra.mrb[48].mxu1 %vm996_vm4, %v983_v7  ;;  %v948_v54 = vmul.f32 %v2951_v23, %v2951_v23 }
 0x161   : > { %3309 = vst [vmem:[#allocation5_spill] sm:$0xff] %v2947_v8  ;;  %v2958_v47 = vadd.f32 %v2660_v43, %v850_v32  ;;  %v946_v50 = vmul.f32 %v2947_v8, %v2947_v8 }
 0x162   : > { %3311 = vst [vmem:[#allocation7_spill] sm:$0xff] %v2954_v21  ;;  %v949_v42 = vmul.f32 %v2954_v21, %v2954_v21 }
 0x163   : > { %3312 = vst [vmem:[#allocation8_spill] sm:$0xff] %v2958_v47  ;;  %v947_v52 = vmul.f32 %v2958_v47, %v2958_v47 }
 0x164   : > { %v985_v16 = vpack.c.bf16 %v949_v42, %v948_v54 }
 0x165   : > { %v984_v4 = vpack.c.bf16 %v947_v52, %v946_v50  ;;  %v2271_v9 = vpop.f32.mrb[56].mxu0 }
 0x166   : > { %v863_v11 = vpop.f32.mrb[57].mxu0  ;;  %v2973_v21 = vadd.f32 %v2271_v9, %v2660_v43 }
 0x167   : > { %v2969_v7 = vadd.f32 %v2660_v43, %v863_v11  ;;  %v2272_v32 = vpop.f32.mrb[58].mxu0  ;;  %2331 = vmatprep.mubr.msk.bf16.mxu1 %vm996_vm4, %v984_v4 }
 0x168   : > { %3314 = vst [vmem:[#allocation10_spill] sm:$0xff] %v2973_v21  ;;  %v2976_v8 = vadd.f32 %v2272_v32, %v2660_v43  ;;  %v866_v47 = vpop.f32.mrb[59].mxu0  ;;  %2332 = vmatmul.mubr.msk.bf16.gmra.mrb[52].mxu1 %vm996_vm4, %v985_v16  ;;  %v952_v54 = vmul.f32 %v2973_v21, %v2973_v21 }
 0x169   : > { %3313 = vst [vmem:[#allocation9_spill] sm:$0xff] %v2969_v7  ;;  %v2980_v50 = vadd.f32 %v2660_v43, %v866_v47  ;;  %v950_v11 = vmul.f32 %v2969_v7, %v2969_v7 }
 0x16a   : > { %3315 = vst [vmem:[#allocation11_spill] sm:$0xff] %v2976_v8  ;;  %v953_v42 = vmul.f32 %v2976_v8, %v2976_v8 }
 0x16b   : > { %3316 = vst [vmem:[#allocation12_spill] sm:$0xff] %v2980_v50  ;;  %v951_v52 = vmul.f32 %v2980_v50, %v2980_v50 }
 0x16c   : > { %v987_v32 = vpack.c.bf16 %v953_v42, %v952_v54 }
 0x16d   : > { %v986_v4 = vpack.c.bf16 %v951_v52, %v950_v11  ;;  %v2275_v9 = vpop.f32.mrb[60].mxu0 }
 0x16e   : > { %v879_v23 = vpop.f32.mrb[61].mxu0  ;;  %v2995_v8 = vadd.f32 %v2275_v9, %v2660_v43 }
 0x16f   : > { %v2991_v16 = vadd.f32 %v2660_v43, %v879_v23  ;;  %v2276_v47 = vpop.f32.mrb[62].mxu0  ;;  %2335 = vmatprep.mubr.msk.bf16.mxu1 %vm996_vm4, %v986_v4 }
 0x170   : > { %3318 = vst [vmem:[#allocation14_spill] sm:$0xff] %v2995_v8  ;;  %v2998_v7 = vadd.f32 %v2276_v47, %v2660_v43  ;;  %v882_v50 = vpop.f32.mrb[63].mxu0  ;;  %2336 = vmatmul.mubr.msk.bf16.gmra.mrb[56].mxu1 %vm996_vm4, %v987_v32  ;;  %v956_v54 = vmul.f32 %v2995_v8, %v2995_v8 }
 0x171   : > { %3317 = vst [vmem:[#allocation13_spill] sm:$0xff] %v2991_v16  ;;  %v3002_v11 = vadd.f32 %v2660_v43, %v882_v50  ;;  %v954_v23 = vmul.f32 %v2991_v16, %v2991_v16  ;;  %v3017_v43 = vld [vmem:[%s3289_s4] ss:$0 sm:$0xff] }
 0x172   : > { %3319 = vst [vmem:[#allocation15_spill] sm:$0xff] %v2998_v7  ;;  %v957_v42 = vmul.f32 %v2998_v7, %v2998_v7 }
 0x173   : > { %3320 = vst [vmem:[#allocation16_spill] sm:$0xff] %v3002_v11  ;;  %v955_v52 = vmul.f32 %v3002_v11, %v3002_v11 }
 0x174   : > { %v989_v9 = vpack.c.bf16 %v957_v42, %v956_v54 }
 0x175   : > { %v988_v4 = vpack.c.bf16 %v955_v52, %v954_v23 }
 0x177   : > { %2339 = vmatprep.mubr.msk.bf16.mxu1 %vm996_vm4, %v988_v4 }
 0x178   : > { %2340 = vmatmul.mubr.msk.bf16.gmra.mrb[60].mxu1 %vm996_vm4, %v989_v9 }
 0x1d3   : > { %v2281_v50 = vpop.f32.mrb[0].mxu1 }
 0x1d4   : > { %v1140_v32 = vadd.f32 %v2281_v50, %v3017_v43  ;;  %v1131_v47 = vpop.f32.mrb[1].mxu1 }
 0x1d5   : > { %v1132_v11 = vadd.f32 %v3017_v43, %v1131_v47  ;;  %v2282_v7 = vpop.f32.mrb[2].mxu1 }
 0x1d6   : > { %2390 = vrsqrt.f32 %v1140_v32  ;;  %v1143_v23 = vadd.f32 %v2282_v7, %v3017_v43  ;;  %v1134_v42 = vpop.f32.mrb[3].mxu1 }
 0x1d7   : > { %2392 = vrsqrt.f32 %v1132_v11  ;;  %v1135_v52 = vadd.f32 %v3017_v43, %v1134_v42 }
 0x1d8   : > { %2394 = vrsqrt.f32 %v1143_v23 }
 0x1d9   : > { %2396 = vrsqrt.f32 %v1135_v52 }
 0x1db   : > { %v2285_v54 = vpop.f32.mrb[4].mxu1 }
 0x1dc   : > { %v1156_v4 = vadd.f32 %v2285_v54, %v3017_v43  ;;  %v1147_v9 = vpop.f32.mrb[5].mxu1 }
 0x1dd   : > { %v1148_v50 = vadd.f32 %v3017_v43, %v1147_v9  ;;  %v2286_v16 = vpop.f32.mrb[6].mxu1 }
 0x1de   : > { %2398 = vrsqrt.f32 %v1156_v4  ;;  %v1159_v47 = vadd.f32 %v2286_v16, %v3017_v43  ;;  %v1150_v32 = vpop.f32.mrb[7].mxu1 }
 0x1df   : > { %2400 = vrsqrt.f32 %v1148_v50  ;;  %v1151_v7 = vadd.f32 %v3017_v43, %v1150_v32 }
 0x1e0   : > { %v2391_v11 = vpop.eup %2390  ;;  %2402 = vrsqrt.f32 %v1159_v47 }
 0x1e1   : > { %v2393_v42 = vpop.eup %2392  ;;  %v1452_v23 = vmul.f32 %v2391_v11, %v2666_v48  ;;  %2404 = vrsqrt.f32 %v1151_v7 }
 0x1e2   : > { %v2395_v52 = vpop.eup %2394  ;;  %v1450_v16 = vmul.f32 %v2393_v42, %v2663_v46 }
 0x1e3   : > { %v2397_v54 = vpop.eup %2396  ;;  %v2071_v4 = vpack.c.bf16 %v1452_v23, %v1452_v23  ;;  %v1453_v9 = vmul.f32 %v2395_v52, %v2669_v49  ;;  %v2289_v50 = vpop.f32.mrb[8].mxu1 }
 0x1e4   : > { %v2069_v48 = vpack.c.bf16 %v1450_v16, %v1450_v16  ;;  %v1451_v47 = vmul.f32 %v2397_v54, %v2672_v51  ;;  %v1172_v32 = vadd.f32 %v2289_v50, %v3017_v43  ;;  %v1163_v7 = vpop.f32.mrb[9].mxu1 }
 0x1e5   : > { %1773 = vst.msk [vmem:[%s3033_s19 + $0x8] sm:$0xf] %vm1770_vm5, %v2071_v4  ;;  %v2072_v11 = vpack.c.bf16 %v1453_v9, %v1453_v9  ;;  %v1164_v8 = vadd.f32 %v3017_v43, %v1163_v7  ;;  %v2290_v21 = vpop.f32.mrb[10].mxu1 }
 0x1e6   : > { %1771 = vst.msk [vmem:[%s3033_s19] sm:$0xf] %vm1770_vm5, %v2069_v48  ;;  %v2070_v46 = vpack.c.bf16 %v1451_v47, %v1451_v47  ;;  %2406 = vrsqrt.f32 %v1172_v32  ;;  %v1175_v49 = vadd.f32 %v2290_v21, %v3017_v43  ;;  %v1166_v42 = vpop.f32.mrb[11].mxu1 }
 0x1e7   : > { %1774 = vst.msk [vmem:[%s3033_s19 + $0xc] sm:$0xf] %vm1770_vm5, %v2072_v11  ;;  %2408 = vrsqrt.f32 %v1164_v8  ;;  %v1167_v51 = vadd.f32 %v3017_v43, %v1166_v42 }
 0x1e8   : > { %v2399_v23 = vpop.eup %2398  ;;  %1772 = vst.msk [vmem:[%s3033_s19 + $0x4] sm:$0xf] %vm1770_vm5, %v2070_v46  ;;  %2410 = vrsqrt.f32 %v1175_v49 }
 0x1e9   : > { %v2401_v52 = vpop.eup %2400  ;;  %v1456_v16 = vmul.f32 %v2399_v23, %v2687_v62  ;;  %2412 = vrsqrt.f32 %v1167_v51 }
 0x1ea   : > { %v2403_v54 = vpop.eup %2402  ;;  %v1454_v4 = vmul.f32 %v2401_v52, %v2683_v60 }
 0x1eb   : > { %v2405_v21 = vpop.eup %2404  ;;  %v2075_v9 = vpack.c.bf16 %v1456_v16, %v1456_v16  ;;  %v1457_v8 = vmul.f32 %v2403_v54, %v2690_v63  ;;  %v2293_v50 = vpop.f32.mrb[12].mxu1 }
 0x1ec   : > { %v2073_v48 = vpack.c.bf16 %v1454_v4, %v1454_v4  ;;  %v1455_v47 = vmul.f32 %v2405_v21, %v2694_v1  ;;  %v1188_v32 = vadd.f32 %v2293_v50, %v3017_v43  ;;  %v1179_v7 = vpop.f32.mrb[13].mxu1 }
 0x1ed   : > { %1777 = vst.msk [vmem:[%s3033_s19 + $0x18] sm:$0xf] %vm1770_vm5, %v2075_v9  ;;  %v2076_v62 = vpack.c.bf16 %v1457_v8, %v1457_v8  ;;  %v1180_v11 = vadd.f32 %v3017_v43, %v1179_v7  ;;  %v2294_v46 = vpop.f32.mrb[14].mxu1 }
 0x1ee   : > { %1775 = vst.msk [vmem:[%s3033_s19 + $0x10] sm:$0xf] %vm1770_vm5, %v2073_v48  ;;  %v2074_v60 = vpack.c.bf16 %v1455_v47, %v1455_v47  ;;  %2414 = vrsqrt.f32 %v1188_v32  ;;  %v1191_v63 = vadd.f32 %v2294_v46, %v3017_v43  ;;  %v1182_v49 = vpop.f32.mrb[15].mxu1 }
 0x1ef   : > { %1778 = vst.msk [vmem:[%s3033_s19 + $0x1c] sm:$0xf] %vm1770_vm5, %v2076_v62  ;;  %2416 = vrsqrt.f32 %v1180_v11  ;;  %v1183_v1 = vadd.f32 %v3017_v43, %v1182_v49 }
 0x1f0   : > { %v2407_v42 = vpop.eup %2406  ;;  %1776 = vst.msk [vmem:[%s3033_s19 + $0x14] sm:$0xf] %vm1770_vm5, %v2074_v60  ;;  %2418 = vrsqrt.f32 %v1191_v63 }
 0x1f1   : > { %v2409_v51 = vpop.eup %2408  ;;  %v1460_v23 = vmul.f32 %v2407_v42, %v2709_v12  ;;  %2420 = vrsqrt.f32 %v1183_v1 }
 0x1f2   : > { %v2411_v52 = vpop.eup %2410  ;;  %v1458_v16 = vmul.f32 %v2409_v51, %v2705_v10 }
 0x1f3   : > { %v2413_v54 = vpop.eup %2412  ;;  %v2079_v4 = vpack.c.bf16 %v1460_v23, %v1460_v23  ;;  %v1461_v21 = vmul.f32 %v2411_v52, %v2712_v13  ;;  %v2297_v9 = vpop.f32.mrb[16].mxu1 }
 0x1f4   : > { %v2077_v8 = vpack.c.bf16 %v1458_v16, %v1458_v16  ;;  %v1459_v50 = vmul.f32 %v2413_v54, %v2716_v15  ;;  %v1204_v48 = vadd.f32 %v2297_v9, %v3017_v43  ;;  %v1195_v47 = vpop.f32.mrb[17].mxu1 }
 0x1f5   : > { %1781 = vst.msk [vmem:[%s3033_s19 + $0x28] sm:$0xf] %vm1770_vm5, %v2079_v4  ;;  %v2080_v12 = vpack.c.bf16 %v1461_v21, %v1461_v21  ;;  %v1196_v32 = vadd.f32 %v3017_v43, %v1195_v47  ;;  %v2298_v7 = vpop.f32.mrb[18].mxu1 }
 0x1f6   : > { %1779 = vst.msk [vmem:[%s3033_s19 + $0x20] sm:$0xf] %vm1770_vm5, %v2077_v8  ;;  %v2078_v10 = vpack.c.bf16 %v1459_v50, %v1459_v50  ;;  %2422 = vrsqrt.f32 %v1204_v48  ;;  %v1207_v13 = vadd.f32 %v2298_v7, %v3017_v43  ;;  %v1198_v62 = vpop.f32.mrb[19].mxu1 }
 0x1f7   : > { %1782 = vst.msk [vmem:[%s3033_s19 + $0x2c] sm:$0xf] %vm1770_vm5, %v2080_v12  ;;  %2424 = vrsqrt.f32 %v1196_v32  ;;  %v1199_v15 = vadd.f32 %v3017_v43, %v1198_v62 }
 0x1f8   : > { %v2415_v11 = vpop.eup %2414  ;;  %1780 = vst.msk [vmem:[%s3033_s19 + $0x24] sm:$0xf] %vm1770_vm5, %v2078_v10  ;;  %2426 = vrsqrt.f32 %v1207_v13 }
 0x1f9   : > { %v2417_v46 = vpop.eup %2416  ;;  %v1464_v60 = vmul.f32 %v2415_v11, %v2731_v26  ;;  %2428 = vrsqrt.f32 %v1199_v15 }
 0x1fa   : > { %v2419_v63 = vpop.eup %2418  ;;  %v1462_v49 = vmul.f32 %v2417_v46, %v2727_v24 }
 0x1fb   : > { %v2421_v1 = vpop.eup %2420  ;;  %v2083_v42 = vpack.c.bf16 %v1464_v60, %v1464_v60  ;;  %v1465_v51 = vmul.f32 %v2419_v63, %v2734_v27  ;;  %v2301_v23 = vpop.f32.mrb[20].mxu1 }
 0x1fc   : > { %v2081_v52 = vpack.c.bf16 %v1462_v49, %v1462_v49  ;;  %v1463_v16 = vmul.f32 %v2421_v1, %v2738_v29  ;;  %v1220_v54 = vadd.f32 %v2301_v23, %v3017_v43  ;;  %v1211_v4 = vpop.f32.mrb[21].mxu1 }
 0x1fd   : > { %1785 = vst.msk [vmem:[%s3033_s19 + $0x38] sm:$0xf] %vm1770_vm5, %v2083_v42  ;;  %v2084_v26 = vpack.c.bf16 %v1465_v51, %v1465_v51  ;;  %v1212_v21 = vadd.f32 %v3017_v43, %v1211_v4  ;;  %v2302_v9 = vpop.f32.mrb[22].mxu1 }
 0x1fe   : > { %1783 = vst.msk [vmem:[%s3033_s19 + $0x30] sm:$0xf] %vm1770_vm5, %v2081_v52  ;;  %v2082_v24 = vpack.c.bf16 %v1463_v16, %v1463_v16  ;;  %2430 = vrsqrt.f32 %v1220_v54  ;;  %v1223_v27 = vadd.f32 %v2302_v9, %v3017_v43  ;;  %v1214_v8 = vpop.f32.mrb[23].mxu1 }
 0x1ff   : > { %1786 = vst.msk [vmem:[%s3033_s19 + $0x3c] sm:$0xf] %vm1770_vm5, %v2084_v26  ;;  %2432 = vrsqrt.f32 %v1212_v21  ;;  %v1215_v29 = vadd.f32 %v3017_v43, %v1214_v8 }
 0x200   : > { %v2423_v50 = vpop.eup %2422  ;;  %1784 = vst.msk [vmem:[%s3033_s19 + $0x34] sm:$0xf] %vm1770_vm5, %v2082_v24  ;;  %2434 = vrsqrt.f32 %v1223_v27 }
 0x201   : > { %v2425_v48 = vpop.eup %2424  ;;  %v1468_v47 = vmul.f32 %v2423_v50, %v2753_v40  ;;  %2436 = vrsqrt.f32 %v1215_v29 }
 0x202   : > { %v2427_v12 = vpop.eup %2426  ;;  %v1466_v32 = vmul.f32 %v2425_v48, %v2749_v38 }
 0x203   : > { %v2429_v7 = vpop.eup %2428  ;;  %v2087_v10 = vpack.c.bf16 %v1468_v47, %v1468_v47  ;;  %v1469_v13 = vmul.f32 %v2427_v12, %v2756_v41  ;;  %v2305_v62 = vpop.f32.mrb[24].mxu1 }
 0x204   : > { %v2085_v15 = vpack.c.bf16 %v1466_v32, %v1466_v32  ;;  %v1467_v11 = vmul.f32 %v2429_v7, %v2760_v44  ;;  %v1236_v46 = vadd.f32 %v2305_v62, %v3017_v43  ;;  %v1227_v60 = vpop.f32.mrb[25].mxu1 }
 0x205   : > { %1789 = vst.msk [vmem:[%s3033_s19 + $0x48] sm:$0xf] %vm1770_vm5, %v2087_v10  ;;  %v2088_v40 = vpack.c.bf16 %v1469_v13, %v1469_v13  ;;  %v1228_v63 = vadd.f32 %v3017_v43, %v1227_v60  ;;  %v2306_v49 = vpop.f32.mrb[26].mxu1 }
 0x206   : > { %1787 = vst.msk [vmem:[%s3033_s19 + $0x40] sm:$0xf] %vm1770_vm5, %v2085_v15  ;;  %v2086_v38 = vpack.c.bf16 %v1467_v11, %v1467_v11  ;;  %2438 = vrsqrt.f32 %v1236_v46  ;;  %v1239_v41 = vadd.f32 %v2306_v49, %v3017_v43  ;;  %v1230_v1 = vpop.f32.mrb[27].mxu1 }
 0x207   : > { %1790 = vst.msk [vmem:[%s3033_s19 + $0x4c] sm:$0xf] %vm1770_vm5, %v2088_v40  ;;  %2440 = vrsqrt.f32 %v1228_v63  ;;  %v1231_v44 = vadd.f32 %v3017_v43, %v1230_v1 }
 0x208   : > { %v2431_v42 = vpop.eup %2430  ;;  %1788 = vst.msk [vmem:[%s3033_s19 + $0x44] sm:$0xf] %vm1770_vm5, %v2086_v38  ;;  %2442 = vrsqrt.f32 %v1239_v41 }
 0x209   : > { %v2433_v51 = vpop.eup %2432  ;;  %v1472_v23 = vmul.f32 %v2431_v42, %v2775_v59  ;;  %2444 = vrsqrt.f32 %v1231_v44 }
 0x20a   : > { %v2435_v52 = vpop.eup %2434  ;;  %v1470_v16 = vmul.f32 %v2433_v51, %v2771_v57 }
 0x20b   : > { %v2437_v54 = vpop.eup %2436  ;;  %v2091_v4 = vpack.c.bf16 %v1472_v23, %v1472_v23  ;;  %v1473_v26 = vmul.f32 %v2435_v52, %v2778_v61  ;;  %v2309_v21 = vpop.f32.mrb[28].mxu1 }
 0x20c   : > { %v2089_v9 = vpack.c.bf16 %v1470_v16, %v1470_v16  ;;  %v1471_v24 = vmul.f32 %v2437_v54, %v2782_v2  ;;  %v1252_v27 = vadd.f32 %v2309_v21, %v3017_v43  ;;  %v1243_v8 = vpop.f32.mrb[29].mxu1 }
 0x20d   : > { %1793 = vst.msk [vmem:[%s3033_s19 + $0x58] sm:$0xf] %vm1770_vm5, %v2091_v4  ;;  %v2092_v59 = vpack.c.bf16 %v1473_v26, %v1473_v26  ;;  %v1244_v29 = vadd.f32 %v3017_v43, %v1243_v8  ;;  %v2310_v50 = vpop.f32.mrb[30].mxu1 }
 0x20e   : > { %1791 = vst.msk [vmem:[%s3033_s19 + $0x50] sm:$0xf] %vm1770_vm5, %v2089_v9  ;;  %v2090_v57 = vpack.c.bf16 %v1471_v24, %v1471_v24  ;;  %2446 = vrsqrt.f32 %v1252_v27  ;;  %v1255_v61 = vadd.f32 %v2310_v50, %v3017_v43  ;;  %v1246_v48 = vpop.f32.mrb[31].mxu1 }
 0x20f   : > { %1794 = vst.msk [vmem:[%s3033_s19 + $0x5c] sm:$0xf] %vm1770_vm5, %v2092_v59  ;;  %2448 = vrsqrt.f32 %v1244_v29  ;;  %v1247_v2 = vadd.f32 %v3017_v43, %v1246_v48 }
 0x210   : > { %v2439_v47 = vpop.eup %2438  ;;  %1792 = vst.msk [vmem:[%s3033_s19 + $0x54] sm:$0xf] %vm1770_vm5, %v2090_v57  ;;  %2450 = vrsqrt.f32 %v1255_v61 }
 0x211   : > { %v2441_v12 = vpop.eup %2440  ;;  %v1476_v32 = vmul.f32 %v2439_v47, %v2797_v17  ;;  %2452 = vrsqrt.f32 %v1247_v2 }
 0x212   : > { %v2443_v7 = vpop.eup %2442  ;;  %v1474_v10 = vmul.f32 %v2441_v12, %v2793_v14 }
 0x213   : > { %v2445_v13 = vpop.eup %2444  ;;  %v2095_v62 = vpack.c.bf16 %v1476_v32, %v1476_v32  ;;  %v1477_v15 = vmul.f32 %v2443_v7, %v2800_v18  ;;  %v2313_v11 = vpop.f32.mrb[32].mxu1 }
 0x214   : > { %v2093_v46 = vpack.c.bf16 %v1474_v10, %v1474_v10  ;;  %v1475_v60 = vmul.f32 %v2445_v13, %v2804_v20  ;;  %v1268_v40 = vadd.f32 %v2313_v11, %v3017_v43  ;;  %v1259_v63 = vpop.f32.mrb[33].mxu1 }
 0x215   : > { %1797 = vst.msk [vmem:[%s3033_s19 + $0x68] sm:$0xf] %vm1770_vm5, %v2095_v62  ;;  %v2096_v17 = vpack.c.bf16 %v1477_v15, %v1477_v15  ;;  %v1260_v49 = vadd.f32 %v3017_v43, %v1259_v63  ;;  %v2314_v38 = vpop.f32.mrb[34].mxu1 }
 0x216   : > { %1795 = vst.msk [vmem:[%s3033_s19 + $0x60] sm:$0xf] %vm1770_vm5, %v2093_v46  ;;  %v2094_v14 = vpack.c.bf16 %v1475_v60, %v1475_v60  ;;  %2454 = vrsqrt.f32 %v1268_v40  ;;  %v1271_v18 = vadd.f32 %v2314_v38, %v3017_v43  ;;  %v1262_v41 = vpop.f32.mrb[35].mxu1 }
 0x217   : > { %1798 = vst.msk [vmem:[%s3033_s19 + $0x6c] sm:$0xf] %vm1770_vm5, %v2096_v17  ;;  %2456 = vrsqrt.f32 %v1260_v49  ;;  %v1263_v20 = vadd.f32 %v3017_v43, %v1262_v41 }
 0x218   : > { %v2447_v1 = vpop.eup %2446  ;;  %1796 = vst.msk [vmem:[%s3033_s19 + $0x64] sm:$0xf] %vm1770_vm5, %v2094_v14  ;;  %2458 = vrsqrt.f32 %v1271_v18 }
 0x219   : > { %v2449_v44 = vpop.eup %2448  ;;  %v1480_v42 = vmul.f32 %v2447_v1, %v2819_v35  ;;  %2460 = vrsqrt.f32 %v1263_v20 }
 0x21a   : > { %v2451_v51 = vpop.eup %2450  ;;  %v1478_v23 = vmul.f32 %v2449_v44, %v2815_v33 }
 0x21b   : > { %v2453_v52 = vpop.eup %2452  ;;  %v2099_v16 = vpack.c.bf16 %v1480_v42, %v1480_v42  ;;  %v1481_v54 = vmul.f32 %v2451_v51, %v2822_v36  ;;  %v2317_v4 = vpop.f32.mrb[36].mxu1 }
 0x21c   : > { %v2097_v26 = vpack.c.bf16 %v1478_v23, %v1478_v23  ;;  %v1479_v21 = vmul.f32 %v2453_v52, %v2826_v39  ;;  %v1284_v9 = vadd.f32 %v2317_v4, %v3017_v43  ;;  %v1275_v24 = vpop.f32.mrb[37].mxu1 }
 0x21d   : > { %1801 = vst.msk [vmem:[%s3033_s19 + $0x78] sm:$0xf] %vm1770_vm5, %v2099_v16  ;;  %v2100_v35 = vpack.c.bf16 %v1481_v54, %v1481_v54  ;;  %v1276_v27 = vadd.f32 %v3017_v43, %v1275_v24  ;;  %v2318_v8 = vpop.f32.mrb[38].mxu1 }
 0x21e   : > { %1799 = vst.msk [vmem:[%s3033_s19 + $0x70] sm:$0xf] %vm1770_vm5, %v2097_v26  ;;  %v2098_v33 = vpack.c.bf16 %v1479_v21, %v1479_v21  ;;  %2462 = vrsqrt.f32 %v1284_v9  ;;  %v1287_v36 = vadd.f32 %v2318_v8, %v3017_v43  ;;  %v1278_v59 = vpop.f32.mrb[39].mxu1 }
 0x21f   : > { %1802 = vst.msk [vmem:[%s3033_s19 + $0x7c] sm:$0xf] %vm1770_vm5, %v2100_v35  ;;  %2464 = vrsqrt.f32 %v1276_v27  ;;  %v1279_v39 = vadd.f32 %v3017_v43, %v1278_v59 }
 0x220   : > { %v2455_v29 = vpop.eup %2454  ;;  %1800 = vst.msk [vmem:[%s3033_s19 + $0x74] sm:$0xf] %vm1770_vm5, %v2098_v33  ;;  %2466 = vrsqrt.f32 %v1287_v36 }
 0x221   : > { %v2457_v50 = vpop.eup %2456  ;;  %v1484_v57 = vmul.f32 %v2455_v29, %v2841_v0  ;;  %2468 = vrsqrt.f32 %v1279_v39 }
 0x222   : > { %v2459_v61 = vpop.eup %2458  ;;  %v1482_v48 = vmul.f32 %v2457_v50, %v2837_v56 }
 0x223   : > { %v2461_v2 = vpop.eup %2460  ;;  %v2103_v47 = vpack.c.bf16 %v1484_v57, %v1484_v57  ;;  %v1485_v12 = vmul.f32 %v2459_v61, %v2844_v3  ;;  %v2321_v32 = vpop.f32.mrb[40].mxu1 }
 0x224   : > { %v2101_v7 = vpack.c.bf16 %v1482_v48, %v1482_v48  ;;  %v1483_v10 = vmul.f32 %v2461_v2, %v2848_v5  ;;  %v1300_v13 = vadd.f32 %v2321_v32, %v3017_v43  ;;  %v1291_v62 = vpop.f32.mrb[41].mxu1 }
 0x225   : > { %1805 = vst.msk [vmem:[%s3033_s19 + $0x88] sm:$0xf] %vm1770_vm5, %v2103_v47  ;;  %v2104_v0 = vpack.c.bf16 %v1485_v12, %v1485_v12  ;;  %v1292_v15 = vadd.f32 %v3017_v43, %v1291_v62  ;;  %v2322_v11 = vpop.f32.mrb[42].mxu1 }
 0x226   : > { %1803 = vst.msk [vmem:[%s3033_s19 + $0x80] sm:$0xf] %vm1770_vm5, %v2101_v7  ;;  %v2102_v56 = vpack.c.bf16 %v1483_v10, %v1483_v10  ;;  %2470 = vrsqrt.f32 %v1300_v13  ;;  %v1303_v3 = vadd.f32 %v2322_v11, %v3017_v43  ;;  %v1294_v46 = vpop.f32.mrb[43].mxu1 }
 0x227   : > { %1806 = vst.msk [vmem:[%s3033_s19 + $0x8c] sm:$0xf] %vm1770_vm5, %v2104_v0  ;;  %2472 = vrsqrt.f32 %v1292_v15  ;;  %v1295_v5 = vadd.f32 %v3017_v43, %v1294_v46 }
 0x228   : > { %v2463_v60 = vpop.eup %2462  ;;  %1804 = vst.msk [vmem:[%s3033_s19 + $0x84] sm:$0xf] %vm1770_vm5, %v2102_v56  ;;  %2474 = vrsqrt.f32 %v1303_v3 }
 0x229   : > { %v2465_v40 = vpop.eup %2464  ;;  %v1488_v63 = vmul.f32 %v2463_v60, %v2863_v25  ;;  %2476 = vrsqrt.f32 %v1295_v5 }
 0x22a   : > { %v2467_v17 = vpop.eup %2466  ;;  %v1486_v49 = vmul.f32 %v2465_v40, %v2859_v22 }
 0x22b   : > { %v2469_v38 = vpop.eup %2468  ;;  %v2107_v14 = vpack.c.bf16 %v1488_v63, %v1488_v63  ;;  %v1489_v18 = vmul.f32 %v2467_v17, %v2866_v28  ;;  %v2325_v41 = vpop.f32.mrb[44].mxu1  ;;  %v3321_v63 = vld [vmem:[#allocation2_spill] sm:$0xff] }
 0x22c   : > { %v2105_v20 = vpack.c.bf16 %v1486_v49, %v1486_v49  ;;  %v1487_v1 = vmul.f32 %v2469_v38, %v2870_v31  ;;  %v1316_v44 = vadd.f32 %v2325_v41, %v3017_v43  ;;  %v1307_v42 = vpop.f32.mrb[45].mxu1 }
 0x22d   : > { %1809 = vst.msk [vmem:[%s3033_s19 + $0x98] sm:$0xf] %vm1770_vm5, %v2107_v14  ;;  %v2108_v25 = vpack.c.bf16 %v1489_v18, %v1489_v18  ;;  %v1308_v51 = vadd.f32 %v3017_v43, %v1307_v42  ;;  %v2326_v23 = vpop.f32.mrb[46].mxu1  ;;  %v3322_v14 = vld [vmem:[#allocation3_spill] sm:$0xff] }
 0x22e   : > { %1807 = vst.msk [vmem:[%s3033_s19 + $0x90] sm:$0xf] %vm1770_vm5, %v2105_v20  ;;  %v2106_v22 = vpack.c.bf16 %v1487_v1, %v1487_v1  ;;  %2478 = vrsqrt.f32 %v1316_v44  ;;  %v1319_v28 = vadd.f32 %v2326_v23, %v3017_v43  ;;  %v1310_v52 = vpop.f32.mrb[47].mxu1  ;;  %v3323_v1 = vld [vmem:[#allocation4_spill] sm:$0xff] }
 0x22f   : > { %1810 = vst.msk [vmem:[%s3033_s19 + $0x9c] sm:$0xf] %vm1770_vm5, %v2108_v25  ;;  %2480 = vrsqrt.f32 %v1308_v51  ;;  %v1311_v31 = vadd.f32 %v3017_v43, %v1310_v52 }
 0x230   : > { %v2471_v16 = vpop.eup %2470  ;;  %1808 = vst.msk [vmem:[%s3033_s19 + $0x94] sm:$0xf] %vm1770_vm5, %v2106_v22  ;;  %2482 = vrsqrt.f32 %v1319_v28 }
 0x231   : > { %v2473_v54 = vpop.eup %2472  ;;  %v1492_v4 = vmul.f32 %v2471_v16, %v2885_v55  ;;  %2484 = vrsqrt.f32 %v1311_v31 }
 0x232   : > { %v2475_v26 = vpop.eup %2474  ;;  %v1490_v21 = vmul.f32 %v2473_v54, %v2881_v53 }
 0x233   : > { %v2477_v9 = vpop.eup %2476  ;;  %v2111_v24 = vpack.c.bf16 %v1492_v4, %v1492_v4  ;;  %v1493_v35 = vmul.f32 %v2475_v26, %v2888_v58  ;;  %v2329_v27 = vpop.f32.mrb[48].mxu1  ;;  %v3324_v4 = vld [vmem:[#allocation6_spill] sm:$0xff] }
 0x234   : > { %v2109_v8 = vpack.c.bf16 %v1490_v21, %v1490_v21  ;;  %v1491_v33 = vmul.f32 %v2477_v9, %v2892_v6  ;;  %v1332_v36 = vadd.f32 %v2329_v27, %v3017_v43  ;;  %v1323_v59 = vpop.f32.mrb[49].mxu1  ;;  %v3325_v9 = vld [vmem:[#allocation5_spill] sm:$0xff] }
 0x235   : > { %1813 = vst.msk [vmem:[%s3033_s19 + $0xa8] sm:$0xf] %vm1770_vm5, %v2111_v24  ;;  %v2112_v55 = vpack.c.bf16 %v1493_v35, %v1493_v35  ;;  %v1324_v39 = vadd.f32 %v3017_v43, %v1323_v59  ;;  %v2330_v29 = vpop.f32.mrb[50].mxu1 }
 0x236   : > { %1811 = vst.msk [vmem:[%s3033_s19 + $0xa0] sm:$0xf] %vm1770_vm5, %v2109_v8  ;;  %v2110_v53 = vpack.c.bf16 %v1491_v33, %v1491_v33  ;;  %2486 = vrsqrt.f32 %v1332_v36  ;;  %v1335_v58 = vadd.f32 %v2330_v29, %v3017_v43  ;;  %v1326_v50 = vpop.f32.mrb[51].mxu1  ;;  %v3326_v8 = vld [vmem:[#allocation7_spill] sm:$0xff] }
 0x237   : > { %1814 = vst.msk [vmem:[%s3033_s19 + $0xac] sm:$0xf] %vm1770_vm5, %v2112_v55  ;;  %2488 = vrsqrt.f32 %v1324_v39  ;;  %v1327_v6 = vadd.f32 %v3017_v43, %v1326_v50  ;;  %v3327_v55 = vld [vmem:[#allocation8_spill] sm:$0xff] }
 0x238   : > { %v2479_v57 = vpop.eup %2478  ;;  %1812 = vst.msk [vmem:[%s3033_s19 + $0xa4] sm:$0xf] %vm1770_vm5, %v2110_v53  ;;  %2490 = vrsqrt.f32 %v1335_v58 }
 0x239   : > { %v2481_v61 = vpop.eup %2480  ;;  %v1496_v48 = vmul.f32 %v2479_v57, %v2907_v34  ;;  %2492 = vrsqrt.f32 %v1327_v6 }
 0x23a   : > { %v2483_v2 = vpop.eup %2482  ;;  %v1494_v47 = vmul.f32 %v2481_v61, %v2903_v30 }
 0x23b   : > { %v2485_v12 = vpop.eup %2484  ;;  %v2115_v32 = vpack.c.bf16 %v1496_v48, %v1496_v48  ;;  %v1497_v7 = vmul.f32 %v2483_v2, %v2910_v37  ;;  %v2333_v10 = vpop.f32.mrb[52].mxu1 }
 0x23c   : > { %v2113_v13 = vpack.c.bf16 %v1494_v47, %v1494_v47  ;;  %v1495_v62 = vmul.f32 %v2485_v12, %v2914_v45  ;;  %v1348_v0 = vadd.f32 %v2333_v10, %v3017_v43  ;;  %v1339_v15 = vpop.f32.mrb[53].mxu1 }
 0x23d   : > { %1817 = vst.msk [vmem:[%s3033_s19 + $0xb8] sm:$0xf] %vm1770_vm5, %v2115_v32  ;;  %v2116_v34 = vpack.c.bf16 %v1497_v7, %v1497_v7  ;;  %v1340_v11 = vadd.f32 %v3017_v43, %v1339_v15  ;;  %v2334_v56 = vpop.f32.mrb[54].mxu1  ;;  %v3328_v32 = vld [vmem:[#allocation10_spill] sm:$0xff] }
 0x23e   : > { %1815 = vst.msk [vmem:[%s3033_s19 + $0xb0] sm:$0xf] %vm1770_vm5, %v2113_v13  ;;  %v2114_v30 = vpack.c.bf16 %v1495_v62, %v1495_v62  ;;  %2494 = vrsqrt.f32 %v1348_v0  ;;  %v1351_v37 = vadd.f32 %v2334_v56, %v3017_v43  ;;  %v1342_v3 = vpop.f32.mrb[55].mxu1  ;;  %v3329_v13 = vld [vmem:[#allocation9_spill] sm:$0xff] }
 0x23f   : > { %1818 = vst.msk [vmem:[%s3033_s19 + $0xbc] sm:$0xf] %vm1770_vm5, %v2116_v34  ;;  %2496 = vrsqrt.f32 %v1340_v11  ;;  %v1343_v45 = vadd.f32 %v3017_v43, %v1342_v3  ;;  %v3330_v34 = vld [vmem:[#allocation11_spill] sm:$0xff] }
 0x240   : > { %v2487_v46 = vpop.eup %2486  ;;  %1816 = vst.msk [vmem:[%s3033_s19 + $0xb4] sm:$0xf] %vm1770_vm5, %v2114_v30  ;;  %2498 = vrsqrt.f32 %v1351_v37 }
 0x241   : > { %v2489_v5 = vpop.eup %2488  ;;  %v1500_v60 = vmul.f32 %v2487_v46, %v2929_v19  ;;  %2500 = vrsqrt.f32 %v1343_v45 }
 0x242   : > { %v2491_v40 = vpop.eup %2490  ;;  %v1498_v17 = vmul.f32 %v2489_v5, %v3321_v63  ;;  %v3332_v5 = vld [vmem:[#allocation14_spill] sm:$0xff]  ;;  %v3333_v63 = vld [vmem:[#allocation13_spill] sm:$0xff] }
 0x243   : > { %v2493_v49 = vpop.eup %2492  ;;  %v2119_v38 = vpack.c.bf16 %v1500_v60, %v1500_v60  ;;  %v1501_v18 = vmul.f32 %v2491_v40, %v3322_v14  ;;  %v2337_v41 = vpop.f32.mrb[56].mxu1  ;;  %v3334_v14 = vld [vmem:[#allocation15_spill] sm:$0xff] }
 0x244   : > { %v2117_v20 = vpack.c.bf16 %v1498_v17, %v1498_v17  ;;  %v1499_v44 = vmul.f32 %v2493_v49, %v3323_v1  ;;  %v1364_v42 = vadd.f32 %v2337_v41, %v3017_v43  ;;  %v1355_v25 = vpop.f32.mrb[57].mxu1 }
 0x245   : > { %1821 = vst.msk [vmem:[%s3033_s19 + $0xc8] sm:$0xf] %vm1770_vm5, %v2119_v38  ;;  %v2120_v19 = vpack.c.bf16 %v1501_v18, %v1501_v18  ;;  %v1356_v51 = vadd.f32 %v3017_v43, %v1355_v25  ;;  %v2338_v23 = vpop.f32.mrb[58].mxu1 }
 0x246   : > { %1819 = vst.msk [vmem:[%s3033_s19 + $0xc0] sm:$0xf] %vm1770_vm5, %v2117_v20  ;;  %v2118_v22 = vpack.c.bf16 %v1499_v44, %v1499_v44  ;;  %2502 = vrsqrt.f32 %v1364_v42  ;;  %v1367_v28 = vadd.f32 %v2338_v23, %v3017_v43  ;;  %v1358_v52 = vpop.f32.mrb[59].mxu1  ;;  %v3335_v20 = vld [vmem:[#allocation16_spill] sm:$0xff] }
 0x247   : > { %1822 = vst.msk [vmem:[%s3033_s19 + $0xcc] sm:$0xf] %vm1770_vm5, %v2120_v19  ;;  %2504 = vrsqrt.f32 %v1356_v51  ;;  %v1359_v31 = vadd.f32 %v3017_v43, %v1358_v52 }
 0x248   : > { %v2495_v16 = vpop.eup %2494  ;;  %1820 = vst.msk [vmem:[%s3033_s19 + $0xc4] sm:$0xf] %vm1770_vm5, %v2118_v22  ;;  %2506 = vrsqrt.f32 %v1367_v28 }
 0x249   : > { %v2497_v54 = vpop.eup %2496  ;;  %v1504_v26 = vmul.f32 %v2495_v16, %v3324_v4  ;;  %2508 = vrsqrt.f32 %v1359_v31 }
 0x24a   : > { %v2499_v21 = vpop.eup %2498  ;;  %v1502_v24 = vmul.f32 %v2497_v54, %v3325_v9 }
 0x24b   : > { %v2501_v35 = vpop.eup %2500  ;;  %v2123_v27 = vpack.c.bf16 %v1504_v26, %v1504_v26  ;;  %v1505_v33 = vmul.f32 %v2499_v21, %v3326_v8  ;;  %v2341_v36 = vpop.f32.mrb[60].mxu1 }
 0x24c   : > { %v2121_v59 = vpack.c.bf16 %v1502_v24, %v1502_v24  ;;  %v1503_v39 = vmul.f32 %v2501_v35, %v3327_v55  ;;  %v1380_v29 = vadd.f32 %v2341_v36, %v3017_v43  ;;  %v1371_v53 = vpop.f32.mrb[61].mxu1 }
 0x24d   : > { %1825 = vst.msk [vmem:[%s3033_s19 + $0xd8] sm:$0xf] %vm1770_vm5, %v2123_v27  ;;  %v2124_v58 = vpack.c.bf16 %v1505_v33, %v1505_v33  ;;  %v1372_v50 = vadd.f32 %v3017_v43, %v1371_v53  ;;  %v2342_v6 = vpop.f32.mrb[62].mxu1 }
 0x24e   : > { %1823 = vst.msk [vmem:[%s3033_s19 + $0xd0] sm:$0xf] %vm1770_vm5, %v2121_v59  ;;  %v2122_v57 = vpack.c.bf16 %v1503_v39, %v1503_v39  ;;  %2510 = vrsqrt.f32 %v1380_v29  ;;  %v1383_v61 = vadd.f32 %v2342_v6, %v3017_v43  ;;  %v1374_v48 = vpop.f32.mrb[63].mxu1 }
 0x24f   : > { %1826 = vst.msk [vmem:[%s3033_s19 + $0xdc] sm:$0xf] %vm1770_vm5, %v2124_v58  ;;  %2512 = vrsqrt.f32 %v1372_v50  ;;  %v1375_v2 = vadd.f32 %v3017_v43, %v1374_v48  ;;  %v3331_v43 = vld [vmem:[#allocation12_spill] sm:$0xff] }
 0x250   : > { %v2503_v47 = vpop.eup %2502  ;;  %1824 = vst.msk [vmem:[%s3033_s19 + $0xd4] sm:$0xf] %vm1770_vm5, %v2122_v57  ;;  %2514 = vrsqrt.f32 %v1383_v61 }
 0x251   : > { %v2505_v12 = vpop.eup %2504  ;;  %v1508_v7 = vmul.f32 %v2503_v47, %v3328_v32  ;;  %2516 = vrsqrt.f32 %v1375_v2 }
 0x252   : > { %v2507_v10 = vpop.eup %2506  ;;  %v1506_v62 = vmul.f32 %v2505_v12, %v3329_v13 }
 0x253   : > { %v2509_v0 = vpop.eup %2508  ;;  %v2127_v15 = vpack.c.bf16 %v1508_v7, %v1508_v7  ;;  %v1509_v11 = vmul.f32 %v2507_v10, %v3330_v34 }
 0x254   : > { %v2125_v56 = vpack.c.bf16 %v1506_v62, %v1506_v62  ;;  %v1507_v30 = vmul.f32 %v2509_v0, %v3331_v43 }
 0x255   : > { %1829 = vst.msk [vmem:[%s3033_s19 + $0xe8] sm:$0xf] %vm1770_vm5, %v2127_v15  ;;  %v2128_v37 = vpack.c.bf16 %v1509_v11, %v1509_v11 }
 0x256   : > { %1827 = vst.msk [vmem:[%s3033_s19 + $0xe0] sm:$0xf] %vm1770_vm5, %v2125_v56  ;;  %v2126_v3 = vpack.c.bf16 %v1507_v30, %v1507_v30 }
 0x257   : > { %1830 = vst.msk [vmem:[%s3033_s19 + $0xec] sm:$0xf] %vm1770_vm5, %v2128_v37 }
 0x258   : > { %v2511_v45 = vpop.eup %2510  ;;  %1828 = vst.msk [vmem:[%s3033_s19 + $0xe4] sm:$0xf] %vm1770_vm5, %v2126_v3 }
 0x259   : > { %v2513_v46 = vpop.eup %2512  ;;  %v1512_v60 = vmul.f32 %v2511_v45, %v3332_v5 }
 0x25a   : > { %v2515_v40 = vpop.eup %2514  ;;  %v1510_v17 = vmul.f32 %v2513_v46, %v3333_v63 }
 0x25b   : > { %v2517_v49 = vpop.eup %2516  ;;  %v2131_v38 = vpack.c.bf16 %v1512_v60, %v1512_v60  ;;  %v1513_v18 = vmul.f32 %v2515_v40, %v3334_v14 }
 0x25c   : > { %v2129_v41 = vpack.c.bf16 %v1510_v17, %v1510_v17  ;;  %v1511_v1 = vmul.f32 %v2517_v49, %v3335_v20 }
 0x25d   : > { %1833 = vst.msk [vmem:[%s3033_s19 + $0xf8] sm:$0xf] %vm1770_vm5, %v2131_v38  ;;  %v2132_v44 = vpack.c.bf16 %v1513_v18, %v1513_v18 }
 0x25e   : > { %1831 = vst.msk [vmem:[%s3033_s19 + $0xf0] sm:$0xf] %vm1770_vm5, %v2129_v41  ;;  %v2130_v42 = vpack.c.bf16 %v1511_v1, %v1511_v1 }
 0x25f   : > { %1834 = vst.msk [vmem:[%s3033_s19 + $0xfc] sm:$0xf] %vm1770_vm5, %v2132_v44 }
 0x260   : > { %1832 = vst.msk [vmem:[%s3033_s19 + $0xf4] sm:$0xf] %vm1770_vm5, %v2130_v42 }
 0x261 PF: > { %s15_s18 = sadd.s32 1, %s2524_s18  }
 0x262   : > { %p12_p4 = scmp.ge.s32.totalorder %s15_s18, 6  }
 0x264   :  { %14 = sbr.rel (!%p12_p4) target bundleno = 1 (0x1), region = 70 }

// kernel: forward.19
= control target key start
LH: loop header
LB: loop body
LE: loop exit
PB: predicated region body
PF: predicated region fallthrough
CT: control target
= control target key end

     0   :  { %s1686_s18 = smov 0   ;;  %s2168_s0 = inlined_call_operand.vmem [shape: bf16[512,200], index: 0, kind: input, shape index: {}]   ;;  %s2169_s1 = inlined_call_operand.vmem [shape: bf16[200,8], index: 1, kind: input, shape index: {}]   ;;  %s2170_s2 = inlined_call_operand.vmem [shape: f32[1,8], index: 2, kind: input, shape index: {}]   ;;  %s2171_s3 = inlined_call_operand.vmem [shape: bf16[8,8], index: 3, kind: input, shape index: {}]   ;;  %s2172_s4 = inlined_call_operand.vmem [shape: f32[1,8], index: 4, kind: input, shape index: {}]   ;;  %s2173_s5 = inlined_call_operand.vmem [shape: bf16[512,8], index: 5, kind: output, shape index: {}]  }
   0x1 LB: > { %s1279_s19 = sadd.s32 4294967295, %s1653_s18   ;;  %p1283_p0 = scmp.ge.s32.totalorder %s1653_s18, 1  ;;  %s1653_s18 = sphi %s1686_s18, %s15_s18  }
   0x2   : > { %p189_p1 = scmp.lt.s32.totalorder %s1653_s18, 3 }
   0x4   : > { %p190_p2 = pnand %p1283_p0, %p189_p1 }
   0x5   : > { %v1522_v0 = vld [vmem:[%s2169_s1] sm:$0xff] (!%p190_p2)   ;;  %v1655_v1 = vmov (!%p190_p2), 0   ;;  %v1523_v2 = vld [vmem:[%s2169_s1 + $0x8] sm:$0xff] (!%p190_p2)   ;;  %s1284_s24 = sshll.u32 (!%p190_p2), %s1279_s19, 5  ;;  %v1524_v3 = vld [vmem:[%s2169_s1 + $0x10] sm:$0xff] (!%p190_p2)   ;;  %vm517_vm0 = vcmask (!%p190_p2), 588800  }
   0x6   : > { %193 = sbr.rel (%p190_p2) target bundleno = 615 (0x267), region = 40  ;;  %570 = vmatprep.subr.bf16.mxu0 (!%p190_p2), %v1655_v1  ;;  %1486 = vmatprep.subr.bf16.mxu1 (!%p190_p2), %v1655_v1  ;;  %p219_p3 = scmp.lt.s32.totalorder (!%p190_p2), %s1284_s24, 63  ;;  %v1525_v4 = vld [vmem:[%s2169_s1 + $0x18] sm:$0xff] (!%p190_p2)   ;;  %v1526_v6 = vld [vmem:[%s2169_s1 + $0x20] sm:$0xff] (!%p190_p2)   ;;  %v1527_v7 = vld [vmem:[%s2169_s1 + $0x28] sm:$0xff] (!%p190_p2)   ;;  %vm566_vm1 = vcmask (!%p190_p2), 1043456  }
   0x7   : > { %571 = vmatpush1.bf16.msra.mxu0 (!%p190_p2), %v1522_v0  ;;  %1499 = vmatpush1.bf16.msra.mxu1 (!%p190_p2), %v1522_v0  ;;  %v1528_v8 = vld [vmem:[%s2169_s1 + $0x30] sm:$0xff] (!%p190_p2)   ;;  %v1529_v9 = vld [vmem:[%s2169_s1 + $0x38] sm:$0xff] (!%p190_p2)   ;;  %v1530_v11 = vld [vmem:[%s2169_s1 + $0x40] sm:$0xff] (!%p190_p2)   ;;  %vm785_vm2 = vcmask (!%p190_p2), 64512   ;;  %vm1190_vm3 = vcmask (!%p190_p2), 60416  }
   0x8   : > { %572 = vmatprep.subr.bf16.mxu0 (!%p190_p2), %v1655_v1  ;;  %1487 = vmatprep.subr.bf16.mxu1 (!%p190_p2), %v1655_v1  ;;  %v1531_v12 = vld [vmem:[%s2169_s1 + $0x48] sm:$0xff] (!%p190_p2)   ;;  %v1532_v13 = vld [vmem:[%s2169_s1 + $0x50] sm:$0xff] (!%p190_p2)   ;;  %v1533_v14 = vld [vmem:[%s2169_s1 + $0x58] sm:$0xff] (!%p190_p2)  }
   0x9   : > { %v1534_v15 = vld [vmem:[%s2169_s1 + $0x60] ss:$0 sps:$4 sm:$0xff] (!%p190_p2)  }
   0xa   : > { %v568_v16 = vsel (!%p190_p2), %vm566_vm1, %v1534_v15, 0  ;;  %v232_v47 = vld [vmem:[%s2171_s3] sm:$0xf] (!%p190_p2) }
   0xb   : > { %573 = vmatpush1.bf16.msra.mxu0 (!%p190_p2), %v1523_v2  ;;  %1500 = vmatpush1.bf16.msra.mxu1 (!%p190_p2), %v1523_v2  ;;  %v835_v48 = vsel (!%p190_p2), %vm566_vm1, %v232_v47, 0  ;;  %v1824_v49 = vld [vmem:[%s2170_s2] ss:$0 sm:$0xff] (!%p190_p2) }
   0xc   : > { %574 = vmatprep.subr.bf16.mxu0 (!%p190_p2), %v1655_v1  ;;  %1488 = vmatprep.subr.bf16.mxu1 (!%p190_p2), %v1655_v1 }
   0xd   : > { %s2175_s24 = smov (!%p219_p3, %s1284_s24), 63 }
   0xe   : > { %s1402_s27 = sshll.u32 %s2175_s24, 3  ;;  %s1288_s9 = sshll.u32 %s2175_s24, 2 }
   0xf   : > { %575 = vmatpush1.bf16.msra.mxu0 %v1524_v3  ;;  %s1718_s7 = scalar_lea.vmem %s2168_s0, %s1402_s27  ;;  %1501 = vmatpush1.bf16.msra.mxu1 %v1524_v3  ;;  %s2040_s12 = scalar_lea.vmem %s2173_s5, %s1288_s9 }
  0x10   : > { %576 = vmatprep.subr.bf16.mxu0 %v1655_v1  ;;  %1489 = vmatprep.subr.bf16.mxu1 %v1655_v1  ;;  %v1537_v5 = vld [vmem:[%s1718_s7 + $0x4] ss:$8 sps:$4 sm:$0xff]   ;;  %v1535_v17 = vld [vmem:[%s1718_s7] ss:$8 sps:$4 sm:$0xff]   ;;  %v1538_v19 = vld [vmem:[%s1718_s7 + $0x14] ss:$8 sps:$4 sm:$0xff]  }
  0x11   : > { %1335 = vmatprep.mubr.msk.bf16.mxu0 %vm517_vm0, %v1537_v5  ;;  %v1567_v10 = vld [vmem:[%s1718_s7 + $0xc4] ss:$8 sps:$4 sm:$0xff]   ;;  %v1565_v18 = vld [vmem:[%s1718_s7 + $0xc0] ss:$8 sps:$4 sm:$0xff]   ;;  %v1571_v20 = vld [vmem:[%s1718_s7 + $0xd4] ss:$8 sps:$4 sm:$0xff]  }
  0x12   : > { %1347 = vmatprep.mubr.msk.bf16.mxu1 %vm517_vm0, %v1567_v10  ;;  %v1540_v21 = vld [vmem:[%s1718_s7 + $0x10] ss:$8 sps:$4 sm:$0xff]   ;;  %v1541_v23 = vld [vmem:[%s1718_s7 + $0x24] ss:$8 sps:$4 sm:$0xff]   ;;  %v1543_v25 = vld [vmem:[%s1718_s7 + $0x20] ss:$8 sps:$4 sm:$0xff]  }
  0x13   : > { %577 = vmatpush1.bf16.msra.mxu0 %v1525_v4  ;;  %1502 = vmatpush1.bf16.msra.mxu1 %v1525_v4  ;;  %v1573_v22 = vld [vmem:[%s1718_s7 + $0xd0] ss:$8 sps:$4 sm:$0xff]   ;;  %v1577_v24 = vld [vmem:[%s1718_s7 + $0xe4] ss:$8 sps:$4 sm:$0xff]   ;;  %v1579_v26 = vld [vmem:[%s1718_s7 + $0xe0] ss:$8 sps:$4 sm:$0xff]  }
  0x14   : > { %578 = vmatprep.subr.bf16.mxu0 %v1655_v1  ;;  %1490 = vmatprep.subr.bf16.mxu1 %v1655_v1  ;;  %v1544_v27 = vld [vmem:[%s1718_s7 + $0x34] ss:$8 sps:$4 sm:$0xff]   ;;  %v1546_v29 = vld [vmem:[%s1718_s7 + $0x30] ss:$8 sps:$4 sm:$0xff]   ;;  %v1547_v31 = vld [vmem:[%s1718_s7 + $0x44] ss:$8 sps:$4 sm:$0xff]  }
  0x15   : > { %v1580_v28 = vld [vmem:[%s1718_s7 + $0xf4] ss:$8 sps:$4 sm:$0xff]   ;;  %v1582_v30 = vld [vmem:[%s1718_s7 + $0xf0] ss:$8 sps:$4 sm:$0xff]   ;;  %v1549_v32 = vld [vmem:[%s1718_s7 + $0x40] ss:$8 sps:$4 sm:$0xff]  }
  0x16   : > { %v1550_v33 = vld [vmem:[%s1718_s7 + $0x54] ss:$8 sps:$4 sm:$0xff]   ;;  %v1552_v34 = vld [vmem:[%s1718_s7 + $0x50] ss:$8 sps:$4 sm:$0xff]   ;;  %v1553_v35 = vld [vmem:[%s1718_s7 + $0x64] ss:$8 sps:$4 sm:$0xff]  }
  0x17   : > { %579 = vmatpush1.bf16.msra.mxu0 %v1526_v6  ;;  %1503 = vmatpush1.bf16.msra.mxu1 %v1526_v6  ;;  %v1555_v36 = vld [vmem:[%s1718_s7 + $0x60] ss:$8 sps:$4 sm:$0xff]   ;;  %v1556_v37 = vld [vmem:[%s1718_s7 + $0x74] ss:$8 sps:$4 sm:$0xff]   ;;  %v1558_v38 = vld [vmem:[%s1718_s7 + $0x70] ss:$8 sps:$4 sm:$0xff]  }
  0x18   : > { %580 = vmatprep.subr.bf16.mxu0 %v1655_v1  ;;  %1491 = vmatprep.subr.bf16.mxu1 %v1655_v1  ;;  %v1559_v39 = vld [vmem:[%s1718_s7 + $0x84] ss:$8 sps:$4 sm:$0xff]   ;;  %v1561_v40 = vld [vmem:[%s1718_s7 + $0x80] ss:$8 sps:$4 sm:$0xff]   ;;  %v1562_v41 = vld [vmem:[%s1718_s7 + $0x94] ss:$8 sps:$4 sm:$0xff]  }
  0x19   : > { %v1564_v42 = vld [vmem:[%s1718_s7 + $0x90] ss:$8 sps:$4 sm:$0xff]   ;;  %v1568_v43 = vld [vmem:[%s1718_s7 + $0xa4] ss:$8 sps:$4 sm:$0xff]   ;;  %v1570_v44 = vld [vmem:[%s1718_s7 + $0xa0] ss:$8 sps:$4 sm:$0xff]  }
  0x1a   : > { %v1574_v45 = vld [vmem:[%s1718_s7 + $0xb4] ss:$8 sps:$4 sm:$0xff]   ;;  %v1576_v46 = vld [vmem:[%s1718_s7 + $0xb0] ss:$8 sps:$4 sm:$0xff]  }
  0x1b   : > { %581 = vmatpush1.bf16.msra.mxu0 %v1527_v7  ;;  %1504 = vmatpush1.bf16.msra.mxu1 %v1527_v7 }
  0x1c   : > { %582 = vmatprep.subr.bf16.mxu0 %v1655_v1  ;;  %1492 = vmatprep.subr.bf16.mxu1 %v1655_v1 }
  0x1f   : > { %583 = vmatpush1.bf16.msra.mxu0 %v1528_v8  ;;  %1505 = vmatpush1.bf16.msra.mxu1 %v1528_v8 }
  0x20   : > { %584 = vmatprep.subr.bf16.mxu0 %v1655_v1  ;;  %1493 = vmatprep.subr.bf16.mxu1 %v1655_v1 }
  0x23   : > { %585 = vmatpush1.bf16.msra.mxu0 %v1529_v9  ;;  %1506 = vmatpush1.bf16.msra.mxu1 %v1529_v9 }
  0x24   : > { %586 = vmatprep.subr.bf16.mxu0 %v1655_v1  ;;  %1494 = vmatprep.subr.bf16.mxu1 %v1655_v1 }
  0x27   : > { %587 = vmatpush1.bf16.msra.mxu0 %v1530_v11  ;;  %1507 = vmatpush1.bf16.msra.mxu1 %v1530_v11 }
  0x28   : > { %588 = vmatprep.subr.bf16.mxu0 %v1655_v1  ;;  %1495 = vmatprep.subr.bf16.mxu1 %v1655_v1 }
  0x2b   : > { %589 = vmatpush1.bf16.msra.mxu0 %v1531_v12  ;;  %1508 = vmatpush1.bf16.msra.mxu1 %v1531_v12 }
  0x2c   : > { %590 = vmatprep.subr.bf16.mxu0 %v1655_v1  ;;  %1496 = vmatprep.subr.bf16.mxu1 %v1655_v1 }
  0x2f   : > { %591 = vmatpush1.bf16.msra.mxu0 %v1532_v13  ;;  %1509 = vmatpush1.bf16.msra.mxu1 %v1532_v13 }
  0x30   : > { %592 = vmatprep.subr.bf16.mxu0 %v1655_v1  ;;  %1497 = vmatprep.subr.bf16.mxu1 %v1655_v1 }
  0x33   : > { %593 = vmatpush1.bf16.msra.mxu0 %v1533_v14  ;;  %1510 = vmatpush1.bf16.msra.mxu1 %v1533_v14 }
  0x34   : > { %594 = vmatprep.subr.bf16.mxu0 %v1655_v1  ;;  %1498 = vmatprep.subr.bf16.mxu1 %v1655_v1 }
  0x37   : > { %595 = vmatpush1.bf16.msra.mxu0 %v568_v16  ;;  %1511 = vmatpush1.bf16.msra.mxu1 %v568_v16 }
  0x38   : > { %1512 = vmatprep.subr.msk.bf16.mxu1 %vm566_vm1, %v232_v47 }
  0x3a   : > { %603 = vmatmul.mubr.bf16.vlgmr.msra.gmra.mrb[0].mxu0 %v1535_v17  ;;  %699 = vmatmul.mubr.bf16.vlgmr.msra.gmra.mrb[0].mxu1 %v1565_v18 }
  0x3b   : > { %1336 = vmatprep.mubr.msk.bf16.mxu0 %vm517_vm0, %v1538_v19  ;;  %1348 = vmatprep.mubr.msk.bf16.mxu1 %vm517_vm0, %v1571_v20 }
  0x3c   : > { %1453 = vmatpush3.bf16.msra.mxu1 %v835_v48 }
  0x42   : > { %611 = vmatmul.mubr.bf16.gmra.mrb[4].mxu0 %v1540_v21  ;;  %707 = vmatmul.mubr.bf16.gmra.mrb[4].mxu1 %v1573_v22 }
  0x43   : > { %1337 = vmatprep.mubr.msk.bf16.mxu0 %vm517_vm0, %v1541_v23  ;;  %1349 = vmatprep.mubr.msk.bf16.mxu1 %vm517_vm0, %v1577_v24 }
  0x4a   : > { %619 = vmatmul.mubr.bf16.gmra.mrb[8].mxu0 %v1543_v25  ;;  %715 = vmatmul.mubr.bf16.gmra.mrb[8].mxu1 %v1579_v26 }
  0x4b   : > { %1338 = vmatprep.mubr.msk.bf16.mxu0 %vm517_vm0, %v1544_v27  ;;  %1350 = vmatprep.mubr.msk.bf16.mxu1 %vm517_vm0, %v1580_v28 }
  0x52   : > { %627 = vmatmul.mubr.bf16.gmra.mrb[12].mxu0 %v1546_v29  ;;  %723 = vmatmul.mubr.bf16.gmra.mrb[12].mxu1 %v1582_v30 }
  0x53   : > { %1339 = vmatprep.mubr.msk.bf16.mxu0 %vm517_vm0, %v1547_v31 }
  0x5a   : > { %635 = vmatmul.mubr.bf16.gmra.mrb[16].mxu0 %v1549_v32 }
  0x5b   : > { %1340 = vmatprep.mubr.msk.bf16.mxu0 %vm517_vm0, %v1550_v33 }
  0x62   : > { %643 = vmatmul.mubr.bf16.gmra.mrb[20].mxu0 %v1552_v34 }
  0x63   : > { %1341 = vmatprep.mubr.msk.bf16.mxu0 %vm517_vm0, %v1553_v35 }
  0x6a   : > { %651 = vmatmul.mubr.bf16.gmra.mrb[24].mxu0 %v1555_v36 }
  0x6b   : > { %1342 = vmatprep.mubr.msk.bf16.mxu0 %vm517_vm0, %v1556_v37 }
  0x72   : > { %659 = vmatmul.mubr.bf16.gmra.mrb[28].mxu0 %v1558_v38 }
  0x73   : > { %1343 = vmatprep.mubr.msk.bf16.mxu0 %vm517_vm0, %v1559_v39 }
  0x7a   : > { %667 = vmatmul.mubr.bf16.gmra.mrb[32].mxu0 %v1561_v40 }
  0x7b   : > { %1344 = vmatprep.mubr.msk.bf16.mxu0 %vm517_vm0, %v1562_v41 }
  0x82   : > { %675 = vmatmul.mubr.bf16.gmra.mrb[36].mxu0 %v1564_v42 }
  0x83   : > { %1345 = vmatprep.mubr.msk.bf16.mxu0 %vm517_vm0, %v1568_v43 }
  0x8a   : > { %683 = vmatmul.mubr.bf16.gmra.mrb[40].mxu0 %v1570_v44 }
  0x8b   : > { %1346 = vmatprep.mubr.msk.bf16.mxu0 %vm517_vm0, %v1574_v45 }
  0x92   : > { %691 = vmatmul.mubr.bf16.gmra.mrb[44].mxu0 %v1576_v46 }
 0x10d   : > { %v604_v50 = vpop.f32.mrb[0].mxu0  ;;  %v1826_v51 = vpop.f32.mrb[0].mxu1 }
 0x10e   : > { %v1829_v52 = vadd.f32 %v1824_v49, %v604_v50  ;;  %v606_v53 = vpop.f32.mrb[1].mxu0  ;;  %v702_v54 = vpop.f32.mrb[1].mxu1 }
 0x10f   : > { %v607_v55 = vpop.f32.mrb[2].mxu0  ;;  %v1831_v56 = vpop.f32.mrb[2].mxu1 }
 0x110   : > { %v1834_v57 = vadd.f32 %v1824_v49, %v607_v55  ;;  %v609_v58 = vpop.f32.mrb[3].mxu0  ;;  %v705_v59 = vpop.f32.mrb[3].mxu1  ;;  %v731_v60 = vmul.f32 %v1829_v52, %v1829_v52 }
 0x112   : > { %v732_v61 = vmul.f32 %v1834_v57, %v1834_v57 }
 0x114   : > { %v763_v62 = vpack.c.bf16 %v732_v61, %v731_v60 }
 0x115   : > { %v612_v63 = vpop.f32.mrb[4].mxu0  ;;  %v1840_v0 = vpop.f32.mrb[4].mxu1 }
 0x116   : > { %v1843_v1 = vadd.f32 %v1824_v49, %v612_v63  ;;  %v614_v2 = vpop.f32.mrb[5].mxu0  ;;  %1454 = vmatprep.mubr.msk.bf16.mxu1 %vm785_vm2, %v763_v62  ;;  %v710_v3 = vpop.f32.mrb[5].mxu1 }
 0x117   : > { %v615_v4 = vpop.f32.mrb[6].mxu0  ;;  %v1846_v5 = vpop.f32.mrb[6].mxu1 }
 0x118   : > { %v1849_v6 = vadd.f32 %v1824_v49, %v615_v4  ;;  %v617_v7 = vpop.f32.mrb[7].mxu0  ;;  %v713_v8 = vpop.f32.mrb[7].mxu1  ;;  %v733_v9 = vmul.f32 %v1843_v1, %v1843_v1 }
 0x11a   : > { %v734_v10 = vmul.f32 %v1849_v6, %v1849_v6 }
 0x11c   : > { %v764_v11 = vpack.c.bf16 %v734_v10, %v733_v9 }
 0x11d   : > { %v620_v12 = vpop.f32.mrb[8].mxu0  ;;  %v1855_v13 = vpop.f32.mrb[8].mxu1 }
 0x11e   : > { %v1858_v14 = vadd.f32 %v1824_v49, %v620_v12  ;;  %v622_v15 = vpop.f32.mrb[9].mxu0  ;;  %1455 = vmatmul.mubr.msk.bf16.vlgmr.msra.gmra.mrb[16].mxu1 %vm785_vm2, %v764_v11  ;;  %v718_v16 = vpop.f32.mrb[9].mxu1 }
 0x11f   : > { %v623_v17 = vpop.f32.mrb[10].mxu0  ;;  %v1861_v18 = vpop.f32.mrb[10].mxu1 }
 0x120   : > { %v1864_v19 = vadd.f32 %v1824_v49, %v623_v17  ;;  %v625_v20 = vpop.f32.mrb[11].mxu0  ;;  %v721_v21 = vpop.f32.mrb[11].mxu1  ;;  %v735_v22 = vmul.f32 %v1858_v14, %v1858_v14 }
 0x122   : > { %v736_v23 = vmul.f32 %v1864_v19, %v1864_v19 }
 0x124   : > { %v765_v24 = vpack.c.bf16 %v736_v23, %v735_v22 }
 0x125   : > { %v628_v25 = vpop.f32.mrb[12].mxu0  ;;  %v1870_v26 = vpop.f32.mrb[12].mxu1 }
 0x126   : > { %v1873_v27 = vadd.f32 %v1824_v49, %v628_v25  ;;  %v630_v28 = vpop.f32.mrb[13].mxu0  ;;  %1458 = vmatprep.mubr.msk.bf16.mxu1 %vm785_vm2, %v765_v24  ;;  %v726_v29 = vpop.f32.mrb[13].mxu1 }
 0x127   : > { %v631_v30 = vpop.f32.mrb[14].mxu0  ;;  %v1876_v31 = vpop.f32.mrb[14].mxu1 }
 0x128   : > { %v1879_v32 = vadd.f32 %v1824_v49, %v631_v30  ;;  %v633_v33 = vpop.f32.mrb[15].mxu0  ;;  %v729_v34 = vpop.f32.mrb[15].mxu1  ;;  %v737_v35 = vmul.f32 %v1873_v27, %v1873_v27 }
 0x12a   : > { %v738_v36 = vmul.f32 %v1879_v32, %v1879_v32 }
 0x12c   : > { %v766_v37 = vpack.c.bf16 %v738_v36, %v737_v35 }
 0x12d   : > { %v636_v38 = vpop.f32.mrb[16].mxu0 }
 0x12e   : > { %v1886_v39 = vadd.f32 %v1824_v49, %v636_v38  ;;  %v638_v40 = vpop.f32.mrb[17].mxu0  ;;  %1459 = vmatmul.mubr.msk.bf16.gmra.mrb[20].mxu1 %vm785_vm2, %v766_v37 }
 0x12f   : > { %v639_v41 = vpop.f32.mrb[18].mxu0 }
 0x130   : > { %v1890_v42 = vadd.f32 %v1824_v49, %v639_v41  ;;  %v641_v43 = vpop.f32.mrb[19].mxu0  ;;  %v739_v44 = vmul.f32 %v1886_v39, %v1886_v39 }
 0x132   : > { %v740_v45 = vmul.f32 %v1890_v42, %v1890_v42 }
 0x134   : > { %v767_v46 = vpack.c.bf16 %v740_v45, %v739_v44 }
 0x135   : > { %v644_v47 = vpop.f32.mrb[20].mxu0 }
 0x136   : > { %v1897_v48 = vadd.f32 %v1824_v49, %v644_v47  ;;  %v646_v50 = vpop.f32.mrb[21].mxu0  ;;  %1462 = vmatprep.mubr.msk.bf16.mxu1 %vm785_vm2, %v767_v46 }
 0x137   : > { %v647_v53 = vpop.f32.mrb[22].mxu0 }
 0x138   : > { %v1901_v54 = vadd.f32 %v1824_v49, %v647_v53  ;;  %v649_v55 = vpop.f32.mrb[23].mxu0  ;;  %v741_v58 = vmul.f32 %v1897_v48, %v1897_v48 }
 0x13a   : > { %v742_v59 = vmul.f32 %v1901_v54, %v1901_v54 }
 0x13c   : > { %v768_v60 = vpack.c.bf16 %v742_v59, %v741_v58 }
 0x13d   : > { %v652_v61 = vpop.f32.mrb[24].mxu0 }
 0x13e   : > { %v1908_v62 = vadd.f32 %v1824_v49, %v652_v61  ;;  %v654_v63 = vpop.f32.mrb[25].mxu0  ;;  %1463 = vmatmul.mubr.msk.bf16.gmra.mrb[24].mxu1 %vm785_vm2, %v768_v60 }
 0x13f   : > { %v655_v2 = vpop.f32.mrb[26].mxu0 }
 0x140   : > { %v1912_v3 = vadd.f32 %v1824_v49, %v655_v2  ;;  %v657_v4 = vpop.f32.mrb[27].mxu0  ;;  %v743_v7 = vmul.f32 %v1908_v62, %v1908_v62  ;;  %v1964_v2 = vadd.f32 %v1824_v49, %v1826_v51 }
 0x141   : > { %v1968_v4 = vadd.f32 %v1824_v49, %v1831_v56 }
 0x142   : > { %v744_v8 = vmul.f32 %v1912_v3, %v1912_v3  ;;  %v755_v51 = vmul.f32 %v1964_v2, %v1964_v2 }
 0x144   : > { %v769_v9 = vpack.c.bf16 %v744_v8, %v743_v7 }
 0x145   : > { %v660_v10 = vpop.f32.mrb[28].mxu0 }
 0x146   : > { %v1919_v11 = vadd.f32 %v1824_v49, %v660_v10  ;;  %v662_v12 = vpop.f32.mrb[29].mxu0  ;;  %1466 = vmatprep.mubr.msk.bf16.mxu1 %vm785_vm2, %v769_v9 }
 0x147   : > { %v663_v15 = vpop.f32.mrb[30].mxu0 }
 0x148   : > { %v1923_v16 = vadd.f32 %v1824_v49, %v663_v15  ;;  %v665_v17 = vpop.f32.mrb[31].mxu0  ;;  %v745_v20 = vmul.f32 %v1919_v11, %v1919_v11 }
 0x149   : > { %v756_v17 = vmul.f32 %v1968_v4, %v1968_v4 }
 0x14a   : > { %v746_v21 = vmul.f32 %v1923_v16, %v1923_v16 }
 0x14c   : > { %v770_v22 = vpack.c.bf16 %v746_v21, %v745_v20  ;;  %v1987_v21 = vadd.f32 %v1824_v49, %v1840_v0 }
 0x14d   : > { %v668_v23 = vpop.f32.mrb[32].mxu0 }
 0x14e   : > { %v1930_v24 = vadd.f32 %v1824_v49, %v668_v23  ;;  %v670_v25 = vpop.f32.mrb[33].mxu0  ;;  %1467 = vmatmul.mubr.msk.bf16.gmra.mrb[28].mxu1 %vm785_vm2, %v770_v22  ;;  %v1991_v22 = vadd.f32 %v1824_v49, %v1846_v5  ;;  %v757_v0 = vmul.f32 %v1987_v21, %v1987_v21 }
 0x14f   : > { %v671_v28 = vpop.f32.mrb[34].mxu0  ;;  %v775_v25 = vpack.c.bf16 %v756_v17, %v755_v51 }
 0x150   : > { %v1934_v29 = vadd.f32 %v1824_v49, %v671_v28  ;;  %v673_v30 = vpop.f32.mrb[35].mxu0  ;;  %v747_v33 = vmul.f32 %v1930_v24, %v1930_v24  ;;  %v1995_v28 = vadd.f32 %v1824_v49, %v1855_v13  ;;  %v758_v5 = vmul.f32 %v1991_v22, %v1991_v22 }
 0x151   : > { %v1999_v30 = vadd.f32 %v1824_v49, %v1861_v18  ;;  %v2013_v18 = vadd.f32 %v1824_v49, %v1870_v26 }
 0x152   : > { %v748_v34 = vmul.f32 %v1934_v29, %v1934_v29 }
 0x153   : > { %v760_v13 = vmul.f32 %v1999_v30, %v1999_v30 }
 0x154   : > { %v771_v35 = vpack.c.bf16 %v748_v34, %v747_v33  ;;  %v759_v33 = vmul.f32 %v1995_v28, %v1995_v28  ;;  %v776_v34 = vpack.c.bf16 %v758_v5, %v757_v0 }
 0x155   : > { %v676_v36 = vpop.f32.mrb[36].mxu0 }
 0x156   : > { %v1941_v37 = vadd.f32 %v1824_v49, %v676_v36  ;;  %v678_v38 = vpop.f32.mrb[37].mxu0  ;;  %1470 = vmatprep.mubr.msk.bf16.mxu1 %vm785_vm2, %v771_v35  ;;  %v2017_v35 = vadd.f32 %v1824_v49, %v1876_v31  ;;  %v777_v36 = vpack.c.bf16 %v760_v13, %v759_v33 }
 0x157   : > { %v679_v40 = vpop.f32.mrb[38].mxu0  ;;  %v761_v38 = vmul.f32 %v2013_v18, %v2013_v18 }
 0x158   : > { %v1945_v41 = vadd.f32 %v1824_v49, %v679_v40  ;;  %v681_v43 = vpop.f32.mrb[39].mxu0  ;;  %v749_v44 = vmul.f32 %v1941_v37, %v1941_v37  ;;  %v762_v40 = vmul.f32 %v2017_v35, %v2017_v35 }
 0x15a   : > { %v750_v45 = vmul.f32 %v1945_v41, %v1945_v41  ;;  %v778_v43 = vpack.c.bf16 %v762_v40, %v761_v38 }
 0x15c   : > { %v772_v46 = vpack.c.bf16 %v750_v45, %v749_v44 }
 0x15d   : > { %v684_v47 = vpop.f32.mrb[40].mxu0 }
 0x15e   : > { %v1952_v50 = vadd.f32 %v1824_v49, %v684_v47  ;;  %v686_v53 = vpop.f32.mrb[41].mxu0  ;;  %1471 = vmatmul.mubr.msk.bf16.gmra.mrb[32].mxu1 %vm785_vm2, %v772_v46 }
 0x15f   : > { %v687_v55 = vpop.f32.mrb[42].mxu0 }
 0x160   : > { %v1956_v58 = vadd.f32 %v1824_v49, %v687_v55  ;;  %v689_v59 = vpop.f32.mrb[43].mxu0  ;;  %v751_v60 = vmul.f32 %v1952_v50, %v1952_v50 }
 0x162   : > { %v752_v61 = vmul.f32 %v1956_v58, %v1956_v58 }
 0x164   : > { %v773_v63 = vpack.c.bf16 %v752_v61, %v751_v60 }
 0x165   : > { %v692_v7 = vpop.f32.mrb[44].mxu0 }
 0x166   : > { %v1971_v8 = vadd.f32 %v1824_v49, %v692_v7  ;;  %v694_v9 = vpop.f32.mrb[45].mxu0  ;;  %1474 = vmatprep.mubr.msk.bf16.mxu1 %vm785_vm2, %v773_v63 }
 0x167   : > { %v695_v10 = vpop.f32.mrb[46].mxu0 }
 0x168   : > { %v1975_v12 = vadd.f32 %v1824_v49, %v695_v10  ;;  %v697_v15 = vpop.f32.mrb[47].mxu0  ;;  %v753_v56 = vmul.f32 %v1971_v8, %v1971_v8  ;;  %v2029_v49 = vld [vmem:[%s2172_s4] ss:$0 sm:$0xff] }
 0x16a   : > { %v754_v20 = vmul.f32 %v1975_v12, %v1975_v12 }
 0x16c   : > { %v774_v23 = vpack.c.bf16 %v754_v20, %v753_v56 }
 0x16e   : > { %1475 = vmatmul.mubr.msk.bf16.gmra.mrb[36].mxu1 %vm785_vm2, %v774_v23 }
 0x16f   : > { %1478 = vmatprep.mubr.msk.bf16.mxu1 %vm785_vm2, %v775_v25 }
 0x176   : > { %1479 = vmatmul.mubr.msk.bf16.gmra.mrb[40].mxu1 %vm785_vm2, %v776_v34 }
 0x177   : > { %1482 = vmatprep.mubr.msk.bf16.mxu1 %vm785_vm2, %v777_v36 }
 0x17e   : > { %1483 = vmatmul.mubr.msk.bf16.gmra.mrb[44].mxu1 %vm785_vm2, %v778_v43 }
 0x1f1   : > { %v1456_v26 = vpop.f32.mrb[16].mxu1 }
 0x1f2   : > { %v880_v31 = vadd.f32 %v1456_v26, %v2029_v49  ;;  %v871_v44 = vpop.f32.mrb[17].mxu1 }
 0x1f3   : > { %v872_v45 = vadd.f32 %v2029_v49, %v871_v44  ;;  %v1457_v46 = vpop.f32.mrb[18].mxu1 }
 0x1f4   : > { %1583 = vrsqrt.f32 %v880_v31  ;;  %v883_v47 = vadd.f32 %v1457_v46, %v2029_v49  ;;  %v874_v53 = vpop.f32.mrb[19].mxu1 }
 0x1f5   : > { %1585 = vrsqrt.f32 %v872_v45  ;;  %v875_v55 = vadd.f32 %v2029_v49, %v874_v53 }
 0x1f6   : > { %1587 = vrsqrt.f32 %v883_v47 }
 0x1f7   : > { %1589 = vrsqrt.f32 %v875_v55 }
 0x1fe   : > { %v1584_v59 = vpop.eup %1583 }
 0x1ff   : > { %v1586_v60 = vpop.eup %1585  ;;  %v1032_v61 = vmul.f32 %v1584_v59, %v1843_v1 }
 0x200   : > { %v1588_v63 = vpop.eup %1587  ;;  %v1030_v7 = vmul.f32 %v1586_v60, %v1829_v52 }
 0x201   : > { %v1590_v9 = vpop.eup %1589  ;;  %v1405_v10 = vpack.c.bf16 %v1032_v61, %v1032_v61  ;;  %v1033_v15 = vmul.f32 %v1588_v63, %v1849_v6  ;;  %v1460_v51 = vpop.f32.mrb[20].mxu1 }
 0x202   : > { %v1403_v17 = vpack.c.bf16 %v1030_v7, %v1030_v7  ;;  %v1031_v1 = vmul.f32 %v1590_v9, %v1834_v57  ;;  %v896_v56 = vadd.f32 %v1460_v51, %v2029_v49  ;;  %v887_v20 = vpop.f32.mrb[21].mxu1 }
 0x203   : > { %1193 = vst.msk [vmem:[%s2040_s12 + $0x8] sm:$0xf] %vm1190_vm3, %v1405_v10  ;;  %v1406_v23 = vpack.c.bf16 %v1033_v15, %v1033_v15  ;;  %v888_v25 = vadd.f32 %v2029_v49, %v887_v20  ;;  %v1461_v0 = vpop.f32.mrb[22].mxu1 }
 0x204   : > { %1191 = vst.msk [vmem:[%s2040_s12] sm:$0xf] %vm1190_vm3, %v1403_v17  ;;  %v1404_v52 = vpack.c.bf16 %v1031_v1, %v1031_v1  ;;  %1591 = vrsqrt.f32 %v896_v56  ;;  %v899_v6 = vadd.f32 %v1461_v0, %v2029_v49  ;;  %v890_v5 = vpop.f32.mrb[23].mxu1 }
 0x205   : > { %1194 = vst.msk [vmem:[%s2040_s12 + $0xc] sm:$0xf] %vm1190_vm3, %v1406_v23  ;;  %1593 = vrsqrt.f32 %v888_v25  ;;  %v891_v57 = vadd.f32 %v2029_v49, %v890_v5 }
 0x206   : > { %1192 = vst.msk [vmem:[%s2040_s12 + $0x4] sm:$0xf] %vm1190_vm3, %v1404_v52  ;;  %1595 = vrsqrt.f32 %v899_v6 }
 0x207   : > { %1597 = vrsqrt.f32 %v891_v57 }
 0x20e   : > { %v1592_v33 = vpop.eup %1591 }
 0x20f   : > { %v1594_v13 = vpop.eup %1593  ;;  %v1036_v34 = vmul.f32 %v1592_v33, %v1873_v27 }
 0x210   : > { %v1596_v36 = vpop.eup %1595  ;;  %v1034_v38 = vmul.f32 %v1594_v13, %v1858_v14 }
 0x211   : > { %v1598_v40 = vpop.eup %1597  ;;  %v1409_v43 = vpack.c.bf16 %v1036_v34, %v1036_v34  ;;  %v1037_v26 = vmul.f32 %v1596_v36, %v1879_v32  ;;  %v1464_v31 = vpop.f32.mrb[24].mxu1 }
 0x212   : > { %v1407_v44 = vpack.c.bf16 %v1034_v38, %v1034_v38  ;;  %v1035_v45 = vmul.f32 %v1598_v40, %v1864_v19  ;;  %v912_v46 = vadd.f32 %v1464_v31, %v2029_v49  ;;  %v903_v47 = vpop.f32.mrb[25].mxu1 }
 0x213   : > { %1197 = vst.msk [vmem:[%s2040_s12 + $0x18] sm:$0xf] %vm1190_vm3, %v1409_v43  ;;  %v1410_v53 = vpack.c.bf16 %v1037_v26, %v1037_v26  ;;  %v904_v27 = vadd.f32 %v2029_v49, %v903_v47  ;;  %v1465_v55 = vpop.f32.mrb[26].mxu1 }
 0x214   : > { %1195 = vst.msk [vmem:[%s2040_s12 + $0x10] sm:$0xf] %vm1190_vm3, %v1407_v44  ;;  %v1408_v14 = vpack.c.bf16 %v1035_v45, %v1035_v45  ;;  %1599 = vrsqrt.f32 %v912_v46  ;;  %v915_v32 = vadd.f32 %v1465_v55, %v2029_v49  ;;  %v906_v59 = vpop.f32.mrb[27].mxu1 }
 0x215   : > { %1198 = vst.msk [vmem:[%s2040_s12 + $0x1c] sm:$0xf] %vm1190_vm3, %v1410_v53  ;;  %1601 = vrsqrt.f32 %v904_v27  ;;  %v907_v19 = vadd.f32 %v2029_v49, %v906_v59 }
 0x216   : > { %1196 = vst.msk [vmem:[%s2040_s12 + $0x14] sm:$0xf] %vm1190_vm3, %v1408_v14  ;;  %1603 = vrsqrt.f32 %v915_v32 }
 0x217   : > { %1605 = vrsqrt.f32 %v907_v19 }
 0x21e   : > { %v1600_v60 = vpop.eup %1599 }
 0x21f   : > { %v1602_v61 = vpop.eup %1601  ;;  %v1040_v63 = vmul.f32 %v1600_v60, %v1897_v48 }
 0x220   : > { %v1604_v7 = vpop.eup %1603  ;;  %v1038_v9 = vmul.f32 %v1602_v61, %v1886_v39 }
 0x221   : > { %v1606_v10 = vpop.eup %1605  ;;  %v1413_v15 = vpack.c.bf16 %v1040_v63, %v1040_v63  ;;  %v1041_v51 = vmul.f32 %v1604_v7, %v1901_v54  ;;  %v1468_v17 = vpop.f32.mrb[28].mxu1 }
 0x222   : > { %v1411_v1 = vpack.c.bf16 %v1038_v9, %v1038_v9  ;;  %v1039_v56 = vmul.f32 %v1606_v10, %v1890_v42  ;;  %v928_v20 = vadd.f32 %v1468_v17, %v2029_v49  ;;  %v919_v23 = vpop.f32.mrb[29].mxu1 }
 0x223   : > { %1201 = vst.msk [vmem:[%s2040_s12 + $0x28] sm:$0xf] %vm1190_vm3, %v1413_v15  ;;  %v1414_v25 = vpack.c.bf16 %v1041_v51, %v1041_v51  ;;  %v920_v48 = vadd.f32 %v2029_v49, %v919_v23  ;;  %v1469_v0 = vpop.f32.mrb[30].mxu1 }
 0x224   : > { %1199 = vst.msk [vmem:[%s2040_s12 + $0x20] sm:$0xf] %vm1190_vm3, %v1411_v1  ;;  %v1412_v39 = vpack.c.bf16 %v1039_v56, %v1039_v56  ;;  %1607 = vrsqrt.f32 %v928_v20  ;;  %v931_v54 = vadd.f32 %v1469_v0, %v2029_v49  ;;  %v922_v52 = vpop.f32.mrb[31].mxu1 }
 0x225   : > { %1202 = vst.msk [vmem:[%s2040_s12 + $0x2c] sm:$0xf] %vm1190_vm3, %v1414_v25  ;;  %1609 = vrsqrt.f32 %v920_v48  ;;  %v923_v42 = vadd.f32 %v2029_v49, %v922_v52 }
 0x226   : > { %1200 = vst.msk [vmem:[%s2040_s12 + $0x24] sm:$0xf] %vm1190_vm3, %v1412_v39  ;;  %1611 = vrsqrt.f32 %v931_v54 }
 0x227   : > { %1613 = vrsqrt.f32 %v923_v42 }
 0x22e   : > { %v1608_v6 = vpop.eup %1607 }
 0x22f   : > { %v1610_v5 = vpop.eup %1609  ;;  %v1044_v57 = vmul.f32 %v1608_v6, %v1919_v11 }
 0x230   : > { %v1612_v33 = vpop.eup %1611  ;;  %v1042_v13 = vmul.f32 %v1610_v5, %v1908_v62 }
 0x231   : > { %v1614_v34 = vpop.eup %1613  ;;  %v1417_v36 = vpack.c.bf16 %v1044_v57, %v1044_v57  ;;  %v1045_v38 = vmul.f32 %v1612_v33, %v1923_v16  ;;  %v1472_v40 = vpop.f32.mrb[32].mxu1 }
 0x232   : > { %v1415_v43 = vpack.c.bf16 %v1042_v13, %v1042_v13  ;;  %v1043_v26 = vmul.f32 %v1614_v34, %v1912_v3  ;;  %v944_v31 = vadd.f32 %v1472_v40, %v2029_v49  ;;  %v935_v44 = vpop.f32.mrb[33].mxu1 }
 0x233   : > { %1205 = vst.msk [vmem:[%s2040_s12 + $0x38] sm:$0xf] %vm1190_vm3, %v1417_v36  ;;  %v1418_v45 = vpack.c.bf16 %v1045_v38, %v1045_v38  ;;  %v936_v11 = vadd.f32 %v2029_v49, %v935_v44  ;;  %v1473_v46 = vpop.f32.mrb[34].mxu1 }
 0x234   : > { %1203 = vst.msk [vmem:[%s2040_s12 + $0x30] sm:$0xf] %vm1190_vm3, %v1415_v43  ;;  %v1416_v62 = vpack.c.bf16 %v1043_v26, %v1043_v26  ;;  %1615 = vrsqrt.f32 %v944_v31  ;;  %v947_v16 = vadd.f32 %v1473_v46, %v2029_v49  ;;  %v938_v47 = vpop.f32.mrb[35].mxu1 }
 0x235   : > { %1206 = vst.msk [vmem:[%s2040_s12 + $0x3c] sm:$0xf] %vm1190_vm3, %v1418_v45  ;;  %1617 = vrsqrt.f32 %v936_v11  ;;  %v939_v3 = vadd.f32 %v2029_v49, %v938_v47 }
 0x236   : > { %1204 = vst.msk [vmem:[%s2040_s12 + $0x34] sm:$0xf] %vm1190_vm3, %v1416_v62  ;;  %1619 = vrsqrt.f32 %v947_v16 }
 0x237   : > { %1621 = vrsqrt.f32 %v939_v3 }
 0x23e   : > { %v1616_v53 = vpop.eup %1615 }
 0x23f   : > { %v1618_v27 = vpop.eup %1617  ;;  %v1048_v55 = vmul.f32 %v1616_v53, %v1941_v37 }
 0x240   : > { %v1620_v14 = vpop.eup %1619  ;;  %v1046_v32 = vmul.f32 %v1618_v27, %v1930_v24 }
 0x241   : > { %v1622_v59 = vpop.eup %1621  ;;  %v1421_v19 = vpack.c.bf16 %v1048_v55, %v1048_v55  ;;  %v1049_v60 = vmul.f32 %v1620_v14, %v1945_v41  ;;  %v1476_v61 = vpop.f32.mrb[36].mxu1 }
 0x242   : > { %v1419_v63 = vpack.c.bf16 %v1046_v32, %v1046_v32  ;;  %v1047_v7 = vmul.f32 %v1622_v59, %v1934_v29  ;;  %v960_v9 = vadd.f32 %v1476_v61, %v2029_v49  ;;  %v951_v10 = vpop.f32.mrb[37].mxu1 }
 0x243   : > { %1209 = vst.msk [vmem:[%s2040_s12 + $0x48] sm:$0xf] %vm1190_vm3, %v1421_v19  ;;  %v1422_v15 = vpack.c.bf16 %v1049_v60, %v1049_v60  ;;  %v952_v37 = vadd.f32 %v2029_v49, %v951_v10  ;;  %v1477_v51 = vpop.f32.mrb[38].mxu1 }
 0x244   : > { %1207 = vst.msk [vmem:[%s2040_s12 + $0x40] sm:$0xf] %vm1190_vm3, %v1419_v63  ;;  %v1420_v24 = vpack.c.bf16 %v1047_v7, %v1047_v7  ;;  %1623 = vrsqrt.f32 %v960_v9  ;;  %v963_v41 = vadd.f32 %v1477_v51, %v2029_v49  ;;  %v954_v17 = vpop.f32.mrb[39].mxu1 }
 0x245   : > { %1210 = vst.msk [vmem:[%s2040_s12 + $0x4c] sm:$0xf] %vm1190_vm3, %v1422_v15  ;;  %1625 = vrsqrt.f32 %v952_v37  ;;  %v955_v29 = vadd.f32 %v2029_v49, %v954_v17 }
 0x246   : > { %1208 = vst.msk [vmem:[%s2040_s12 + $0x44] sm:$0xf] %vm1190_vm3, %v1420_v24  ;;  %1627 = vrsqrt.f32 %v963_v41 }
 0x247   : > { %1629 = vrsqrt.f32 %v955_v29 }
 0x249   : > { %v1480_v1 = vpop.f32.mrb[40].mxu1 }
 0x24a   : > { %v976_v56 = vadd.f32 %v1480_v1, %v2029_v49  ;;  %v967_v20 = vpop.f32.mrb[41].mxu1 }
 0x24b   : > { %v968_v23 = vadd.f32 %v2029_v49, %v967_v20  ;;  %v1481_v25 = vpop.f32.mrb[42].mxu1 }
 0x24c   : > { %1631 = vrsqrt.f32 %v976_v56  ;;  %v979_v48 = vadd.f32 %v1481_v25, %v2029_v49  ;;  %v970_v0 = vpop.f32.mrb[43].mxu1 }
 0x24d   : > { %1633 = vrsqrt.f32 %v968_v23  ;;  %v971_v39 = vadd.f32 %v2029_v49, %v970_v0 }
 0x24e   : > { %v1624_v54 = vpop.eup %1623  ;;  %1635 = vrsqrt.f32 %v979_v48 }
 0x24f   : > { %v1626_v52 = vpop.eup %1625  ;;  %v1052_v42 = vmul.f32 %v1624_v54, %v1971_v8  ;;  %1637 = vrsqrt.f32 %v971_v39 }
 0x250   : > { %v1628_v6 = vpop.eup %1627  ;;  %v1050_v5 = vmul.f32 %v1626_v52, %v1952_v50 }
 0x251   : > { %v1630_v57 = vpop.eup %1629  ;;  %v1425_v33 = vpack.c.bf16 %v1052_v42, %v1052_v42  ;;  %v1053_v13 = vmul.f32 %v1628_v6, %v1975_v12  ;;  %v1484_v34 = vpop.f32.mrb[44].mxu1 }
 0x252   : > { %v1423_v36 = vpack.c.bf16 %v1050_v5, %v1050_v5  ;;  %v1051_v38 = vmul.f32 %v1630_v57, %v1956_v58  ;;  %v992_v40 = vadd.f32 %v1484_v34, %v2029_v49  ;;  %v983_v43 = vpop.f32.mrb[45].mxu1 }
 0x253   : > { %1213 = vst.msk [vmem:[%s2040_s12 + $0x58] sm:$0xf] %vm1190_vm3, %v1425_v33  ;;  %v1426_v8 = vpack.c.bf16 %v1053_v13, %v1053_v13  ;;  %v984_v26 = vadd.f32 %v2029_v49, %v983_v43  ;;  %v1485_v31 = vpop.f32.mrb[46].mxu1 }
 0x254   : > { %1211 = vst.msk [vmem:[%s2040_s12 + $0x50] sm:$0xf] %vm1190_vm3, %v1423_v36  ;;  %v1424_v50 = vpack.c.bf16 %v1051_v38, %v1051_v38  ;;  %1639 = vrsqrt.f32 %v992_v40  ;;  %v995_v12 = vadd.f32 %v1485_v31, %v2029_v49  ;;  %v986_v44 = vpop.f32.mrb[47].mxu1 }
 0x255   : > { %1214 = vst.msk [vmem:[%s2040_s12 + $0x5c] sm:$0xf] %vm1190_vm3, %v1426_v8  ;;  %1641 = vrsqrt.f32 %v984_v26  ;;  %v987_v58 = vadd.f32 %v2029_v49, %v986_v44 }
 0x256   : > { %v1632_v45 = vpop.eup %1631  ;;  %1212 = vst.msk [vmem:[%s2040_s12 + $0x54] sm:$0xf] %vm1190_vm3, %v1424_v50  ;;  %1643 = vrsqrt.f32 %v995_v12 }
 0x257   : > { %v1634_v11 = vpop.eup %1633  ;;  %v1056_v46 = vmul.f32 %v1632_v45, %v1987_v21  ;;  %1645 = vrsqrt.f32 %v987_v58 }
 0x258   : > { %v1636_v62 = vpop.eup %1635  ;;  %v1054_v16 = vmul.f32 %v1634_v11, %v1964_v2 }
 0x259   : > { %v1638_v47 = vpop.eup %1637  ;;  %v1429_v3 = vpack.c.bf16 %v1056_v46, %v1056_v46  ;;  %v1057_v53 = vmul.f32 %v1636_v62, %v1991_v22 }
 0x25a   : > { %v1427_v27 = vpack.c.bf16 %v1054_v16, %v1054_v16  ;;  %v1055_v49 = vmul.f32 %v1638_v47, %v1968_v4 }
 0x25b   : > { %1217 = vst.msk [vmem:[%s2040_s12 + $0x68] sm:$0xf] %vm1190_vm3, %v1429_v3  ;;  %v1430_v55 = vpack.c.bf16 %v1057_v53, %v1057_v53 }
 0x25c   : > { %1215 = vst.msk [vmem:[%s2040_s12 + $0x60] sm:$0xf] %vm1190_vm3, %v1427_v27  ;;  %v1428_v14 = vpack.c.bf16 %v1055_v49, %v1055_v49 }
 0x25d   : > { %1218 = vst.msk [vmem:[%s2040_s12 + $0x6c] sm:$0xf] %vm1190_vm3, %v1430_v55 }
 0x25e   : > { %v1640_v21 = vpop.eup %1639  ;;  %1216 = vst.msk [vmem:[%s2040_s12 + $0x64] sm:$0xf] %vm1190_vm3, %v1428_v14 }
 0x25f   : > { %v1642_v2 = vpop.eup %1641  ;;  %v1060_v22 = vmul.f32 %v1640_v21, %v2013_v18 }
 0x260   : > { %v1644_v32 = vpop.eup %1643  ;;  %v1058_v4 = vmul.f32 %v1642_v2, %v1995_v28 }
 0x261   : > { %v1646_v59 = vpop.eup %1645  ;;  %v1433_v19 = vpack.c.bf16 %v1060_v22, %v1060_v22  ;;  %v1061_v60 = vmul.f32 %v1644_v32, %v2017_v35 }
 0x262   : > { %v1431_v61 = vpack.c.bf16 %v1058_v4, %v1058_v4  ;;  %v1059_v63 = vmul.f32 %v1646_v59, %v1999_v30 }
 0x263   : > { %1221 = vst.msk [vmem:[%s2040_s12 + $0x78] sm:$0xf] %vm1190_vm3, %v1433_v19  ;;  %v1434_v7 = vpack.c.bf16 %v1061_v60, %v1061_v60 }
 0x264   : > { %1219 = vst.msk [vmem:[%s2040_s12 + $0x70] sm:$0xf] %vm1190_vm3, %v1431_v61  ;;  %v1432_v9 = vpack.c.bf16 %v1059_v63, %v1059_v63 }
 0x265   : > { %1222 = vst.msk [vmem:[%s2040_s12 + $0x7c] sm:$0xf] %vm1190_vm3, %v1434_v7 }
 0x266   : > { %1220 = vst.msk [vmem:[%s2040_s12 + $0x74] sm:$0xf] %vm1190_vm3, %v1432_v9 }
 0x267 PF: > { %s15_s18 = sadd.s32 1, %s1653_s18  }
 0x268   : > { %p12_p4 = scmp.ge.s32.totalorder %s15_s18, 4  }
 0x26a   :  { %14 = sbr.rel (!%p12_p4) target bundleno = 1 (0x1), region = 70 }

// kernel: forward.20
= control target key start
LH: loop header
LB: loop body
LE: loop exit
PB: predicated region body
PF: predicated region fallthrough
CT: control target
= control target key end

     0   :  { %s870_s18 = smov 0   ;;  %s1019_s0 = inlined_call_operand.vmem [shape: bf16[128,200], index: 0, kind: input, shape index: {}]   ;;  %s1020_s1 = inlined_call_operand.vmem [shape: bf16[200,8], index: 1, kind: input, shape index: {}]   ;;  %s1021_s2 = inlined_call_operand.vmem [shape: f32[1,8], index: 2, kind: input, shape index: {}]   ;;  %s1022_s3 = inlined_call_operand.vmem [shape: bf16[8,8], index: 3, kind: input, shape index: {}]   ;;  %s1023_s4 = inlined_call_operand.vmem [shape: f32[1,8], index: 4, kind: input, shape index: {}]   ;;  %s1024_s5 = inlined_call_operand.vmem [shape: bf16[128,8], index: 5, kind: output, shape index: {}]  }
   0x1 LB: > { %s679_s19 = sadd.s32 4294967295, %s837_s18   ;;  %p683_p0 = scmp.ge.s32.totalorder %s837_s18, 1  ;;  %s837_s18 = sphi %s870_s18, %s15_s18  }
   0x2   : > { %p189_p1 = scmp.lt.s32.totalorder %s837_s18, 3 }
   0x4   : > { %p190_p2 = pnand %p683_p0, %p189_p1 }
   0x5   : > { %v790_v0 = vld [vmem:[%s1020_s1] sm:$0xff] (!%p190_p2)   ;;  %v839_v1 = vmov (!%p190_p2), 0   ;;  %v791_v2 = vld [vmem:[%s1020_s1 + $0x8] sm:$0xff] (!%p190_p2)   ;;  %s684_s24 = sshll.u32 (!%p190_p2), %s679_s19, 3  ;;  %v792_v3 = vld [vmem:[%s1020_s1 + $0x10] sm:$0xff] (!%p190_p2)   ;;  %vm385_vm0 = vcmask (!%p190_p2), 588800  }
   0x6   : > { %193 = sbr.rel (%p190_p2) target bundleno = 528 (0x210), region = 40  ;;  %402 = vmatprep.subr.bf16.mxu0 (!%p190_p2), %v839_v1  ;;  %754 = vmatprep.subr.bf16.mxu1 (!%p190_p2), %v839_v1  ;;  %p219_p3 = scmp.lt.s32.totalorder (!%p190_p2), %s684_s24, 15  ;;  %v793_v4 = vld [vmem:[%s1020_s1 + $0x18] sm:$0xff] (!%p190_p2)   ;;  %v794_v6 = vld [vmem:[%s1020_s1 + $0x20] sm:$0xff] (!%p190_p2)   ;;  %v795_v8 = vld [vmem:[%s1020_s1 + $0x28] sm:$0xff] (!%p190_p2)   ;;  %vm398_vm1 = vcmask (!%p190_p2), 1043456  }
   0x7   : > { %403 = vmatpush1.bf16.msra.mxu0 (!%p190_p2), %v790_v0  ;;  %767 = vmatpush1.bf16.msra.mxu1 (!%p190_p2), %v790_v0  ;;  %v796_v9 = vld [vmem:[%s1020_s1 + $0x30] sm:$0xff] (!%p190_p2)   ;;  %v797_v10 = vld [vmem:[%s1020_s1 + $0x38] sm:$0xff] (!%p190_p2)   ;;  %v798_v11 = vld [vmem:[%s1020_s1 + $0x40] sm:$0xff] (!%p190_p2)   ;;  %vm485_vm2 = vcmask (!%p190_p2), 64512   ;;  %vm614_vm3 = vcmask (!%p190_p2), 60416  }
   0x8   : > { %404 = vmatprep.subr.bf16.mxu0 (!%p190_p2), %v839_v1  ;;  %755 = vmatprep.subr.bf16.mxu1 (!%p190_p2), %v839_v1  ;;  %v799_v12 = vld [vmem:[%s1020_s1 + $0x48] sm:$0xff] (!%p190_p2)   ;;  %v800_v13 = vld [vmem:[%s1020_s1 + $0x50] sm:$0xff] (!%p190_p2)   ;;  %v801_v14 = vld [vmem:[%s1020_s1 + $0x58] sm:$0xff] (!%p190_p2)  }
   0x9   : > { %v802_v15 = vld [vmem:[%s1020_s1 + $0x60] ss:$0 sps:$4 sm:$0xff] (!%p190_p2)  }
   0xa   : > { %v400_v16 = vsel (!%p190_p2), %vm398_vm1, %v802_v15, 0  ;;  %v232_v23 = vld [vmem:[%s1022_s3] sm:$0xf] (!%p190_p2) }
   0xb   : > { %405 = vmatpush1.bf16.msra.mxu0 (!%p190_p2), %v791_v2  ;;  %768 = vmatpush1.bf16.msra.mxu1 (!%p190_p2), %v791_v2  ;;  %v499_v24 = vsel (!%p190_p2), %vm398_vm1, %v232_v23, 0  ;;  %v689_v25 = vld [vmem:[%s1021_s2] ss:$0 sm:$0xff] (!%p190_p2) }
   0xc   : > { %406 = vmatprep.subr.bf16.mxu0 (!%p190_p2), %v839_v1  ;;  %756 = vmatprep.subr.bf16.mxu1 (!%p190_p2), %v839_v1  ;;  %v715_v62 = vld [vmem:[%s1023_s4] ss:$0 sm:$0xff] (!%p190_p2) }
   0xd   : > { %s1026_s24 = smov (!%p219_p3, %s684_s24), 15 }
   0xe   : > { %s730_s27 = sshll.u32 %s1026_s24, 3  ;;  %s688_s9 = sshll.u32 %s1026_s24, 2 }
   0xf   : > { %407 = vmatpush1.bf16.msra.mxu0 %v792_v3  ;;  %769 = vmatpush1.bf16.msra.mxu1 %v792_v3  ;;  %s902_s7 = scalar_lea.vmem %s1019_s0, %s730_s27  ;;  %s229_s12 = scalar_lea.vmem %s1024_s5, %s688_s9 }
  0x10   : > { %408 = vmatprep.subr.bf16.mxu0 %v839_v1  ;;  %757 = vmatprep.subr.bf16.mxu1 %v839_v1  ;;  %v805_v5 = vld [vmem:[%s902_s7 + $0x4] ss:$8 sps:$4 sm:$0xff]   ;;  %v811_v7 = vld [vmem:[%s902_s7 + $0x34] ss:$8 sps:$4 sm:$0xff]   ;;  %v803_v17 = vld [vmem:[%s902_s7] ss:$8 sps:$4 sm:$0xff]  }
  0x11   : > { %711 = vmatprep.mubr.msk.bf16.mxu0 %vm385_vm0, %v805_v5  ;;  %714 = vmatprep.mubr.msk.bf16.mxu1 %vm385_vm0, %v811_v7  ;;  %v809_v18 = vld [vmem:[%s902_s7 + $0x30] ss:$8 sps:$4 sm:$0xff]   ;;  %v806_v19 = vld [vmem:[%s902_s7 + $0x14] ss:$8 sps:$4 sm:$0xff]   ;;  %v812_v21 = vld [vmem:[%s902_s7 + $0x24] ss:$8 sps:$4 sm:$0xff]  }
  0x12   : > { %v808_v20 = vld [vmem:[%s902_s7 + $0x10] ss:$8 sps:$4 sm:$0xff]   ;;  %v814_v22 = vld [vmem:[%s902_s7 + $0x20] ss:$8 sps:$4 sm:$0xff]  }
  0x13   : > { %409 = vmatpush1.bf16.msra.mxu0 %v793_v4  ;;  %770 = vmatpush1.bf16.msra.mxu1 %v793_v4 }
  0x14   : > { %410 = vmatprep.subr.bf16.mxu0 %v839_v1  ;;  %758 = vmatprep.subr.bf16.mxu1 %v839_v1 }
  0x17   : > { %411 = vmatpush1.bf16.msra.mxu0 %v794_v6  ;;  %771 = vmatpush1.bf16.msra.mxu1 %v794_v6 }
  0x18   : > { %412 = vmatprep.subr.bf16.mxu0 %v839_v1  ;;  %759 = vmatprep.subr.bf16.mxu1 %v839_v1 }
  0x1b   : > { %413 = vmatpush1.bf16.msra.mxu0 %v795_v8  ;;  %772 = vmatpush1.bf16.msra.mxu1 %v795_v8 }
  0x1c   : > { %414 = vmatprep.subr.bf16.mxu0 %v839_v1  ;;  %760 = vmatprep.subr.bf16.mxu1 %v839_v1 }
  0x1f   : > { %415 = vmatpush1.bf16.msra.mxu0 %v796_v9  ;;  %773 = vmatpush1.bf16.msra.mxu1 %v796_v9 }
  0x20   : > { %416 = vmatprep.subr.bf16.mxu0 %v839_v1  ;;  %761 = vmatprep.subr.bf16.mxu1 %v839_v1 }
  0x23   : > { %417 = vmatpush1.bf16.msra.mxu0 %v797_v10  ;;  %774 = vmatpush1.bf16.msra.mxu1 %v797_v10 }
  0x24   : > { %418 = vmatprep.subr.bf16.mxu0 %v839_v1  ;;  %762 = vmatprep.subr.bf16.mxu1 %v839_v1 }
  0x27   : > { %419 = vmatpush1.bf16.msra.mxu0 %v798_v11  ;;  %775 = vmatpush1.bf16.msra.mxu1 %v798_v11 }
  0x28   : > { %420 = vmatprep.subr.bf16.mxu0 %v839_v1  ;;  %763 = vmatprep.subr.bf16.mxu1 %v839_v1 }
  0x2b   : > { %421 = vmatpush1.bf16.msra.mxu0 %v799_v12  ;;  %776 = vmatpush1.bf16.msra.mxu1 %v799_v12 }
  0x2c   : > { %422 = vmatprep.subr.bf16.mxu0 %v839_v1  ;;  %764 = vmatprep.subr.bf16.mxu1 %v839_v1 }
  0x2f   : > { %423 = vmatpush1.bf16.msra.mxu0 %v800_v13  ;;  %777 = vmatpush1.bf16.msra.mxu1 %v800_v13 }
  0x30   : > { %424 = vmatprep.subr.bf16.mxu0 %v839_v1  ;;  %765 = vmatprep.subr.bf16.mxu1 %v839_v1 }
  0x33   : > { %425 = vmatpush1.bf16.msra.mxu0 %v801_v14  ;;  %778 = vmatpush1.bf16.msra.mxu1 %v801_v14 }
  0x34   : > { %426 = vmatprep.subr.bf16.mxu0 %v839_v1  ;;  %766 = vmatprep.subr.bf16.mxu1 %v839_v1 }
  0x37   : > { %427 = vmatpush1.bf16.msra.mxu0 %v400_v16  ;;  %779 = vmatpush1.bf16.msra.mxu1 %v400_v16 }
  0x38   : > { %780 = vmatprep.subr.msk.bf16.mxu1 %vm398_vm1, %v232_v23 }
  0x3a   : > { %435 = vmatmul.mubr.bf16.vlgmr.msra.gmra.mrb[0].mxu0 %v803_v17  ;;  %459 = vmatmul.mubr.bf16.vlgmr.msra.gmra.mrb[0].mxu1 %v809_v18 }
  0x3b   : > { %712 = vmatprep.mubr.msk.bf16.mxu0 %vm385_vm0, %v806_v19  ;;  %745 = vmatpush3.bf16.msra.mxu1 %v499_v24 }
  0x42   : > { %443 = vmatmul.mubr.bf16.gmra.mrb[4].mxu0 %v808_v20 }
  0x43   : > { %713 = vmatprep.mubr.msk.bf16.mxu0 %vm385_vm0, %v812_v21 }
  0x4a   : > { %451 = vmatmul.mubr.bf16.gmra.mrb[8].mxu0 %v814_v22 }
 0x10d   : > { %v436_v26 = vpop.f32.mrb[0].mxu0  ;;  %v460_v27 = vpop.f32.mrb[0].mxu1 }
 0x10e   : > { %v972_v28 = vadd.f32 %v689_v25, %v436_v26  ;;  %v438_v29 = vpop.f32.mrb[1].mxu0  ;;  %v462_v30 = vpop.f32.mrb[1].mxu1  ;;  %v981_v48 = vadd.f32 %v689_v25, %v460_v27 }
 0x10f   : > { %v439_v31 = vpop.f32.mrb[2].mxu0  ;;  %v463_v32 = vpop.f32.mrb[2].mxu1 }
 0x110   : > { %v974_v33 = vadd.f32 %v689_v25, %v439_v31  ;;  %v441_v34 = vpop.f32.mrb[3].mxu0  ;;  %v465_v35 = vpop.f32.mrb[3].mxu1  ;;  %v467_v36 = vmul.f32 %v972_v28, %v972_v28  ;;  %v983_v50 = vadd.f32 %v689_v25, %v463_v32  ;;  %v473_v56 = vmul.f32 %v981_v48, %v981_v48 }
 0x112   : > { %v468_v37 = vmul.f32 %v974_v33, %v974_v33  ;;  %v474_v57 = vmul.f32 %v983_v50, %v983_v50 }
 0x114   : > { %v475_v38 = vpack.c.bf16 %v468_v37, %v467_v36  ;;  %v478_v61 = vpack.c.bf16 %v474_v57, %v473_v56 }
 0x115   : > { %v444_v39 = vpop.f32.mrb[4].mxu0 }
 0x116   : > { %v445_v40 = vadd.f32 %v689_v25, %v444_v39  ;;  %v446_v41 = vpop.f32.mrb[5].mxu0  ;;  %746 = vmatprep.mubr.msk.bf16.mxu1 %vm485_vm2, %v475_v38 }
 0x117   : > { %v447_v42 = vpop.f32.mrb[6].mxu0 }
 0x118   : > { %v448_v43 = vadd.f32 %v689_v25, %v447_v42  ;;  %v449_v44 = vpop.f32.mrb[7].mxu0  ;;  %v469_v45 = vmul.f32 %v445_v40, %v445_v40 }
 0x11a   : > { %v470_v46 = vmul.f32 %v448_v43, %v448_v43 }
 0x11c   : > { %v476_v47 = vpack.c.bf16 %v470_v46, %v469_v45 }
 0x11d   : > { %v452_v49 = vpop.f32.mrb[8].mxu0 }
 0x11e   : > { %v453_v51 = vadd.f32 %v689_v25, %v452_v49  ;;  %v454_v52 = vpop.f32.mrb[9].mxu0  ;;  %747 = vmatmul.mubr.msk.bf16.vlgmr.msra.gmra.mrb[4].mxu1 %vm485_vm2, %v476_v47 }
 0x11f   : > { %v455_v53 = vpop.f32.mrb[10].mxu0 }
 0x120   : > { %v986_v54 = vadd.f32 %v689_v25, %v455_v53  ;;  %v457_v55 = vpop.f32.mrb[11].mxu0  ;;  %v471_v58 = vmul.f32 %v453_v51, %v453_v51 }
 0x122   : > { %v472_v59 = vmul.f32 %v986_v54, %v986_v54 }
 0x124   : > { %v477_v60 = vpack.c.bf16 %v472_v59, %v471_v58 }
 0x126   : > { %750 = vmatprep.mubr.msk.bf16.mxu1 %vm485_vm2, %v477_v60 }
 0x127   : > { %751 = vmatmul.mubr.msk.bf16.gmra.mrb[8].mxu1 %vm485_vm2, %v478_v61 }
 0x1f1   : > { %v748_v63 = vpop.f32.mrb[4].mxu1 }
 0x1f2   : > { %v544_v0 = vadd.f32 %v748_v63, %v715_v62  ;;  %v535_v1 = vpop.f32.mrb[5].mxu1 }
 0x1f3   : > { %v536_v2 = vadd.f32 %v715_v62, %v535_v1  ;;  %v749_v3 = vpop.f32.mrb[6].mxu1 }
 0x1f4   : > { %815 = vrsqrt.f32 %v544_v0  ;;  %v547_v4 = vadd.f32 %v749_v3, %v715_v62  ;;  %v538_v5 = vpop.f32.mrb[7].mxu1 }
 0x1f5   : > { %817 = vrsqrt.f32 %v536_v2  ;;  %v539_v6 = vadd.f32 %v715_v62, %v538_v5 }
 0x1f6   : > { %819 = vrsqrt.f32 %v547_v4 }
 0x1f7   : > { %821 = vrsqrt.f32 %v539_v6 }
 0x1fa   : > { %v752_v7 = vpop.f32.mrb[8].mxu1 }
 0x1fb   : > { %v560_v8 = vadd.f32 %v752_v7, %v715_v62  ;;  %v551_v9 = vpop.f32.mrb[9].mxu1 }
 0x1fc   : > { %v552_v10 = vadd.f32 %v715_v62, %v551_v9  ;;  %v753_v11 = vpop.f32.mrb[10].mxu1 }
 0x1fd   : > { %823 = vrsqrt.f32 %v560_v8  ;;  %v563_v12 = vadd.f32 %v753_v11, %v715_v62  ;;  %v554_v13 = vpop.f32.mrb[11].mxu1 }
 0x1fe   : > { %v816_v14 = vpop.eup %815  ;;  %825 = vrsqrt.f32 %v552_v10  ;;  %v555_v15 = vadd.f32 %v715_v62, %v554_v13 }
 0x1ff   : > { %v818_v16 = vpop.eup %817  ;;  %v576_v17 = vmul.f32 %v816_v14, %v445_v40  ;;  %827 = vrsqrt.f32 %v563_v12 }
 0x200   : > { %v820_v18 = vpop.eup %819  ;;  %v574_v19 = vmul.f32 %v818_v16, %v972_v28  ;;  %829 = vrsqrt.f32 %v555_v15 }
 0x201   : > { %v822_v20 = vpop.eup %821  ;;  %v733_v21 = vpack.c.bf16 %v576_v17, %v576_v17  ;;  %v577_v22 = vmul.f32 %v820_v18, %v448_v43 }
 0x202   : > { %v731_v23 = vpack.c.bf16 %v574_v19, %v574_v19  ;;  %v575_v24 = vmul.f32 %v822_v20, %v974_v33 }
 0x203   : > { %617 = vst.msk [vmem:[%s229_s12 + $0x8] sm:$0xf] %vm614_vm3, %v733_v21  ;;  %v734_v25 = vpack.c.bf16 %v577_v22, %v577_v22 }
 0x204   : > { %615 = vst.msk [vmem:[%s229_s12] sm:$0xf] %vm614_vm3, %v731_v23  ;;  %v732_v26 = vpack.c.bf16 %v575_v24, %v575_v24 }
 0x205   : > { %618 = vst.msk [vmem:[%s229_s12 + $0xc] sm:$0xf] %vm614_vm3, %v734_v25 }
 0x206   : > { %616 = vst.msk [vmem:[%s229_s12 + $0x4] sm:$0xf] %vm614_vm3, %v732_v26 }
 0x207   : > { %v824_v27 = vpop.eup %823 }
 0x208   : > { %v826_v29 = vpop.eup %825  ;;  %v580_v28 = vmul.f32 %v824_v27, %v981_v48 }
 0x209   : > { %v828_v30 = vpop.eup %827  ;;  %v578_v31 = vmul.f32 %v826_v29, %v453_v51 }
 0x20a   : > { %v830_v32 = vpop.eup %829  ;;  %v737_v34 = vpack.c.bf16 %v580_v28, %v580_v28  ;;  %v581_v33 = vmul.f32 %v828_v30, %v983_v50 }
 0x20b   : > { %v735_v35 = vpack.c.bf16 %v578_v31, %v578_v31  ;;  %v579_v36 = vmul.f32 %v830_v32, %v986_v54 }
 0x20c   : > { %621 = vst.msk [vmem:[%s229_s12 + $0x18] sm:$0xf] %vm614_vm3, %v737_v34  ;;  %v738_v37 = vpack.c.bf16 %v581_v33, %v581_v33 }
 0x20d   : > { %619 = vst.msk [vmem:[%s229_s12 + $0x10] sm:$0xf] %vm614_vm3, %v735_v35  ;;  %v736_v38 = vpack.c.bf16 %v579_v36, %v579_v36 }
 0x20e   : > { %622 = vst.msk [vmem:[%s229_s12 + $0x1c] sm:$0xf] %vm614_vm3, %v738_v37 }
 0x20f   : > { %620 = vst.msk [vmem:[%s229_s12 + $0x14] sm:$0xf] %vm614_vm3, %v736_v38 }
 0x210 PF: > { %s15_s18 = sadd.s32 1, %s837_s18  }
 0x211   : > { %p12_p4 = scmp.ge.s32.totalorder %s15_s18, 4  }
 0x213   :  { %14 = sbr.rel (!%p12_p4) target bundleno = 1 (0x1), region = 70 }

// kernel: forward.21
= control target key start
LH: loop header
LB: loop body
LE: loop exit
PB: predicated region body
PF: predicated region fallthrough
CT: control target
= control target key end

     0   :  { %s488_s12 = smov 0   ;;  %s558_s0 = inlined_call_operand.vmem [shape: bf16[32,200], index: 0, kind: input, shape index: {}]   ;;  %s559_s1 = inlined_call_operand.vmem [shape: bf16[200,16], index: 1, kind: input, shape index: {}]   ;;  %s560_s2 = inlined_call_operand.vmem [shape: f32[1,16], index: 2, kind: input, shape index: {}]   ;;  %s561_s3 = inlined_call_operand.vmem [shape: f32[32,16], index: 3, kind: output, shape index: {}]  }
   0x1 LB: > { %s404_s13 = sadd.s32 4294967295, %s465_s12   ;;  %p408_p0 = scmp.ge.s32.totalorder %s465_s12, 1  ;;  %s465_s12 = sphi %s488_s12, %s13_s12  }
   0x2   : > { %p139_p1 = scmp.lt.s32.totalorder %s465_s12, 3 }
   0x4   : > { %p140_p2 = pnand %p408_p0, %p139_p1 }
   0x5   : > { %v443_v0 = vld [vmem:[%s559_s1] sm:$0xff] (!%p140_p2)   ;;  %v467_v1 = vmov (!%p140_p2), 0   ;;  %v444_v2 = vld [vmem:[%s559_s1 + $0x8] sm:$0xff] (!%p140_p2)   ;;  %s409_s18 = sshll.u32 (!%p140_p2), %s404_s13, 1  ;;  %v445_v3 = vld [vmem:[%s559_s1 + $0x10] sm:$0xff] (!%p140_p2)   ;;  %vm296_vm0 = vcmask (!%p140_p2), 588800  }
   0x6   : > { %143 = sbr.rel (%p140_p2) target bundleno = 275 (0x113), region = 32  ;;  %304 = vmatprep.subr.bf16.mxu0 (!%p140_p2), %v467_v1  ;;  %p165_p3 = scmp.lt.s32.totalorder (!%p140_p2), %s409_s18, 3  ;;  %v446_v4 = vld [vmem:[%s559_s1 + $0x18] sm:$0xff] (!%p140_p2)   ;;  %v447_v6 = vld [vmem:[%s559_s1 + $0x20] sm:$0xff] (!%p140_p2)   ;;  %v448_v7 = vld [vmem:[%s559_s1 + $0x28] sm:$0xff] (!%p140_p2)   ;;  %vm300_vm1 = vcmask (!%p140_p2), 1043456  }
   0x7   : > { %305 = vmatpush1.bf16.msra.mxu0 (!%p140_p2), %v443_v0  ;;  %v449_v8 = vld [vmem:[%s559_s1 + $0x30] sm:$0xff] (!%p140_p2)   ;;  %v450_v9 = vld [vmem:[%s559_s1 + $0x38] sm:$0xff] (!%p140_p2)   ;;  %v451_v10 = vld [vmem:[%s559_s1 + $0x40] sm:$0xff] (!%p140_p2)   ;;  %vm345_vm2 = vcmask (!%p140_p2), 130048  }
   0x8   : > { %306 = vmatprep.subr.bf16.mxu0 (!%p140_p2), %v467_v1  ;;  %v452_v11 = vld [vmem:[%s559_s1 + $0x48] sm:$0xff] (!%p140_p2)   ;;  %v453_v12 = vld [vmem:[%s559_s1 + $0x50] sm:$0xff] (!%p140_p2)   ;;  %v454_v13 = vld [vmem:[%s559_s1 + $0x58] sm:$0xff] (!%p140_p2)  }
   0x9   : > { %v455_v14 = vld [vmem:[%s559_s1 + $0x60] ss:$0 sps:$4 sm:$0xff] (!%p140_p2)  }
   0xa   : > { %v302_v15 = vsel (!%p140_p2), %vm300_vm1, %v455_v14, 0  ;;  %v414_v17 = vld [vmem:[%s560_s2] ss:$0 sm:$0xff] (!%p140_p2) }
   0xb   : > { %307 = vmatpush1.bf16.msra.mxu0 (!%p140_p2), %v444_v2 }
   0xc   : > { %308 = vmatprep.subr.bf16.mxu0 (!%p140_p2), %v467_v1 }
   0xd   : > { %s563_s18 = smov (!%p165_p3, %s409_s18), 3 }
   0xe   : > { %s433_s21 = sshll.u32 %s563_s18, 3 }
   0xf   : > { %309 = vmatpush1.bf16.msra.mxu0 %v445_v3  ;;  %s516_s26 = scalar_lea.vmem %s558_s0, %s433_s21  ;;  %s175_s25 = scalar_lea.vmem %s561_s3, %s433_s21 }
  0x10   : > { %310 = vmatprep.subr.bf16.mxu0 %v467_v1  ;;  %v458_v5 = vld [vmem:[%s516_s26 + $0x4] ss:$8 sps:$4 sm:$0xff]   ;;  %v456_v16 = vld [vmem:[%s516_s26] ss:$8 sps:$4 sm:$0xff]  }
  0x11   : > { %430 = vmatprep.mubr.msk.bf16.mxu0 %vm296_vm0, %v458_v5 }
  0x13   : > { %311 = vmatpush1.bf16.msra.mxu0 %v446_v4 }
  0x14   : > { %312 = vmatprep.subr.bf16.mxu0 %v467_v1 }
  0x17   : > { %313 = vmatpush1.bf16.msra.mxu0 %v447_v6 }
  0x18   : > { %314 = vmatprep.subr.bf16.mxu0 %v467_v1 }
  0x1b   : > { %315 = vmatpush1.bf16.msra.mxu0 %v448_v7 }
  0x1c   : > { %316 = vmatprep.subr.bf16.mxu0 %v467_v1 }
  0x1f   : > { %317 = vmatpush1.bf16.msra.mxu0 %v449_v8 }
  0x20   : > { %318 = vmatprep.subr.bf16.mxu0 %v467_v1 }
  0x23   : > { %319 = vmatpush1.bf16.msra.mxu0 %v450_v9 }
  0x24   : > { %320 = vmatprep.subr.bf16.mxu0 %v467_v1 }
  0x27   : > { %321 = vmatpush1.bf16.msra.mxu0 %v451_v10 }
  0x28   : > { %322 = vmatprep.subr.bf16.mxu0 %v467_v1 }
  0x2b   : > { %323 = vmatpush1.bf16.msra.mxu0 %v452_v11 }
  0x2c   : > { %324 = vmatprep.subr.bf16.mxu0 %v467_v1 }
  0x2f   : > { %325 = vmatpush1.bf16.msra.mxu0 %v453_v12 }
  0x30   : > { %326 = vmatprep.subr.bf16.mxu0 %v467_v1 }
  0x33   : > { %327 = vmatpush1.bf16.msra.mxu0 %v454_v13 }
  0x34   : > { %328 = vmatprep.subr.bf16.mxu0 %v467_v1 }
  0x37   : > { %329 = vmatpush1.bf16.msra.mxu0 %v302_v15 }
  0x3a   : > { %337 = vmatmul.mubr.bf16.vlgmr.msra.gmra.mrb[0].mxu0 %v456_v16 }
 0x10d   : > { %v338_v18 = vpop.f32.mrb[0].mxu0 }
 0x10e   : > { %v339_v19 = vadd.f32 %v414_v17, %v338_v18  ;;  %v340_v20 = vpop.f32.mrb[1].mxu0 }
 0x10f   : > { %v341_v21 = vpop.f32.mrb[2].mxu0 }
 0x110   : > { %346 = vst.msk [vmem:[%s175_s25] sm:$0xff] %vm345_vm2, %v339_v19  ;;  %v342_v22 = vadd.f32 %v414_v17, %v341_v21  ;;  %v343_v23 = vpop.f32.mrb[3].mxu0 }
 0x112   : > { %347 = vst.msk [vmem:[%s175_s25 + $0x8] sm:$0xff] %vm345_vm2, %v342_v22 }
 0x113 PF: > { %s13_s12 = sadd.s32 1, %s465_s12  }
 0x114   : > { %p10_p4 = scmp.ge.s32.totalorder %s13_s12, 4  }
 0x116   :  { %12 = sbr.rel (!%p10_p4) target bundleno = 1 (0x1), region = 62 }

// kernel: forward.31
= control target key start
LH: loop header
LB: loop body
LE: loop exit
PB: predicated region body
PF: predicated region fallthrough
CT: control target
= control target key end

     0   :  { %s636_s18 = smov 0   ;;  %s696_s0 = inlined_call_operand.vmem [shape: bf16[32,144], index: 0, kind: input, shape index: {}]   ;;  %s697_s1 = inlined_call_operand.vmem [shape: bf16[144,32], index: 1, kind: input, shape index: {}]   ;;  %s698_s2 = inlined_call_operand.vmem [shape: f32[1,32], index: 2, kind: input, shape index: {}]   ;;  %s699_s3 = inlined_call_operand.vmem [shape: bf16[32,32], index: 3, kind: input, shape index: {}]   ;;  %s700_s4 = inlined_call_operand.vmem [shape: f32[1,32], index: 4, kind: input, shape index: {}]   ;;  %s701_s5 = inlined_call_operand.vmem [shape: bf16[32,32], index: 5, kind: output, shape index: {}]  }
   0x1 LB: > { %s521_s19 = sadd.s32 4294967295, %s601_s18   ;;  %p525_p0 = scmp.ge.s32.totalorder %s601_s18, 1  ;;  %s601_s18 = sphi %s636_s18, %s15_s18  }
   0x2   : > { %p189_p1 = scmp.lt.s32.totalorder %s601_s18, 3 }
   0x4   : > { %p190_p2 = pnand %p525_p0, %p189_p1 }
   0x5   : > { %v577_v0 = vld [vmem:[%s697_s1] sm:$0xff] (!%p190_p2)   ;;  %v603_v1 = vmov (!%p190_p2), 0   ;;  %s526_s22 = sshll.u32 (!%p190_p2), %s521_s19, 1  ;;  %v578_v2 = vld [vmem:[%s697_s1 + $0x8] sm:$0xff] (!%p190_p2)   ;;  %v579_v3 = vld [vmem:[%s697_s1 + $0x10] sm:$0xff] (!%p190_p2)   ;;  %vm327_vm0 = vcmask (!%p190_p2), 130048  }
   0x6   : > { %193 = sbr.rel (%p190_p2) target bundleno = 498 (0x1f2), region = 40  ;;  %331 = vmatprep.subr.bf16.mxu0 (!%p190_p2), %v603_v1  ;;  %p219_p3 = scmp.lt.s32.totalorder (!%p190_p2), %s526_s22, 3  ;;  %v580_v4 = vld [vmem:[%s697_s1 + $0x18] sm:$0xff] (!%p190_p2)   ;;  %v581_v6 = vld [vmem:[%s697_s1 + $0x20] sm:$0xff] (!%p190_p2)   ;;  %v582_v7 = vld [vmem:[%s697_s1 + $0x28] sm:$0xff] (!%p190_p2)   ;;  %v604_v13 = vmov (!%p190_p2), 0.0  }
   0x7   : > { %332 = vmatpush1.bf16.msra.mxu0 (!%p190_p2), %v577_v0  ;;  %v583_v8 = vld [vmem:[%s697_s1 + $0x30] sm:$0xff] (!%p190_p2)   ;;  %v584_v9 = vld [vmem:[%s697_s1 + $0x38] sm:$0xff] (!%p190_p2)   ;;  %v585_v10 = vld [vmem:[%s697_s1 + $0x40] sm:$0xff] (!%p190_p2)   ;;  %558 = vmatprep.subr.bf16.mxu1 (!%p190_p2), %v604_v13  ;;  %vm605_vm1 = vmmov (!%p190_p2), 0   ;;  %vm393_vm2 = vcmask (!%p190_p2), 261120   ;;  %vm462_vm6 = vcmask (!%p190_p2), 257024  }
   0x8   : > { %333 = vmatprep.subr.bf16.mxu0 (!%p190_p2), %v603_v1  ;;  %v589_v12 = vld [vmem:[%s699_s3] sm:$0xff] (!%p190_p2)   ;;  %v590_v14 = vld [vmem:[%s699_s3 + $0x8] sm:$0xff] (!%p190_p2)   ;;  %562 = vmatprep.mubr.msk.bf16.mxu1 (!%p190_p2), %vm605_vm1, %v604_v13 }
   0x9   : > { %559 = vmatpush3.bf16.msra.mxu1 (!%p190_p2), %v589_v12  ;;  %v531_v15 = vld [vmem:[%s698_s2] ss:$0 sm:$0xff] (!%p190_p2) }
   0xa   : > { %560 = vmatprep.subr.bf16.mxu1 (!%p190_p2), %v604_v13  ;;  %v544_v25 = vld [vmem:[%s700_s4] ss:$0 sm:$0xff] (!%p190_p2) }
   0xb   : > { %334 = vmatpush1.bf16.msra.mxu0 (!%p190_p2), %v578_v2 }
   0xc   : > { %335 = vmatprep.subr.bf16.mxu0 (!%p190_p2), %v603_v1 }
   0xd   : > { %s703_s22 = smov (!%p219_p3, %s526_s22), 3  ;;  %561 = vmatpush3.bf16.msra.mxu1 %v590_v14 }
   0xe   : > { %s552_s27 = sshll.u32 %s703_s22, 3  ;;  %s530_s28 = sshll.u32 %s703_s22, 2 }
   0xf   : > { %s223_s30 = scalar_lea.vmem %s696_s0, %s552_s27  ;;  %336 = vmatpush1.bf16.msra.mxu0 %v579_v3  ;;  %s229_s6 = scalar_lea.vmem %s701_s5, %s530_s28 }
  0x10   : > { %v588_v5 = vld [vmem:[%s223_s30 + $0x4] ss:$8 sps:$4 sm:$0xff]   ;;  %337 = vmatprep.subr.bf16.mxu0 %v603_v1  ;;  %v586_v11 = vld [vmem:[%s223_s30] ss:$8 sps:$4 sm:$0xff]  }
  0x11   : > { %543 = vmatprep.mubr.msk.bf16.mxu0 %vm327_vm0, %v588_v5 }
  0x13   : > { %338 = vmatpush1.bf16.msra.mxu0 %v580_v4 }
  0x14   : > { %339 = vmatprep.subr.bf16.mxu0 %v603_v1 }
  0x17   : > { %340 = vmatpush1.bf16.msra.mxu0 %v581_v6 }
  0x18   : > { %341 = vmatprep.subr.bf16.mxu0 %v603_v1 }
  0x1b   : > { %342 = vmatpush1.bf16.msra.mxu0 %v582_v7 }
  0x1c   : > { %343 = vmatprep.subr.bf16.mxu0 %v603_v1 }
  0x1f   : > { %344 = vmatpush1.bf16.msra.mxu0 %v583_v8 }
  0x20   : > { %345 = vmatprep.subr.bf16.mxu0 %v603_v1 }
  0x23   : > { %346 = vmatpush1.bf16.msra.mxu0 %v584_v9 }
  0x24   : > { %347 = vmatprep.subr.bf16.mxu0 %v603_v1 }
  0x27   : > { %348 = vmatpush1.bf16.msra.mxu0 %v585_v10 }
  0x2a   : > { %364 = vmatmul.mubr.bf16.vlgmr.msra.gmra.mrb[0].mxu0 %v586_v11 }
  0xfd   : > { %v365_v16 = vpop.f32.mrb[0].mxu0 }
  0xfe   : > { %v366_v17 = vadd.f32 %v531_v15, %v365_v16  ;;  %v367_v18 = vpop.f32.mrb[1].mxu0 }
  0xff   : > { %v368_v19 = vpop.f32.mrb[2].mxu0 }
 0x100   : > { %v369_v20 = vadd.f32 %v531_v15, %v368_v19  ;;  %v370_v21 = vpop.f32.mrb[3].mxu0  ;;  %v372_v22 = vmul.f32 %v366_v17, %v366_v17 }
 0x102   : > { %v373_v23 = vmul.f32 %v369_v20, %v369_v20 }
 0x104   : > { %v374_v24 = vpack.c.bf16 %v373_v23, %v372_v22 }
 0x106   : > { %563 = vmatmul.mubr.msk.bf16.vlgmr.msra.gmra.mrb[0].mxu1 %vm393_vm2, %v374_v24 }
 0x1d9   : > { %v431_v26 = vpop.f32.mrb[0].mxu1 }
 0x1da   : > { %v432_v27 = vadd.f32 %v544_v25, %v431_v26  ;;  %v564_v28 = vpop.f32.mrb[1].mxu1 }
 0x1db   : > { %v434_v29 = vpop.f32.mrb[2].mxu1 }
 0x1dc   : > { %591 = vrsqrt.f32 %v432_v27  ;;  %v565_v30 = vpop.f32.mrb[3].mxu1  ;;  %v435_v31 = vadd.f32 %v544_v25, %v434_v29  ;;  %vm440_vm3 = vcmp.eq.f32.partialorder %v432_v27, inf  ;;  %v443_v34 = vand.u32 2147483648, %v432_v27 }
 0x1dd   : > { %vm442_vm4 = vcmp.eq.f32.partialorder %v432_v27, 0.0 }
 0x1de   : > { %593 = vrsqrt.f32 %v435_v31  ;;  %vm447_vm5 = vcmp.eq.f32.partialorder %v435_v31, inf  ;;  %v450_v40 = vand.u32 2147483648, %v435_v31  ;;  %vm449_vm7 = vcmp.eq.f32.partialorder %v435_v31, 0.0 }
 0x1e6   : > { %v592_v32 = vpop.eup %591 }
 0x1e7   : > { %v439_v33 = vmul.f32 %v592_v32, %v432_v27 }
 0x1e8   : > { %v594_v35 = vpop.eup %593 }
 0x1e9   : > { %v441_v36 = vsel %vm440_vm3, %v432_v27, %v439_v33  ;;  %v446_v38 = vmul.f32 %v594_v35, %v435_v31 }
 0x1ea   : > { %v444_v37 = vsel %vm442_vm4, %v443_v34, %v441_v36 }
 0x1eb   : > { %v452_v39 = vmul.f32 %v444_v37, %v366_v17  ;;  %v448_v41 = vsel %vm447_vm5, %v435_v31, %v446_v38 }
 0x1ec   : > { %v451_v43 = vsel %vm449_vm7, %v450_v40, %v448_v41 }
 0x1ed   : > { %v553_v42 = vpack.c.bf16 %v452_v39, %v452_v39  ;;  %v453_v44 = vmul.f32 %v451_v43, %v369_v20 }
 0x1ef   : > { %463 = vst.msk [vmem:[%s229_s6] sm:$0xf] %vm462_vm6, %v553_v42  ;;  %v554_v45 = vpack.c.bf16 %v453_v44, %v453_v44 }
 0x1f1   : > { %464 = vst.msk [vmem:[%s229_s6 + $0x4] sm:$0xf] %vm462_vm6, %v554_v45 }
 0x1f2 PF: > { %s15_s18 = sadd.s32 1, %s601_s18  }
 0x1f3   : > { %p12_p4 = scmp.ge.s32.totalorder %s15_s18, 4  }
 0x1f5   :  { %14 = sbr.rel (!%p12_p4) target bundleno = 1 (0x1), region = 70 }

// kernel: forward.22
= control target key start
LH: loop header
LB: loop body
LE: loop exit
PB: predicated region body
PF: predicated region fallthrough
CT: control target
= control target key end

     0   :  { %s462_s12 = smov 0   ;;  %s513_s0 = inlined_call_operand.vmem [shape: bf16[32,144], index: 0, kind: input, shape index: {}]   ;;  %s514_s1 = inlined_call_operand.vmem [shape: bf16[144,8], index: 1, kind: input, shape index: {}]   ;;  %s515_s2 = inlined_call_operand.vmem [shape: f32[1,8], index: 2, kind: input, shape index: {}]   ;;  %s516_s3 = inlined_call_operand.vmem [shape: bf16[32,8], index: 3, kind: output, shape index: {}]  }
   0x1 LB: > { %s382_s13 = sadd.s32 4294967295, %s439_s12   ;;  %p386_p0 = scmp.ge.s32.totalorder %s439_s12, 1  ;;  %s439_s12 = sphi %s462_s12, %s13_s12  }
   0x2   : > { %p139_p1 = scmp.lt.s32.totalorder %s439_s12, 3 }
   0x4   : > { %p140_p2 = pnand %p386_p0, %p139_p1 }
   0x5   : > { %v421_v0 = vld [vmem:[%s514_s1] sm:$0xff] (!%p140_p2)   ;;  %v441_v1 = vmov (!%p140_p2), 0   ;;  %s387_s16 = sshll.u32 (!%p140_p2), %s382_s13, 1  ;;  %v422_v2 = vld [vmem:[%s514_s1 + $0x8] sm:$0xff] (!%p140_p2)   ;;  %v423_v3 = vld [vmem:[%s514_s1 + $0x10] sm:$0xff] (!%p140_p2)   ;;  %vm268_vm0 = vcmask (!%p140_p2), 130048  }
   0x6   : > { %143 = sbr.rel (%p140_p2) target bundleno = 263 (0x107), region = 32  ;;  %272 = vmatprep.subr.bf16.mxu0 (!%p140_p2), %v441_v1  ;;  %p165_p3 = scmp.lt.s32.totalorder (!%p140_p2), %s387_s16, 3  ;;  %v424_v4 = vld [vmem:[%s514_s1 + $0x18] sm:$0xff] (!%p140_p2)   ;;  %v425_v6 = vld [vmem:[%s514_s1 + $0x20] sm:$0xff] (!%p140_p2)   ;;  %v426_v7 = vld [vmem:[%s514_s1 + $0x28] sm:$0xff] (!%p140_p2)   ;;  %vm323_vm1 = vcmask (!%p140_p2), 60416  }
   0x7   : > { %273 = vmatpush1.bf16.msra.mxu0 (!%p140_p2), %v421_v0  ;;  %v427_v8 = vld [vmem:[%s514_s1 + $0x30] sm:$0xff] (!%p140_p2)   ;;  %v428_v9 = vld [vmem:[%s514_s1 + $0x38] sm:$0xff] (!%p140_p2)   ;;  %v429_v10 = vld [vmem:[%s514_s1 + $0x40] sm:$0xff] (!%p140_p2)  }
   0x8   : > { %274 = vmatprep.subr.bf16.mxu0 (!%p140_p2), %v441_v1  ;;  %v392_v12 = vld [vmem:[%s515_s2] ss:$0 sm:$0xff] (!%p140_p2) }
   0xb   : > { %275 = vmatpush1.bf16.msra.mxu0 (!%p140_p2), %v422_v2 }
   0xc   : > { %276 = vmatprep.subr.bf16.mxu0 (!%p140_p2), %v441_v1 }
   0xd   : > { %s518_s16 = smov (!%p165_p3, %s387_s16), 3 }
   0xe   : > { %s409_s21 = sshll.u32 %s518_s16, 3  ;;  %s391_s13 = sshll.u32 %s518_s16, 2 }
   0xf   : > { %s169_s24 = scalar_lea.vmem %s513_s0, %s409_s21  ;;  %277 = vmatpush1.bf16.msra.mxu0 %v423_v3  ;;  %s175_s17 = scalar_lea.vmem %s516_s3, %s391_s13 }
  0x10   : > { %v432_v5 = vld [vmem:[%s169_s24 + $0x4] ss:$8 sps:$4 sm:$0xff]   ;;  %278 = vmatprep.subr.bf16.mxu0 %v441_v1  ;;  %v430_v11 = vld [vmem:[%s169_s24] ss:$8 sps:$4 sm:$0xff]  }
  0x11   : > { %404 = vmatprep.mubr.msk.bf16.mxu0 %vm268_vm0, %v432_v5 }
  0x13   : > { %279 = vmatpush1.bf16.msra.mxu0 %v424_v4 }
  0x14   : > { %280 = vmatprep.subr.bf16.mxu0 %v441_v1 }
  0x17   : > { %281 = vmatpush1.bf16.msra.mxu0 %v425_v6 }
  0x18   : > { %282 = vmatprep.subr.bf16.mxu0 %v441_v1 }
  0x1b   : > { %283 = vmatpush1.bf16.msra.mxu0 %v426_v7 }
  0x1c   : > { %284 = vmatprep.subr.bf16.mxu0 %v441_v1 }
  0x1f   : > { %285 = vmatpush1.bf16.msra.mxu0 %v427_v8 }
  0x20   : > { %286 = vmatprep.subr.bf16.mxu0 %v441_v1 }
  0x23   : > { %287 = vmatpush1.bf16.msra.mxu0 %v428_v9 }
  0x24   : > { %288 = vmatprep.subr.bf16.mxu0 %v441_v1 }
  0x27   : > { %289 = vmatpush1.bf16.msra.mxu0 %v429_v10 }
  0x2a   : > { %305 = vmatmul.mubr.bf16.vlgmr.msra.gmra.mrb[0].mxu0 %v430_v11 }
  0xfd   : > { %v306_v13 = vpop.f32.mrb[0].mxu0 }
  0xfe   : > { %v307_v14 = vadd.f32 %v392_v12, %v306_v13  ;;  %v308_v15 = vpop.f32.mrb[1].mxu0 }
  0xff   : > { %v309_v16 = vpop.f32.mrb[2].mxu0 }
 0x100   : > { %v313_v17 = vmax.f32 %v307_v14, 0.0  ;;  %v310_v18 = vadd.f32 %v392_v12, %v309_v16  ;;  %v311_v19 = vpop.f32.mrb[3].mxu0 }
 0x102   : > { %v410_v20 = vpack.c.bf16 %v313_v17, %v313_v17  ;;  %v314_v21 = vmax.f32 %v310_v18, 0.0 }
 0x104   : > { %324 = vst.msk [vmem:[%s175_s17] sm:$0xf] %vm323_vm1, %v410_v20  ;;  %v411_v22 = vpack.c.bf16 %v314_v21, %v314_v21 }
 0x106   : > { %325 = vst.msk [vmem:[%s175_s17 + $0x4] sm:$0xf] %vm323_vm1, %v411_v22 }
 0x107 PF: > { %s13_s12 = sadd.s32 1, %s439_s12  }
 0x108   : > { %p10_p4 = scmp.ge.s32.totalorder %s13_s12, 4  }
 0x10a   :  { %12 = sbr.rel (!%p10_p4) target bundleno = 1 (0x1), region = 62 }

// kernel: forward.23
= control target key start
LH: loop header
LB: loop body
LE: loop exit
PB: predicated region body
PF: predicated region fallthrough
CT: control target
= control target key end

     0   :  { %v218_v0 = vmov 0   ;;  %vm129_vm0 = vcmask 588800   ;;  %vm133_vm1 = vcmask 1043456   ;;  %vm179_vm2 = vcmask 60416   ;;  %s287_s1 = inlined_call_operand.vmem [shape: bf16[200,8], index: 1, kind: input, shape index: {}]   ;;  %s288_s0 = inlined_call_operand.vmem [shape: bf16[8,200], index: 0, kind: input, shape index: {}]   ;;  %s289_s2 = inlined_call_operand.vmem [shape: f32[1,8], index: 2, kind: input, shape index: {}]   ;;  %s290_s3 = inlined_call_operand.vmem [shape: bf16[8,8], index: 3, kind: output, shape index: {}]  }
   0x1   :  { %137 = vmatprep.subr.bf16.mxu0 %v218_v0  ;;  %v203_v1 = vld [vmem:[%s287_s1] sm:$0xff]   ;;  %v204_v2 = vld [vmem:[%s287_s1 + $0x8] sm:$0xff]   ;;  %v205_v3 = vld [vmem:[%s287_s1 + $0x10] sm:$0xff]  }
   0x2   :  { %138 = vmatpush1.bf16.msra.mxu0 %v203_v1  ;;  %v206_v4 = vld [vmem:[%s287_s1 + $0x18] sm:$0xff]   ;;  %v15_v5 = vld [vmem:[%s288_s0] sm:$0xff]  ;;  %v208_v8 = vld [vmem:[%s287_s1 + $0x28] sm:$0xff]  }
   0x3   :  { %139 = vmatprep.subr.bf16.mxu0 %v218_v0  ;;  %v187_v6 = vcombine.high %v15_v5, %v15_v5  ;;  %v207_v7 = vld [vmem:[%s287_s1 + $0x20] sm:$0xff]   ;;  %v209_v9 = vld [vmem:[%s287_s1 + $0x30] sm:$0xff]   ;;  %v210_v10 = vld [vmem:[%s287_s1 + $0x38] sm:$0xff]   ;;  %v186_v17 = vcombine.low %v15_v5, %v15_v5 }
   0x4   :  { %v211_v11 = vld [vmem:[%s287_s1 + $0x40] sm:$0xff]   ;;  %v212_v12 = vld [vmem:[%s287_s1 + $0x48] sm:$0xff]   ;;  %v213_v13 = vld [vmem:[%s287_s1 + $0x50] sm:$0xff]  }
   0x5   :  { %201 = vmatprep.mubr.msk.bf16.mxu0 %vm129_vm0, %v187_v6  ;;  %v214_v14 = vld [vmem:[%s287_s1 + $0x58] sm:$0xff]   ;;  %v215_v15 = vld [vmem:[%s287_s1 + $0x60] ss:$0 sps:$4 sm:$0xff]  }
   0x6   :  { %140 = vmatpush1.bf16.msra.mxu0 %v204_v2  ;;  %v135_v16 = vsel %vm133_vm1, %v215_v15, 0  ;;  %v185_v18 = vld [vmem:[%s289_s2] ss:$0 sm:$0xff] }
   0x7   :  { %141 = vmatprep.subr.bf16.mxu0 %v218_v0 }
   0xa   :  { %142 = vmatpush1.bf16.msra.mxu0 %v205_v3 }
   0xb   :  { %143 = vmatprep.subr.bf16.mxu0 %v218_v0 }
   0xe   :  { %144 = vmatpush1.bf16.msra.mxu0 %v206_v4 }
   0xf   :  { %145 = vmatprep.subr.bf16.mxu0 %v218_v0 }
  0x12   :  { %146 = vmatpush1.bf16.msra.mxu0 %v207_v7 }
  0x13   :  { %147 = vmatprep.subr.bf16.mxu0 %v218_v0 }
  0x16   :  { %148 = vmatpush1.bf16.msra.mxu0 %v208_v8 }
  0x17   :  { %149 = vmatprep.subr.bf16.mxu0 %v218_v0 }
  0x1a   :  { %150 = vmatpush1.bf16.msra.mxu0 %v209_v9 }
  0x1b   :  { %151 = vmatprep.subr.bf16.mxu0 %v218_v0 }
  0x1e   :  { %152 = vmatpush1.bf16.msra.mxu0 %v210_v10 }
  0x1f   :  { %153 = vmatprep.subr.bf16.mxu0 %v218_v0 }
  0x22   :  { %154 = vmatpush1.bf16.msra.mxu0 %v211_v11 }
  0x23   :  { %155 = vmatprep.subr.bf16.mxu0 %v218_v0 }
  0x26   :  { %156 = vmatpush1.bf16.msra.mxu0 %v212_v12 }
  0x27   :  { %157 = vmatprep.subr.bf16.mxu0 %v218_v0 }
  0x2a   :  { %158 = vmatpush1.bf16.msra.mxu0 %v213_v13 }
  0x2b   :  { %159 = vmatprep.subr.bf16.mxu0 %v218_v0 }
  0x2e   :  { %160 = vmatpush1.bf16.msra.mxu0 %v214_v14 }
  0x2f   :  { %161 = vmatprep.subr.bf16.mxu0 %v218_v0 }
  0x32   :  { %162 = vmatpush1.bf16.msra.mxu0 %v135_v16 }
  0x35   :  { %170 = vmatmul.mubr.bf16.vlgmr.msra.gmra.mrb[0].mxu0 %v186_v17 }
 0x108   :  { %v171_v19 = vpop.f32.mrb[0].mxu0 }
 0x109   :  { %v172_v20 = vadd.f32 %v185_v18, %v171_v19  ;;  %v173_v21 = vpop.f32.mrb[1].mxu0 }
 0x10a   :  { %v174_v22 = vpop.f32.mrb[2].mxu0 }
 0x10b   :  { %v177_v23 = vmax.f32 %v172_v20, 0.0  ;;  %v175_v24 = vpop.f32.mrb[3].mxu0 }
 0x10d   :  { %v178_v25 = vpack.c.bf16 %v177_v23, %v177_v23 }
 0x10f   :  { %180 = vst.msk [vmem:[%s290_s3] sm:$0xf] %vm179_vm2, %v178_v25 }

// kernel: forward.24
= control target key start
LH: loop header
LB: loop body
LE: loop exit
PB: predicated region body
PF: predicated region fallthrough
CT: control target
= control target key end

     0   :  { %v232_v0 = vmov 0   ;;  %v233_v3 = vmov 1966171168   ;;  %v60_v5 = vlaneseq  ;;  %vm147_vm0 = vcmask 588800   ;;  %s302_s1 = inlined_call_operand.vmem [shape: bf16[200,8], index: 1, kind: input, shape index: {}]   ;;  %s303_s0 = inlined_call_operand.vmem [shape: bf16[2,200], index: 0, kind: input, shape index: {}]   ;;  %s304_s2 = inlined_call_operand.vmem [shape: f32[1,8], index: 2, kind: input, shape index: {}]   ;;  %s305_s3 = inlined_call_operand.vmem [shape: f32[2,8], index: 3, kind: output, shape index: {}]  }
   0x1   :  { %155 = vmatprep.subr.bf16.mxu0 %v232_v0  ;;  %v219_v1 = vld [vmem:[%s302_s1] sm:$0xff]   ;;  %v220_v2 = vld [vmem:[%s302_s1 + $0x8] sm:$0xff]   ;;  %v58_v4 = vunpack.c.l.s4 %v233_v3  ;;  %v221_v6 = vld [vmem:[%s302_s1 + $0x10] sm:$0xff]   ;;  %vm151_vm1 = vcmask 1043456   ;;  %vm195_vm2 = vcmask 58368  }
   0x2   :  { %156 = vmatpush1.bf16.msra.mxu0 %v219_v1  ;;  %v61_v8 = vshrl.u32 %v60_v5, 7  ;;  %v222_v9 = vld [vmem:[%s302_s1 + $0x18] sm:$0xff]   ;;  %v202_v11 = vld.sshfl [vmem:[%s303_s0] sm:$0x11 pattern:$0x75316420] }
   0x3   :  { %157 = vmatprep.subr.bf16.mxu0 %v232_v0  ;;  %v59_v7 = vunpack.c.0.s8 %v58_v4  ;;  %v223_v12 = vld [vmem:[%s302_s1 + $0x20] sm:$0xff]   ;;  %v56_v13 = vcombine.high %v202_v11, %v202_v11  ;;  %v224_v15 = vld [vmem:[%s302_s1 + $0x28] sm:$0xff]   ;;  %v225_v16 = vld [vmem:[%s302_s1 + $0x30] sm:$0xff]  }
   0x4   :  { %v226_v17 = vld [vmem:[%s302_s1 + $0x38] sm:$0xff]   ;;  %v227_v18 = vld [vmem:[%s302_s1 + $0x40] sm:$0xff]   ;;  %v228_v19 = vld [vmem:[%s302_s1 + $0x48] sm:$0xff]  }
   0x5   :  { %v62_v10 = vsub.s32 %v59_v7, %v61_v8  ;;  %v229_v20 = vld [vmem:[%s302_s1 + $0x50] sm:$0xff]   ;;  %v230_v21 = vld [vmem:[%s302_s1 + $0x58] sm:$0xff]   ;;  %v231_v22 = vld [vmem:[%s302_s1 + $0x60] ss:$0 sps:$4 sm:$0xff]  }
   0x6   :  { %158 = vmatpush1.bf16.msra.mxu0 %v220_v2  ;;  %v153_v23 = vsel %vm151_vm1, %v231_v22, 0  ;;  %v201_v25 = vld [vmem:[%s304_s2] ss:$0 sm:$0xff] }
   0x7   :  { %159 = vmatprep.subr.bf16.mxu0 %v232_v0  ;;  %v70_v14 = vrot.slane %v56_v13, %v62_v10  ;;  %v63_v24 = vrot.slane %v202_v11, %v62_v10 }
   0x9   :  { %216 = vmatprep.mubr.msk.bf16.mxu0 %vm147_vm0, %v70_v14 }
   0xa   :  { %160 = vmatpush1.bf16.msra.mxu0 %v221_v6 }
   0xb   :  { %161 = vmatprep.subr.bf16.mxu0 %v232_v0 }
   0xe   :  { %162 = vmatpush1.bf16.msra.mxu0 %v222_v9 }
   0xf   :  { %163 = vmatprep.subr.bf16.mxu0 %v232_v0 }
  0x12   :  { %164 = vmatpush1.bf16.msra.mxu0 %v223_v12 }
  0x13   :  { %165 = vmatprep.subr.bf16.mxu0 %v232_v0 }
  0x16   :  { %166 = vmatpush1.bf16.msra.mxu0 %v224_v15 }
  0x17   :  { %167 = vmatprep.subr.bf16.mxu0 %v232_v0 }
  0x1a   :  { %168 = vmatpush1.bf16.msra.mxu0 %v225_v16 }
  0x1b   :  { %169 = vmatprep.subr.bf16.mxu0 %v232_v0 }
  0x1e   :  { %170 = vmatpush1.bf16.msra.mxu0 %v226_v17 }
  0x1f   :  { %171 = vmatprep.subr.bf16.mxu0 %v232_v0 }
  0x22   :  { %172 = vmatpush1.bf16.msra.mxu0 %v227_v18 }
  0x23   :  { %173 = vmatprep.subr.bf16.mxu0 %v232_v0 }
  0x26   :  { %174 = vmatpush1.bf16.msra.mxu0 %v228_v19 }
  0x27   :  { %175 = vmatprep.subr.bf16.mxu0 %v232_v0 }
  0x2a   :  { %176 = vmatpush1.bf16.msra.mxu0 %v229_v20 }
  0x2b   :  { %177 = vmatprep.subr.bf16.mxu0 %v232_v0 }
  0x2e   :  { %178 = vmatpush1.bf16.msra.mxu0 %v230_v21 }
  0x2f   :  { %179 = vmatprep.subr.bf16.mxu0 %v232_v0 }
  0x32   :  { %180 = vmatpush1.bf16.msra.mxu0 %v153_v23 }
  0x35   :  { %188 = vmatmul.mubr.bf16.vlgmr.msra.gmra.mrb[0].mxu0 %v63_v24 }
 0x108   :  { %v189_v26 = vpop.f32.mrb[0].mxu0 }
 0x109   :  { %v190_v27 = vadd.f32 %v201_v25, %v189_v26  ;;  %v191_v28 = vpop.f32.mrb[1].mxu0 }
 0x10a   :  { %v192_v29 = vpop.f32.mrb[2].mxu0 }
 0x10b   :  { %196 = vst.msk [vmem:[%s305_s3] sm:$0x3] %vm195_vm2, %v190_v27  ;;  %v193_v30 = vpop.f32.mrb[3].mxu0 }

// kernel: forward.26
= control target key start
LH: loop header
LB: loop body
LE: loop exit
PB: predicated region body
PF: predicated region fallthrough
CT: control target
= control target key end

     0   :  { %v149_v0 = vmov 0.0   ;;  %vm150_vm0 = vmmov 0   ;;  %vm63_vm1 = vcmask 1043456   ;;  %vm59_vm2 = vcmask 588800   ;;  %s195_s1 = inlined_call_operand.vmem [shape: bf16[72,32], index: 1, kind: input, shape index: {}]   ;;  %s196_s0 = inlined_call_operand.vmem [shape: bf16[8,72], index: 0, kind: input, shape index: {}]   ;;  %s197_s2 = inlined_call_operand.vmem [shape: f32[1,32], index: 2, kind: input, shape index: {}]   ;;  %s198_s3 = inlined_call_operand.vmem [shape: bf16[8,32], index: 3, kind: output, shape index: {}]  }
   0x1   :  { %128 = vmatprep.subr.bf16.mxu0 %v149_v0  ;;  %v144_v1 = vld [vmem:[%s195_s1] sm:$0xff]   ;;  %138 = vmatprep.mubr.msk.bf16.mxu0 %vm150_vm0, %v149_v0  ;;  %v145_v2 = vld [vmem:[%s195_s1 + $0x8] sm:$0xff]   ;;  %v146_v3 = vld [vmem:[%s195_s1 + $0x10] sm:$0xff]   ;;  %vm109_vm3 = vcmask 257024  }
   0x2   :  { %129 = vmatpush3.bf16.msra.mxu0 %v144_v1  ;;  %v147_v4 = vld [vmem:[%s195_s1 + $0x18] sm:$0xff]   ;;  %v148_v5 = vld [vmem:[%s195_s1 + $0x20] ss:$0 sps:$4 sm:$0xff]  }
   0x3   :  { %130 = vmatprep.subr.bf16.mxu0 %v149_v0  ;;  %v65_v6 = vsel %vm63_vm1, %v148_v5, 0  ;;  %v15_v7 = vld [vmem:[%s196_s0] sm:$0xf] }
   0x4   :  { %v115_v8 = vld [vmem:[%s197_s2] ss:$0 sm:$0xff] }
   0x6   :  { %131 = vmatpush3.bf16.msra.mxu0 %v145_v2 }
   0x7   :  { %132 = vmatprep.subr.bf16.mxu0 %v149_v0 }
   0xa   :  { %133 = vmatpush3.bf16.msra.mxu0 %v146_v3 }
   0xb   :  { %134 = vmatprep.subr.bf16.mxu0 %v149_v0 }
   0xe   :  { %135 = vmatpush3.bf16.msra.mxu0 %v147_v4 }
   0xf   :  { %136 = vmatprep.subr.bf16.mxu0 %v149_v0 }
  0x12   :  { %137 = vmatpush3.bf16.msra.mxu0 %v65_v6 }
  0x15   :  { %139 = vmatmul.mubr.msk.bf16.vlgmr.msra.gmra.mrb[0].mxu0 %vm59_vm2, %v15_v7 }
  0xe8   :  { %v101_v9 = vpop.f32.mrb[0].mxu0 }
  0xe9   :  { %v102_v10 = vadd.f32 %v115_v8, %v101_v9  ;;  %v140_v11 = vpop.f32.mrb[1].mxu0 }
  0xea   :  { %v104_v12 = vpop.f32.mrb[2].mxu0 }
  0xeb   :  { %v107_v13 = vmax.f32 %v102_v10, 0.0  ;;  %v141_v14 = vpop.f32.mrb[3].mxu0 }
  0xed   :  { %v108_v15 = vpack.c.bf16 %v107_v13, %v107_v13 }
  0xef   :  { %110 = vst.msk [vmem:[%s198_s3] sm:$0xf] %vm109_vm3, %v108_v15 }

// kernel: forward.25
= control target key start
LH: loop header
LB: loop body
LE: loop exit
PB: predicated region body
PF: predicated region fallthrough
CT: control target
= control target key end

     0   :  { %v149_v0 = vmov 0.0   ;;  %vm150_vm0 = vmmov 0   ;;  %vm63_vm1 = vcmask 1043456   ;;  %vm59_vm2 = vcmask 588800   ;;  %s195_s1 = inlined_call_operand.vmem [shape: bf16[72,32], index: 1, kind: input, shape index: {}]   ;;  %s196_s0 = inlined_call_operand.vmem [shape: bf16[2,72], index: 0, kind: input, shape index: {}]   ;;  %s197_s2 = inlined_call_operand.vmem [shape: f32[1,32], index: 2, kind: input, shape index: {}]   ;;  %s198_s3 = inlined_call_operand.vmem [shape: bf16[2,32], index: 3, kind: output, shape index: {}]  }
   0x1   :  { %128 = vmatprep.subr.bf16.mxu0 %v149_v0  ;;  %v144_v1 = vld [vmem:[%s195_s1] sm:$0xff]   ;;  %138 = vmatprep.mubr.msk.bf16.mxu0 %vm150_vm0, %v149_v0  ;;  %v145_v2 = vld [vmem:[%s195_s1 + $0x8] sm:$0xff]   ;;  %v146_v3 = vld [vmem:[%s195_s1 + $0x10] sm:$0xff]   ;;  %vm109_vm3 = vcmask 253952  }
   0x2   :  { %129 = vmatpush3.bf16.msra.mxu0 %v144_v1  ;;  %v147_v4 = vld [vmem:[%s195_s1 + $0x18] sm:$0xff]   ;;  %v148_v5 = vld [vmem:[%s195_s1 + $0x20] ss:$0 sps:$4 sm:$0xff]  }
   0x3   :  { %130 = vmatprep.subr.bf16.mxu0 %v149_v0  ;;  %v65_v6 = vsel %vm63_vm1, %v148_v5, 0  ;;  %v15_v7 = vld [vmem:[%s196_s0] sm:$0x1] }
   0x4   :  { %v115_v8 = vld [vmem:[%s197_s2] ss:$0 sm:$0xff] }
   0x6   :  { %131 = vmatpush3.bf16.msra.mxu0 %v145_v2 }
   0x7   :  { %132 = vmatprep.subr.bf16.mxu0 %v149_v0 }
   0xa   :  { %133 = vmatpush3.bf16.msra.mxu0 %v146_v3 }
   0xb   :  { %134 = vmatprep.subr.bf16.mxu0 %v149_v0 }
   0xe   :  { %135 = vmatpush3.bf16.msra.mxu0 %v147_v4 }
   0xf   :  { %136 = vmatprep.subr.bf16.mxu0 %v149_v0 }
  0x12   :  { %137 = vmatpush3.bf16.msra.mxu0 %v65_v6 }
  0x15   :  { %139 = vmatmul.mubr.msk.bf16.vlgmr.msra.gmra.mrb[0].mxu0 %vm59_vm2, %v15_v7 }
  0xe8   :  { %v101_v9 = vpop.f32.mrb[0].mxu0 }
  0xe9   :  { %v102_v10 = vadd.f32 %v115_v8, %v101_v9  ;;  %v140_v11 = vpop.f32.mrb[1].mxu0 }
  0xea   :  { %v104_v12 = vpop.f32.mrb[2].mxu0 }
  0xeb   :  { %v107_v13 = vmax.f32 %v102_v10, 0.0  ;;  %v141_v14 = vpop.f32.mrb[3].mxu0 }
  0xed   :  { %v108_v15 = vpack.c.bf16 %v107_v13, %v107_v13 }
  0xef   :  { %110 = vst.msk [vmem:[%s198_s3] sm:$0x1] %vm109_vm3, %v108_v15 }

// kernel: forward.28
= control target key start
LH: loop header
LB: loop body
LE: loop exit
PB: predicated region body
PF: predicated region fallthrough
CT: control target
= control target key end

     0   :  { %s466_s12 = smov 0   ;;  %s517_s0 = inlined_call_operand.vmem [shape: bf16[32,144], index: 0, kind: input, shape index: {}]   ;;  %s518_s1 = inlined_call_operand.vmem [shape: bf16[144,16], index: 1, kind: input, shape index: {}]   ;;  %s519_s2 = inlined_call_operand.vmem [shape: f32[1,16], index: 2, kind: input, shape index: {}]   ;;  %s520_s3 = inlined_call_operand.vmem [shape: bf16[32,16], index: 3, kind: output, shape index: {}]  }
   0x1 LB: > { %s386_s13 = sadd.s32 4294967295, %s443_s12   ;;  %p390_p0 = scmp.ge.s32.totalorder %s443_s12, 1  ;;  %s443_s12 = sphi %s466_s12, %s13_s12  }
   0x2   : > { %p139_p1 = scmp.lt.s32.totalorder %s443_s12, 3 }
   0x4   : > { %p140_p2 = pnand %p390_p0, %p139_p1 }
   0x5   : > { %v425_v0 = vld [vmem:[%s518_s1] sm:$0xff] (!%p140_p2)   ;;  %v445_v1 = vmov (!%p140_p2), 0   ;;  %s391_s16 = sshll.u32 (!%p140_p2), %s386_s13, 1  ;;  %v426_v2 = vld [vmem:[%s518_s1 + $0x8] sm:$0xff] (!%p140_p2)   ;;  %v427_v3 = vld [vmem:[%s518_s1 + $0x10] sm:$0xff] (!%p140_p2)   ;;  %vm268_vm0 = vcmask (!%p140_p2), 130048  }
   0x6   : > { %143 = sbr.rel (%p140_p2) target bundleno = 264 (0x108), region = 32  ;;  %272 = vmatprep.subr.bf16.mxu0 (!%p140_p2), %v445_v1  ;;  %p165_p3 = scmp.lt.s32.totalorder (!%p140_p2), %s391_s16, 3  ;;  %v428_v4 = vld [vmem:[%s518_s1 + $0x18] sm:$0xff] (!%p140_p2)   ;;  %v429_v6 = vld [vmem:[%s518_s1 + $0x20] sm:$0xff] (!%p140_p2)   ;;  %v430_v7 = vld [vmem:[%s518_s1 + $0x28] sm:$0xff] (!%p140_p2)   ;;  %vm327_vm2 = vcmask (!%p140_p2), 125952  }
   0x7   : > { %273 = vmatpush1.bf16.msra.mxu0 (!%p140_p2), %v425_v0  ;;  %v431_v8 = vld [vmem:[%s518_s1 + $0x30] sm:$0xff] (!%p140_p2)   ;;  %v432_v9 = vld [vmem:[%s518_s1 + $0x38] sm:$0xff] (!%p140_p2)   ;;  %v433_v10 = vld [vmem:[%s518_s1 + $0x40] sm:$0xff] (!%p140_p2)  }
   0x8   : > { %274 = vmatprep.subr.bf16.mxu0 (!%p140_p2), %v445_v1  ;;  %v396_v12 = vld [vmem:[%s519_s2] ss:$0 sm:$0xff] (!%p140_p2) }
   0xb   : > { %275 = vmatpush1.bf16.msra.mxu0 (!%p140_p2), %v426_v2 }
   0xc   : > { %276 = vmatprep.subr.bf16.mxu0 (!%p140_p2), %v445_v1 }
   0xd   : > { %s522_s16 = smov (!%p165_p3, %s391_s16), 3 }
   0xe   : > { %s413_s21 = sshll.u32 %s522_s16, 3  ;;  %s395_s13 = sshll.u32 %s522_s16, 2 }
   0xf   : > { %s169_s24 = scalar_lea.vmem %s517_s0, %s413_s21  ;;  %277 = vmatpush1.bf16.msra.mxu0 %v427_v3  ;;  %s175_s17 = scalar_lea.vmem %s520_s3, %s395_s13 }
  0x10   : > { %v436_v5 = vld [vmem:[%s169_s24 + $0x4] ss:$8 sps:$4 sm:$0xff]   ;;  %278 = vmatprep.subr.bf16.mxu0 %v445_v1  ;;  %v434_v11 = vld [vmem:[%s169_s24] ss:$8 sps:$4 sm:$0xff]  }
  0x11   : > { %408 = vmatprep.mubr.msk.bf16.mxu0 %vm268_vm0, %v436_v5 }
  0x13   : > { %279 = vmatpush1.bf16.msra.mxu0 %v428_v4 }
  0x14   : > { %280 = vmatprep.subr.bf16.mxu0 %v445_v1 }
  0x17   : > { %281 = vmatpush1.bf16.msra.mxu0 %v429_v6 }
  0x18   : > { %282 = vmatprep.subr.bf16.mxu0 %v445_v1 }
  0x1b   : > { %283 = vmatpush1.bf16.msra.mxu0 %v430_v7 }
  0x1c   : > { %284 = vmatprep.subr.bf16.mxu0 %v445_v1 }
  0x1f   : > { %285 = vmatpush1.bf16.msra.mxu0 %v431_v8 }
  0x20   : > { %286 = vmatprep.subr.bf16.mxu0 %v445_v1 }
  0x23   : > { %287 = vmatpush1.bf16.msra.mxu0 %v432_v9 }
  0x24   : > { %288 = vmatprep.subr.bf16.mxu0 %v445_v1 }
  0x27   : > { %289 = vmatpush1.bf16.msra.mxu0 %v433_v10 }
  0x2a   : > { %305 = vmatmul.mubr.bf16.vlgmr.msra.gmra.mrb[0].mxu0 %v434_v11 }
  0xfd   : > { %v306_v13 = vpop.f32.mrb[0].mxu0 }
  0xfe   : > { %v307_v14 = vadd.f32 %v396_v12, %v306_v13  ;;  %v308_v15 = vpop.f32.mrb[1].mxu0 }
  0xff   : > { %v309_v16 = vpop.f32.mrb[2].mxu0 }
 0x100   : > { %vm313_vm1 = vcmp.ge.f32.partialorder %v307_v14, 0.0  ;;  %v315_v17 = vmul.f32 0.01, %v307_v14  ;;  %v310_v18 = vadd.f32 %v396_v12, %v309_v16  ;;  %v311_v19 = vpop.f32.mrb[3].mxu0 }
 0x102   : > { %v317_v20 = vsel %vm313_vm1, %v307_v14, %v315_v17  ;;  %vm314_vm3 = vcmp.ge.f32.partialorder %v310_v18, 0.0  ;;  %v316_v21 = vmul.f32 0.01, %v310_v18 }
 0x103   : > { %v414_v22 = vpack.c.bf16 %v317_v20, %v317_v20 }
 0x104   : > { %v318_v23 = vsel %vm314_vm3, %v310_v18, %v316_v21 }
 0x105   : > { %328 = vst.msk [vmem:[%s175_s17] sm:$0xf] %vm327_vm2, %v414_v22  ;;  %v415_v24 = vpack.c.bf16 %v318_v23, %v318_v23 }
 0x107   : > { %329 = vst.msk [vmem:[%s175_s17 + $0x4] sm:$0xf] %vm327_vm2, %v415_v24 }
 0x108 PF: > { %s13_s12 = sadd.s32 1, %s443_s12  }
 0x109   : > { %p10_p4 = scmp.ge.s32.totalorder %s13_s12, 4  }
 0x10b   :  { %12 = sbr.rel (!%p10_p4) target bundleno = 1 (0x1), region = 62 }

// kernel: forward.27
= control target key start
LH: loop header
LB: loop body
LE: loop exit
PB: predicated region body
PF: predicated region fallthrough
CT: control target
= control target key end

     0   :  { %s430_s12 = smov 0   ;;  %s465_s0 = inlined_call_operand.vmem [shape: bf16[32,72], index: 0, kind: input, shape index: {}]   ;;  %s466_s1 = inlined_call_operand.vmem [shape: bf16[72,16], index: 1, kind: input, shape index: {}]   ;;  %s467_s2 = inlined_call_operand.vmem [shape: f32[1,16], index: 2, kind: input, shape index: {}]   ;;  %s468_s3 = inlined_call_operand.vmem [shape: bf16[32,16], index: 3, kind: output, shape index: {}]  }
   0x1 LB: > { %s341_s13 = sadd.s32 4294967295, %s406_s12   ;;  %p345_p0 = scmp.ge.s32.totalorder %s406_s12, 1  ;;  %s406_s12 = sphi %s430_s12, %s13_s12  }
   0x2   : > { %p138_p1 = scmp.lt.s32.totalorder %s406_s12, 3 }
   0x4   : > { %p139_p2 = pnand %p345_p0, %p138_p1 }
   0x5   : > { %v394_v0 = vld [vmem:[%s466_s1] sm:$0xff] (!%p139_p2)   ;;  %v408_v1 = vmov (!%p139_p2), 0.0   ;;  %v395_v2 = vld [vmem:[%s466_s1 + $0x8] sm:$0xff] (!%p139_p2)   ;;  %vm409_vm0 = vmmov (!%p139_p2), 0   ;;  %s346_s18 = sshll.u32 (!%p139_p2), %s341_s13, 1  ;;  %v396_v3 = vld [vmem:[%s466_s1 + $0x10] sm:$0xff] (!%p139_p2)  }
   0x6   : > { %142 = sbr.rel (%p139_p2) target bundleno = 245 (0xf5), region = 32  ;;  %370 = vmatprep.subr.bf16.mxu0 (!%p139_p2), %v408_v1  ;;  %380 = vmatprep.mubr.msk.bf16.mxu0 (!%p139_p2), %vm409_vm0, %v408_v1  ;;  %p163_p3 = scmp.lt.s32.totalorder (!%p139_p2), %s346_s18, 3  ;;  %v397_v4 = vld [vmem:[%s466_s1 + $0x18] sm:$0xff] (!%p139_p2)   ;;  %v398_v5 = vld [vmem:[%s466_s1 + $0x20] ss:$0 sps:$4 sm:$0xff] (!%p139_p2)   ;;  %vm229_vm1 = vcmask (!%p139_p2), 1043456  }
   0x7   : > { %371 = vmatpush3.bf16.msra.mxu0 (!%p139_p2), %v394_v0  ;;  %v231_v6 = vsel (!%p139_p2), %vm229_vm1, %v398_v5, 0  ;;  %vm225_vm2 = vcmask (!%p139_p2), 588800   ;;  %v350_v8 = vld [vmem:[%s467_s2] ss:$0 sm:$0xff] (!%p139_p2)  ;;  %vm282_vm3 = vcmask (!%p139_p2), 125952  }
   0x8   : > { %372 = vmatprep.subr.bf16.mxu0 (!%p139_p2), %v408_v1 }
   0xb   : > { %373 = vmatpush3.bf16.msra.mxu0 (!%p139_p2), %v395_v2 }
   0xc   : > { %374 = vmatprep.subr.bf16.mxu0 (!%p139_p2), %v408_v1 }
   0xd   : > { %s470_s18 = smov (!%p163_p3, %s346_s18), 3 }
   0xe   : > { %s347_s21 = sshll.u32 %s470_s18, 2 }
   0xf   : > { %s166_s24 = scalar_lea.vmem %s465_s0, %s347_s21  ;;  %375 = vmatpush3.bf16.msra.mxu0 %v396_v3  ;;  %s172_s6 = scalar_lea.vmem %s468_s3, %s347_s21 }
  0x10   : > { %376 = vmatprep.subr.bf16.mxu0 %v408_v1  ;;  %v399_v7 = vld [vmem:[%s166_s24] sm:$0xff]  }
  0x13   : > { %377 = vmatpush3.bf16.msra.mxu0 %v397_v4 }
  0x14   : > { %378 = vmatprep.subr.bf16.mxu0 %v408_v1 }
  0x17   : > { %379 = vmatpush3.bf16.msra.mxu0 %v231_v6 }
  0x1a   : > { %381 = vmatmul.mubr.msk.bf16.vlgmr.msra.gmra.mrb[0].mxu0 %vm225_vm2, %v399_v7 }
  0xed   : > { %v267_v9 = vpop.f32.mrb[0].mxu0 }
  0xee   : > { %v268_v10 = vadd.f32 %v350_v8, %v267_v9  ;;  %v382_v11 = vpop.f32.mrb[1].mxu0 }
  0xef   : > { %v270_v12 = vpop.f32.mrb[2].mxu0 }
  0xf0   : > { %v362_v13 = vpack.c.bf16 %v268_v10, %v268_v10  ;;  %v271_v14 = vadd.f32 %v350_v8, %v270_v12  ;;  %v383_v15 = vpop.f32.mrb[3].mxu0 }
  0xf2   : > { %283 = vst.msk [vmem:[%s172_s6] sm:$0xf] %vm282_vm3, %v362_v13  ;;  %v363_v16 = vpack.c.bf16 %v271_v14, %v271_v14 }
  0xf4   : > { %284 = vst.msk [vmem:[%s172_s6 + $0x4] sm:$0xf] %vm282_vm3, %v363_v16 }
  0xf5 PF: > { %s13_s12 = sadd.s32 1, %s406_s12  }
  0xf6   : > { %p10_p4 = scmp.ge.s32.totalorder %s13_s12, 4  }
  0xf8   :  { %12 = sbr.rel (!%p10_p4) target bundleno = 1 (0x1), region = 62 }

// kernel: forward.30
= control target key start
LH: loop header
LB: loop body
LE: loop exit
PB: predicated region body
PF: predicated region fallthrough
CT: control target
= control target key end

     0   :  { %s448_s12 = smov 0   ;;  %s498_s0 = inlined_call_operand.vmem [shape: bf16[32,144], index: 0, kind: input, shape index: {}]   ;;  %s499_s1 = inlined_call_operand.vmem [shape: bf16[144,32], index: 1, kind: input, shape index: {}]   ;;  %s500_s2 = inlined_call_operand.vmem [shape: f32[1,32], index: 2, kind: input, shape index: {}]   ;;  %s501_s3 = inlined_call_operand.vmem [shape: f32[32,32], index: 3, kind: output, shape index: {}]  }
   0x1 LB: > { %s372_s13 = sadd.s32 4294967295, %s425_s12   ;;  %p376_p0 = scmp.ge.s32.totalorder %s425_s12, 1  ;;  %s425_s12 = sphi %s448_s12, %s13_s12  }
   0x2   : > { %p139_p1 = scmp.lt.s32.totalorder %s425_s12, 3 }
   0x4   : > { %p140_p2 = pnand %p376_p0, %p139_p1 }
   0x5   : > { %v407_v0 = vld [vmem:[%s499_s1] sm:$0xff] (!%p140_p2)   ;;  %v427_v1 = vmov (!%p140_p2), 0   ;;  %s377_s16 = sshll.u32 (!%p140_p2), %s372_s13, 1  ;;  %v408_v2 = vld [vmem:[%s499_s1 + $0x8] sm:$0xff] (!%p140_p2)   ;;  %v409_v3 = vld [vmem:[%s499_s1 + $0x10] sm:$0xff] (!%p140_p2)   ;;  %vm268_vm0 = vcmask (!%p140_p2), 130048  }
   0x6   : > { %143 = sbr.rel (%p140_p2) target bundleno = 259 (0x103), region = 32  ;;  %272 = vmatprep.subr.bf16.mxu0 (!%p140_p2), %v427_v1  ;;  %p165_p3 = scmp.lt.s32.totalorder (!%p140_p2), %s377_s16, 3  ;;  %v410_v4 = vld [vmem:[%s499_s1 + $0x18] sm:$0xff] (!%p140_p2)   ;;  %v411_v6 = vld [vmem:[%s499_s1 + $0x20] sm:$0xff] (!%p140_p2)   ;;  %v412_v7 = vld [vmem:[%s499_s1 + $0x28] sm:$0xff] (!%p140_p2)   ;;  %vm313_vm1 = vcmask (!%p140_p2), 261120  }
   0x7   : > { %273 = vmatpush1.bf16.msra.mxu0 (!%p140_p2), %v407_v0  ;;  %v413_v8 = vld [vmem:[%s499_s1 + $0x30] sm:$0xff] (!%p140_p2)   ;;  %v414_v9 = vld [vmem:[%s499_s1 + $0x38] sm:$0xff] (!%p140_p2)   ;;  %v415_v10 = vld [vmem:[%s499_s1 + $0x40] sm:$0xff] (!%p140_p2)  }
   0x8   : > { %274 = vmatprep.subr.bf16.mxu0 (!%p140_p2), %v427_v1  ;;  %v382_v12 = vld [vmem:[%s500_s2] ss:$0 sm:$0xff] (!%p140_p2) }
   0xb   : > { %275 = vmatpush1.bf16.msra.mxu0 (!%p140_p2), %v408_v2 }
   0xc   : > { %276 = vmatprep.subr.bf16.mxu0 (!%p140_p2), %v427_v1 }
   0xd   : > { %s503_s16 = smov (!%p165_p3, %s377_s16), 3 }
   0xe   : > { %s397_s21 = sshll.u32 %s503_s16, 3 }
   0xf   : > { %s169_s24 = scalar_lea.vmem %s498_s0, %s397_s21  ;;  %277 = vmatpush1.bf16.msra.mxu0 %v409_v3  ;;  %s175_s15 = scalar_lea.vmem %s501_s3, %s397_s21 }
  0x10   : > { %v418_v5 = vld [vmem:[%s169_s24 + $0x4] ss:$8 sps:$4 sm:$0xff]   ;;  %278 = vmatprep.subr.bf16.mxu0 %v427_v1  ;;  %v416_v11 = vld [vmem:[%s169_s24] ss:$8 sps:$4 sm:$0xff]  }
  0x11   : > { %394 = vmatprep.mubr.msk.bf16.mxu0 %vm268_vm0, %v418_v5 }
  0x13   : > { %279 = vmatpush1.bf16.msra.mxu0 %v410_v4 }
  0x14   : > { %280 = vmatprep.subr.bf16.mxu0 %v427_v1 }
  0x17   : > { %281 = vmatpush1.bf16.msra.mxu0 %v411_v6 }
  0x18   : > { %282 = vmatprep.subr.bf16.mxu0 %v427_v1 }
  0x1b   : > { %283 = vmatpush1.bf16.msra.mxu0 %v412_v7 }
  0x1c   : > { %284 = vmatprep.subr.bf16.mxu0 %v427_v1 }
  0x1f   : > { %285 = vmatpush1.bf16.msra.mxu0 %v413_v8 }
  0x20   : > { %286 = vmatprep.subr.bf16.mxu0 %v427_v1 }
  0x23   : > { %287 = vmatpush1.bf16.msra.mxu0 %v414_v9 }
  0x24   : > { %288 = vmatprep.subr.bf16.mxu0 %v427_v1 }
  0x27   : > { %289 = vmatpush1.bf16.msra.mxu0 %v415_v10 }
  0x2a   : > { %305 = vmatmul.mubr.bf16.vlgmr.msra.gmra.mrb[0].mxu0 %v416_v11 }
  0xfd   : > { %v306_v13 = vpop.f32.mrb[0].mxu0 }
  0xfe   : > { %v307_v14 = vadd.f32 %v382_v12, %v306_v13  ;;  %v308_v15 = vpop.f32.mrb[1].mxu0 }
  0xff   : > { %v309_v16 = vpop.f32.mrb[2].mxu0 }
 0x100   : > { %314 = vst.msk [vmem:[%s175_s15] sm:$0xff] %vm313_vm1, %v307_v14  ;;  %v310_v17 = vadd.f32 %v382_v12, %v309_v16  ;;  %v311_v18 = vpop.f32.mrb[3].mxu0 }
 0x102   : > { %315 = vst.msk [vmem:[%s175_s15 + $0x8] sm:$0xff] %vm313_vm1, %v310_v17 }
 0x103 PF: > { %s13_s12 = sadd.s32 1, %s425_s12  }
 0x104   : > { %p10_p4 = scmp.ge.s32.totalorder %s13_s12, 4  }
 0x106   :  { %12 = sbr.rel (!%p10_p4) target bundleno = 1 (0x1), region = 62 }

// kernel: forward.32
= control target key start
LH: loop header
LB: loop body
LE: loop exit
PB: predicated region body
PF: predicated region fallthrough
CT: control target
= control target key end

     0   :  { %s823_s18 = smov 0   ;;  %s972_s0 = inlined_call_operand.vmem [shape: bf16[128,72], index: 0, kind: input, shape index: {}]   ;;  %s973_s1 = inlined_call_operand.vmem [shape: bf16[72,32], index: 1, kind: input, shape index: {}]   ;;  %s974_s2 = inlined_call_operand.vmem [shape: f32[1,32], index: 2, kind: input, shape index: {}]   ;;  %s975_s3 = inlined_call_operand.vmem [shape: bf16[32,32], index: 3, kind: input, shape index: {}]   ;;  %s976_s4 = inlined_call_operand.vmem [shape: f32[1,32], index: 4, kind: input, shape index: {}]   ;;  %s977_s5 = inlined_call_operand.vmem [shape: bf16[128,32], index: 5, kind: output, shape index: {}]  }
   0x1 LB: > { %s656_s19 = sadd.s32 4294967295, %s791_s18   ;;  %p660_p0 = scmp.ge.s32.totalorder %s791_s18, 1  ;;  %s791_s18 = sphi %s823_s18, %s15_s18  }
   0x2   : > { %p188_p1 = scmp.lt.s32.totalorder %s791_s18, 3 }
   0x4   : > { %p189_p2 = pnand %p660_p0, %p188_p1 }
   0x5   : > { %v758_v0 = vld [vmem:[%s973_s1] sm:$0xff] (!%p189_p2)   ;;  %v759_v1 = vld [vmem:[%s973_s1 + $0x8] sm:$0xff] (!%p189_p2)   ;;  %s661_s24 = sshll.u32 (!%p189_p2), %s656_s19, 3  ;;  %v760_v2 = vld [vmem:[%s973_s1 + $0x10] sm:$0xff] (!%p189_p2)   ;;  %vm305_vm0 = vcmask (!%p189_p2), 588800   ;;  %vm318_vm1 = vcmask (!%p189_p2), 1043456  }
   0x6   : > { %192 = sbr.rel (%p189_p2) target bundleno = 493 (0x1ed), region = 40  ;;  %719 = vmatprep.subr.bf16.mxu0 (!%p189_p2), %v758_v0  ;;  %p217_p3 = scmp.lt.s32.totalorder (!%p189_p2), %s661_s24, 15  ;;  %v761_v3 = vld [vmem:[%s973_s1 + $0x18] sm:$0xff] (!%p189_p2)   ;;  %v762_v5 = vld [vmem:[%s973_s1 + $0x20] ss:$0 sps:$4 sm:$0xff] (!%p189_p2)   ;;  %v768_v11 = vld [vmem:[%s975_s3 + $0x8] sm:$0xff] (!%p189_p2)  }
   0x7   : > { %720 = vmatpush3.bf16.msra.mxu0 (!%p189_p2), %v758_v0  ;;  %v320_v6 = vsel (!%p189_p2), %vm318_vm1, %v762_v5, 0  ;;  %v767_v10 = vld [vmem:[%s975_s3] sm:$0xff] (!%p189_p2)   ;;  %vm417_vm2 = vcmask (!%p189_p2), 261120   ;;  %vm591_vm6 = vcmask (!%p189_p2), 257024  }
   0x8   : > { %721 = vmatprep.subr.bf16.mxu0 (!%p189_p2), %v759_v1  ;;  %737 = vmatprep.subr.bf16.mxu1 (!%p189_p2), %v767_v10  ;;  %v665_v12 = vld [vmem:[%s974_s2] ss:$0 sm:$0xff] (!%p189_p2) }
   0x9   : > { %738 = vmatpush3.bf16.msra.mxu1 (!%p189_p2), %v767_v10  ;;  %v679_v41 = vld [vmem:[%s976_s4] ss:$0 sm:$0xff] (!%p189_p2) }
   0xa   : > { %739 = vmatprep.subr.bf16.mxu1 (!%p189_p2), %v768_v11 }
   0xb   : > { %722 = vmatpush3.bf16.msra.mxu0 (!%p189_p2), %v759_v1 }
   0xc   : > { %723 = vmatprep.subr.bf16.mxu0 (!%p189_p2), %v760_v2 }
   0xd   : > { %s979_s24 = smov (!%p217_p3, %s661_s24), 15  ;;  %740 = vmatpush3.bf16.msra.mxu1 %v768_v11 }
   0xe   : > { %s662_s27 = sshll.u32 %s979_s24, 2 }
   0xf   : > { %s220_s7 = scalar_lea.vmem %s972_s0, %s662_s27  ;;  %724 = vmatpush3.bf16.msra.mxu0 %v760_v2  ;;  %s924_s21 = scalar_lea.vmem %s977_s5, %s662_s27 }
  0x10   : > { %v763_v4 = vld [vmem:[%s220_s7] sm:$0xff]   ;;  %725 = vmatprep.subr.bf16.mxu0 %v761_v3  ;;  %v764_v7 = vld [vmem:[%s220_s7 + $0x8] sm:$0xff]   ;;  %v765_v8 = vld [vmem:[%s220_s7 + $0x10] sm:$0xff]  }
  0x11   : > { %729 = vmatprep.mubr.msk.bf16.mxu0 %vm305_vm0, %v763_v4  ;;  %v766_v9 = vld [vmem:[%s220_s7 + $0x18] sm:$0xff]  }
  0x13   : > { %726 = vmatpush3.bf16.msra.mxu0 %v761_v3 }
  0x14   : > { %749 = vmatprep.subr.msk.bf16.mxu0 %vm318_vm1, %v762_v5 }
  0x17   : > { %728 = vmatpush3.bf16.msra.mxu0 %v320_v6 }
  0x1a   : > { %730 = vmatmul.mubr.msk.bf16.vlgmr.msra.gmra.mrb[0].mxu0 %vm305_vm0, %v764_v7 }
  0x1b   : > { %733 = vmatprep.mubr.msk.bf16.mxu0 %vm305_vm0, %v765_v8 }
  0x22   : > { %734 = vmatmul.mubr.msk.bf16.gmra.mrb[4].mxu0 %vm305_vm0, %v766_v9 }
  0xed   : > { %v731_v13 = vpop.f32.mrb[0].mxu0 }
  0xee   : > { %v356_v14 = vpop.f32.mrb[1].mxu0  ;;  %v869_v17 = vadd.f32 %v731_v13, %v665_v12 }
  0xef   : > { %v867_v15 = vadd.f32 %v665_v12, %v356_v14  ;;  %v732_v16 = vpop.f32.mrb[2].mxu0 }
  0xf0   : > { %v871_v18 = vadd.f32 %v732_v16, %v665_v12  ;;  %v359_v19 = vpop.f32.mrb[3].mxu0  ;;  %v389_v24 = vmul.f32 %v869_v17, %v869_v17 }
  0xf1   : > { %v873_v20 = vadd.f32 %v665_v12, %v359_v19  ;;  %v387_v22 = vmul.f32 %v867_v15, %v867_v15 }
  0xf2   : > { %v390_v21 = vmul.f32 %v871_v18, %v871_v18 }
  0xf3   : > { %v388_v23 = vmul.f32 %v873_v20, %v873_v20 }
  0xf4   : > { %v396_v27 = vpack.c.bf16 %v390_v21, %v389_v24 }
  0xf5   : > { %v735_v25 = vpop.f32.mrb[4].mxu0  ;;  %v395_v26 = vpack.c.bf16 %v388_v23, %v387_v22 }
  0xf6   : > { %v372_v28 = vpop.f32.mrb[5].mxu0  ;;  %v886_v31 = vadd.f32 %v735_v25, %v665_v12 }
  0xf7   : > { %v883_v29 = vadd.f32 %v665_v12, %v372_v28  ;;  %v736_v30 = vpop.f32.mrb[6].mxu0  ;;  %741 = vmatprep.mubr.msk.bf16.mxu1 %vm417_vm2, %v395_v26 }
  0xf8   : > { %v888_v32 = vadd.f32 %v736_v30, %v665_v12  ;;  %v375_v33 = vpop.f32.mrb[7].mxu0  ;;  %742 = vmatmul.mubr.msk.bf16.vlgmr.msra.gmra.mrb[0].mxu1 %vm417_vm2, %v396_v27  ;;  %v393_v38 = vmul.f32 %v886_v31, %v886_v31 }
  0xf9   : > { %v891_v34 = vadd.f32 %v665_v12, %v375_v33  ;;  %v391_v36 = vmul.f32 %v883_v29, %v883_v29 }
  0xfa   : > { %v394_v35 = vmul.f32 %v888_v32, %v888_v32 }
  0xfb   : > { %v392_v37 = vmul.f32 %v891_v34, %v891_v34 }
  0xfc   : > { %v398_v40 = vpack.c.bf16 %v394_v35, %v393_v38 }
  0xfd   : > { %v397_v39 = vpack.c.bf16 %v392_v37, %v391_v36 }
  0xff   : > { %745 = vmatprep.mubr.msk.bf16.mxu1 %vm417_vm2, %v397_v39 }
 0x100   : > { %746 = vmatmul.mubr.msk.bf16.gmra.mrb[4].mxu1 %vm417_vm2, %v398_v40 }
 0x1cb   : > { %v743_v42 = vpop.f32.mrb[0].mxu1 }
 0x1cc   : > { %v473_v43 = vadd.f32 %v743_v42, %v679_v41  ;;  %v464_v44 = vpop.f32.mrb[1].mxu1 }
 0x1cd   : > { %v465_v45 = vadd.f32 %v679_v41, %v464_v44  ;;  %v744_v46 = vpop.f32.mrb[2].mxu1 }
 0x1ce   : > { %769 = vrsqrt.f32 %v473_v43  ;;  %v467_v47 = vpop.f32.mrb[3].mxu1  ;;  %v476_v48 = vadd.f32 %v744_v46, %v679_v41  ;;  %vm511_vm3 = vcmp.eq.f32.partialorder %v473_v43, inf  ;;  %vm513_vm4 = vcmp.eq.f32.partialorder %v473_v43, 0.0 }
 0x1cf   : > { %771 = vrsqrt.f32 %v465_v45  ;;  %v468_v49 = vadd.f32 %v679_v41, %v467_v47  ;;  %v514_v61 = vand.u32 2147483648, %v473_v43  ;;  %vm497_vm5 = vcmp.eq.f32.partialorder %v465_v45, inf }
 0x1d0   : > { %773 = vrsqrt.f32 %v476_v48  ;;  %v500_v0 = vand.u32 2147483648, %v465_v45  ;;  %vm499_vm7 = vcmp.eq.f32.partialorder %v465_v45, 0.0  ;;  %vm518_vm8 = vcmp.eq.f32.partialorder %v476_v48, inf }
 0x1d1   : > { %775 = vrsqrt.f32 %v468_v49  ;;  %vm520_vm9 = vcmp.eq.f32.partialorder %v476_v48, 0.0  ;;  %v521_v9 = vand.u32 2147483648, %v476_v48  ;;  %vm504_vm10 = vcmp.eq.f32.partialorder %v468_v49, inf }
 0x1d2   : > { %v507_v13 = vand.u32 2147483648, %v468_v49  ;;  %vm506_vm11 = vcmp.eq.f32.partialorder %v468_v49, 0.0 }
 0x1d3   : > { %v747_v50 = vpop.f32.mrb[4].mxu1 }
 0x1d4   : > { %v906_v51 = vadd.f32 %v747_v50, %v679_v41  ;;  %v480_v52 = vpop.f32.mrb[5].mxu1 }
 0x1d5   : > { %v908_v53 = vadd.f32 %v679_v41, %v480_v52  ;;  %v748_v54 = vpop.f32.mrb[6].mxu1 }
 0x1d6   : > { %777 = vrsqrt.f32 %v906_v51  ;;  %v483_v55 = vpop.f32.mrb[7].mxu1  ;;  %v912_v57 = vadd.f32 %v748_v54, %v679_v41  ;;  %vm539_vm12 = vcmp.eq.f32.partialorder %v906_v51, inf  ;;  %vm541_vm13 = vcmp.eq.f32.partialorder %v906_v51, 0.0 }
 0x1d7   : > { %779 = vrsqrt.f32 %v908_v53  ;;  %v914_v58 = vadd.f32 %v679_v41, %v483_v55  ;;  %v542_v25 = vand.u32 2147483648, %v906_v51  ;;  %vm525_vm14 = vcmp.eq.f32.partialorder %v908_v53, inf }
 0x1d8   : > { %v770_v56 = vpop.eup %769  ;;  %781 = vrsqrt.f32 %v912_v57  ;;  %v528_v28 = vand.u32 2147483648, %v908_v53  ;;  %vm527_vm15 = vcmp.eq.f32.partialorder %v908_v53, 0.0  ;;  %vm546_vm0 = vcmp.eq.f32.partialorder %v912_v57, inf }
 0x1d9   : > { %v772_v59 = vpop.eup %771  ;;  %v510_v60 = vmul.f32 %v770_v56, %v473_v43  ;;  %783 = vrsqrt.f32 %v914_v58  ;;  %vm548_vm1 = vcmp.eq.f32.partialorder %v912_v57, 0.0  ;;  %v549_v41 = vand.u32 2147483648, %v912_v57 }
 0x1da   : > { %v496_v62 = vmul.f32 %v772_v59, %v465_v45  ;;  %v774_v1 = vpop.eup %773  ;;  %vm532_vm2 = vcmp.eq.f32.partialorder %v914_v58, inf  ;;  %v535_v44 = vand.u32 2147483648, %v914_v58 }
 0x1db   : > { %v512_v63 = vsel %vm511_vm3, %v473_v43, %v510_v60  ;;  %v776_v4 = vpop.eup %775  ;;  %v517_v7 = vmul.f32 %v774_v1, %v476_v48  ;;  %vm534_vm3 = vcmp.eq.f32.partialorder %v914_v58, 0.0 }
 0x1dc   : > { %v515_v2 = vsel %vm513_vm4, %v514_v61, %v512_v63  ;;  %v498_v3 = vsel %vm497_vm5, %v465_v45, %v496_v62  ;;  %v503_v10 = vmul.f32 %v776_v4, %v468_v49 }
 0x1dd   : > { %v553_v5 = vmul.f32 %v515_v2, %v869_v17  ;;  %v501_v6 = vsel %vm499_vm7, %v500_v0, %v498_v3  ;;  %v519_v12 = vsel %vm518_vm8, %v476_v48, %v517_v7 }
 0x1de   : > { %v551_v8 = vmul.f32 %v501_v6, %v867_v15  ;;  %v522_v17 = vsel %vm520_vm9, %v521_v9, %v519_v12  ;;  %v505_v19 = vsel %vm504_vm10, %v468_v49, %v503_v10 }
 0x1df   : > { %v698_v11 = vpack.c.bf16 %v553_v5, %v553_v5  ;;  %v554_v22 = vmul.f32 %v522_v17, %v871_v18  ;;  %v508_v23 = vsel %vm506_vm11, %v507_v13, %v505_v19 }
 0x1e0   : > { %v778_v14 = vpop.eup %777  ;;  %v696_v16 = vpack.c.bf16 %v551_v8, %v551_v8  ;;  %v552_v24 = vmul.f32 %v508_v23, %v873_v20 }
 0x1e1   : > { %v780_v21 = vpop.eup %779  ;;  %594 = vst.msk [vmem:[%s924_s21 + $0x8] sm:$0xf] %vm591_vm6, %v698_v11  ;;  %v538_v15 = vmul.f32 %v778_v14, %v906_v51  ;;  %v699_v27 = vpack.c.bf16 %v554_v22, %v554_v22 }
 0x1e2   : > { %592 = vst.msk [vmem:[%s924_s21] sm:$0xf] %vm591_vm6, %v696_v16  ;;  %v524_v26 = vmul.f32 %v780_v21, %v908_v53  ;;  %v782_v30 = vpop.eup %781  ;;  %v697_v33 = vpack.c.bf16 %v552_v24, %v552_v24 }
 0x1e3   : > { %v540_v18 = vsel %vm539_vm12, %v906_v51, %v538_v15  ;;  %v784_v20 = vpop.eup %783  ;;  %595 = vst.msk [vmem:[%s924_s21 + $0xc] sm:$0xf] %vm591_vm6, %v699_v27  ;;  %v545_v39 = vmul.f32 %v782_v30, %v912_v57 }
 0x1e4   : > { %v543_v35 = vsel %vm541_vm13, %v542_v25, %v540_v18  ;;  %v526_v36 = vsel %vm525_vm14, %v908_v53, %v524_v26  ;;  %593 = vst.msk [vmem:[%s924_s21 + $0x4] sm:$0xf] %vm591_vm6, %v697_v33  ;;  %v531_v42 = vmul.f32 %v784_v20, %v914_v58 }
 0x1e5   : > { %v557_v37 = vmul.f32 %v543_v35, %v886_v31  ;;  %v529_v38 = vsel %vm527_vm15, %v528_v28, %v526_v36  ;;  %v547_v31 = vsel %vm546_vm0, %v912_v57, %v545_v39 }
 0x1e6   : > { %v555_v40 = vmul.f32 %v529_v38, %v883_v29  ;;  %v550_v46 = vsel %vm548_vm1, %v549_v41, %v547_v31  ;;  %v533_v47 = vsel %vm532_vm2, %v914_v58, %v531_v42 }
 0x1e7   : > { %v702_v43 = vpack.c.bf16 %v557_v37, %v557_v37  ;;  %v558_v29 = vmul.f32 %v550_v46, %v888_v32  ;;  %v536_v48 = vsel %vm534_vm3, %v535_v44, %v533_v47 }
 0x1e8   : > { %v700_v45 = vpack.c.bf16 %v555_v40, %v555_v40  ;;  %v556_v49 = vmul.f32 %v536_v48, %v891_v34 }
 0x1e9   : > { %598 = vst.msk [vmem:[%s924_s21 + $0x18] sm:$0xf] %vm591_vm6, %v702_v43  ;;  %v703_v50 = vpack.c.bf16 %v558_v29, %v558_v29 }
 0x1ea   : > { %596 = vst.msk [vmem:[%s924_s21 + $0x10] sm:$0xf] %vm591_vm6, %v700_v45  ;;  %v701_v51 = vpack.c.bf16 %v556_v49, %v556_v49 }
 0x1eb   : > { %599 = vst.msk [vmem:[%s924_s21 + $0x1c] sm:$0xf] %vm591_vm6, %v703_v50 }
 0x1ec   : > { %597 = vst.msk [vmem:[%s924_s21 + $0x14] sm:$0xf] %vm591_vm6, %v701_v51 }
 0x1ed PF: > { %s15_s18 = sadd.s32 1, %s791_s18  }
 0x1ee   : > { %p12_p4 = scmp.ge.s32.totalorder %s15_s18, 4  }
 0x1f0   :  { %14 = sbr.rel (!%p12_p4) target bundleno = 1 (0x1), region = 70 }

// kernel: forward.33
= control target key start
LH: loop header
LB: loop body
LE: loop exit
PB: predicated region body
PF: predicated region fallthrough
CT: control target
= control target key end

     0   :  { %s1735_s18 = smov 0   ;;  %s2442_s0 = inlined_call_operand.vmem [shape: bf16[512,72], index: 0, kind: input, shape index: {}]   ;;  %s2443_s1 = inlined_call_operand.vmem [shape: bf16[72,32], index: 1, kind: input, shape index: {}]   ;;  %s2444_s2 = inlined_call_operand.vmem [shape: f32[1,32], index: 2, kind: input, shape index: {}]   ;;  %s2445_s3 = inlined_call_operand.vmem [shape: bf16[32,32], index: 3, kind: input, shape index: {}]   ;;  %s2446_s4 = inlined_call_operand.vmem [shape: f32[1,32], index: 4, kind: input, shape index: {}]   ;;  %s2447_s5 = inlined_call_operand.vmem [shape: bf16[512,32], index: 5, kind: output, shape index: {}]  }
   0x1 LB: > { %s1352_s19 = sadd.s32 4294967295, %s1703_s18   ;;  %p1356_p0 = scmp.ge.s32.totalorder %s1703_s18, 1  ;;  %s1703_s18 = sphi %s1735_s18, %s15_s18  }
   0x2   : > { %p188_p1 = scmp.lt.s32.totalorder %s1703_s18, 3 }
   0x4   : > { %p189_p2 = pnand %p1356_p0, %p188_p1 }
   0x5   : > { %v1610_v0 = vld [vmem:[%s2443_s1] sm:$0xff] (!%p189_p2)   ;;  %v1611_v1 = vld [vmem:[%s2443_s1 + $0x8] sm:$0xff] (!%p189_p2)   ;;  %s1357_s24 = sshll.u32 (!%p189_p2), %s1352_s19, 5  ;;  %v1612_v2 = vld [vmem:[%s2443_s1 + $0x10] sm:$0xff] (!%p189_p2)   ;;  %vm389_vm0 = vcmask (!%p189_p2), 588800   ;;  %vm438_vm1 = vcmask (!%p189_p2), 1043456  }
   0x6   : > { %192 = sbr.rel (%p189_p2) target bundleno = 552 (0x228), region = 40  ;;  %1523 = vmatprep.subr.bf16.mxu0 (!%p189_p2), %v1610_v0  ;;  %p217_p3 = scmp.lt.s32.totalorder (!%p189_p2), %s1357_s24, 63  ;;  %v1613_v3 = vld [vmem:[%s2443_s1 + $0x18] sm:$0xff] (!%p189_p2)   ;;  %v1614_v5 = vld [vmem:[%s2443_s1 + $0x20] ss:$0 sps:$4 sm:$0xff] (!%p189_p2)   ;;  %v1632_v23 = vld [vmem:[%s2445_s3 + $0x8] sm:$0xff] (!%p189_p2)  }
   0x7   : > { %1524 = vmatpush3.bf16.msra.mxu0 (!%p189_p2), %v1610_v0  ;;  %v440_v6 = vsel (!%p189_p2), %vm438_vm1, %v1614_v5, 0  ;;  %v1631_v22 = vld [vmem:[%s2445_s3] sm:$0xff] (!%p189_p2)   ;;  %vm669_vm2 = vcmask (!%p189_p2), 261120   ;;  %vm1263_vm4 = vcmask (!%p189_p2), 257024  }
   0x8   : > { %1525 = vmatprep.subr.bf16.mxu0 (!%p189_p2), %v1611_v1  ;;  %1565 = vmatprep.subr.bf16.mxu1 (!%p189_p2), %v1631_v22  ;;  %v1809_v24 = vld [vmem:[%s2444_s2] ss:$0 sm:$0xff] (!%p189_p2) }
   0x9   : > { %1566 = vmatpush3.bf16.msra.mxu1 (!%p189_p2), %v1631_v22 }
   0xa   : > { %1567 = vmatprep.subr.bf16.mxu1 (!%p189_p2), %v1632_v23 }
   0xb   : > { %1526 = vmatpush3.bf16.msra.mxu0 (!%p189_p2), %v1611_v1 }
   0xc   : > { %1527 = vmatprep.subr.bf16.mxu0 (!%p189_p2), %v1612_v2 }
   0xd   : > { %s2449_s24 = smov (!%p217_p3, %s1357_s24), 63  ;;  %1568 = vmatpush3.bf16.msra.mxu1 %v1632_v23 }
   0xe   : > { %s1358_s27 = sshll.u32 %s2449_s24, 2 }
   0xf   : > { %s1763_s7 = scalar_lea.vmem %s2442_s0, %s1358_s27  ;;  %1528 = vmatpush3.bf16.msra.mxu0 %v1612_v2  ;;  %s2034_s21 = scalar_lea.vmem %s2447_s5, %s1358_s27 }
  0x10   : > { %v1615_v4 = vld [vmem:[%s1763_s7] sm:$0xff]   ;;  %1529 = vmatprep.subr.bf16.mxu0 %v1613_v3  ;;  %v1616_v7 = vld [vmem:[%s1763_s7 + $0x8] sm:$0xff]   ;;  %v1617_v8 = vld [vmem:[%s1763_s7 + $0x10] sm:$0xff]  }
  0x11   : > { %1533 = vmatprep.mubr.msk.bf16.mxu0 %vm389_vm0, %v1615_v4  ;;  %v1618_v9 = vld [vmem:[%s1763_s7 + $0x18] sm:$0xff]   ;;  %v1619_v10 = vld [vmem:[%s1763_s7 + $0x20] sm:$0xff]   ;;  %v1620_v11 = vld [vmem:[%s1763_s7 + $0x28] sm:$0xff]  }
  0x12   : > { %v1621_v12 = vld [vmem:[%s1763_s7 + $0x30] sm:$0xff]   ;;  %v1622_v13 = vld [vmem:[%s1763_s7 + $0x38] sm:$0xff]   ;;  %v1623_v14 = vld [vmem:[%s1763_s7 + $0x40] sm:$0xff]  }
  0x13   : > { %1530 = vmatpush3.bf16.msra.mxu0 %v1613_v3  ;;  %v1624_v15 = vld [vmem:[%s1763_s7 + $0x48] sm:$0xff]   ;;  %v1625_v16 = vld [vmem:[%s1763_s7 + $0x50] sm:$0xff]   ;;  %v1626_v17 = vld [vmem:[%s1763_s7 + $0x58] sm:$0xff]  }
  0x14   : > { %1601 = vmatprep.subr.msk.bf16.mxu0 %vm438_vm1, %v1614_v5  ;;  %v1627_v18 = vld [vmem:[%s1763_s7 + $0x60] sm:$0xff]   ;;  %v1628_v19 = vld [vmem:[%s1763_s7 + $0x68] sm:$0xff]   ;;  %v1629_v20 = vld [vmem:[%s1763_s7 + $0x70] sm:$0xff]  }
  0x15   : > { %v1630_v21 = vld [vmem:[%s1763_s7 + $0x78] sm:$0xff]  }
  0x17   : > { %1532 = vmatpush3.bf16.msra.mxu0 %v440_v6 }
  0x1a   : > { %1534 = vmatmul.mubr.msk.bf16.vlgmr.msra.gmra.mrb[0].mxu0 %vm389_vm0, %v1616_v7 }
  0x1b   : > { %1537 = vmatprep.mubr.msk.bf16.mxu0 %vm389_vm0, %v1617_v8 }
  0x22   : > { %1538 = vmatmul.mubr.msk.bf16.gmra.mrb[4].mxu0 %vm389_vm0, %v1618_v9 }
  0x23   : > { %1541 = vmatprep.mubr.msk.bf16.mxu0 %vm389_vm0, %v1619_v10 }
  0x2a   : > { %1542 = vmatmul.mubr.msk.bf16.gmra.mrb[8].mxu0 %vm389_vm0, %v1620_v11 }
  0x2b   : > { %1545 = vmatprep.mubr.msk.bf16.mxu0 %vm389_vm0, %v1621_v12 }
  0x32   : > { %1546 = vmatmul.mubr.msk.bf16.gmra.mrb[12].mxu0 %vm389_vm0, %v1622_v13 }
  0x33   : > { %1549 = vmatprep.mubr.msk.bf16.mxu0 %vm389_vm0, %v1623_v14 }
  0x3a   : > { %1550 = vmatmul.mubr.msk.bf16.gmra.mrb[16].mxu0 %vm389_vm0, %v1624_v15 }
  0x3b   : > { %1553 = vmatprep.mubr.msk.bf16.mxu0 %vm389_vm0, %v1625_v16 }
  0x42   : > { %1554 = vmatmul.mubr.msk.bf16.gmra.mrb[20].mxu0 %vm389_vm0, %v1626_v17 }
  0x43   : > { %1557 = vmatprep.mubr.msk.bf16.mxu0 %vm389_vm0, %v1627_v18 }
  0x4a   : > { %1558 = vmatmul.mubr.msk.bf16.gmra.mrb[24].mxu0 %vm389_vm0, %v1628_v19 }
  0x4b   : > { %1561 = vmatprep.mubr.msk.bf16.mxu0 %vm389_vm0, %v1629_v20 }
  0x52   : > { %1562 = vmatmul.mubr.msk.bf16.gmra.mrb[28].mxu0 %vm389_vm0, %v1630_v21 }
  0xed   : > { %v1535_v25 = vpop.f32.mrb[0].mxu0 }
  0xee   : > { %v476_v26 = vpop.f32.mrb[1].mxu0  ;;  %v1815_v29 = vadd.f32 %v1535_v25, %v1809_v24 }
  0xef   : > { %v1812_v27 = vadd.f32 %v1809_v24, %v476_v26  ;;  %v1536_v28 = vpop.f32.mrb[2].mxu0 }
  0xf0   : > { %v1818_v30 = vadd.f32 %v1536_v28, %v1809_v24  ;;  %v479_v31 = vpop.f32.mrb[3].mxu0  ;;  %v605_v36 = vmul.f32 %v1815_v29, %v1815_v29 }
  0xf1   : > { %v1821_v32 = vadd.f32 %v1809_v24, %v479_v31  ;;  %v603_v34 = vmul.f32 %v1812_v27, %v1812_v27 }
  0xf2   : > { %v606_v33 = vmul.f32 %v1818_v30, %v1818_v30 }
  0xf3   : > { %v604_v35 = vmul.f32 %v1821_v32, %v1821_v32 }
  0xf4   : > { %v636_v39 = vpack.c.bf16 %v606_v33, %v605_v36 }
  0xf5   : > { %v1539_v37 = vpop.f32.mrb[4].mxu0  ;;  %v635_v38 = vpack.c.bf16 %v604_v35, %v603_v34 }
  0xf6   : > { %v492_v40 = vpop.f32.mrb[5].mxu0  ;;  %v1836_v43 = vadd.f32 %v1539_v37, %v1809_v24 }
  0xf7   : > { %v1832_v41 = vadd.f32 %v1809_v24, %v492_v40  ;;  %v1540_v42 = vpop.f32.mrb[6].mxu0  ;;  %1569 = vmatprep.mubr.msk.bf16.mxu1 %vm669_vm2, %v635_v38 }
  0xf8   : > { %v1839_v44 = vadd.f32 %v1540_v42, %v1809_v24  ;;  %v495_v45 = vpop.f32.mrb[7].mxu0  ;;  %1570 = vmatmul.mubr.msk.bf16.vlgmr.msra.gmra.mrb[0].mxu1 %vm669_vm2, %v636_v39  ;;  %v609_v50 = vmul.f32 %v1836_v43, %v1836_v43 }
  0xf9   : > { %v1843_v46 = vadd.f32 %v1809_v24, %v495_v45  ;;  %v607_v48 = vmul.f32 %v1832_v41, %v1832_v41 }
  0xfa   : > { %v610_v47 = vmul.f32 %v1839_v44, %v1839_v44 }
  0xfb   : > { %v608_v49 = vmul.f32 %v1843_v46, %v1843_v46 }
  0xfc   : > { %v638_v53 = vpack.c.bf16 %v610_v47, %v609_v50 }
  0xfd   : > { %v637_v51 = vpack.c.bf16 %v608_v49, %v607_v48  ;;  %v1543_v52 = vpop.f32.mrb[8].mxu0 }
  0xfe   : > { %v508_v54 = vpop.f32.mrb[9].mxu0  ;;  %v1858_v57 = vadd.f32 %v1543_v52, %v1809_v24 }
  0xff   : > { %v1854_v55 = vadd.f32 %v1809_v24, %v508_v54  ;;  %v1544_v56 = vpop.f32.mrb[10].mxu0  ;;  %1573 = vmatprep.mubr.msk.bf16.mxu1 %vm669_vm2, %v637_v51 }
 0x100   : > { %v1861_v58 = vadd.f32 %v1544_v56, %v1809_v24  ;;  %v511_v59 = vpop.f32.mrb[11].mxu0  ;;  %1574 = vmatmul.mubr.msk.bf16.gmra.mrb[4].mxu1 %vm669_vm2, %v638_v53  ;;  %v613_v0 = vmul.f32 %v1858_v57, %v1858_v57 }
 0x101   : > { %v1865_v60 = vadd.f32 %v1809_v24, %v511_v59  ;;  %v611_v62 = vmul.f32 %v1854_v55, %v1854_v55 }
 0x102   : > { %v614_v61 = vmul.f32 %v1861_v58, %v1861_v58 }
 0x103   : > { %v612_v63 = vmul.f32 %v1865_v60, %v1865_v60 }
 0x104   : > { %v640_v3 = vpack.c.bf16 %v614_v61, %v613_v0 }
 0x105   : > { %v639_v1 = vpack.c.bf16 %v612_v63, %v611_v62  ;;  %v1547_v2 = vpop.f32.mrb[12].mxu0 }
 0x106   : > { %v524_v4 = vpop.f32.mrb[13].mxu0  ;;  %v1880_v7 = vadd.f32 %v1547_v2, %v1809_v24 }
 0x107   : > { %v1876_v5 = vadd.f32 %v1809_v24, %v524_v4  ;;  %v1548_v6 = vpop.f32.mrb[14].mxu0  ;;  %1577 = vmatprep.mubr.msk.bf16.mxu1 %vm669_vm2, %v639_v1 }
 0x108   : > { %v1883_v8 = vadd.f32 %v1548_v6, %v1809_v24  ;;  %v527_v9 = vpop.f32.mrb[15].mxu0  ;;  %1578 = vmatmul.mubr.msk.bf16.gmra.mrb[8].mxu1 %vm669_vm2, %v640_v3  ;;  %v617_v14 = vmul.f32 %v1880_v7, %v1880_v7 }
 0x109   : > { %v1887_v10 = vadd.f32 %v1809_v24, %v527_v9  ;;  %v615_v12 = vmul.f32 %v1876_v5, %v1876_v5 }
 0x10a   : > { %v618_v11 = vmul.f32 %v1883_v8, %v1883_v8 }
 0x10b   : > { %v616_v13 = vmul.f32 %v1887_v10, %v1887_v10 }
 0x10c   : > { %v642_v17 = vpack.c.bf16 %v618_v11, %v617_v14 }
 0x10d   : > { %v641_v15 = vpack.c.bf16 %v616_v13, %v615_v12  ;;  %v1551_v16 = vpop.f32.mrb[16].mxu0 }
 0x10e   : > { %v540_v18 = vpop.f32.mrb[17].mxu0  ;;  %v1902_v21 = vadd.f32 %v1551_v16, %v1809_v24 }
 0x10f   : > { %v1898_v19 = vadd.f32 %v1809_v24, %v540_v18  ;;  %v1552_v20 = vpop.f32.mrb[18].mxu0  ;;  %1581 = vmatprep.mubr.msk.bf16.mxu1 %vm669_vm2, %v641_v15 }
 0x110   : > { %v1905_v22 = vadd.f32 %v1552_v20, %v1809_v24  ;;  %v543_v23 = vpop.f32.mrb[19].mxu0  ;;  %1582 = vmatmul.mubr.msk.bf16.gmra.mrb[12].mxu1 %vm669_vm2, %v642_v17  ;;  %v621_v33 = vmul.f32 %v1902_v21, %v1902_v21 }
 0x111   : > { %v1909_v25 = vadd.f32 %v1809_v24, %v543_v23  ;;  %v619_v28 = vmul.f32 %v1898_v19, %v1898_v19 }
 0x112   : > { %v622_v26 = vmul.f32 %v1905_v22, %v1905_v22 }
 0x113   : > { %v620_v31 = vmul.f32 %v1909_v25, %v1909_v25 }
 0x114   : > { %v644_v36 = vpack.c.bf16 %v622_v26, %v621_v33 }
 0x115   : > { %v643_v34 = vpack.c.bf16 %v620_v31, %v619_v28  ;;  %v1555_v35 = vpop.f32.mrb[20].mxu0 }
 0x116   : > { %v556_v37 = vpop.f32.mrb[21].mxu0  ;;  %v1924_v40 = vadd.f32 %v1555_v35, %v1809_v24 }
 0x117   : > { %v1920_v38 = vadd.f32 %v1809_v24, %v556_v37  ;;  %v1556_v39 = vpop.f32.mrb[22].mxu0  ;;  %1585 = vmatprep.mubr.msk.bf16.mxu1 %vm669_vm2, %v643_v34 }
 0x118   : > { %v1927_v42 = vadd.f32 %v1556_v39, %v1809_v24  ;;  %v559_v45 = vpop.f32.mrb[23].mxu0  ;;  %1586 = vmatmul.mubr.msk.bf16.gmra.mrb[16].mxu1 %vm669_vm2, %v644_v36  ;;  %v625_v51 = vmul.f32 %v1924_v40, %v1924_v40 }
 0x119   : > { %v1931_v47 = vadd.f32 %v1809_v24, %v559_v45  ;;  %v623_v49 = vmul.f32 %v1920_v38, %v1920_v38 }
 0x11a   : > { %v626_v48 = vmul.f32 %v1927_v42, %v1927_v42 }
 0x11b   : > { %v624_v50 = vmul.f32 %v1931_v47, %v1931_v47 }
 0x11c   : > { %v646_v54 = vpack.c.bf16 %v626_v48, %v625_v51 }
 0x11d   : > { %v645_v52 = vpack.c.bf16 %v624_v50, %v623_v49  ;;  %v1559_v53 = vpop.f32.mrb[24].mxu0 }
 0x11e   : > { %v572_v56 = vpop.f32.mrb[25].mxu0  ;;  %v1946_v62 = vadd.f32 %v1559_v53, %v1809_v24 }
 0x11f   : > { %v1942_v59 = vadd.f32 %v1809_v24, %v572_v56  ;;  %v1560_v61 = vpop.f32.mrb[26].mxu0  ;;  %1589 = vmatprep.mubr.msk.bf16.mxu1 %vm669_vm2, %v645_v52 }
 0x120   : > { %v1949_v63 = vadd.f32 %v1560_v61, %v1809_v24  ;;  %v575_v0 = vpop.f32.mrb[27].mxu0  ;;  %1590 = vmatmul.mubr.msk.bf16.gmra.mrb[20].mxu1 %vm669_vm2, %v646_v54  ;;  %v629_v6 = vmul.f32 %v1946_v62, %v1946_v62 }
 0x121   : > { %v1953_v1 = vadd.f32 %v1809_v24, %v575_v0  ;;  %v627_v3 = vmul.f32 %v1942_v59, %v1942_v59 }
 0x122   : > { %v630_v2 = vmul.f32 %v1949_v63, %v1949_v63 }
 0x123   : > { %v628_v4 = vmul.f32 %v1953_v1, %v1953_v1 }
 0x124   : > { %v648_v12 = vpack.c.bf16 %v630_v2, %v629_v6 }
 0x125   : > { %v647_v9 = vpack.c.bf16 %v628_v4, %v627_v3  ;;  %v1563_v11 = vpop.f32.mrb[28].mxu0 }
 0x126   : > { %v588_v13 = vpop.f32.mrb[29].mxu0  ;;  %v1968_v16 = vadd.f32 %v1563_v11, %v1809_v24 }
 0x127   : > { %v1964_v14 = vadd.f32 %v1809_v24, %v588_v13  ;;  %v1564_v15 = vpop.f32.mrb[30].mxu0  ;;  %1593 = vmatprep.mubr.msk.bf16.mxu1 %vm669_vm2, %v647_v9 }
 0x128   : > { %v1971_v17 = vadd.f32 %v1564_v15, %v1809_v24  ;;  %v591_v18 = vpop.f32.mrb[31].mxu0  ;;  %1594 = vmatmul.mubr.msk.bf16.gmra.mrb[24].mxu1 %vm669_vm2, %v648_v12  ;;  %v633_v31 = vmul.f32 %v1968_v16, %v1968_v16 }
 0x129   : > { %v1975_v20 = vadd.f32 %v1809_v24, %v591_v18  ;;  %v631_v26 = vmul.f32 %v1964_v14, %v1964_v14  ;;  %v1990_v24 = vld [vmem:[%s2446_s4] ss:$0 sm:$0xff] }
 0x12a   : > { %v634_v23 = vmul.f32 %v1971_v17, %v1971_v17 }
 0x12b   : > { %v632_v28 = vmul.f32 %v1975_v20, %v1975_v20 }
 0x12c   : > { %v650_v34 = vpack.c.bf16 %v634_v23, %v633_v31 }
 0x12d   : > { %v649_v33 = vpack.c.bf16 %v632_v28, %v631_v26 }
 0x12f   : > { %1597 = vmatprep.mubr.msk.bf16.mxu1 %vm669_vm2, %v649_v33 }
 0x130   : > { %1598 = vmatmul.mubr.msk.bf16.gmra.mrb[28].mxu1 %vm669_vm2, %v650_v34 }
 0x1cb   : > { %v1571_v35 = vpop.f32.mrb[0].mxu1 }
 0x1cc   : > { %v761_v36 = vadd.f32 %v1571_v35, %v1990_v24  ;;  %v752_v37 = vpop.f32.mrb[1].mxu1 }
 0x1cd   : > { %v753_v39 = vadd.f32 %v1990_v24, %v752_v37  ;;  %v1572_v45 = vpop.f32.mrb[2].mxu1 }
 0x1ce   : > { %1633 = vrsqrt.f32 %v761_v36  ;;  %v755_v48 = vpop.f32.mrb[3].mxu1  ;;  %v764_v49 = vadd.f32 %v1572_v45, %v1990_v24  ;;  %vm895_vm3 = vcmp.eq.f32.partialorder %v761_v36, inf  ;;  %vm897_vm5 = vcmp.eq.f32.partialorder %v761_v36, 0.0 }
 0x1cf   : > { %1635 = vrsqrt.f32 %v753_v39  ;;  %v1996_v50 = vadd.f32 %v1990_v24, %v755_v48  ;;  %v898_v0 = vand.u32 2147483648, %v761_v36  ;;  %vm881_vm6 = vcmp.eq.f32.partialorder %v753_v39, inf }
 0x1d0   : > { %1637 = vrsqrt.f32 %v764_v49  ;;  %vm883_vm7 = vcmp.eq.f32.partialorder %v753_v39, 0.0  ;;  %v884_v3 = vand.u32 2147483648, %v753_v39  ;;  %vm902_vm8 = vcmp.eq.f32.partialorder %v764_v49, inf }
 0x1d1   : > { %1639 = vrsqrt.f32 %v1996_v50  ;;  %vm904_vm9 = vcmp.eq.f32.partialorder %v764_v49, 0.0  ;;  %v905_v12 = vand.u32 2147483648, %v764_v49  ;;  %vm888_vm10 = vcmp.eq.f32.partialorder %v1996_v50, inf }
 0x1d2   : > { %vm890_vm11 = vcmp.eq.f32.partialorder %v1996_v50, 0.0  ;;  %v891_v18 = vand.u32 2147483648, %v1996_v50 }
 0x1d3   : > { %v1575_v51 = vpop.f32.mrb[4].mxu1 }
 0x1d4   : > { %v2000_v52 = vadd.f32 %v1575_v51, %v1990_v24  ;;  %v768_v53 = vpop.f32.mrb[5].mxu1 }
 0x1d5   : > { %v2003_v54 = vadd.f32 %v1990_v24, %v768_v53  ;;  %v1576_v56 = vpop.f32.mrb[6].mxu1 }
 0x1d6   : > { %1641 = vrsqrt.f32 %v2000_v52  ;;  %v771_v61 = vpop.f32.mrb[7].mxu1  ;;  %v2008_v4 = vadd.f32 %v1576_v56, %v1990_v24  ;;  %vm923_vm12 = vcmp.eq.f32.partialorder %v2000_v52, inf  ;;  %vm925_vm13 = vcmp.eq.f32.partialorder %v2000_v52, 0.0 }
 0x1d7   : > { %1643 = vrsqrt.f32 %v2003_v54  ;;  %v2011_v6 = vadd.f32 %v1990_v24, %v771_v61  ;;  %v926_v33 = vand.u32 2147483648, %v2000_v52  ;;  %vm909_vm14 = vcmp.eq.f32.partialorder %v2003_v54, inf }
 0x1d8   : > { %v1634_v2 = vpop.eup %1633  ;;  %1645 = vrsqrt.f32 %v2008_v4  ;;  %vm911_vm15 = vcmp.eq.f32.partialorder %v2003_v54, 0.0  ;;  %vm930_vm0 = vcmp.eq.f32.partialorder %v2008_v4, inf  ;;  %vm932_vm1 = vcmp.eq.f32.partialorder %v2008_v4, 0.0 }
 0x1d9   : > { %v1636_v9 = vpop.eup %1635  ;;  %v894_v11 = vmul.f32 %v1634_v2, %v761_v36  ;;  %1647 = vrsqrt.f32 %v2011_v6  ;;  %vm916_vm2 = vcmp.eq.f32.partialorder %v2011_v6, inf }
 0x1da   : > { %v880_v13 = vmul.f32 %v1636_v9, %v753_v39  ;;  %v1638_v26 = vpop.eup %1637 }
 0x1db   : > { %v896_v15 = vsel %vm895_vm3, %v761_v36, %v894_v11  ;;  %v1579_v23 = vpop.f32.mrb[8].mxu1  ;;  %v1640_v35 = vpop.eup %1639  ;;  %v901_v48 = vmul.f32 %v1638_v26, %v764_v49  ;;  %vm918_vm3 = vcmp.eq.f32.partialorder %v2011_v6, 0.0 }
 0x1dc   : > { %v899_v28 = vsel %vm897_vm5, %v898_v0, %v896_v15  ;;  %v882_v31 = vsel %vm881_vm6, %v753_v39, %v880_v13  ;;  %v784_v34 = vpop.f32.mrb[9].mxu1  ;;  %v2027_v51 = vadd.f32 %v1579_v23, %v1990_v24  ;;  %v887_v56 = vmul.f32 %v1640_v35, %v1996_v50 }
 0x1dd   : > { %v1105_v37 = vmul.f32 %v899_v28, %v1815_v29  ;;  %v885_v45 = vsel %vm883_vm7, %v884_v3, %v882_v31  ;;  %v1580_v53 = vpop.f32.mrb[10].mxu1  ;;  %v2040_v29 = vadd.f32 %v1990_v24, %v784_v34  ;;  %v903_v0 = vsel %vm902_vm8, %v764_v49, %v901_v48 }
 0x1de   : > { %v1103_v36 = vmul.f32 %v885_v45, %v1812_v27  ;;  %v787_v39 = vpop.f32.mrb[11].mxu1  ;;  %1649 = vrsqrt.f32 %v2027_v51  ;;  %v906_v27 = vsel %vm904_vm9, %v905_v12, %v903_v0  ;;  %v889_v9 = vsel %vm888_vm10, %v1996_v50, %v887_v56 }
 0x1df   : > { %v1454_v61 = vpack.c.bf16 %v1105_v37, %v1105_v37  ;;  %v2050_v11 = vadd.f32 %v1580_v53, %v1990_v24  ;;  %v1106_v15 = vmul.f32 %v906_v27, %v1818_v30  ;;  %v892_v23 = vsel %vm890_vm11, %v891_v18, %v889_v9 }
 0x1e0   : > { %v1642_v2 = vpop.eup %1641  ;;  %v1452_v3 = vpack.c.bf16 %v1103_v36, %v1103_v36  ;;  %v912_v49 = vand.u32 2147483648, %v2003_v54  ;;  %v1104_v12 = vmul.f32 %v892_v23, %v1821_v32  ;;  %1651 = vrsqrt.f32 %v2040_v29 }
 0x1e1   : > { %v1644_v13 = vpop.eup %1643  ;;  %1266 = vst.msk [vmem:[%s2034_s21 + $0x8] sm:$0xf] %vm1263_vm4, %v1454_v61  ;;  %v922_v26 = vmul.f32 %v1642_v2, %v2000_v52  ;;  %v1455_v31 = vpack.c.bf16 %v1106_v15, %v1106_v15  ;;  %v933_v50 = vand.u32 2147483648, %v2008_v4  ;;  %1653 = vrsqrt.f32 %v2050_v11 }
 0x1e2   : > { %1264 = vst.msk [vmem:[%s2034_s21] sm:$0xf] %vm1263_vm4, %v1452_v3  ;;  %v908_v28 = vmul.f32 %v1644_v13, %v2003_v54  ;;  %v1646_v34 = vpop.eup %1645  ;;  %v1453_v32 = vpack.c.bf16 %v1104_v12, %v1104_v12  ;;  %v2093_v3 = vadd.f32 %v1990_v24, %v787_v39  ;;  %vm951_vm5 = vcmp.eq.f32.partialorder %v2027_v51, inf }
 0x1e3   : > { %v924_v30 = vsel %vm923_vm12, %v2000_v52, %v922_v26  ;;  %v1583_v18 = vpop.f32.mrb[12].mxu1  ;;  %v1648_v48 = vpop.eup %1647  ;;  %1267 = vst.msk [vmem:[%s2034_s21 + $0xc] sm:$0xf] %vm1263_vm4, %v1455_v31  ;;  %v929_v56 = vmul.f32 %v1646_v34, %v2008_v4  ;;  %vm953_vm6 = vcmp.eq.f32.partialorder %v2027_v51, 0.0  ;;  %v954_v12 = vand.u32 2147483648, %v2027_v51 }
 0x1e4   : > { %v927_v35 = vsel %vm925_vm13, %v926_v33, %v924_v30  ;;  %v910_v37 = vsel %vm909_vm14, %v2003_v54, %v908_v28  ;;  %v800_v45 = vpop.f32.mrb[13].mxu1  ;;  %1265 = vst.msk [vmem:[%s2034_s21 + $0x4] sm:$0xf] %vm1263_vm4, %v1453_v32  ;;  %v915_v61 = vmul.f32 %v1648_v48, %v2011_v6  ;;  %v2096_v27 = vadd.f32 %v1583_v18, %v1990_v24 }
 0x1e5   : > { %v1109_v53 = vmul.f32 %v927_v35, %v1836_v43  ;;  %v913_v36 = vsel %vm911_vm15, %v912_v49, %v910_v37  ;;  %v1584_v52 = vpop.f32.mrb[14].mxu1  ;;  %v919_v43 = vand.u32 2147483648, %v2011_v6  ;;  %v931_v2 = vsel %vm930_vm0, %v2008_v4, %v929_v56 }
 0x1e6   : > { %v1107_v33 = vmul.f32 %v913_v36, %v1832_v41  ;;  %v803_v0 = vpop.f32.mrb[15].mxu1  ;;  %v934_v9 = vsel %vm932_vm1, %v933_v50, %v931_v2  ;;  %v917_v13 = vsel %vm916_vm2, %v2011_v6, %v915_v61  ;;  %v2102_v15 = vadd.f32 %v1990_v24, %v800_v45 }
 0x1e7   : > { %v1458_v54 = vpack.c.bf16 %v1109_v53, %v1109_v53  ;;  %v1110_v26 = vmul.f32 %v934_v9, %v1839_v44  ;;  %v920_v49 = vsel %vm918_vm3, %v919_v43, %v917_v13  ;;  %1655 = vrsqrt.f32 %v2093_v3 }
 0x1e8   : > { %v1456_v41 = vpack.c.bf16 %v1107_v33, %v1107_v33  ;;  %v1650_v23 = vpop.eup %1649  ;;  %v1108_v39 = vmul.f32 %v920_v49, %v1843_v46  ;;  %vm937_vm7 = vcmp.eq.f32.partialorder %v2040_v29, inf  ;;  %1657 = vrsqrt.f32 %v2096_v27 }
 0x1e9   : > { %1270 = vst.msk [vmem:[%s2034_s21 + $0x18] sm:$0xf] %vm1263_vm4, %v1458_v54  ;;  %v950_v4 = vmul.f32 %v1650_v23, %v2027_v51  ;;  %v1459_v6 = vpack.c.bf16 %v1110_v26, %v1110_v26  ;;  %vm939_vm8 = vcmp.eq.f32.partialorder %v2040_v29, 0.0  ;;  %1659 = vrsqrt.f32 %v2102_v15 }
 0x1ea   : > { %1268 = vst.msk [vmem:[%s2034_s21 + $0x10] sm:$0xf] %vm1263_vm4, %v1456_v41  ;;  %v1652_v28 = vpop.eup %1651  ;;  %v1457_v31 = vpack.c.bf16 %v1108_v39, %v1108_v39  ;;  %v940_v34 = vand.u32 2147483648, %v2040_v29  ;;  %vm958_vm9 = vcmp.eq.f32.partialorder %v2050_v11, inf  ;;  %vm960_vm10 = vcmp.eq.f32.partialorder %v2050_v11, 0.0 }
 0x1eb   : > { %v1587_v44 = vpop.f32.mrb[16].mxu1  ;;  %v952_v30 = vsel %vm951_vm5, %v2027_v51, %v950_v4  ;;  %1271 = vst.msk [vmem:[%s2034_s21 + $0x1c] sm:$0xf] %vm1263_vm4, %v1459_v6  ;;  %v936_v18 = vmul.f32 %v1652_v28, %v2040_v29  ;;  %v1654_v35 = vpop.eup %1653  ;;  %v2130_v37 = vadd.f32 %v1584_v52, %v1990_v24  ;;  %v2133_v45 = vadd.f32 %v1990_v24, %v803_v0 }
 0x1ec   : > { %v816_v46 = vpop.f32.mrb[17].mxu1  ;;  %v955_v50 = vsel %vm953_vm6, %v954_v12, %v952_v30  ;;  %1269 = vst.msk [vmem:[%s2034_s21 + $0x14] sm:$0xf] %vm1263_vm4, %v1457_v31  ;;  %v957_v36 = vmul.f32 %v1654_v35, %v2050_v11  ;;  %v961_v56 = vand.u32 2147483648, %v2050_v11  ;;  %vm944_vm11 = vcmp.eq.f32.partialorder %v2093_v3, inf }
 0x1ed   : > { %v1588_v32 = vpop.f32.mrb[18].mxu1  ;;  %v1113_v51 = vmul.f32 %v955_v50, %v1858_v57  ;;  %v938_v53 = vsel %vm937_vm7, %v2040_v29, %v936_v18  ;;  %v2141_v57 = vadd.f32 %v1587_v44, %v1990_v24  ;;  %1661 = vrsqrt.f32 %v2130_v37 }
 0x1ee   : > { %v819_v48 = vpop.f32.mrb[19].mxu1  ;;  %v941_v52 = vsel %vm939_vm8, %v940_v34, %v938_v53  ;;  %v959_v43 = vsel %vm958_vm9, %v2050_v11, %v957_v36  ;;  %vm946_vm12 = vcmp.eq.f32.partialorder %v2093_v3, 0.0  ;;  %v2153_v0 = vadd.f32 %v1990_v24, %v816_v46 }
 0x1ef   : > { %v1462_v33 = vpack.c.bf16 %v1113_v51, %v1113_v51  ;;  %v1111_v61 = vmul.f32 %v941_v52, %v1854_v55  ;;  %v962_v29 = vsel %vm960_vm10, %v961_v56, %v959_v43  ;;  %v947_v54 = vand.u32 2147483648, %v2093_v3 }
 0x1f0   : > { %vm979_vm13 = vcmp.eq.f32.partialorder %v2096_v27, inf  ;;  %1663 = vrsqrt.f32 %v2133_v45  ;;  %v1114_v41 = vmul.f32 %v962_v29, %v1861_v58  ;;  %vm981_vm14 = vcmp.eq.f32.partialorder %v2096_v27, 0.0 }
 0x1f1   : > { %1274 = vst.msk [vmem:[%s2034_s21 + $0x28] sm:$0xf] %vm1263_vm4, %v1462_v33  ;;  %v1656_v55 = vpop.eup %1655  ;;  %v1460_v2 = vpack.c.bf16 %v1111_v61, %v1111_v61  ;;  %1665 = vrsqrt.f32 %v2141_v57  ;;  %v982_v11 = vand.u32 2147483648, %v2096_v27  ;;  %vm965_vm15 = vcmp.eq.f32.partialorder %v2102_v15, inf }
 0x1f2   : > { %v943_v13 = vmul.f32 %v1656_v55, %v2093_v3  ;;  %vm967_vm0 = vcmp.eq.f32.partialorder %v2102_v15, 0.0  ;;  %v1658_v26 = vpop.eup %1657  ;;  %v1463_v49 = vpack.c.bf16 %v1114_v41, %v1114_v41  ;;  %v968_v58 = vand.u32 2147483648, %v2102_v15 }
 0x1f3   : > { %v1591_v9 = vpop.f32.mrb[20].mxu1  ;;  %1272 = vst.msk [vmem:[%s2034_s21 + $0x20] sm:$0xf] %vm1263_vm4, %v1460_v2  ;;  %vm986_vm1 = vcmp.eq.f32.partialorder %v2130_v37, inf  ;;  %1667 = vrsqrt.f32 %v2153_v0  ;;  %v1660_v4 = vpop.eup %1659  ;;  %v978_v12 = vmul.f32 %v1658_v26, %v2096_v27  ;;  %vm988_vm2 = vcmp.eq.f32.partialorder %v2130_v37, 0.0 }
 0x1f4   : > { %v832_v23 = vpop.f32.mrb[21].mxu1  ;;  %v945_v6 = vsel %vm944_vm11, %v2093_v3, %v943_v13  ;;  %v2180_v44 = vadd.f32 %v1588_v32, %v1990_v24  ;;  %1275 = vst.msk [vmem:[%s2034_s21 + $0x2c] sm:$0xf] %vm1263_vm4, %v1463_v49  ;;  %v964_v30 = vmul.f32 %v1660_v4, %v2102_v15  ;;  %v989_v46 = vand.u32 2147483648, %v2130_v37 }
 0x1f5   : > { %v1592_v39 = vpop.f32.mrb[22].mxu1  ;;  %v948_v31 = vsel %vm946_vm12, %v947_v54, %v945_v6  ;;  %v2189_v50 = vadd.f32 %v1990_v24, %v819_v48  ;;  %v980_v34 = vsel %vm979_vm13, %v2096_v27, %v978_v12  ;;  %v2197_v32 = vadd.f32 %v1591_v9, %v1990_v24 }
 0x1f6   : > { %v835_v28 = vpop.f32.mrb[23].mxu1  ;;  %v1112_v18 = vmul.f32 %v948_v31, %v1865_v60  ;;  %1669 = vrsqrt.f32 %v2180_v44  ;;  %v983_v3 = vsel %vm981_vm14, %v982_v11, %v980_v34  ;;  %v966_v35 = vsel %vm965_vm15, %v2102_v15, %v964_v30 }
 0x1f7   : > { %vm972_vm3 = vcmp.eq.f32.partialorder %v2133_v45, inf  ;;  %vm974_vm5 = vcmp.eq.f32.partialorder %v2133_v45, 0.0  ;;  %v1662_v60 = vpop.eup %1661  ;;  %v1117_v48 = vmul.f32 %v983_v3, %v1880_v7  ;;  %v969_v53 = vsel %vm967_vm0, %v968_v58, %v966_v35 }
 0x1f8   : > { %v1461_v51 = vpack.c.bf16 %v1112_v18, %v1112_v18  ;;  %1671 = vrsqrt.f32 %v2189_v50  ;;  %v1115_v27 = vmul.f32 %v969_v53, %v1876_v5  ;;  %v985_v36 = vmul.f32 %v1662_v60, %v2130_v37 }
 0x1f9   : > { %v975_v56 = vand.u32 2147483648, %v2133_v45  ;;  %vm1007_vm6 = vcmp.eq.f32.partialorder %v2141_v57, inf  ;;  %v1466_v7 = vpack.c.bf16 %v1117_v48, %v1117_v48  ;;  %vm1009_vm7 = vcmp.eq.f32.partialorder %v2141_v57, 0.0 }
 0x1fa   : > { %v1664_v52 = vpop.eup %1663  ;;  %1273 = vst.msk [vmem:[%s2034_s21 + $0x24] sm:$0xf] %vm1263_vm4, %v1461_v51  ;;  %v1010_v15 = vand.u32 2147483648, %v2141_v57  ;;  %1673 = vrsqrt.f32 %v2197_v32  ;;  %v1464_v43 = vpack.c.bf16 %v1115_v27, %v1115_v27  ;;  %v987_v29 = vsel %vm986_vm1, %v2130_v37, %v985_v36 }
 0x1fb   : > { %v2214_v33 = vpop.f32.mrb[24].mxu1  ;;  %v1666_v61 = vpop.eup %1665  ;;  %v971_v54 = vmul.f32 %v1664_v52, %v2133_v45  ;;  %vm993_vm8 = vcmp.eq.f32.partialorder %v2153_v0, inf  ;;  %1278 = vst.msk [vmem:[%s2034_s21 + $0x38] sm:$0xf] %vm1263_vm4, %v1466_v7  ;;  %v990_v2 = vsel %vm988_vm2, %v989_v46, %v987_v29  ;;  %vm995_vm9 = vcmp.eq.f32.partialorder %v2153_v0, 0.0 }
 0x1fc   : > { %v2221_v5 = vpop.f32.mrb[25].mxu1  ;;  %v1006_v41 = vmul.f32 %v1666_v61, %v2141_v57  ;;  %v2237_v9 = vadd.f32 %v1990_v24, %v832_v23  ;;  %1276 = vst.msk [vmem:[%s2034_s21 + $0x30] sm:$0xf] %vm1263_vm4, %v1464_v43  ;;  %v1118_v26 = vmul.f32 %v990_v2, %v1883_v8  ;;  %v996_v37 = vand.u32 2147483648, %v2153_v0 }
 0x1fd   : > { %v2228_v55 = vpop.f32.mrb[26].mxu1  ;;  %v1668_v11 = vpop.eup %1667  ;;  %v973_v49 = vsel %vm972_vm3, %v2133_v45, %v971_v54  ;;  %v2249_v58 = vadd.f32 %v1592_v39, %v1990_v24  ;;  %v2262_v39 = vadd.f32 %v1990_v24, %v835_v28  ;;  %vm1014_vm10 = vcmp.eq.f32.partialorder %v2180_v44, inf }
 0x1fe   : > { %v2239_v13 = vpop.f32.mrb[27].mxu1  ;;  %v976_v23 = vsel %vm974_vm5, %v975_v56, %v973_v49  ;;  %v1008_v4 = vsel %vm1007_vm6, %v2141_v57, %v1006_v41  ;;  %v992_v6 = vmul.f32 %v1668_v11, %v2153_v0  ;;  %1675 = vrsqrt.f32 %v2237_v9 }
 0x1ff   : > { %v1467_v8 = vpack.c.bf16 %v1118_v26, %v1118_v26  ;;  %v1116_v12 = vmul.f32 %v976_v23, %v1887_v10  ;;  %v1011_v31 = vsel %vm1009_vm7, %v1010_v15, %v1008_v4  ;;  %vm1016_vm11 = vcmp.eq.f32.partialorder %v2180_v44, 0.0 }
 0x200   : > { %v1670_v30 = vpop.eup %1669  ;;  %v1121_v45 = vmul.f32 %v1011_v31, %v1902_v21  ;;  %v994_v46 = vsel %vm993_vm8, %v2153_v0, %v992_v6  ;;  %1677 = vrsqrt.f32 %v2249_v58  ;;  %v1017_v35 = vand.u32 2147483648, %v2180_v44 }
 0x201   : > { %1279 = vst.msk [vmem:[%s2034_s21 + $0x3c] sm:$0xf] %vm1263_vm4, %v1467_v8  ;;  %v1465_v10 = vpack.c.bf16 %v1116_v12, %v1116_v12  ;;  %v997_v57 = vsel %vm995_vm9, %v996_v37, %v994_v46  ;;  %v1013_v28 = vmul.f32 %v1670_v30, %v2180_v44  ;;  %vm1000_vm12 = vcmp.eq.f32.partialorder %v2189_v50, inf }
 0x202   : > { %v1672_v18 = vpop.eup %1671  ;;  %v1470_v34 = vpack.c.bf16 %v1121_v45, %v1121_v45  ;;  %v1119_v3 = vmul.f32 %v997_v57, %v1898_v19  ;;  %vm1002_vm13 = vcmp.eq.f32.partialorder %v2189_v50, 0.0  ;;  %1679 = vrsqrt.f32 %v2262_v39 }
 0x203   : > { %v2276_v21 = vpop.f32.mrb[28].mxu1  ;;  %1277 = vst.msk [vmem:[%s2034_s21 + $0x34] sm:$0xf] %vm1263_vm4, %v1465_v10  ;;  %v1015_v0 = vsel %vm1014_vm10, %v2180_v44, %v1013_v28  ;;  %v999_v51 = vmul.f32 %v1672_v18, %v2189_v50  ;;  %v1003_v36 = vand.u32 2147483648, %v2189_v50  ;;  %vm1035_vm14 = vcmp.eq.f32.partialorder %v2197_v32, inf }
 0x204   : > { %v864_v60 = vpop.f32.mrb[29].mxu1  ;;  %v1674_v53 = vpop.eup %1673  ;;  %1282 = vst.msk [vmem:[%s2034_s21 + $0x48] sm:$0xf] %vm1263_vm4, %v1470_v34  ;;  %v1468_v19 = vpack.c.bf16 %v1119_v3, %v1119_v3  ;;  %v1018_v27 = vsel %vm1016_vm11, %v1017_v35, %v1015_v0  ;;  %vm1037_vm15 = vcmp.eq.f32.partialorder %v2197_v32, 0.0  ;;  %v1038_v61 = vand.u32 2147483648, %v2197_v32 }
 0x205   : > { %v1600_v48 = vpop.f32.mrb[30].mxu1  ;;  %v1122_v52 = vmul.f32 %v1018_v27, %v1905_v22  ;;  %v1001_v7 = vsel %vm1000_vm12, %v2189_v50, %v999_v51  ;;  %v1034_v15 = vmul.f32 %v1674_v53, %v2197_v32  ;;  %v2306_v43 = vadd.f32 %v2214_v33, %v1990_v24 }
 0x206   : > { %v2293_v56 = vpop.f32.mrb[31].mxu1  ;;  %1280 = vst.msk [vmem:[%s2034_s21 + $0x40] sm:$0xf] %vm1263_vm4, %v1468_v19  ;;  %v1004_v44 = vsel %vm1002_vm13, %v1003_v36, %v1001_v7  ;;  %v2310_v22 = vadd.f32 %v1990_v24, %v2221_v5  ;;  %v2316_v2 = vadd.f32 %v2228_v55, %v1990_v24  ;;  %vm1021_vm0 = vcmp.eq.f32.partialorder %v2237_v9, inf }
 0x207   : > { %v1471_v29 = vpack.c.bf16 %v1122_v52, %v1122_v52  ;;  %v1120_v50 = vmul.f32 %v1004_v44, %v1909_v25  ;;  %v1036_v54 = vsel %vm1035_vm14, %v2197_v32, %v1034_v15  ;;  %1681 = vrsqrt.f32 %v2306_v43 }
 0x208   : > { %v1676_v41 = vpop.eup %1675  ;;  %v1039_v11 = vsel %vm1037_vm15, %v1038_v61, %v1036_v54  ;;  %v2325_v25 = vadd.f32 %v1990_v24, %v2239_v13  ;;  %v1024_v32 = vand.u32 2147483648, %v2237_v9  ;;  %1683 = vrsqrt.f32 %v2310_v22 }
 0x209   : > { %1283 = vst.msk [vmem:[%s2034_s21 + $0x4c] sm:$0xf] %vm1263_vm4, %v1471_v29  ;;  %v1469_v33 = vpack.c.bf16 %v1120_v50, %v1120_v50  ;;  %v1125_v5 = vmul.f32 %v1039_v11, %v1924_v40  ;;  %v1020_v26 = vmul.f32 %v1676_v41, %v2237_v9  ;;  %vm1023_vm1 = vcmp.eq.f32.partialorder %v2237_v9, 0.0 }
 0x20a   : > { %v1678_v55 = vpop.eup %1677  ;;  %1685 = vrsqrt.f32 %v2316_v2  ;;  %vm1042_vm2 = vcmp.eq.f32.partialorder %v2249_v58, inf  ;;  %vm1044_vm3 = vcmp.eq.f32.partialorder %v2249_v58, 0.0  ;;  %v1045_v6 = vand.u32 2147483648, %v2249_v58 }
 0x20b   : > { %1281 = vst.msk [vmem:[%s2034_s21 + $0x44] sm:$0xf] %vm1263_vm4, %v1469_v33  ;;  %v1474_v49 = vpack.c.bf16 %v1125_v5, %v1125_v5  ;;  %v1022_v37 = vsel %vm1021_vm0, %v2237_v9, %v1020_v26  ;;  %v1041_v13 = vmul.f32 %v1678_v55, %v2249_v58  ;;  %vm1028_vm5 = vcmp.eq.f32.partialorder %v2262_v39, inf }
 0x20c   : > { %v1025_v40 = vsel %vm1023_vm1, %v1024_v32, %v1022_v37  ;;  %v1680_v23 = vpop.eup %1679  ;;  %1687 = vrsqrt.f32 %v2325_v25  ;;  %v1031_v12 = vand.u32 2147483648, %v2262_v39  ;;  %v2349_v31 = vadd.f32 %v2276_v21, %v1990_v24 }
 0x20d   : > { %1286 = vst.msk [vmem:[%s2034_s21 + $0x58] sm:$0xf] %vm1263_vm4, %v1474_v49  ;;  %v1123_v4 = vmul.f32 %v1025_v40, %v1920_v38  ;;  %v1043_v9 = vsel %vm1042_vm2, %v2249_v58, %v1041_v13  ;;  %v1027_v8 = vmul.f32 %v1680_v23, %v2262_v39  ;;  %v2352_v38 = vadd.f32 %v1990_v24, %v864_v60 }
 0x20e   : > { %v1046_v45 = vsel %vm1044_vm3, %v1045_v6, %v1043_v9  ;;  %v2355_v46 = vadd.f32 %v1600_v48, %v1990_v24  ;;  %vm1030_vm6 = vcmp.eq.f32.partialorder %v2262_v39, 0.0  ;;  %1689 = vrsqrt.f32 %v2349_v31 }
 0x20f   : > { %v1472_v30 = vpack.c.bf16 %v1123_v4, %v1123_v4  ;;  %v1126_v10 = vmul.f32 %v1046_v45, %v1927_v42  ;;  %v1029_v58 = vsel %vm1028_vm5, %v2262_v39, %v1027_v8  ;;  %1691 = vrsqrt.f32 %v2352_v38 }
 0x210   : > { %v1032_v57 = vsel %vm1030_vm6, %v1031_v12, %v1029_v58  ;;  %vm1063_vm7 = vcmp.eq.f32.partialorder %v2306_v43, inf  ;;  %vm1065_vm8 = vcmp.eq.f32.partialorder %v2306_v43, 0.0  ;;  %1693 = vrsqrt.f32 %v2355_v46 }
 0x211   : > { %1284 = vst.msk [vmem:[%s2034_s21 + $0x50] sm:$0xf] %vm1263_vm4, %v1472_v30  ;;  %v1682_v28 = vpop.eup %1681  ;;  %v1475_v21 = vpack.c.bf16 %v1126_v10, %v1126_v10  ;;  %v1124_v18 = vmul.f32 %v1032_v57, %v1931_v47  ;;  %v1066_v3 = vand.u32 2147483648, %v2306_v43  ;;  %vm1049_vm9 = vcmp.eq.f32.partialorder %v2310_v22, inf }
 0x212   : > { %v1062_v34 = vmul.f32 %v1682_v28, %v2306_v43  ;;  %v1684_v42 = vpop.eup %1683  ;;  %v2375_v47 = vadd.f32 %v1990_v24, %v2293_v56  ;;  %vm1051_vm10 = vcmp.eq.f32.partialorder %v2310_v22, 0.0  ;;  %v1052_v51 = vand.u32 2147483648, %v2310_v22 }
 0x213   : > { %1287 = vst.msk [vmem:[%s2034_s21 + $0x5c] sm:$0xf] %vm1263_vm4, %v1475_v21  ;;  %v1473_v39 = vpack.c.bf16 %v1124_v18, %v1124_v18  ;;  %v1048_v0 = vmul.f32 %v1684_v42, %v2310_v22  ;;  %vm1070_vm11 = vcmp.eq.f32.partialorder %v2316_v2, inf  ;;  %vm1072_vm12 = vcmp.eq.f32.partialorder %v2316_v2, 0.0 }
 0x214   : > { %v1686_v35 = vpop.eup %1685  ;;  %v1064_v60 = vsel %vm1063_vm7, %v2306_v43, %v1062_v34  ;;  %1695 = vrsqrt.f32 %v2375_v47  ;;  %v1073_v36 = vand.u32 2147483648, %v2316_v2  ;;  %vm1056_vm13 = vcmp.eq.f32.partialorder %v2325_v25, inf }
 0x215   : > { %1285 = vst.msk [vmem:[%s2034_s21 + $0x54] sm:$0xf] %vm1263_vm4, %v1473_v39  ;;  %v1067_v48 = vsel %vm1065_vm8, %v1066_v3, %v1064_v60  ;;  %v1069_v53 = vmul.f32 %v1686_v35, %v2316_v2  ;;  %v1050_v27 = vsel %vm1049_vm9, %v2310_v22, %v1048_v0  ;;  %vm1058_vm14 = vcmp.eq.f32.partialorder %v2325_v25, 0.0 }
 0x216   : > { %v1688_v24 = vpop.eup %1687  ;;  %v1129_v19 = vmul.f32 %v1067_v48, %v1946_v62  ;;  %v1053_v56 = vsel %vm1051_vm10, %v1052_v51, %v1050_v27  ;;  %v1059_v62 = vand.u32 2147483648, %v2325_v25  ;;  %vm1091_vm15 = vcmp.eq.f32.partialorder %v2349_v31, inf }
 0x217   : > { %v1071_v52 = vsel %vm1070_vm11, %v2316_v2, %v1069_v53  ;;  %v1055_v7 = vmul.f32 %v1688_v24, %v2325_v25  ;;  %v1127_v44 = vmul.f32 %v1053_v56, %v1942_v59  ;;  %vm1093_vm0 = vcmp.eq.f32.partialorder %v2349_v31, 0.0 }
 0x218   : > { %v1478_v15 = vpack.c.bf16 %v1129_v19, %v1129_v19  ;;  %v1074_v61 = vsel %vm1072_vm12, %v1073_v36, %v1071_v52  ;;  %v1690_v43 = vpop.eup %1689  ;;  %vm1077_vm1 = vcmp.eq.f32.partialorder %v2352_v38, inf  ;;  %vm1079_vm2 = vcmp.eq.f32.partialorder %v2352_v38, 0.0 }
 0x219   : > { %v1130_v22 = vmul.f32 %v1074_v61, %v1949_v63  ;;  %v1057_v29 = vsel %vm1056_vm13, %v2325_v25, %v1055_v7  ;;  %v1692_v50 = vpop.eup %1691  ;;  %v1476_v54 = vpack.c.bf16 %v1127_v44, %v1127_v44  ;;  %v1090_v59 = vmul.f32 %v1690_v43, %v2349_v31 }
 0x21a   : > { %1290 = vst.msk [vmem:[%s2034_s21 + $0x68] sm:$0xf] %vm1263_vm4, %v1478_v15  ;;  %v1060_v2 = vsel %vm1058_vm14, %v1059_v62, %v1057_v29  ;;  %v1094_v63 = vand.u32 2147483648, %v2349_v31  ;;  %v1076_v33 = vmul.f32 %v1692_v50, %v2352_v38  ;;  %v1694_v5 = vpop.eup %1693  ;;  %v1080_v25 = vand.u32 2147483648, %v2352_v38 }
 0x21b   : > { %v1479_v41 = vpack.c.bf16 %v1130_v22, %v1130_v22  ;;  %v1128_v11 = vmul.f32 %v1060_v2, %v1953_v1  ;;  %1288 = vst.msk [vmem:[%s2034_s21 + $0x60] sm:$0xf] %vm1263_vm4, %v1476_v54  ;;  %v1092_v26 = vsel %vm1091_vm15, %v2349_v31, %v1090_v59  ;;  %v1097_v49 = vmul.f32 %v1694_v5, %v2355_v46 }
 0x21c   : > { %v1095_v1 = vsel %vm1093_vm0, %v1094_v63, %v1092_v26  ;;  %v1078_v55 = vsel %vm1077_vm1, %v2352_v38, %v1076_v33  ;;  %vm1098_vm3 = vcmp.eq.f32.partialorder %v2355_v46, inf  ;;  %v1101_v13 = vand.u32 2147483648, %v2355_v46 }
 0x21d   : > { %1291 = vst.msk [vmem:[%s2034_s21 + $0x6c] sm:$0xf] %vm1263_vm4, %v1479_v41  ;;  %v1477_v32 = vpack.c.bf16 %v1128_v11, %v1128_v11  ;;  %v1133_v37 = vmul.f32 %v1095_v1, %v1968_v16  ;;  %v1081_v40 = vsel %vm1079_vm2, %v1080_v25, %v1078_v55  ;;  %v1099_v6 = vsel %vm1098_vm3, %v2355_v46, %v1097_v49 }
 0x21e   : > { %v1696_v23 = vpop.eup %1695  ;;  %v1131_v4 = vmul.f32 %v1081_v40, %v1964_v14  ;;  %vm1100_vm5 = vcmp.eq.f32.partialorder %v2355_v46, 0.0  ;;  %vm1084_vm6 = vcmp.eq.f32.partialorder %v2375_v47, inf  ;;  %v1087_v30 = vand.u32 2147483648, %v2375_v47 }
 0x21f   : > { %1289 = vst.msk [vmem:[%s2034_s21 + $0x64] sm:$0xf] %vm1263_vm4, %v1477_v32  ;;  %v1482_v9 = vpack.c.bf16 %v1133_v37, %v1133_v37  ;;  %v1102_v16 = vsel %vm1100_vm5, %v1101_v13, %v1099_v6  ;;  %v1083_v8 = vmul.f32 %v1696_v23, %v2375_v47  ;;  %vm1086_vm7 = vcmp.eq.f32.partialorder %v2375_v47, 0.0 }
 0x220   : > { %v1480_v12 = vpack.c.bf16 %v1131_v4, %v1131_v4  ;;  %v1134_v31 = vmul.f32 %v1102_v16, %v1971_v17 }
 0x221   : > { %1294 = vst.msk [vmem:[%s2034_s21 + $0x78] sm:$0xf] %vm1263_vm4, %v1482_v9  ;;  %v1085_v14 = vsel %vm1084_vm6, %v2375_v47, %v1083_v8 }
 0x222   : > { %1292 = vst.msk [vmem:[%s2034_s21 + $0x70] sm:$0xf] %vm1263_vm4, %v1480_v12  ;;  %v1483_v45 = vpack.c.bf16 %v1134_v31, %v1134_v31  ;;  %v1088_v38 = vsel %vm1086_vm7, %v1087_v30, %v1085_v14 }
 0x223   : > { %v1132_v46 = vmul.f32 %v1088_v38, %v1975_v20 }
 0x224   : > { %1295 = vst.msk [vmem:[%s2034_s21 + $0x7c] sm:$0xf] %vm1263_vm4, %v1483_v45 }
 0x225   : > { %v1481_v10 = vpack.c.bf16 %v1132_v46, %v1132_v46 }
 0x227   : > { %1293 = vst.msk [vmem:[%s2034_s21 + $0x74] sm:$0xf] %vm1263_vm4, %v1481_v10 }
 0x228 PF: > { %s15_s18 = sadd.s32 1, %s1703_s18  }
 0x229   : > { %p12_p4 = scmp.ge.s32.totalorder %s15_s18, 4  }
 0x22b   :  { %14 = sbr.rel (!%p12_p4) target bundleno = 1 (0x1), region = 70 }

// kernel: forward.34
= control target key start
LH: loop header
LB: loop body
LE: loop exit
PB: predicated region body
PF: predicated region fallthrough
CT: control target
= control target key end

     0   :  { %s1230_s12 = smov 0   ;;  %s1531_s0 = inlined_call_operand.vmem [shape: bf16[2048,72], index: 0, kind: input, shape index: {}]   ;;  %s1532_s1 = inlined_call_operand.vmem [shape: bf16[72,12], index: 1, kind: input, shape index: {}]   ;;  %s1533_s2 = inlined_call_operand.vmem [shape: f32[1,12], index: 2, kind: input, shape index: {}]   ;;  %s1534_s3 = inlined_call_operand.vmem [shape: f32[2048,12], index: 3, kind: output, shape index: {}]  }
   0x1 LB: > { %s953_s13 = sadd.s32 4294967295, %s1208_s12   ;;  %p957_p0 = scmp.ge.s32.totalorder %s1208_s12, 1  ;;  %s1208_s12 = sphi %s1230_s12, %s13_s12  }
   0x2   : > { %p138_p1 = scmp.lt.s32.totalorder %s1208_s12, 5 }
   0x4   : > { %p139_p2 = pnand %p957_p0, %p138_p1 }
   0x5   : > { %v1165_v0 = vld [vmem:[%s1532_s1] sm:$0xff] (!%p139_p2)   ;;  %v1166_v1 = vld [vmem:[%s1532_s1 + $0x8] sm:$0xff] (!%p139_p2)   ;;  %s958_s18 = sshll.u32 (!%p139_p2), %s953_s13, 6  ;;  %v1167_v2 = vld [vmem:[%s1532_s1 + $0x10] sm:$0xff] (!%p139_p2)   ;;  %vm442_vm0 = vcmask (!%p139_p2), 588800   ;;  %vm539_vm1 = vcmask (!%p139_p2), 1043456  }
   0x6   : > { %142 = sbr.rel (%p139_p2) target bundleno = 300 (0x12c), region = 32  ;;  %1071 = vmatprep.subr.bf16.mxu0 (!%p139_p2), %v1165_v0  ;;  %1145 = vmatprep.subr.bf16.mxu1 (!%p139_p2), %v1165_v0  ;;  %p163_p3 = scmp.lt.s32.totalorder (!%p139_p2), %s958_s18, 255  ;;  %v1168_v3 = vld [vmem:[%s1532_s1 + $0x18] sm:$0xff] (!%p139_p2)   ;;  %v1169_v6 = vld [vmem:[%s1532_s1 + $0x20] ss:$0 sps:$4 sm:$0xff] (!%p139_p2)   ;;  %vm832_vm2 = vcmask (!%p139_p2), 97280  }
   0x7   : > { %1072 = vmatpush3.bf16.msra.mxu0 (!%p139_p2), %v1165_v0  ;;  %1150 = vmatpush3.bf16.msra.mxu1 (!%p139_p2), %v1165_v0  ;;  %v541_v7 = vsel (!%p139_p2), %vm539_vm1, %v1169_v6, 0  ;;  %v1329_v38 = vld [vmem:[%s1533_s2] ss:$0 sm:$0xff] (!%p139_p2) }
   0x8   : > { %1073 = vmatprep.subr.bf16.mxu0 (!%p139_p2), %v1166_v1  ;;  %1146 = vmatprep.subr.bf16.mxu1 (!%p139_p2), %v1166_v1 }
   0xb   : > { %1074 = vmatpush3.bf16.msra.mxu0 (!%p139_p2), %v1166_v1  ;;  %1151 = vmatpush3.bf16.msra.mxu1 (!%p139_p2), %v1166_v1 }
   0xc   : > { %1075 = vmatprep.subr.bf16.mxu0 (!%p139_p2), %v1167_v2  ;;  %1147 = vmatprep.subr.bf16.mxu1 (!%p139_p2), %v1167_v2 }
   0xd   : > { %s1536_s18 = smov (!%p163_p3, %s958_s18), 255 }
   0xe   : > { %s959_s21 = sshll.u32 %s1536_s18, 2  ;;  %s961_s29 = sshll.u32 %s1536_s18, 3 }
   0xf   : > { %s1256_s26 = scalar_lea.vmem %s1531_s0, %s959_s21  ;;  %1076 = vmatpush3.bf16.msra.mxu0 %v1167_v2  ;;  %1152 = vmatpush3.bf16.msra.mxu1 %v1167_v2  ;;  %s1334_s7 = scalar_lea.vmem %s1534_s3, %s961_s29 }
  0x10   : > { %v1170_v4 = vld [vmem:[%s1256_s26] sm:$0xff]   ;;  %1077 = vmatprep.subr.bf16.mxu0 %v1168_v3  ;;  %1148 = vmatprep.subr.bf16.mxu1 %v1168_v3  ;;  %v1172_v8 = vld [vmem:[%s1256_s26 + $0x8] sm:$0xff]   ;;  %v1174_v10 = vld [vmem:[%s1256_s26 + $0x10] sm:$0xff]  }
  0x11   : > { %v1171_v5 = vld [vmem:[%s1256_s26 + $0x80] sm:$0xff]   ;;  %1081 = vmatprep.mubr.msk.bf16.mxu0 %vm442_vm0, %v1170_v4  ;;  %v1173_v9 = vld [vmem:[%s1256_s26 + $0x88] sm:$0xff]   ;;  %v1175_v11 = vld [vmem:[%s1256_s26 + $0x90] sm:$0xff]  }
  0x12   : > { %1113 = vmatprep.mubr.msk.bf16.mxu1 %vm442_vm0, %v1171_v5  ;;  %v1176_v12 = vld [vmem:[%s1256_s26 + $0x18] sm:$0xff]   ;;  %v1178_v14 = vld [vmem:[%s1256_s26 + $0x20] sm:$0xff]   ;;  %v1180_v16 = vld [vmem:[%s1256_s26 + $0x28] sm:$0xff]  }
  0x13   : > { %1078 = vmatpush3.bf16.msra.mxu0 %v1168_v3  ;;  %1153 = vmatpush3.bf16.msra.mxu1 %v1168_v3  ;;  %v1177_v13 = vld [vmem:[%s1256_s26 + $0x98] sm:$0xff]   ;;  %v1179_v15 = vld [vmem:[%s1256_s26 + $0xa0] sm:$0xff]   ;;  %v1181_v17 = vld [vmem:[%s1256_s26 + $0xa8] sm:$0xff]  }
  0x14   : > { %1155 = vmatprep.subr.msk.bf16.mxu0 %vm539_vm1, %v1169_v6  ;;  %1156 = vmatprep.subr.msk.bf16.mxu1 %vm539_vm1, %v1169_v6  ;;  %v1182_v18 = vld [vmem:[%s1256_s26 + $0x30] sm:$0xff]   ;;  %v1184_v20 = vld [vmem:[%s1256_s26 + $0x38] sm:$0xff]   ;;  %v1186_v22 = vld [vmem:[%s1256_s26 + $0x40] sm:$0xff]  }
  0x15   : > { %v1183_v19 = vld [vmem:[%s1256_s26 + $0xb0] sm:$0xff]   ;;  %v1185_v21 = vld [vmem:[%s1256_s26 + $0xb8] sm:$0xff]   ;;  %v1187_v23 = vld [vmem:[%s1256_s26 + $0xc0] sm:$0xff]  }
  0x16   : > { %v1188_v24 = vld [vmem:[%s1256_s26 + $0x48] sm:$0xff]   ;;  %v1190_v26 = vld [vmem:[%s1256_s26 + $0x50] sm:$0xff]   ;;  %v1192_v28 = vld [vmem:[%s1256_s26 + $0x58] sm:$0xff]  }
  0x17   : > { %1080 = vmatpush3.bf16.msra.mxu0 %v541_v7  ;;  %1154 = vmatpush3.bf16.msra.mxu1 %v541_v7  ;;  %v1189_v25 = vld [vmem:[%s1256_s26 + $0xc8] sm:$0xff]   ;;  %v1191_v27 = vld [vmem:[%s1256_s26 + $0xd0] sm:$0xff]   ;;  %v1193_v29 = vld [vmem:[%s1256_s26 + $0xd8] sm:$0xff]  }
  0x18   : > { %v1194_v30 = vld [vmem:[%s1256_s26 + $0x60] sm:$0xff]   ;;  %v1196_v32 = vld [vmem:[%s1256_s26 + $0x68] sm:$0xff]   ;;  %v1198_v34 = vld [vmem:[%s1256_s26 + $0x70] sm:$0xff]  }
  0x19   : > { %v1195_v31 = vld [vmem:[%s1256_s26 + $0xe0] sm:$0xff]   ;;  %v1197_v33 = vld [vmem:[%s1256_s26 + $0xe8] sm:$0xff]   ;;  %v1199_v35 = vld [vmem:[%s1256_s26 + $0xf0] sm:$0xff]  }
  0x1a   : > { %1082 = vmatmul.mubr.msk.bf16.vlgmr.msra.gmra.mrb[0].mxu0 %vm442_vm0, %v1172_v8  ;;  %1114 = vmatmul.mubr.msk.bf16.vlgmr.msra.gmra.mrb[0].mxu1 %vm442_vm0, %v1173_v9  ;;  %v1200_v36 = vld [vmem:[%s1256_s26 + $0x78] sm:$0xff]  }
  0x1b   : > { %1085 = vmatprep.mubr.msk.bf16.mxu0 %vm442_vm0, %v1174_v10  ;;  %1117 = vmatprep.mubr.msk.bf16.mxu1 %vm442_vm0, %v1175_v11  ;;  %v1201_v37 = vld [vmem:[%s1256_s26 + $0xf8] sm:$0xff]  }
  0x22   : > { %1086 = vmatmul.mubr.msk.bf16.gmra.mrb[4].mxu0 %vm442_vm0, %v1176_v12  ;;  %1118 = vmatmul.mubr.msk.bf16.gmra.mrb[4].mxu1 %vm442_vm0, %v1177_v13 }
  0x23   : > { %1089 = vmatprep.mubr.msk.bf16.mxu0 %vm442_vm0, %v1178_v14  ;;  %1121 = vmatprep.mubr.msk.bf16.mxu1 %vm442_vm0, %v1179_v15 }
  0x2a   : > { %1090 = vmatmul.mubr.msk.bf16.gmra.mrb[8].mxu0 %vm442_vm0, %v1180_v16  ;;  %1122 = vmatmul.mubr.msk.bf16.gmra.mrb[8].mxu1 %vm442_vm0, %v1181_v17 }
  0x2b   : > { %1093 = vmatprep.mubr.msk.bf16.mxu0 %vm442_vm0, %v1182_v18  ;;  %1125 = vmatprep.mubr.msk.bf16.mxu1 %vm442_vm0, %v1183_v19 }
  0x32   : > { %1094 = vmatmul.mubr.msk.bf16.gmra.mrb[12].mxu0 %vm442_vm0, %v1184_v20  ;;  %1126 = vmatmul.mubr.msk.bf16.gmra.mrb[12].mxu1 %vm442_vm0, %v1185_v21 }
  0x33   : > { %1097 = vmatprep.mubr.msk.bf16.mxu0 %vm442_vm0, %v1186_v22  ;;  %1129 = vmatprep.mubr.msk.bf16.mxu1 %vm442_vm0, %v1187_v23 }
  0x3a   : > { %1098 = vmatmul.mubr.msk.bf16.gmra.mrb[16].mxu0 %vm442_vm0, %v1188_v24  ;;  %1130 = vmatmul.mubr.msk.bf16.gmra.mrb[16].mxu1 %vm442_vm0, %v1189_v25 }
  0x3b   : > { %1101 = vmatprep.mubr.msk.bf16.mxu0 %vm442_vm0, %v1190_v26  ;;  %1133 = vmatprep.mubr.msk.bf16.mxu1 %vm442_vm0, %v1191_v27 }
  0x42   : > { %1102 = vmatmul.mubr.msk.bf16.gmra.mrb[20].mxu0 %vm442_vm0, %v1192_v28  ;;  %1134 = vmatmul.mubr.msk.bf16.gmra.mrb[20].mxu1 %vm442_vm0, %v1193_v29 }
  0x43   : > { %1105 = vmatprep.mubr.msk.bf16.mxu0 %vm442_vm0, %v1194_v30  ;;  %1137 = vmatprep.mubr.msk.bf16.mxu1 %vm442_vm0, %v1195_v31 }
  0x4a   : > { %1106 = vmatmul.mubr.msk.bf16.gmra.mrb[24].mxu0 %vm442_vm0, %v1196_v32  ;;  %1138 = vmatmul.mubr.msk.bf16.gmra.mrb[24].mxu1 %vm442_vm0, %v1197_v33 }
  0x4b   : > { %1109 = vmatprep.mubr.msk.bf16.mxu0 %vm442_vm0, %v1198_v34  ;;  %1141 = vmatprep.mubr.msk.bf16.mxu1 %vm442_vm0, %v1199_v35 }
  0x52   : > { %1110 = vmatmul.mubr.msk.bf16.gmra.mrb[28].mxu0 %vm442_vm0, %v1200_v36  ;;  %1142 = vmatmul.mubr.msk.bf16.gmra.mrb[28].mxu1 %vm442_vm0, %v1201_v37 }
  0xed   : > { %v1083_v39 = vpop.f32.mrb[0].mxu0  ;;  %v1115_v40 = vpop.f32.mrb[0].mxu1 }
  0xee   : > { %v586_v41 = vadd.f32 %v1083_v39, %v1329_v38  ;;  %v714_v42 = vadd.f32 %v1115_v40, %v1329_v38  ;;  %v577_v43 = vpop.f32.mrb[1].mxu0  ;;  %v705_v44 = vpop.f32.mrb[1].mxu1 }
  0xef   : > { %v578_v45 = vadd.f32 %v1329_v38, %v577_v43  ;;  %v706_v46 = vadd.f32 %v1329_v38, %v705_v44  ;;  %v1084_v47 = vpop.f32.mrb[2].mxu0  ;;  %v1116_v48 = vpop.f32.mrb[2].mxu1 }
  0xf0   : > { %835 = vst.msk [vmem:[%s1334_s7 + $0x10] sm:$0xff] %vm832_vm2, %v586_v41  ;;  %867 = vst.msk [vmem:[%s1334_s7 + $0x110] sm:$0xff] %vm832_vm2, %v714_v42  ;;  %v589_v49 = vadd.f32 %v1084_v47, %v1329_v38  ;;  %v717_v50 = vadd.f32 %v1116_v48, %v1329_v38  ;;  %v580_v51 = vpop.f32.mrb[3].mxu0  ;;  %v708_v52 = vpop.f32.mrb[3].mxu1 }
  0xf1   : > { %833 = vst.msk [vmem:[%s1334_s7] sm:$0xff] %vm832_vm2, %v578_v45  ;;  %865 = vst.msk [vmem:[%s1334_s7 + $0x100] sm:$0xff] %vm832_vm2, %v706_v46  ;;  %v581_v53 = vadd.f32 %v1329_v38, %v580_v51  ;;  %v709_v54 = vadd.f32 %v1329_v38, %v708_v52 }
  0xf2   : > { %836 = vst.msk [vmem:[%s1334_s7 + $0x18] sm:$0xff] %vm832_vm2, %v589_v49  ;;  %868 = vst.msk [vmem:[%s1334_s7 + $0x118] sm:$0xff] %vm832_vm2, %v717_v50 }
  0xf3   : > { %834 = vst.msk [vmem:[%s1334_s7 + $0x8] sm:$0xff] %vm832_vm2, %v581_v53  ;;  %866 = vst.msk [vmem:[%s1334_s7 + $0x108] sm:$0xff] %vm832_vm2, %v709_v54 }
  0xf5   : > { %v1087_v55 = vpop.f32.mrb[4].mxu0  ;;  %v1119_v56 = vpop.f32.mrb[4].mxu1 }
  0xf6   : > { %v602_v57 = vadd.f32 %v1087_v55, %v1329_v38  ;;  %v730_v58 = vadd.f32 %v1119_v56, %v1329_v38  ;;  %v593_v59 = vpop.f32.mrb[5].mxu0  ;;  %v721_v60 = vpop.f32.mrb[5].mxu1 }
  0xf7   : > { %v594_v61 = vadd.f32 %v1329_v38, %v593_v59  ;;  %v722_v62 = vadd.f32 %v1329_v38, %v721_v60  ;;  %v1088_v63 = vpop.f32.mrb[6].mxu0  ;;  %v1120_v0 = vpop.f32.mrb[6].mxu1 }
  0xf8   : > { %839 = vst.msk [vmem:[%s1334_s7 + $0x30] sm:$0xff] %vm832_vm2, %v602_v57  ;;  %871 = vst.msk [vmem:[%s1334_s7 + $0x130] sm:$0xff] %vm832_vm2, %v730_v58  ;;  %v605_v1 = vadd.f32 %v1088_v63, %v1329_v38  ;;  %v733_v2 = vadd.f32 %v1120_v0, %v1329_v38  ;;  %v596_v3 = vpop.f32.mrb[7].mxu0  ;;  %v724_v4 = vpop.f32.mrb[7].mxu1 }
  0xf9   : > { %837 = vst.msk [vmem:[%s1334_s7 + $0x20] sm:$0xff] %vm832_vm2, %v594_v61  ;;  %869 = vst.msk [vmem:[%s1334_s7 + $0x120] sm:$0xff] %vm832_vm2, %v722_v62  ;;  %v597_v5 = vadd.f32 %v1329_v38, %v596_v3  ;;  %v725_v6 = vadd.f32 %v1329_v38, %v724_v4 }
  0xfa   : > { %840 = vst.msk [vmem:[%s1334_s7 + $0x38] sm:$0xff] %vm832_vm2, %v605_v1  ;;  %872 = vst.msk [vmem:[%s1334_s7 + $0x138] sm:$0xff] %vm832_vm2, %v733_v2 }
  0xfb   : > { %838 = vst.msk [vmem:[%s1334_s7 + $0x28] sm:$0xff] %vm832_vm2, %v597_v5  ;;  %870 = vst.msk [vmem:[%s1334_s7 + $0x128] sm:$0xff] %vm832_vm2, %v725_v6 }
  0xfd   : > { %v1091_v7 = vpop.f32.mrb[8].mxu0  ;;  %v1123_v8 = vpop.f32.mrb[8].mxu1 }
  0xfe   : > { %v618_v9 = vadd.f32 %v1091_v7, %v1329_v38  ;;  %v746_v10 = vadd.f32 %v1123_v8, %v1329_v38  ;;  %v609_v11 = vpop.f32.mrb[9].mxu0  ;;  %v737_v12 = vpop.f32.mrb[9].mxu1 }
  0xff   : > { %v610_v13 = vadd.f32 %v1329_v38, %v609_v11  ;;  %v738_v14 = vadd.f32 %v1329_v38, %v737_v12  ;;  %v1092_v15 = vpop.f32.mrb[10].mxu0  ;;  %v1124_v16 = vpop.f32.mrb[10].mxu1 }
 0x100   : > { %843 = vst.msk [vmem:[%s1334_s7 + $0x50] sm:$0xff] %vm832_vm2, %v618_v9  ;;  %875 = vst.msk [vmem:[%s1334_s7 + $0x150] sm:$0xff] %vm832_vm2, %v746_v10  ;;  %v621_v17 = vadd.f32 %v1092_v15, %v1329_v38  ;;  %v749_v18 = vadd.f32 %v1124_v16, %v1329_v38  ;;  %v612_v19 = vpop.f32.mrb[11].mxu0  ;;  %v740_v20 = vpop.f32.mrb[11].mxu1 }
 0x101   : > { %841 = vst.msk [vmem:[%s1334_s7 + $0x40] sm:$0xff] %vm832_vm2, %v610_v13  ;;  %873 = vst.msk [vmem:[%s1334_s7 + $0x140] sm:$0xff] %vm832_vm2, %v738_v14  ;;  %v613_v21 = vadd.f32 %v1329_v38, %v612_v19  ;;  %v741_v22 = vadd.f32 %v1329_v38, %v740_v20 }
 0x102   : > { %844 = vst.msk [vmem:[%s1334_s7 + $0x58] sm:$0xff] %vm832_vm2, %v621_v17  ;;  %876 = vst.msk [vmem:[%s1334_s7 + $0x158] sm:$0xff] %vm832_vm2, %v749_v18 }
 0x103   : > { %842 = vst.msk [vmem:[%s1334_s7 + $0x48] sm:$0xff] %vm832_vm2, %v613_v21  ;;  %874 = vst.msk [vmem:[%s1334_s7 + $0x148] sm:$0xff] %vm832_vm2, %v741_v22 }
 0x105   : > { %v1095_v23 = vpop.f32.mrb[12].mxu0  ;;  %v1127_v24 = vpop.f32.mrb[12].mxu1 }
 0x106   : > { %v634_v25 = vadd.f32 %v1095_v23, %v1329_v38  ;;  %v762_v26 = vadd.f32 %v1127_v24, %v1329_v38  ;;  %v625_v27 = vpop.f32.mrb[13].mxu0  ;;  %v753_v28 = vpop.f32.mrb[13].mxu1 }
 0x107   : > { %v626_v29 = vadd.f32 %v1329_v38, %v625_v27  ;;  %v754_v30 = vadd.f32 %v1329_v38, %v753_v28  ;;  %v1096_v31 = vpop.f32.mrb[14].mxu0  ;;  %v1128_v32 = vpop.f32.mrb[14].mxu1 }
 0x108   : > { %847 = vst.msk [vmem:[%s1334_s7 + $0x70] sm:$0xff] %vm832_vm2, %v634_v25  ;;  %879 = vst.msk [vmem:[%s1334_s7 + $0x170] sm:$0xff] %vm832_vm2, %v762_v26  ;;  %v637_v33 = vadd.f32 %v1096_v31, %v1329_v38  ;;  %v765_v34 = vadd.f32 %v1128_v32, %v1329_v38  ;;  %v628_v35 = vpop.f32.mrb[15].mxu0  ;;  %v756_v36 = vpop.f32.mrb[15].mxu1 }
 0x109   : > { %845 = vst.msk [vmem:[%s1334_s7 + $0x60] sm:$0xff] %vm832_vm2, %v626_v29  ;;  %877 = vst.msk [vmem:[%s1334_s7 + $0x160] sm:$0xff] %vm832_vm2, %v754_v30  ;;  %v629_v37 = vadd.f32 %v1329_v38, %v628_v35  ;;  %v757_v39 = vadd.f32 %v1329_v38, %v756_v36 }
 0x10a   : > { %848 = vst.msk [vmem:[%s1334_s7 + $0x78] sm:$0xff] %vm832_vm2, %v637_v33  ;;  %880 = vst.msk [vmem:[%s1334_s7 + $0x178] sm:$0xff] %vm832_vm2, %v765_v34 }
 0x10b   : > { %846 = vst.msk [vmem:[%s1334_s7 + $0x68] sm:$0xff] %vm832_vm2, %v629_v37  ;;  %878 = vst.msk [vmem:[%s1334_s7 + $0x168] sm:$0xff] %vm832_vm2, %v757_v39 }
 0x10d   : > { %v1099_v40 = vpop.f32.mrb[16].mxu0  ;;  %v1131_v41 = vpop.f32.mrb[16].mxu1 }
 0x10e   : > { %v650_v42 = vadd.f32 %v1099_v40, %v1329_v38  ;;  %v778_v43 = vadd.f32 %v1131_v41, %v1329_v38  ;;  %v641_v44 = vpop.f32.mrb[17].mxu0  ;;  %v769_v45 = vpop.f32.mrb[17].mxu1 }
 0x10f   : > { %v642_v46 = vadd.f32 %v1329_v38, %v641_v44  ;;  %v770_v47 = vadd.f32 %v1329_v38, %v769_v45  ;;  %v1100_v48 = vpop.f32.mrb[18].mxu0  ;;  %v1132_v49 = vpop.f32.mrb[18].mxu1 }
 0x110   : > { %851 = vst.msk [vmem:[%s1334_s7 + $0x90] sm:$0xff] %vm832_vm2, %v650_v42  ;;  %883 = vst.msk [vmem:[%s1334_s7 + $0x190] sm:$0xff] %vm832_vm2, %v778_v43  ;;  %v653_v50 = vadd.f32 %v1100_v48, %v1329_v38  ;;  %v781_v51 = vadd.f32 %v1132_v49, %v1329_v38  ;;  %v644_v52 = vpop.f32.mrb[19].mxu0  ;;  %v772_v53 = vpop.f32.mrb[19].mxu1 }
 0x111   : > { %849 = vst.msk [vmem:[%s1334_s7 + $0x80] sm:$0xff] %vm832_vm2, %v642_v46  ;;  %881 = vst.msk [vmem:[%s1334_s7 + $0x180] sm:$0xff] %vm832_vm2, %v770_v47  ;;  %v645_v54 = vadd.f32 %v1329_v38, %v644_v52  ;;  %v773_v55 = vadd.f32 %v1329_v38, %v772_v53 }
 0x112   : > { %852 = vst.msk [vmem:[%s1334_s7 + $0x98] sm:$0xff] %vm832_vm2, %v653_v50  ;;  %884 = vst.msk [vmem:[%s1334_s7 + $0x198] sm:$0xff] %vm832_vm2, %v781_v51 }
 0x113   : > { %850 = vst.msk [vmem:[%s1334_s7 + $0x88] sm:$0xff] %vm832_vm2, %v645_v54  ;;  %882 = vst.msk [vmem:[%s1334_s7 + $0x188] sm:$0xff] %vm832_vm2, %v773_v55 }
 0x115   : > { %v1103_v56 = vpop.f32.mrb[20].mxu0  ;;  %v1135_v57 = vpop.f32.mrb[20].mxu1 }
 0x116   : > { %v666_v58 = vadd.f32 %v1103_v56, %v1329_v38  ;;  %v794_v59 = vadd.f32 %v1135_v57, %v1329_v38  ;;  %v657_v60 = vpop.f32.mrb[21].mxu0  ;;  %v785_v61 = vpop.f32.mrb[21].mxu1 }
 0x117   : > { %v658_v62 = vadd.f32 %v1329_v38, %v657_v60  ;;  %v786_v63 = vadd.f32 %v1329_v38, %v785_v61  ;;  %v1104_v0 = vpop.f32.mrb[22].mxu0  ;;  %v1136_v1 = vpop.f32.mrb[22].mxu1 }
 0x118   : > { %855 = vst.msk [vmem:[%s1334_s7 + $0xb0] sm:$0xff] %vm832_vm2, %v666_v58  ;;  %887 = vst.msk [vmem:[%s1334_s7 + $0x1b0] sm:$0xff] %vm832_vm2, %v794_v59  ;;  %v669_v2 = vadd.f32 %v1104_v0, %v1329_v38  ;;  %v797_v3 = vadd.f32 %v1136_v1, %v1329_v38  ;;  %v660_v4 = vpop.f32.mrb[23].mxu0  ;;  %v788_v5 = vpop.f32.mrb[23].mxu1 }
 0x119   : > { %853 = vst.msk [vmem:[%s1334_s7 + $0xa0] sm:$0xff] %vm832_vm2, %v658_v62  ;;  %885 = vst.msk [vmem:[%s1334_s7 + $0x1a0] sm:$0xff] %vm832_vm2, %v786_v63  ;;  %v661_v6 = vadd.f32 %v1329_v38, %v660_v4  ;;  %v789_v7 = vadd.f32 %v1329_v38, %v788_v5 }
 0x11a   : > { %856 = vst.msk [vmem:[%s1334_s7 + $0xb8] sm:$0xff] %vm832_vm2, %v669_v2  ;;  %888 = vst.msk [vmem:[%s1334_s7 + $0x1b8] sm:$0xff] %vm832_vm2, %v797_v3 }
 0x11b   : > { %854 = vst.msk [vmem:[%s1334_s7 + $0xa8] sm:$0xff] %vm832_vm2, %v661_v6  ;;  %886 = vst.msk [vmem:[%s1334_s7 + $0x1a8] sm:$0xff] %vm832_vm2, %v789_v7 }
 0x11d   : > { %v1107_v8 = vpop.f32.mrb[24].mxu0  ;;  %v1139_v9 = vpop.f32.mrb[24].mxu1 }
 0x11e   : > { %v682_v10 = vadd.f32 %v1107_v8, %v1329_v38  ;;  %v810_v11 = vadd.f32 %v1139_v9, %v1329_v38  ;;  %v673_v12 = vpop.f32.mrb[25].mxu0  ;;  %v801_v13 = vpop.f32.mrb[25].mxu1 }
 0x11f   : > { %v674_v14 = vadd.f32 %v1329_v38, %v673_v12  ;;  %v802_v15 = vadd.f32 %v1329_v38, %v801_v13  ;;  %v1108_v16 = vpop.f32.mrb[26].mxu0  ;;  %v1140_v17 = vpop.f32.mrb[26].mxu1 }
 0x120   : > { %859 = vst.msk [vmem:[%s1334_s7 + $0xd0] sm:$0xff] %vm832_vm2, %v682_v10  ;;  %891 = vst.msk [vmem:[%s1334_s7 + $0x1d0] sm:$0xff] %vm832_vm2, %v810_v11  ;;  %v685_v18 = vadd.f32 %v1108_v16, %v1329_v38  ;;  %v813_v19 = vadd.f32 %v1140_v17, %v1329_v38  ;;  %v676_v20 = vpop.f32.mrb[27].mxu0  ;;  %v804_v21 = vpop.f32.mrb[27].mxu1 }
 0x121   : > { %857 = vst.msk [vmem:[%s1334_s7 + $0xc0] sm:$0xff] %vm832_vm2, %v674_v14  ;;  %889 = vst.msk [vmem:[%s1334_s7 + $0x1c0] sm:$0xff] %vm832_vm2, %v802_v15  ;;  %v677_v22 = vadd.f32 %v1329_v38, %v676_v20  ;;  %v805_v23 = vadd.f32 %v1329_v38, %v804_v21 }
 0x122   : > { %860 = vst.msk [vmem:[%s1334_s7 + $0xd8] sm:$0xff] %vm832_vm2, %v685_v18  ;;  %892 = vst.msk [vmem:[%s1334_s7 + $0x1d8] sm:$0xff] %vm832_vm2, %v813_v19 }
 0x123   : > { %858 = vst.msk [vmem:[%s1334_s7 + $0xc8] sm:$0xff] %vm832_vm2, %v677_v22  ;;  %890 = vst.msk [vmem:[%s1334_s7 + $0x1c8] sm:$0xff] %vm832_vm2, %v805_v23 }
 0x125   : > { %v1111_v24 = vpop.f32.mrb[28].mxu0  ;;  %v1143_v25 = vpop.f32.mrb[28].mxu1 }
 0x126   : > { %v698_v26 = vadd.f32 %v1111_v24, %v1329_v38  ;;  %v826_v27 = vadd.f32 %v1143_v25, %v1329_v38  ;;  %v689_v28 = vpop.f32.mrb[29].mxu0  ;;  %v817_v29 = vpop.f32.mrb[29].mxu1 }
 0x127   : > { %v690_v30 = vadd.f32 %v1329_v38, %v689_v28  ;;  %v818_v31 = vadd.f32 %v1329_v38, %v817_v29  ;;  %v1112_v32 = vpop.f32.mrb[30].mxu0  ;;  %v1144_v33 = vpop.f32.mrb[30].mxu1 }
 0x128   : > { %863 = vst.msk [vmem:[%s1334_s7 + $0xf0] sm:$0xff] %vm832_vm2, %v698_v26  ;;  %895 = vst.msk [vmem:[%s1334_s7 + $0x1f0] sm:$0xff] %vm832_vm2, %v826_v27  ;;  %v701_v34 = vadd.f32 %v1112_v32, %v1329_v38  ;;  %v829_v35 = vadd.f32 %v1144_v33, %v1329_v38  ;;  %v692_v36 = vpop.f32.mrb[31].mxu0  ;;  %v820_v37 = vpop.f32.mrb[31].mxu1 }
 0x129   : > { %861 = vst.msk [vmem:[%s1334_s7 + $0xe0] sm:$0xff] %vm832_vm2, %v690_v30  ;;  %893 = vst.msk [vmem:[%s1334_s7 + $0x1e0] sm:$0xff] %vm832_vm2, %v818_v31  ;;  %v693_v39 = vadd.f32 %v1329_v38, %v692_v36  ;;  %v821_v40 = vadd.f32 %v1329_v38, %v820_v37 }
 0x12a   : > { %864 = vst.msk [vmem:[%s1334_s7 + $0xf8] sm:$0xff] %vm832_vm2, %v701_v34  ;;  %896 = vst.msk [vmem:[%s1334_s7 + $0x1f8] sm:$0xff] %vm832_vm2, %v829_v35 }
 0x12b   : > { %862 = vst.msk [vmem:[%s1334_s7 + $0xe8] sm:$0xff] %vm832_vm2, %v693_v39  ;;  %894 = vst.msk [vmem:[%s1334_s7 + $0x1e8] sm:$0xff] %vm832_vm2, %v821_v40 }
 0x12c PF: > { %s13_s12 = sadd.s32 1, %s1208_s12  }
 0x12d   : > { %p10_p4 = scmp.ge.s32.totalorder %s13_s12, 6  }
 0x12f   :  { %12 = sbr.rel (!%p10_p4) target bundleno = 1 (0x1), region = 62 }

// kernel: forward.35
= control target key start
LH: loop header
LB: loop body
LE: loop exit
PB: predicated region body
PF: predicated region fallthrough
CT: control target
= control target key end

     0   :  { %9 = vsyncpa [#allocation3], 0  ;;  %s544_s12 = smov 0   ;;  %s682_s0 = inlined_call_operand.vmem [shape: f32[192,128], index: 0, kind: input, shape index: {}]   ;;  %s683_s1 = inlined_call_operand.vmem [shape: f32[192,128], index: 1, kind: input, shape index: {}]   ;;  %s684_s2 = inlined_call_operand.vmem [shape: f32[192,128], index: 2, kind: output, shape index: {0}]   ;;  %s685_s3 = inlined_call_operand.hbm [shape: f32[1,1], index: 3, kind: output, shape index: {1}]  }
   0x1 LB: > { %s550_s13 = sadd.s32 4294967295, %s520_s12   ;;  %p457_p0 = scmp.ge.s32.totalorder %s520_s12, 1  ;;  %s520_s12 = sphi %s544_s12, %s15_s12  }
   0x2   : > { %p148_p1 = scmp.lt.s32.totalorder %s520_s12, 3 }
   0x4   : > { %p149_p2 = pnand %p457_p0, %p148_p1 }
   0x5   : > { %s177_s14 = smul.u32 (!%p149_p2), 12, %s550_s13  ;;  %p461_p4 = scmp.ne.s32.totalorder (!%p149_p2), %s550_s13, 0 }
   0x6   : > { %152 = sbr.rel (%p149_p2) target bundleno = 282 (0x11a), region = 28 }
   0x7   : > { %p178_p3 = scmp.lt.s32.totalorder (!%p149_p2), %s177_s14, 23 }
   0xd   : > { %s687_s14 = smov (!%p178_p3, %s177_s14), 23  ;;  %198 = sbr.rel (%p461_p4) target bundleno = 20 (0x14), region = 32 }
   0xe   : > { %s458_s15 = sshll.u32 %s687_s14, 3  ;;  %vm199_vm0 = vcmask (!%p461_p4), 0   ;;  %v522_v0 = vmov (!%p461_p4), 0.0  }
   0xf   : > { %s181_s18 = scalar_lea.vmem %s682_s0, %s458_s15  ;;  %s561_s21 = scalar_lea.vmem %s683_s1, %s458_s15  ;;  %200 = vst.msk [vmem:[#allocation2] sm:$0x1] (!%p461_p4), %vm199_vm0, %v522_v0 }
  0x10   : > { %s566_s24 = scalar_lea.vmem %s684_s2, %s458_s15 }
  0x14 PF: > { %v569_v1 = vld [vmem:[%s181_s18] sm:$0xff]  ;;  %v571_v2 = vld [vmem:[%s181_s18 + $0x8] sm:$0xff]  ;;  %v573_v3 = vld [vmem:[%s181_s18 + $0x10] sm:$0xff]  ;;  %v274_v34 = vlaneseq  ;;  %s273_s25 = smul.u32 96, %s550_s13  ;;  %s523_s26 = smov [#allocation2]   ;;  %vm359_vm13 = vcmask 0  }
  0x15   : > { %v575_v4 = vld [vmem:[%s181_s18 + $0x18] sm:$0xff]  ;;  %v577_v5 = vld [vmem:[%s181_s18 + $0x20] sm:$0xff]  ;;  %v579_v6 = vld [vmem:[%s181_s18 + $0x28] sm:$0xff]  ;;  %v225_v7 = vmax.f32 %v569_v1, 0.0  ;;  %v226_v8 = vmax.f32 %v571_v2, 0.0  ;;  %v227_v9 = vmax.f32 %v573_v3, 0.0 }
  0x16   : > { %v584_v10 = vld [vmem:[%s181_s18 + $0x30] sm:$0xff]  ;;  %v586_v11 = vld [vmem:[%s181_s18 + $0x38] sm:$0xff]  ;;  %v588_v12 = vld [vmem:[%s181_s18 + $0x40] sm:$0xff]  ;;  %v228_v13 = vmax.f32 %v575_v4, 0.0  ;;  %v229_v14 = vmax.f32 %v577_v5, 0.0  ;;  %v230_v15 = vmax.f32 %v579_v6, 0.0  ;;  %v618_v39 = vstv %s273_s25 }
  0x17   : > { %v593_v16 = vld [vmem:[%s181_s18 + $0x48] sm:$0xff]  ;;  %v595_v17 = vld [vmem:[%s181_s18 + $0x50] sm:$0xff]  ;;  %v597_v18 = vld [vmem:[%s181_s18 + $0x58] sm:$0xff]  ;;  %v231_v19 = vmax.f32 %v584_v10, 0.0  ;;  %v232_v20 = vmax.f32 %v586_v11, 0.0  ;;  %v233_v21 = vmax.f32 %v588_v12, 0.0 }
  0x18   : > { %v234_v22 = vmax.f32 %v593_v16, 0.0  ;;  %v235_v23 = vmax.f32 %v595_v17, 0.0  ;;  %v236_v24 = vmax.f32 %v597_v18, 0.0  ;;  %v237_v25 = vmin.f32 %v225_v7, 1.0  ;;  %v213_v43 = vld [vmem:[%s561_s21] sm:$0xff]  ;;  %v214_v44 = vld [vmem:[%s561_s21 + $0x8] sm:$0xff] }
  0x19   : > { %v238_v26 = vmin.f32 %v226_v8, 1.0  ;;  %v239_v27 = vmin.f32 %v227_v9, 1.0  ;;  %v240_v28 = vmin.f32 %v228_v13, 1.0  ;;  %v241_v29 = vmin.f32 %v229_v14, 1.0  ;;  %v215_v45 = vld [vmem:[%s561_s21 + $0x10] sm:$0xff]  ;;  %v216_v50 = vld [vmem:[%s561_s21 + $0x18] sm:$0xff] }
  0x1a   : > { %v242_v30 = vmin.f32 %v230_v15, 1.0  ;;  %v243_v31 = vmin.f32 %v231_v19, 1.0  ;;  %v244_v32 = vmin.f32 %v232_v20, 1.0  ;;  %v245_v33 = vmin.f32 %v233_v21, 1.0  ;;  %249 = vst [vmem:[%s566_s24] sm:$0xff] %v237_v25  ;;  %v217_v56 = vld [vmem:[%s561_s21 + $0x20] sm:$0xff]  ;;  %v218_v60 = vld [vmem:[%s561_s21 + $0x28] sm:$0xff] }
  0x1b   : > { %250 = vst [vmem:[%s566_s24 + $0x8] sm:$0xff] %v238_v26  ;;  %251 = vst [vmem:[%s566_s24 + $0x10] sm:$0xff] %v239_v27  ;;  %v246_v35 = vmin.f32 %v234_v22, 1.0  ;;  %v247_v36 = vmin.f32 %v235_v23, 1.0  ;;  %v248_v37 = vmin.f32 %v236_v24, 1.0  ;;  %v275_v38 = vshrl.u32 %v274_v34, 7 }
  0x1c   : > { %252 = vst [vmem:[%s566_s24 + $0x18] sm:$0xff] %v240_v28  ;;  %253 = vst [vmem:[%s566_s24 + $0x20] sm:$0xff] %v241_v29  ;;  %v261_v51 = vsub.f32 %v569_v1, %v213_v43  ;;  %v262_v54 = vsub.f32 %v571_v2, %v214_v44  ;;  %v263_v55 = vsub.f32 %v573_v3, %v215_v45  ;;  %v219_v3 = vld [vmem:[%s561_s21 + $0x30] sm:$0xff]  ;;  %v220_v15 = vld [vmem:[%s561_s21 + $0x38] sm:$0xff]  ;;  %s377_s27 = sshll.u32 %s523_s26, 4  ;;  %p472_p5 = scmp.eq.s32.totalorder %s550_s13, 1  ;;  %s378_s27 = int_to_ptr.vmem [resolvable:$true] %s377_s27 }
  0x1d   : > { %254 = vst [vmem:[%s566_s24 + $0x28] sm:$0xff] %v242_v30  ;;  %255 = vst [vmem:[%s566_s24 + $0x30] sm:$0xff] %v243_v31  ;;  %v276_v40 = vadd.s32 8, %v275_v38  ;;  %v277_v41 = vadd.s32 16, %v275_v38  ;;  %v278_v42 = vadd.s32 24, %v275_v38  ;;  %v279_v46 = vadd.s32 32, %v275_v38  ;;  %p491_p9 = scmp.lt.s32.totalorder %s378_s27, %s378_s27 }
  0x1e   : > { %256 = vst [vmem:[%s566_s24 + $0x38] sm:$0xff] %v244_v32  ;;  %257 = vst [vmem:[%s566_s24 + $0x40] sm:$0xff] %v245_v33  ;;  %v288_v47 = vadd.s32 %v618_v39, %v275_v38  ;;  %v280_v52 = vadd.s32 40, %v275_v38  ;;  %v281_v57 = vadd.s32 48, %v275_v38  ;;  %v264_v59 = vsub.f32 %v575_v4, %v216_v50  ;;  %v221_v24 = vld [vmem:[%s561_s21 + $0x40] sm:$0xff]  ;;  %v222_v30 = vld [vmem:[%s561_s21 + $0x48] sm:$0xff] }
  0x1f   : > { %258 = vst [vmem:[%s566_s24 + $0x48] sm:$0xff] %v246_v35  ;;  %259 = vst [vmem:[%s566_s24 + $0x50] sm:$0xff] %v247_v36  ;;  %v289_v48 = vadd.s32 %v618_v39, %v276_v40  ;;  %v290_v49 = vadd.s32 %v618_v39, %v277_v41  ;;  %v291_v53 = vadd.s32 %v618_v39, %v278_v42  ;;  %v282_v61 = vadd.s32 56, %v275_v38  ;;  %v223_v35 = vld [vmem:[%s561_s21 + $0x50] sm:$0xff]  ;;  %v224_v41 = vld [vmem:[%s561_s21 + $0x58] sm:$0xff]  ;;  %s484_s29 = scalar_lea.vmem %s378_s27, 16 }
  0x20   : > { %260 = vst [vmem:[%s566_s24 + $0x58] sm:$0xff] %v248_v37  ;;  %vm300_vm1 = vcmp.lt.s32.totalorder %v288_v47, 192  ;;  %v292_v58 = vadd.s32 %v618_v39, %v279_v46  ;;  %v293_v62 = vadd.s32 %v618_v39, %v280_v52  ;;  %v265_v0 = vsub.f32 %v577_v5, %v217_v56  ;;  %p485_p6 = scmp.ne.s32.totalorder %s378_s27, %s484_s29  ;;  %s490_s30 = scalar_lea.vmem %s378_s27, 32 }
  0x21   : > { %vm301_vm2 = vcmp.lt.s32.totalorder %v289_v48, 192  ;;  %vm302_vm3 = vcmp.lt.s32.totalorder %v290_v49, 192  ;;  %vm303_vm4 = vcmp.lt.s32.totalorder %v291_v53, 192  ;;  %v312_v63 = vsel %vm300_vm1, %v261_v51, 0.0  ;;  %p492_p10 = scmp.lt.s32.totalorder %s490_s30, %s484_s29 }
  0x22   : > { %v313_v1 = vsel %vm301_vm2, %v262_v54, 0.0  ;;  %v314_v2 = vsel %vm302_vm3, %v263_v55, 0.0  ;;  %v283_v7 = vadd.s32 64, %v275_v38  ;;  %v294_v8 = vadd.s32 %v618_v39, %v281_v57  ;;  %p486_p7 = pnand %p485_p6, %p472_p5 }
  0x23   : > { %vm304_vm5 = vcmp.lt.s32.totalorder %v292_v58, 192  ;;  %v266_v9 = vsub.f32 %v579_v6, %v218_v60  ;;  %v284_v4 = vadd.s32 72, %v275_v38  ;;  %v315_v13 = vsel %vm303_vm4, %v264_v59, 0.0  ;;  %p493_p11 = por %p492_p10, %p491_p9 }
  0x24   : > { %v325_v14 = vmul.f32 %v312_v63, %v312_v63  ;;  %v295_v19 = vadd.s32 %v618_v39, %v282_v61  ;;  %vm305_vm6 = vcmp.lt.s32.totalorder %v293_v62, 192  ;;  %v326_v20 = vmul.f32 %v313_v1, %v313_v1  ;;  %v324_v1 = vld [vmem:[#allocation2] sm:$0x1]  ;;  %p487_p8 = pneg %p486_p7 }
  0x25   : > { %v327_v5 = vmul.f32 %v314_v2, %v314_v2  ;;  %v267_v21 = vsub.f32 %v584_v10, %v219_v3  ;;  %v285_v22 = vadd.s32 80, %v275_v38  ;;  %v316_v23 = vsel %vm304_vm5, %v265_v0, 0.0 }
  0x26   : > { %v296_v25 = vadd.s32 %v618_v39, %v283_v7  ;;  %vm306_vm7 = vcmp.lt.s32.totalorder %v294_v8, 192  ;;  %v328_v6 = vmul.f32 %v315_v13, %v315_v13  ;;  %v337_v26 = vadd.f32 %v326_v20, %v325_v14  ;;  %p494_p12 = pnand %p493_p11, %p487_p8 }
  0x27   : > { %v268_v27 = vsub.f32 %v586_v11, %v220_v15  ;;  %v286_v28 = vadd.s32 88, %v275_v38  ;;  %v317_v29 = vsel %vm305_vm6, %v266_v9, 0.0  ;;  %v297_v31 = vadd.s32 %v618_v39, %v284_v4 }
  0x28   : > { %vm307_vm8 = vcmp.lt.s32.totalorder %v295_v19, 192  ;;  %v329_v32 = vmul.f32 %v316_v23, %v316_v23  ;;  %v338_v10 = vadd.f32 %v337_v26, %v327_v5  ;;  %v269_v33 = vsub.f32 %v588_v12, %v221_v24 }
  0x29   : > { %v318_v34 = vsel %vm306_vm7, %v267_v21, 0.0  ;;  %v298_v36 = vadd.s32 %v618_v39, %v285_v22  ;;  %vm308_vm9 = vcmp.lt.s32.totalorder %v296_v25, 192  ;;  %v330_v37 = vmul.f32 %v317_v29, %v317_v29 }
  0x2a   : > { %v339_v40 = vadd.f32 %v338_v10, %v328_v6  ;;  %v270_v11 = vsub.f32 %v593_v16, %v222_v30  ;;  %v319_v38 = vsel %vm307_vm8, %v268_v27, 0.0  ;;  %v299_v42 = vadd.s32 %v618_v39, %v286_v28 }
  0x2b   : > { %vm309_vm10 = vcmp.lt.s32.totalorder %v297_v31, 192  ;;  %v331_v43 = vmul.f32 %v318_v34, %v318_v34  ;;  %v271_v45 = vsub.f32 %v595_v17, %v223_v35  ;;  %v320_v46 = vsel %vm308_vm9, %v269_v33, 0.0 }
  0x2c   : > { %v340_v44 = vadd.f32 %v339_v40, %v329_v32  ;;  %vm310_vm11 = vcmp.lt.s32.totalorder %v298_v36, 192  ;;  %v332_v12 = vmul.f32 %v319_v38, %v319_v38  ;;  %v272_v48 = vsub.f32 %v597_v18, %v224_v41 }
  0x2d   : > { %v321_v49 = vsel %vm309_vm10, %v270_v11, 0.0  ;;  %vm311_vm12 = vcmp.lt.s32.totalorder %v299_v42, 192  ;;  %v333_v50 = vmul.f32 %v320_v46, %v320_v46  ;;  %v322_v16 = vsel %vm310_vm11, %v271_v45, 0.0 }
  0x2e   : > { %v341_v47 = vadd.f32 %v340_v44, %v330_v37  ;;  %v334_v52 = vmul.f32 %v321_v49, %v321_v49  ;;  %v323_v54 = vsel %vm311_vm12, %v272_v48, 0.0  ;;  %v335_v39 = vmul.f32 %v322_v16, %v322_v16 }
  0x2f   : > { %v336_v56 = vmul.f32 %v323_v54, %v323_v54 }
  0x30   : > { %v342_v51 = vadd.f32 %v341_v47, %v331_v43 }
  0x32   : > { %v343_v53 = vadd.f32 %v342_v51, %v332_v12 }
  0x34   : > { %v344_v55 = vadd.f32 %v343_v53, %v333_v50 }
  0x36   : > { %v345_v57 = vadd.f32 %v344_v55, %v334_v52 }
  0x38   : > { %v346_v58 = vadd.f32 %v345_v57, %v335_v39 }
  0x3a   : > { %v347_v17 = vadd.f32 %v346_v58, %v336_v56 }
  0x3c   : > { %348 = vadd.xlane.f32.xlu0 %v347_v17 }
  0xc9   : > { %v349_v59 = vpop.xlane.xlu0 %348 }
  0xca   : > { %v350_v60 = vrot.slane %v349_v59, 4 }
  0xcc   : > { %v351_v61 = vadd.f32 %v350_v60, %v349_v59 }
  0xce   : > { %v352_v18 = vrot.slane %v351_v61, 2 }
  0xd0   : > { %v353_v62 = vadd.f32 %v352_v18, %v351_v61 }
  0xd2   : > { %v354_v63 = vrot.slane %v353_v62, 1 }
  0xd4   : > { %v355_v0 = vadd.f32 %v354_v63, %v353_v62 }
  0xd6   : > { %466 = vpush %v355_v0 }
 0x107   : > { %s467_s28 = spop %466 }
 0x108   : > { %v357_v2 = vstv %s467_s28 }
 0x109   : > { %v358_v3 = vadd.f32 %v357_v2, %v324_v1 }
 0x10b   : > { %360 = vst.msk [vmem:[#allocation2] sm:$0x1] %vm359_vm13, %v358_v3 }
 0x10c   : > { %497 = shalt.err (!%p494_p12)
}
 0x10d   : > { %s498_s6 = scalar_lea.hbm %s685_s3, 16 }
 0x10e   : > { %p499_p13 = scmp.ne.s32.totalorder %s685_s3, %s498_s6  ;;  %p504_p2 = scmp.lt.u32.totalorder %s498_s6, %s685_s3 }
 0x110   : > { %p500_p0 = pnand %p499_p13, %p472_p5 }
 0x112   : > { %p501_p1 = pneg %p500_p0 }
 0x114   : > { %p506_p3 = pnand %p504_p2, %p501_p1 }
 0x116   : > { %509 = shalt.err (!%p506_p3)
}
 0x117   : > { %469 = dma.vmem_to_hbm [thread:$0]  (%p472_p5), %s378_s27, 16, %s685_s3, [#allocation3]  }
 0x118   : > { %515 = dma.done.wait (%p472_p5), [#allocation3], 16  }
 0x119   : > { %517 = vsyncadd (%p472_p5), [#allocation3], 4294967280 }
 0x11a PF: > { %s15_s12 = sadd.s32 1, %s520_s12  }
 0x11b   : > { %p12_p4 = scmp.ge.s32.totalorder %s15_s12, 4  }
 0x11d   :  { %14 = sbr.rel (!%p12_p4) target bundleno = 1 (0x1), region = 74 }
 0x124   :  { %398 = vsyncpa [#allocation3], 1 }
 0x125   :  { %400 = vsyncpa [#allocation3 + $0x1], 1 }

</bundles_post_ra>
